<compile_context>
chip_gen: v7x
topology: tpu7x:2x2x1
jax: 0.10.0
libtpu: 0.0.40
codegen_flags: <defaults>
</compile_context>

<pallas_src>
import functools

import jax
import jax.numpy as jnp
from jax.experimental import pallas as pl
from jax.experimental.pallas import tpu as pltpu

F32 = jnp.float32
BF16 = jnp.bfloat16
BN_EPS = 1e-5
LIF_TAU = 2.0
NUM_HEADS = (1, 2, 4)          # one Block per entry (len(depths) == 3 blocks)
EMBED_DIM = 64
MLP_RATIOS = (4, 4, 4)
IN_CHANNELS = 2
ATTN_SCALE = 0.125


# ---------------------------------------------------------------------------
# Shared LIF step (MultiStepLIFNode: tau=2, decay_input=True, v_reset=0)
# ---------------------------------------------------------------------------
def _lif_step(v_ref, inp, v_th, inv_tau):
    """One LIF time step; membrane potential lives in VMEM scratch `v_ref`."""
    v = v_ref[...] + (inp - v_ref[...]) * inv_tau
    fired = v >= v_th
    v_ref[...] = jnp.where(fired, 0.0, v)       # hard reset (jnp.where, no mul)
    return fired.astype(F32)


# ---------------------------------------------------------------------------
# SPS stage kernels: conv3x3 + BN + LIF (+ fused MaxPool / + residual)
# ---------------------------------------------------------------------------
def _conv3x3_bn_lif_pool_kernel(x_ref, w_ref, b_ref, o_ref, v_ref,
                                *, H, W, Cin, Cout, tau, v_th):
    """One (b, t) grid step.

    x_ref : (1, H+2, W+2, Cin)   bf16, halo padded once in the wrapper
    w_ref : (9*Cin, Cout)        bf16 BN-fused im2col weights, rows = (dy, dx, cin)
    b_ref : (1, Cout)            f32 BN-fused bias
    o_ref : (1, H/2, W/2, Cout)  bf16 pooled spikes (only tensor written to HBM)
    v_ref : (H*W, Cout)          f32 LIF membrane, carried across the inner t axis
    """
    @pl.when(pl.program_id(1) == 0)
    def _():
        v_ref[...] = jnp.zeros_like(v_ref)

    HW, Ho, Wo = H * W, H // 2, W // 2

    # im2col: the nine shifted windows concatenated along the channel (lane) axis
    # -> one K = 9*Cin bf16 MXU matmul instead of nine K = Cin matmuls.
    taps = [x_ref[0, dy:dy + H, dx:dx + W, :].reshape(HW, Cin)
            for dy in range(3) for dx in range(3)]
    patch = jnp.concatenate(taps, axis=-1)                       # (HW, 9*Cin) bf16
    y = jnp.dot(patch, w_ref[...], preferred_element_type=F32) + b_ref[...]

    spike = _lif_step(v_ref, y, v_th, 1.0 / tau)                 # (HW, Cout) in {0,1}

    # MaxPool2d(3, 2, 1) on the spike map (values >= 0 so 0-padding == -inf padding).
    # Rows are (h, w) row-major: +-W row shifts give the h+-1 neighbours, +-1 the
    # w+-1 neighbours; the stride-2 selection is a parity split of the row axis.
    zrow = jnp.zeros((W, Cout), F32)
    padv = jnp.concatenate([zrow, spike, zrow], axis=0)
    vmax = jnp.maximum(jnp.maximum(padv[:HW], spike), padv[2 * W:])
    zer1 = jnp.zeros((1, Cout), F32)
    left = jnp.concatenate([zer1, vmax[:HW - 1]], axis=0)        # (h, w-1)
    w_idx = jax.lax.broadcasted_iota(jnp.int32, (H, W, Cout), 1).reshape(HW, Cout)
    left = jnp.where(w_idx == 0, 0.0, left)                      # no wrap across rows
    right = jnp.concatenate([vmax[1:], zer1], axis=0)            # (h, w+1); wrap lands
    hmax = jnp.maximum(jnp.maximum(left, vmax), right)           # on odd w -> dropped
    pooled = hmax.reshape(HW // 2, 2, Cout)[:, 0]                # keep even w
    pooled = pooled.reshape(Ho, 2, Wo, Cout)[:, 0]               # keep even h
    o_ref[...] = pooled[None].astype(o_ref.dtype)


def _conv3x3_bn_lif_res_kernel(x_ref, w_ref, b_ref, o_ref, v_ref,
                               *, H, W, C, tau, v_th):
    """rpe stage: conv3x3 + BN + LIF + residual with the (unpadded) input (x_feat).

    o_ref : (1, N, C) bf16 -- already in the transformer `rows` layout.
    """
    @pl.when(pl.program_id(1) == 0)
    def _():
        v_ref[...] = jnp.zeros_like(v_ref)

    HW = H * W
    taps = [x_ref[0, dy:dy + H, dx:dx + W, :].reshape(HW, C)
            for dy in range(3) for dx in range(3)]
    patch = jnp.concatenate(taps, axis=-1)                       # (HW, 9*C) bf16
    y = jnp.dot(patch, w_ref[...], preferred_element_type=F32) + b_ref[...]
    spike = _lif_step(v_ref, y, v_th, 1.0 / tau)
    x_feat = taps[4].astype(F32)          # centre tap == the unpadded input (x_feat)
    o_ref[...] = (spike + x_feat)[None].astype(o_ref.dtype)      # values in {0,1,2}


def conv3x3_bn_lif_pool(x_pad, w, b, *, T, B, H, W, Cin, Cout):
    Ho, Wo = H // 2, W // 2
    kern = functools.partial(_conv3x3_bn_lif_pool_kernel, H=H, W=W, Cin=Cin,
                             Cout=Cout, tau=LIF_TAU, v_th=1.0)
    return pl.pallas_call(
        kern,
        out_shape=jax.ShapeDtypeStruct((T * B, Ho, Wo, Cout), BF16),
        grid_spec=pltpu.PrefetchScalarGridSpec(
            num_scalar_prefetch=0,
            grid=(B, T),        # b outer (independent), t inner (LIF recurrence)
            in_specs=[
                pl.BlockSpec((1, H + 2, W + 2, Cin),
                             lambda b, t: (t * B + b, 0, 0, 0)),
                pl.BlockSpec((9 * Cin, Cout), lambda b, t: (0, 0)),
                pl.BlockSpec((1, Cout), lambda b, t: (0, 0)),
            ],
            out_specs=pl.BlockSpec((1, Ho, Wo, Cout),
                                   lambda b, t: (t * B + b, 0, 0, 0)),
            scratch_shapes=[pltpu.VMEM((H * W, Cout), F32)],     # LIF membrane
        ),
        compiler_params=pltpu.CompilerParams(
            dimension_semantics=("parallel", "arbitrary")),
    )(x_pad, w, b)


def conv3x3_bn_lif_residual(x_pad, w, b, *, T, B, H, W, C):
    N = H * W
    kern = functools.partial(_conv3x3_bn_lif_res_kernel, H=H, W=W, C=C,
                             tau=LIF_TAU, v_th=1.0)
    return pl.pallas_call(
        kern,
        out_shape=jax.ShapeDtypeStruct((T, B * N, C), BF16),
        grid_spec=pltpu.PrefetchScalarGridSpec(
            num_scalar_prefetch=0,
            grid=(B, T),
            in_specs=[
                pl.BlockSpec((1, H + 2, W + 2, C),
                             lambda b, t: (t * B + b, 0, 0, 0)),
                pl.BlockSpec((9 * C, C), lambda b, t: (0, 0)),
                pl.BlockSpec((1, C), lambda b, t: (0, 0)),
            ],
            out_specs=pl.BlockSpec((1, N, C), lambda b, t: (t, b, 0)),
            scratch_shapes=[pltpu.VMEM((N, C), F32)],
        ),
        compiler_params=pltpu.CompilerParams(
            dimension_semantics=("parallel", "arbitrary")),
    )(x_pad, w, b)


# ---------------------------------------------------------------------------
# One fused Spikformer Block (SSA + MLP + residuals)
# ---------------------------------------------------------------------------
def _block_kernel(x_ref, mask_ref, wqkv_ref, bqkv_ref, wproj_ref, bproj_ref,
                  wfc1_ref, bfc1_ref, wfc2_ref, bfc2_ref, o_ref,
                  vqkv, vattn, vproj, vfc1, vfc2,
                  *, B, N, C, tau):
    """Full Block per time step; grid=(T,).  The whole batch is folded into the
    matmul row dimension (M = B*N); every LIF membrane lives in VMEM scratch."""
    @pl.when(pl.program_id(0) == 0)
    def _():
        vqkv[...] = jnp.zeros_like(vqkv)
        vattn[...] = jnp.zeros_like(vattn)
        vproj[...] = jnp.zeros_like(vproj)
        vfc1[...] = jnp.zeros_like(vfc1)
        vfc2[...] = jnp.zeros_like(vfc2)

    inv_tau = 1.0 / tau
    x = x_ref[0]                                                    # (B*N, C) bf16

    # fused q|k|v 1x1 conv (+BN): one lane-dense (B*N, 3C) bf16 matmul + 3 LIFs.
    qkv_in = jnp.dot(x, wqkv_ref[...], preferred_element_type=F32) + bqkv_ref[...]
    qkv_s = _lif_step(vqkv, qkv_in, 1.0, inv_tau).astype(BF16)      # (B*N, 3C) spikes

    # SSA per (batch, head): q @ (k^T v) * scale (== the PyTorch (q k^T) v order by
    # associativity).  Implemented as two batched MXU matmuls over the full channel
    # dim with a constant block-diagonal head mask (scale folded in) -> no per-head
    # slicing / merge buffer; cross-head products are simply masked away.
    q = qkv_s[:, 0 * C:1 * C].reshape(B, N, C)
    k = qkv_s[:, 1 * C:2 * C].reshape(B, N, C)
    v = qkv_s[:, 2 * C:3 * C].reshape(B, N, C)
    kv = jax.lax.dot_general(k, v, (((1,), (1,)), ((0,), (0,))),
                             preferred_element_type=F32)            # (B, C, C) = k^T v
    kv = (kv * mask_ref[...]).astype(BF16)   # spike counts <= N: exact in bf16 (N<=256)
    attn_in = jax.lax.dot_general(q, kv, (((2,), (1,)), ((0,), (0,))),
                                  preferred_element_type=F32)       # (B, N, C)
    attn_s = _lif_step(vattn, attn_in.reshape(B * N, C), 0.5,
                       inv_tau).astype(BF16)                        # attn_lif v_th=0.5

    proj_in = (jnp.dot(attn_s, wproj_ref[...], preferred_element_type=F32)
               + bproj_ref[...])
    ssa_out = _lif_step(vproj, proj_in, 1.0, inv_tau)

    x1 = x.astype(F32) + ssa_out                                    # residual 1

    h1 = (jnp.dot(x1.astype(BF16), wfc1_ref[...], preferred_element_type=F32)
          + bfc1_ref[...])
    s1 = _lif_step(vfc1, h1, 1.0, inv_tau).astype(BF16)
    h2 = jnp.dot(s1, wfc2_ref[...], preferred_element_type=F32) + bfc2_ref[...]
    s2 = _lif_step(vfc2, h2, 1.0, inv_tau)

    o_ref[...] = (x1 + s2)[None].astype(o_ref.dtype)                # residual 2


def transformer_block(rows, p, *, num_heads, B, N):
    T, M, C = rows.shape
    hidden = p['fc1_w'].shape[1]
    d = C // num_heads
    head_id = jnp.arange(C, dtype=jnp.int32) // d
    mask = ATTN_SCALE * (head_id[:, None] == head_id[None, :]).astype(F32)  # (C, C)
    kern = functools.partial(_block_kernel, B=B, N=N, C=C, tau=LIF_TAU)

    def wspec(shape):
        return pl.BlockSpec(shape, lambda t, _s=shape: tuple(0 for _ in _s))

    return pl.pallas_call(
        kern,
        out_shape=jax.ShapeDtypeStruct((T, M, C), BF16),
        grid_spec=pltpu.PrefetchScalarGridSpec(
            num_scalar_prefetch=0,
            grid=(T,),       # t carries the LIF membranes; B folded into rows
            in_specs=[
                pl.BlockSpec((1, M, C), lambda t: (t, 0, 0)),
                wspec((C, C)),                      # head mask (scale folded in)
                wspec((C, 3 * C)), wspec((1, 3 * C)),
                wspec((C, C)), wspec((1, C)),
                wspec((C, hidden)), wspec((1, hidden)),
                wspec((hidden, C)), wspec((1, C)),
            ],
            out_specs=pl.BlockSpec((1, M, C), lambda t: (t, 0, 0)),
            scratch_shapes=[
                pltpu.VMEM((M, 3 * C), F32),    # v_q|k|v LIF membranes
                pltpu.VMEM((M, C), F32),        # v_attn
                pltpu.VMEM((M, C), F32),        # v_proj
                pltpu.VMEM((M, hidden), F32),   # v_fc1
                pltpu.VMEM((M, C), F32),        # v_fc2
            ],
        ),
        compiler_params=pltpu.CompilerParams(dimension_semantics=("arbitrary",)),
    )(rows, mask, p['qkv_w'], p['qkv_b'], p['proj_w'], p['proj_b'],
      p['fc1_w'], p['fc1_b'], p['fc2_w'], p['fc2_b'])


# ---------------------------------------------------------------------------
# Parameter construction (deterministic; eval-mode BN fused into the convs)
# ---------------------------------------------------------------------------
def init_params(key):
    keys = iter(jax.random.split(key, 256))

    def nk():
        return next(keys)

    def conv_w(shape, fan_in):
        return jax.random.normal(nk(), shape, F32) / jnp.sqrt(float(fan_in))

    def bn_stats(c):
        gamma = 1.0 + 0.1 * jax.random.normal(nk(), (c,), F32)
        beta = 0.1 * jax.random.normal(nk(), (c,), F32)
        mean = 0.1 * jax.random.normal(nk(), (c,), F32)
        var = 1.0 + 0.1 * jax.random.uniform(nk(), (c,), F32)
        return gamma, beta, mean, var

    def fuse(w, conv_b, bn):
        gamma, beta, mean, var = bn
        s = gamma / jnp.sqrt(var + BN_EPS)
        wf = w * s                                 # Cout is the trailing axis of w
        bf = beta - mean * s
        if conv_b is not None:
            bf = bf + conv_b * s
        return wf, bf

    D = EMBED_DIM

    def fused_3x3(cin, cout):
        wf, bf = fuse(conv_w((3, 3, cin, cout), cin * 9), None, bn_stats(cout))
        # im2col layout: rows ordered (dy, dx, cin), matching the kernel's tap concat.
        return (wf.reshape(9 * cin, cout).astype(BF16),
                bf.reshape(1, cout).astype(F32))

    def fused_pw(cin, cout, bias):
        cb = 0.1 * jax.random.normal(nk(), (cout,), F32) if bias else None
        return fuse(conv_w((cin, cout), cin), cb, bn_stats(cout))

    sps = {}
    sps['proj_w'], sps['proj_b'] = fused_3x3(IN_CHANNELS, D // 2)
    sps['proj1_w'], sps['proj1_b'] = fused_3x3(D // 2, D)
    sps['rpe_w'], sps['rpe_b'] = fused_3x3(D, D)

    blocks = []
    for j in range(len(NUM_HEADS)):
        qw, qb = fused_pw(D, D, bias=False)
        kw, kb = fused_pw(D, D, bias=False)
        vw, vb = fused_pw(D, D, bias=False)
        pw, pb = fused_pw(D, D, bias=True)
        hidden = int(D * MLP_RATIOS[j])
        f1w, f1b = fused_pw(D, hidden, bias=True)
        f2w, f2b = fused_pw(hidden, D, bias=True)
        blocks.append({
            'qkv_w': jnp.concatenate([qw, kw, vw], axis=1).astype(BF16),
            'qkv_b': jnp.concatenate([qb, kb, vb]).reshape(1, 3 * D).astype(F32),
            'proj_w': pw.astype(BF16), 'proj_b': pb.reshape(1, D).astype(F32),
            'fc1_w': f1w.astype(BF16), 'fc1_b': f1b.reshape(1, hidden).astype(F32),
            'fc2_w': f2w.astype(BF16), 'fc2_b': f2b.reshape(1, D).astype(F32),
        })
    return {'sps': sps, 'blocks': blocks}


# ---------------------------------------------------------------------------
# Forward pass (wrapper glue: free reshapes, one halo pad per conv stage)
# ---------------------------------------------------------------------------
def _pad_hw(x4):
    # (TB, H, W, C) -> (TB, H+2, W+2, C); done once in HBM instead of in-kernel.
    return jnp.pad(x4, ((0, 0), (1, 1), (1, 1), (0, 0)))


def sps_forward(x_tbhwc, p, *, T, B, H, W):
    D = EMBED_DIM
    x0 = x_tbhwc.reshape(T * B, H, W, IN_CHANNELS).astype(BF16)
    y1 = conv3x3_bn_lif_pool(_pad_hw(x0), p['proj_w'], p['proj_b'],
                             T=T, B=B, H=H, W=W, Cin=IN_CHANNELS, Cout=D // 2)
    H2, W2 = H // 2, W // 2
    y2 = conv3x3_bn_lif_pool(_pad_hw(y1), p['proj1_w'], p['proj1_b'],
                             T=T, B=B, H=H2, W=W2, Cin=D // 2, Cout=D)
    H4, W4 = H // 4, W // 4
    return conv3x3_bn_lif_residual(_pad_hw(y2), p['rpe_w'], p['rpe_b'],
                                   T=T, B=B, H=H4, W=W4, C=D)   # (T, B*N, D) bf16


def spikformer_block_forward(x, params):
    # x: (B, Cin, S, H, W) -> permute(2,0,1,3,4) -> (T=S, B, Cin, H, W)
    B, _, S, H, W = x.shape
    T = S
    # TODO(synk): SPS_64's `unsqueeze(0).repeat(T,...)` is incompatible with the 5-D
    # tensor produced by SpikformerBlock.permute (it raises in PyTorch); the permuted
    # sequence axis is used directly as the spiking time axis T here.
    x_tbhwc = jnp.transpose(x, (2, 0, 3, 4, 1))                     # (T, B, H, W, Cin)

    rows = sps_forward(x_tbhwc, params['sps'], T=T, B=B, H=H, W=W)  # (T, B*N, C) bf16
    H4, W4 = H // 4, W // 4
    N = H4 * W4
    for j, bp in enumerate(params['blocks']):
        rows = transformer_block(rows, bp, num_heads=NUM_HEADS[j], B=B, N=N)

    out = rows.reshape(T, B, H4, W4, EMBED_DIM)
    return jnp.transpose(out, (1, 4, 0, 2, 3)).astype(F32)          # (B, C, T, H/4, W/4)


# ---------------------------------------------------------------------------
if __name__ == "__main__":
    key = jax.random.PRNGKey(0)
    kp, kx = jax.random.split(key)
    params = init_params(kp)

    B, Cin, S, H, W = 2, IN_CHANNELS, 4, 16, 16
    x = jax.random.normal(kx, (B, Cin, S, H, W), F32)

    fwd = jax.jit(spikformer_block_forward)
    out = jax.block_until_ready(fwd(x, params))

    assert out.shape == (B, EMBED_DIM, S, H // 4, W // 4), out.shape
    assert bool(jnp.all(jnp.isfinite(out)))
    print("KERNEL_OK")
</pallas_src>

<mosaic_0001>
module attributes {stable_mosaic.version = 11 : i64} {
  func.func @_conv3x3_bn_lif_pool_kernel(%arg0: i32, %arg1: i32, %arg2: memref<1x18x18x2xbf16, #tpu.memory_space<vmem>>, %arg3: memref<18x32xbf16, #tpu.memory_space<vmem>>, %arg4: memref<1x32xf32, #tpu.memory_space<vmem>>, %arg5: memref<1x8x8x32xbf16, #tpu.memory_space<vmem>>, %arg6: memref<256x32xf32, #tpu.memory_space<vmem>>) attributes {dimension_semantics = [#tpu.dimension_semantics<parallel>, #tpu.dimension_semantics<arbitrary>], iteration_bounds = array<i64: 2, 4>, scalar_prefetch = 0 : i64, scratch_operands = 1 : i64, tpu.core_type = #tpu.core_type<tc>, window_params = [{transform_indices = @transform_0, window_bounds = array<i64: 1, 18, 18, 2>}, {pipeline_mode = #tpu.pipeline_mode<synchronous>, transform_indices = @transform_1, window_bounds = array<i64: 18, 32>}, {pipeline_mode = #tpu.pipeline_mode<synchronous>, transform_indices = @transform_2, window_bounds = array<i64: 1, 32>}, {transform_indices = @transform_3, window_bounds = array<i64: 1, 8, 8, 32>}]} {
    %c0_i32 = arith.constant 0 : i32
    %0 = arith.cmpi eq, %arg1, %c0_i32 : i32
    %1 = arith.extui %0 : i1 to i32
    %c0_i32_0 = arith.constant 0 : i32
    %2 = arith.cmpi ne, %1, %c0_i32_0 : i32
    scf.if %2 {
      %cst_55 = arith.constant 0.000000e+00 : f32
      %77 = vector.broadcast %cst_55 : f32 to vector<256x32xf32>
      %c0_56 = arith.constant 0 : index
      %c0_57 = arith.constant 0 : index
      %78 = vector.load %arg6[%c0_56, %c0_57] : memref<256x32xf32, #tpu.memory_space<vmem>>, vector<256x32xf32>
      tpu.vector_store %arg6[%c0_56, %c0_57], %77 {strides = array<i32>} : memref<256x32xf32, #tpu.memory_space<vmem>>, vector<256x32xf32>,
    } else {
    }
    %c0 = arith.constant 0 : index
    %c0_1 = arith.constant 0 : index
    %c0_2 = arith.constant 0 : index
    %c0_3 = arith.constant 0 : index
    %3 = vector.load %arg2[%c0, %c0_1, %c0_2, %c0_3] : memref<1x18x18x2xbf16, #tpu.memory_space<vmem>>, vector<1x16x16x2xbf16>
    %4 = vector.shape_cast %3 : vector<1x16x16x2xbf16> to vector<16x16x2xbf16>
    %5 = vector.shape_cast %4 : vector<16x16x2xbf16> to vector<256x2xbf16>
    %c0_4 = arith.constant 0 : index
    %c0_5 = arith.constant 0 : index
    %c1 = arith.constant 1 : index
    %c0_6 = arith.constant 0 : index
    %6 = vector.load %arg2[%c0_4, %c0_5, %c1, %c0_6] : memref<1x18x18x2xbf16, #tpu.memory_space<vmem>>, vector<1x16x16x2xbf16>
    %7 = vector.shape_cast %6 : vector<1x16x16x2xbf16> to vector<16x16x2xbf16>
    %8 = vector.shape_cast %7 : vector<16x16x2xbf16> to vector<256x2xbf16>
    %c0_7 = arith.constant 0 : index
    %c0_8 = arith.constant 0 : index
    %c2 = arith.constant 2 : index
    %c0_9 = arith.constant 0 : index
    %9 = vector.load %arg2[%c0_7, %c0_8, %c2, %c0_9] : memref<1x18x18x2xbf16, #tpu.memory_space<vmem>>, vector<1x16x16x2xbf16>
    %10 = vector.shape_cast %9 : vector<1x16x16x2xbf16> to vector<16x16x2xbf16>
    %11 = vector.shape_cast %10 : vector<16x16x2xbf16> to vector<256x2xbf16>
    %c0_10 = arith.constant 0 : index
    %c1_11 = arith.constant 1 : index
    %c0_12 = arith.constant 0 : index
    %c0_13 = arith.constant 0 : index
    %12 = vector.load %arg2[%c0_10, %c1_11, %c0_12, %c0_13] : memref<1x18x18x2xbf16, #tpu.memory_space<vmem>>, vector<1x16x16x2xbf16>
    %13 = vector.shape_cast %12 : vector<1x16x16x2xbf16> to vector<16x16x2xbf16>
    %14 = vector.shape_cast %13 : vector<16x16x2xbf16> to vector<256x2xbf16>
    %c0_14 = arith.constant 0 : index
    %c1_15 = arith.constant 1 : index
    %c1_16 = arith.constant 1 : index
    %c0_17 = arith.constant 0 : index
    %15 = vector.load %arg2[%c0_14, %c1_15, %c1_16, %c0_17] : memref<1x18x18x2xbf16, #tpu.memory_space<vmem>>, vector<1x16x16x2xbf16>
    %16 = vector.shape_cast %15 : vector<1x16x16x2xbf16> to vector<16x16x2xbf16>
    %17 = vector.shape_cast %16 : vector<16x16x2xbf16> to vector<256x2xbf16>
    %c0_18 = arith.constant 0 : index
    %c1_19 = arith.constant 1 : index
    %c2_20 = arith.constant 2 : index
    %c0_21 = arith.constant 0 : index
    %18 = vector.load %arg2[%c0_18, %c1_19, %c2_20, %c0_21] : memref<1x18x18x2xbf16, #tpu.memory_space<vmem>>, vector<1x16x16x2xbf16>
    %19 = vector.shape_cast %18 : vector<1x16x16x2xbf16> to vector<16x16x2xbf16>
    %20 = vector.shape_cast %19 : vector<16x16x2xbf16> to vector<256x2xbf16>
    %c0_22 = arith.constant 0 : index
    %c2_23 = arith.constant 2 : index
    %c0_24 = arith.constant 0 : index
    %c0_25 = arith.constant 0 : index
    %21 = vector.load %arg2[%c0_22, %c2_23, %c0_24, %c0_25] : memref<1x18x18x2xbf16, #tpu.memory_space<vmem>>, vector<1x16x16x2xbf16>
    %22 = vector.shape_cast %21 : vector<1x16x16x2xbf16> to vector<16x16x2xbf16>
    %23 = vector.shape_cast %22 : vector<16x16x2xbf16> to vector<256x2xbf16>
    %c0_26 = arith.constant 0 : index
    %c2_27 = arith.constant 2 : index
    %c1_28 = arith.constant 1 : index
    %c0_29 = arith.constant 0 : index
    %24 = vector.load %arg2[%c0_26, %c2_27, %c1_28, %c0_29] : memref<1x18x18x2xbf16, #tpu.memory_space<vmem>>, vector<1x16x16x2xbf16>
    %25 = vector.shape_cast %24 : vector<1x16x16x2xbf16> to vector<16x16x2xbf16>
    %26 = vector.shape_cast %25 : vector<16x16x2xbf16> to vector<256x2xbf16>
    %c0_30 = arith.constant 0 : index
    %c2_31 = arith.constant 2 : index
    %c2_32 = arith.constant 2 : index
    %c0_33 = arith.constant 0 : index
    %27 = vector.load %arg2[%c0_30, %c2_31, %c2_32, %c0_33] : memref<1x18x18x2xbf16, #tpu.memory_space<vmem>>, vector<1x16x16x2xbf16>
    %28 = vector.shape_cast %27 : vector<1x16x16x2xbf16> to vector<16x16x2xbf16>
    %29 = vector.shape_cast %28 : vector<16x16x2xbf16> to vector<256x2xbf16>
    %30 = tpu.concatenate %5, %8, %11, %14, %17, %20, %23, %26, %29 in 1 : vector<256x2xbf16>, vector<256x2xbf16>, vector<256x2xbf16>, vector<256x2xbf16>, vector<256x2xbf16>, vector<256x2xbf16>, vector<256x2xbf16>, vector<256x2xbf16>, vector<256x2xbf16> -> vector<256x18xbf16>
    %c0_34 = arith.constant 0 : index
    %c0_35 = arith.constant 0 : index
    %31 = vector.load %arg3[%c0_34, %c0_35] : memref<18x32xbf16, #tpu.memory_space<vmem>>, vector<18x32xbf16>
    %cst = arith.constant dense<0.000000e+00> : vector<256x32xf32>
    %32 = tpu.matmul %30, %31, %cst {dimension_numbers = #tpu.dot_dimension_numbers<[1], [0], [0], [1], [0, 0, 1, 1], [], []>} : vector<256x18xbf16>, vector<18x32xbf16>, vector<256x32xf32> -> vector<256x32xf32>
    %c0_36 = arith.constant 0 : index
    %c0_37 = arith.constant 0 : index
    %33 = vector.load %arg4[%c0_36, %c0_37] : memref<1x32xf32, #tpu.memory_space<vmem>>, vector<1x32xf32>
    %34 = vector.broadcast %33 : vector<1x32xf32> to vector<256x32xf32>
    %35 = arith.addf %32, %34 : vector<256x32xf32>
    %c0_38 = arith.constant 0 : index
    %c0_39 = arith.constant 0 : index
    %36 = vector.load %arg6[%c0_38, %c0_39] : memref<256x32xf32, #tpu.memory_space<vmem>>, vector<256x32xf32>
    %c0_40 = arith.constant 0 : index
    %c0_41 = arith.constant 0 : index
    %37 = vector.load %arg6[%c0_40, %c0_41] : memref<256x32xf32, #tpu.memory_space<vmem>>, vector<256x32xf32>
    %38 = arith.subf %35, %37 : vector<256x32xf32>
    %cst_42 = arith.constant 5.000000e-01 : f32
    %39 = vector.broadcast %cst_42 : f32 to vector<256x32xf32>
    %40 = arith.mulf %38, %39 : vector<256x32xf32>
    %41 = arith.addf %36, %40 : vector<256x32xf32>
    %cst_43 = arith.constant 1.000000e+00 : f32
    %42 = vector.broadcast %cst_43 : f32 to vector<256x32xf32>
    %43 = arith.cmpf oge, %41, %42 : vector<256x32xf32>
    %cst_44 = arith.constant 0.000000e+00 : f32
    %44 = vector.broadcast %cst_44 : f32 to vector<256x32xf32>
    %45 = arith.select %43, %44, %41 : vector<256x32xi1>, vector<256x32xf32>
    %c0_45 = arith.constant 0 : index
    %c0_46 = arith.constant 0 : index
    %46 = vector.load %arg6[%c0_45, %c0_46] : memref<256x32xf32, #tpu.memory_space<vmem>>, vector<256x32xf32>
    tpu.vector_store %arg6[%c0_45, %c0_46], %45 {strides = array<i32>} : memref<256x32xf32, #tpu.memory_space<vmem>>, vector<256x32xf32>,
    %47 = arith.extui %43 : vector<256x32xi1> to vector<256x32xi32>
    %48 = arith.sitofp %47 : vector<256x32xi32> to vector<256x32xf32>
    %cst_47 = arith.constant 0.000000e+00 : f32
    %49 = vector.broadcast %cst_47 : f32 to vector<16x32xf32>
    %50 = tpu.concatenate %49, %48, %49 in 0 : vector<16x32xf32>, vector<256x32xf32>, vector<16x32xf32> -> vector<288x32xf32>
    %51 = vector.extract_strided_slice %50 {offsets = [0, 0], sizes = [256, 32], strides = [1, 1]} : vector<288x32xf32> to vector<256x32xf32>
    %52 = arith.maximumf %51, %48 : vector<256x32xf32>
    %53 = vector.extract_strided_slice %50 {offsets = [32, 0], sizes = [256, 32], strides = [1, 1]} : vector<288x32xf32> to vector<256x32xf32>
    %54 = arith.maximumf %52, %53 : vector<256x32xf32>
    %cst_48 = arith.constant 0.000000e+00 : f32
    %55 = vector.broadcast %cst_48 : f32 to vector<1x32xf32>
    %56 = vector.extract_strided_slice %54 {offsets = [0, 0], sizes = [255, 32], strides = [1, 1]} : vector<256x32xf32> to vector<255x32xf32>
    %57 = tpu.concatenate %55, %56 in 0 : vector<1x32xf32>, vector<255x32xf32> -> vector<256x32xf32>
    %58 = tpu.iota {dimensions = array<i32: 1>} : vector<16x16x32xi32>
    %59 = vector.shape_cast %58 : vector<16x16x32xi32> to vector<256x32xi32>
    %c0_i32_49 = arith.constant 0 : i32
    %60 = vector.broadcast %c0_i32_49 : i32 to vector<256x32xi32>
    %61 = arith.cmpi eq, %59, %60 : vector<256x32xi32>
    %cst_50 = arith.constant 0.000000e+00 : f32
    %62 = vector.broadcast %cst_50 : f32 to vector<256x32xf32>
    %63 = arith.select %61, %62, %57 : vector<256x32xi1>, vector<256x32xf32>
    %64 = vector.extract_strided_slice %54 {offsets = [1, 0], sizes = [255, 32], strides = [1, 1]} : vector<256x32xf32> to vector<255x32xf32>
    %65 = tpu.concatenate %64, %55 in 0 : vector<255x32xf32>, vector<1x32xf32> -> vector<256x32xf32>
    %66 = arith.maximumf %63, %54 : vector<256x32xf32>
    %67 = arith.maximumf %66, %65 : vector<256x32xf32>
    %68 = vector.shape_cast %67 : vector<256x32xf32> to vector<128x2x32xf32>
    %69 = vector.extract_strided_slice %68 {offsets = [0, 0, 0], sizes = [128, 1, 32], strides = [1, 1, 1]} : vector<128x2x32xf32> to vector<128x1x32xf32>
    %70 = vector.shape_cast %69 : vector<128x1x32xf32> to vector<128x32xf32>
    %71 = vector.shape_cast %70 : vector<128x32xf32> to vector<8x2x8x32xf32>
    %72 = vector.extract_strided_slice %71 {offsets = [0, 0, 0, 0], sizes = [8, 1, 8, 32], strides = [1, 1, 1, 1]} : vector<8x2x8x32xf32> to vector<8x1x8x32xf32>
    %73 = vector.shape_cast %72 : vector<8x1x8x32xf32> to vector<8x8x32xf32>
    %74 = vector.shape_cast %73 : vector<8x8x32xf32> to vector<1x8x8x32xf32>
    %75 = arith.truncf %74 : vector<1x8x8x32xf32> to vector<1x8x8x32xbf16>
    %c0_51 = arith.constant 0 : index
    %c0_52 = arith.constant 0 : index
    %c0_53 = arith.constant 0 : index
    %c0_54 = arith.constant 0 : index
    %76 = vector.load %arg5[%c0_51, %c0_52, %c0_53, %c0_54] : memref<1x8x8x32xbf16, #tpu.memory_space<vmem>>, vector<1x8x8x32xbf16>
    tpu.vector_store %arg5[%c0_51, %c0_52, %c0_53, %c0_54], %75 {strides = array<i32>} : memref<1x8x8x32xbf16, #tpu.memory_space<vmem>>, vector<1x8x8x32xbf16>,
    return
  }
  func.func @transform_0(%arg0: i32, %arg1: i32) -> (i32, i32, i32, i32) {
    %c2_i32 = arith.constant 2 : i32
    %0 = arith.muli %arg1, %c2_i32 : i32
    %1 = arith.addi %0, %arg0 : i32
    %c0_i32 = arith.constant 0 : i32
    %c0_i32_0 = arith.constant 0 : i32
    %c0_i32_1 = arith.constant 0 : i32
    %c0_i32_2 = arith.constant 0 : i32
    return %1, %c0_i32, %c0_i32_0, %c0_i32_1 : i32, i32, i32, i32
  }
  func.func @transform_1(%arg0: i32, %arg1: i32) -> (i32, i32) {
    %c0_i32 = arith.constant 0 : i32
    %c0_i32_0 = arith.constant 0 : i32
    %c0_i32_1 = arith.constant 0 : i32
    return %c0_i32, %c0_i32_0 : i32, i32
  }
  func.func @transform_2(%arg0: i32, %arg1: i32) -> (i32, i32) {
    %c0_i32 = arith.constant 0 : i32
    %c0_i32_0 = arith.constant 0 : i32
    %c0_i32_1 = arith.constant 0 : i32
    return %c0_i32, %c0_i32_0 : i32, i32
  }
  func.func @transform_3(%arg0: i32, %arg1: i32) -> (i32, i32, i32, i32) {
    %c2_i32 = arith.constant 2 : i32
    %0 = arith.muli %arg1, %c2_i32 : i32
    %1 = arith.addi %0, %arg0 : i32
    %c0_i32 = arith.constant 0 : i32
    %c0_i32_0 = arith.constant 0 : i32
    %c0_i32_1 = arith.constant 0 : i32
    %c0_i32_2 = arith.constant 0 : i32
    return %1, %c0_i32, %c0_i32_0, %c0_i32_1 : i32, i32, i32, i32
  }
}

module attributes {stable_mosaic.version = 11 : i64} {
  func.func @_conv3x3_bn_lif_res_kernel(%arg0: i32, %arg1: i32, %arg2: memref<1x6x6x64xbf16, #tpu.memory_space<vmem>>, %arg3: memref<576x64xbf16, #tpu.memory_space<vmem>>, %arg4: memref<1x64xf32, #tpu.memory_space<vmem>>, %arg5: memref<1x16x64xbf16, #tpu.memory_space<vmem>>, %arg6: memref<16x64xf32, #tpu.memory_space<vmem>>) attributes {dimension_semantics = [#tpu.dimension_semantics<parallel>, #tpu.dimension_semantics<arbitrary>], iteration_bounds = array<i64: 2, 4>, scalar_prefetch = 0 : i64, scratch_operands = 1 : i64, tpu.core_type = #tpu.core_type<tc>, window_params = [{transform_indices = @transform_0, window_bounds = array<i64: 1, 6, 6, 64>}, {pipeline_mode = #tpu.pipeline_mode<synchronous>, transform_indices = @transform_1, window_bounds = array<i64: 576, 64>}, {pipeline_mode = #tpu.pipeline_mode<synchronous>, transform_indices = @transform_2, window_bounds = array<i64: 1, 64>}, {transform_indices = @transform_3, window_bounds = array<i64: 1, 16, 64>}]} {
    %c0_i32 = arith.constant 0 : i32
    %0 = arith.cmpi eq, %arg1, %c0_i32 : i32
    %1 = arith.extui %0 : i1 to i32
    %c0_i32_0 = arith.constant 0 : i32
    %2 = arith.cmpi ne, %1, %c0_i32_0 : i32
    scf.if %2 {
      %cst_50 = arith.constant 0.000000e+00 : f32
      %54 = vector.broadcast %cst_50 : f32 to vector<16x64xf32>
      %c0_51 = arith.constant 0 : index
      %c0_52 = arith.constant 0 : index
      %55 = vector.load %arg6[%c0_51, %c0_52] : memref<16x64xf32, #tpu.memory_space<vmem>>, vector<16x64xf32>
      tpu.vector_store %arg6[%c0_51, %c0_52], %54 {strides = array<i32>} : memref<16x64xf32, #tpu.memory_space<vmem>>, vector<16x64xf32>,
    } else {
    }
    %c0 = arith.constant 0 : index
    %c0_1 = arith.constant 0 : index
    %c0_2 = arith.constant 0 : index
    %c0_3 = arith.constant 0 : index
    %3 = vector.load %arg2[%c0, %c0_1, %c0_2, %c0_3] : memref<1x6x6x64xbf16, #tpu.memory_space<vmem>>, vector<1x4x4x64xbf16>
    %4 = vector.shape_cast %3 : vector<1x4x4x64xbf16> to vector<4x4x64xbf16>
    %5 = vector.shape_cast %4 : vector<4x4x64xbf16> to vector<16x64xbf16>
    %c0_4 = arith.constant 0 : index
    %c0_5 = arith.constant 0 : index
    %c1 = arith.constant 1 : index
    %c0_6 = arith.constant 0 : index
    %6 = vector.load %arg2[%c0_4, %c0_5, %c1, %c0_6] : memref<1x6x6x64xbf16, #tpu.memory_space<vmem>>, vector<1x4x4x64xbf16>
    %7 = vector.shape_cast %6 : vector<1x4x4x64xbf16> to vector<4x4x64xbf16>
    %8 = vector.shape_cast %7 : vector<4x4x64xbf16> to vector<16x64xbf16>
    %c0_7 = arith.constant 0 : index
    %c0_8 = arith.constant 0 : index
    %c2 = arith.constant 2 : index
    %c0_9 = arith.constant 0 : index
    %9 = vector.load %arg2[%c0_7, %c0_8, %c2, %c0_9] : memref<1x6x6x64xbf16, #tpu.memory_space<vmem>>, vector<1x4x4x64xbf16>
    %10 = vector.shape_cast %9 : vector<1x4x4x64xbf16> to vector<4x4x64xbf16>
    %11 = vector.shape_cast %10 : vector<4x4x64xbf16> to vector<16x64xbf16>
    %c0_10 = arith.constant 0 : index
    %c1_11 = arith.constant 1 : index
    %c0_12 = arith.constant 0 : index
    %c0_13 = arith.constant 0 : index
    %12 = vector.load %arg2[%c0_10, %c1_11, %c0_12, %c0_13] : memref<1x6x6x64xbf16, #tpu.memory_space<vmem>>, vector<1x4x4x64xbf16>
    %13 = vector.shape_cast %12 : vector<1x4x4x64xbf16> to vector<4x4x64xbf16>
    %14 = vector.shape_cast %13 : vector<4x4x64xbf16> to vector<16x64xbf16>
    %c0_14 = arith.constant 0 : index
    %c1_15 = arith.constant 1 : index
    %c1_16 = arith.constant 1 : index
    %c0_17 = arith.constant 0 : index
    %15 = vector.load %arg2[%c0_14, %c1_15, %c1_16, %c0_17] : memref<1x6x6x64xbf16, #tpu.memory_space<vmem>>, vector<1x4x4x64xbf16>
    %16 = vector.shape_cast %15 : vector<1x4x4x64xbf16> to vector<4x4x64xbf16>
    %17 = vector.shape_cast %16 : vector<4x4x64xbf16> to vector<16x64xbf16>
    %c0_18 = arith.constant 0 : index
    %c1_19 = arith.constant 1 : index
    %c2_20 = arith.constant 2 : index
    %c0_21 = arith.constant 0 : index
    %18 = vector.load %arg2[%c0_18, %c1_19, %c2_20, %c0_21] : memref<1x6x6x64xbf16, #tpu.memory_space<vmem>>, vector<1x4x4x64xbf16>
    %19 = vector.shape_cast %18 : vector<1x4x4x64xbf16> to vector<4x4x64xbf16>
    %20 = vector.shape_cast %19 : vector<4x4x64xbf16> to vector<16x64xbf16>
    %c0_22 = arith.constant 0 : index
    %c2_23 = arith.constant 2 : index
    %c0_24 = arith.constant 0 : index
    %c0_25 = arith.constant 0 : index
    %21 = vector.load %arg2[%c0_22, %c2_23, %c0_24, %c0_25] : memref<1x6x6x64xbf16, #tpu.memory_space<vmem>>, vector<1x4x4x64xbf16>
    %22 = vector.shape_cast %21 : vector<1x4x4x64xbf16> to vector<4x4x64xbf16>
    %23 = vector.shape_cast %22 : vector<4x4x64xbf16> to vector<16x64xbf16>
    %c0_26 = arith.constant 0 : index
    %c2_27 = arith.constant 2 : index
    %c1_28 = arith.constant 1 : index
    %c0_29 = arith.constant 0 : index
    %24 = vector.load %arg2[%c0_26, %c2_27, %c1_28, %c0_29] : memref<1x6x6x64xbf16, #tpu.memory_space<vmem>>, vector<1x4x4x64xbf16>
    %25 = vector.shape_cast %24 : vector<1x4x4x64xbf16> to vector<4x4x64xbf16>
    %26 = vector.shape_cast %25 : vector<4x4x64xbf16> to vector<16x64xbf16>
    %c0_30 = arith.constant 0 : index
    %c2_31 = arith.constant 2 : index
    %c2_32 = arith.constant 2 : index
    %c0_33 = arith.constant 0 : index
    %27 = vector.load %arg2[%c0_30, %c2_31, %c2_32, %c0_33] : memref<1x6x6x64xbf16, #tpu.memory_space<vmem>>, vector<1x4x4x64xbf16>
    %28 = vector.shape_cast %27 : vector<1x4x4x64xbf16> to vector<4x4x64xbf16>
    %29 = vector.shape_cast %28 : vector<4x4x64xbf16> to vector<16x64xbf16>
    %30 = tpu.concatenate %5, %8, %11, %14, %17, %20, %23, %26, %29 in 1 : vector<16x64xbf16>, vector<16x64xbf16>, vector<16x64xbf16>, vector<16x64xbf16>, vector<16x64xbf16>, vector<16x64xbf16>, vector<16x64xbf16>, vector<16x64xbf16>, vector<16x64xbf16> -> vector<16x576xbf16>
    %c0_34 = arith.constant 0 : index
    %c0_35 = arith.constant 0 : index
    %31 = vector.load %arg3[%c0_34, %c0_35] : memref<576x64xbf16, #tpu.memory_space<vmem>>, vector<576x64xbf16>
    %cst = arith.constant dense<0.000000e+00> : vector<16x64xf32>
    %32 = tpu.matmul %30, %31, %cst {dimension_numbers = #tpu.dot_dimension_numbers<[1], [0], [0], [1], [0, 0, 1, 1], [], []>} : vector<16x576xbf16>, vector<576x64xbf16>, vector<16x64xf32> -> vector<16x64xf32>
    %c0_36 = arith.constant 0 : index
    %c0_37 = arith.constant 0 : index
    %33 = vector.load %arg4[%c0_36, %c0_37] : memref<1x64xf32, #tpu.memory_space<vmem>>, vector<1x64xf32>
    %34 = vector.broadcast %33 : vector<1x64xf32> to vector<16x64xf32>
    %35 = arith.addf %32, %34 : vector<16x64xf32>
    %c0_38 = arith.constant 0 : index
    %c0_39 = arith.constant 0 : index
    %36 = vector.load %arg6[%c0_38, %c0_39] : memref<16x64xf32, #tpu.memory_space<vmem>>, vector<16x64xf32>
    %c0_40 = arith.constant 0 : index
    %c0_41 = arith.constant 0 : index
    %37 = vector.load %arg6[%c0_40, %c0_41] : memref<16x64xf32, #tpu.memory_space<vmem>>, vector<16x64xf32>
    %38 = arith.subf %35, %37 : vector<16x64xf32>
    %cst_42 = arith.constant 5.000000e-01 : f32
    %39 = vector.broadcast %cst_42 : f32 to vector<16x64xf32>
    %40 = arith.mulf %38, %39 : vector<16x64xf32>
    %41 = arith.addf %36, %40 : vector<16x64xf32>
    %cst_43 = arith.constant 1.000000e+00 : f32
    %42 = vector.broadcast %cst_43 : f32 to vector<16x64xf32>
    %43 = arith.cmpf oge, %41, %42 : vector<16x64xf32>
    %cst_44 = arith.constant 0.000000e+00 : f32
    %44 = vector.broadcast %cst_44 : f32 to vector<16x64xf32>
    %45 = arith.select %43, %44, %41 : vector<16x64xi1>, vector<16x64xf32>
    %c0_45 = arith.constant 0 : index
    %c0_46 = arith.constant 0 : index
    %46 = vector.load %arg6[%c0_45, %c0_46] : memref<16x64xf32, #tpu.memory_space<vmem>>, vector<16x64xf32>
    tpu.vector_store %arg6[%c0_45, %c0_46], %45 {strides = array<i32>} : memref<16x64xf32, #tpu.memory_space<vmem>>, vector<16x64xf32>,
    %47 = arith.extui %43 : vector<16x64xi1> to vector<16x64xi32>
    %48 = arith.sitofp %47 : vector<16x64xi32> to vector<16x64xf32>
    %49 = arith.extf %17 : vector<16x64xbf16> to vector<16x64xf32>
    %50 = arith.addf %48, %49 : vector<16x64xf32>
    %51 = vector.shape_cast %50 : vector<16x64xf32> to vector<1x16x64xf32>
    %52 = arith.truncf %51 : vector<1x16x64xf32> to vector<1x16x64xbf16>
    %c0_47 = arith.constant 0 : index
    %c0_48 = arith.constant 0 : index
    %c0_49 = arith.constant 0 : index
    %53 = vector.load %arg5[%c0_47, %c0_48, %c0_49] : memref<1x16x64xbf16, #tpu.memory_space<vmem>>, vector<1x16x64xbf16>
    tpu.vector_store %arg5[%c0_47, %c0_48, %c0_49], %52 {strides = array<i32>} : memref<1x16x64xbf16, #tpu.memory_space<vmem>>, vector<1x16x64xbf16>,
    return
  }
  func.func @transform_0(%arg0: i32, %arg1: i32) -> (i32, i32, i32, i32) {
    %c2_i32 = arith.constant 2 : i32
    %0 = arith.muli %arg1, %c2_i32 : i32
    %1 = arith.addi %0, %arg0 : i32
    %c0_i32 = arith.constant 0 : i32
    %c0_i32_0 = arith.constant 0 : i32
    %c0_i32_1 = arith.constant 0 : i32
    %c0_i32_2 = arith.constant 0 : i32
    return %1, %c0_i32, %c0_i32_0, %c0_i32_1 : i32, i32, i32, i32
  }
  func.func @transform_1(%arg0: i32, %arg1: i32) -> (i32, i32) {
    %c0_i32 = arith.constant 0 : i32
    %c0_i32_0 = arith.constant 0 : i32
    %c0_i32_1 = arith.constant 0 : i32
    return %c0_i32, %c0_i32_0 : i32, i32
  }
  func.func @transform_2(%arg0: i32, %arg1: i32) -> (i32, i32) {
    %c0_i32 = arith.constant 0 : i32
    %c0_i32_0 = arith.constant 0 : i32
    %c0_i32_1 = arith.constant 0 : i32
    return %c0_i32, %c0_i32_0 : i32, i32
  }
  func.func @transform_3(%arg0: i32, %arg1: i32) -> (i32, i32, i32) {
    %c0_i32 = arith.constant 0 : i32
    %c0_i32_0 = arith.constant 0 : i32
    return %arg1, %arg0, %c0_i32 : i32, i32, i32
  }
}

module attributes {stable_mosaic.version = 11 : i64} {
  func.func @_conv3x3_bn_lif_pool_kernel(%arg0: i32, %arg1: i32, %arg2: memref<1x10x10x32xbf16, #tpu.memory_space<vmem>>, %arg3: memref<288x64xbf16, #tpu.memory_space<vmem>>, %arg4: memref<1x64xf32, #tpu.memory_space<vmem>>, %arg5: memref<1x4x4x64xbf16, #tpu.memory_space<vmem>>, %arg6: memref<64x64xf32, #tpu.memory_space<vmem>>) attributes {dimension_semantics = [#tpu.dimension_semantics<parallel>, #tpu.dimension_semantics<arbitrary>], iteration_bounds = array<i64: 2, 4>, scalar_prefetch = 0 : i64, scratch_operands = 1 : i64, tpu.core_type = #tpu.core_type<tc>, window_params = [{transform_indices = @transform_0, window_bounds = array<i64: 1, 10, 10, 32>}, {pipeline_mode = #tpu.pipeline_mode<synchronous>, transform_indices = @transform_1, window_bounds = array<i64: 288, 64>}, {pipeline_mode = #tpu.pipeline_mode<synchronous>, transform_indices = @transform_2, window_bounds = array<i64: 1, 64>}, {transform_indices = @transform_3, window_bounds = array<i64: 1, 4, 4, 64>}]} {
    %c0_i32 = arith.constant 0 : i32
    %0 = arith.cmpi eq, %arg1, %c0_i32 : i32
    %1 = arith.extui %0 : i1 to i32
    %c0_i32_0 = arith.constant 0 : i32
    %2 = arith.cmpi ne, %1, %c0_i32_0 : i32
    scf.if %2 {
      %cst_55 = arith.constant 0.000000e+00 : f32
      %77 = vector.broadcast %cst_55 : f32 to vector<64x64xf32>
      %c0_56 = arith.constant 0 : index
      %c0_57 = arith.constant 0 : index
      %78 = vector.load %arg6[%c0_56, %c0_57] : memref<64x64xf32, #tpu.memory_space<vmem>>, vector<64x64xf32>
      tpu.vector_store %arg6[%c0_56, %c0_57], %77 {strides = array<i32>} : memref<64x64xf32, #tpu.memory_space<vmem>>, vector<64x64xf32>,
    } else {
    }
    %c0 = arith.constant 0 : index
    %c0_1 = arith.constant 0 : index
    %c0_2 = arith.constant 0 : index
    %c0_3 = arith.constant 0 : index
    %3 = vector.load %arg2[%c0, %c0_1, %c0_2, %c0_3] : memref<1x10x10x32xbf16, #tpu.memory_space<vmem>>, vector<1x8x8x32xbf16>
    %4 = vector.shape_cast %3 : vector<1x8x8x32xbf16> to vector<8x8x32xbf16>
    %5 = vector.shape_cast %4 : vector<8x8x32xbf16> to vector<64x32xbf16>
    %c0_4 = arith.constant 0 : index
    %c0_5 = arith.constant 0 : index
    %c1 = arith.constant 1 : index
    %c0_6 = arith.constant 0 : index
    %6 = vector.load %arg2[%c0_4, %c0_5, %c1, %c0_6] : memref<1x10x10x32xbf16, #tpu.memory_space<vmem>>, vector<1x8x8x32xbf16>
    %7 = vector.shape_cast %6 : vector<1x8x8x32xbf16> to vector<8x8x32xbf16>
    %8 = vector.shape_cast %7 : vector<8x8x32xbf16> to vector<64x32xbf16>
    %c0_7 = arith.constant 0 : index
    %c0_8 = arith.constant 0 : index
    %c2 = arith.constant 2 : index
    %c0_9 = arith.constant 0 : index
    %9 = vector.load %arg2[%c0_7, %c0_8, %c2, %c0_9] : memref<1x10x10x32xbf16, #tpu.memory_space<vmem>>, vector<1x8x8x32xbf16>
    %10 = vector.shape_cast %9 : vector<1x8x8x32xbf16> to vector<8x8x32xbf16>
    %11 = vector.shape_cast %10 : vector<8x8x32xbf16> to vector<64x32xbf16>
    %c0_10 = arith.constant 0 : index
    %c1_11 = arith.constant 1 : index
    %c0_12 = arith.constant 0 : index
    %c0_13 = arith.constant 0 : index
    %12 = vector.load %arg2[%c0_10, %c1_11, %c0_12, %c0_13] : memref<1x10x10x32xbf16, #tpu.memory_space<vmem>>, vector<1x8x8x32xbf16>
    %13 = vector.shape_cast %12 : vector<1x8x8x32xbf16> to vector<8x8x32xbf16>
    %14 = vector.shape_cast %13 : vector<8x8x32xbf16> to vector<64x32xbf16>
    %c0_14 = arith.constant 0 : index
    %c1_15 = arith.constant 1 : index
    %c1_16 = arith.constant 1 : index
    %c0_17 = arith.constant 0 : index
    %15 = vector.load %arg2[%c0_14, %c1_15, %c1_16, %c0_17] : memref<1x10x10x32xbf16, #tpu.memory_space<vmem>>, vector<1x8x8x32xbf16>
    %16 = vector.shape_cast %15 : vector<1x8x8x32xbf16> to vector<8x8x32xbf16>
    %17 = vector.shape_cast %16 : vector<8x8x32xbf16> to vector<64x32xbf16>
    %c0_18 = arith.constant 0 : index
    %c1_19 = arith.constant 1 : index
    %c2_20 = arith.constant 2 : index
    %c0_21 = arith.constant 0 : index
    %18 = vector.load %arg2[%c0_18, %c1_19, %c2_20, %c0_21] : memref<1x10x10x32xbf16, #tpu.memory_space<vmem>>, vector<1x8x8x32xbf16>
    %19 = vector.shape_cast %18 : vector<1x8x8x32xbf16> to vector<8x8x32xbf16>
    %20 = vector.shape_cast %19 : vector<8x8x32xbf16> to vector<64x32xbf16>
    %c0_22 = arith.constant 0 : index
    %c2_23 = arith.constant 2 : index
    %c0_24 = arith.constant 0 : index
    %c0_25 = arith.constant 0 : index
    %21 = vector.load %arg2[%c0_22, %c2_23, %c0_24, %c0_25] : memref<1x10x10x32xbf16, #tpu.memory_space<vmem>>, vector<1x8x8x32xbf16>
    %22 = vector.shape_cast %21 : vector<1x8x8x32xbf16> to vector<8x8x32xbf16>
    %23 = vector.shape_cast %22 : vector<8x8x32xbf16> to vector<64x32xbf16>
    %c0_26 = arith.constant 0 : index
    %c2_27 = arith.constant 2 : index
    %c1_28 = arith.constant 1 : index
    %c0_29 = arith.constant 0 : index
    %24 = vector.load %arg2[%c0_26, %c2_27, %c1_28, %c0_29] : memref<1x10x10x32xbf16, #tpu.memory_space<vmem>>, vector<1x8x8x32xbf16>
    %25 = vector.shape_cast %24 : vector<1x8x8x32xbf16> to vector<8x8x32xbf16>
    %26 = vector.shape_cast %25 : vector<8x8x32xbf16> to vector<64x32xbf16>
    %c0_30 = arith.constant 0 : index
    %c2_31 = arith.constant 2 : index
    %c2_32 = arith.constant 2 : index
    %c0_33 = arith.constant 0 : index
    %27 = vector.load %arg2[%c0_30, %c2_31, %c2_32, %c0_33] : memref<1x10x10x32xbf16, #tpu.memory_space<vmem>>, vector<1x8x8x32xbf16>
    %28 = vector.shape_cast %27 : vector<1x8x8x32xbf16> to vector<8x8x32xbf16>
    %29 = vector.shape_cast %28 : vector<8x8x32xbf16> to vector<64x32xbf16>
    %30 = tpu.concatenate %5, %8, %11, %14, %17, %20, %23, %26, %29 in 1 : vector<64x32xbf16>, vector<64x32xbf16>, vector<64x32xbf16>, vector<64x32xbf16>, vector<64x32xbf16>, vector<64x32xbf16>, vector<64x32xbf16>, vector<64x32xbf16>, vector<64x32xbf16> -> vector<64x288xbf16>
    %c0_34 = arith.constant 0 : index
    %c0_35 = arith.constant 0 : index
    %31 = vector.load %arg3[%c0_34, %c0_35] : memref<288x64xbf16, #tpu.memory_space<vmem>>, vector<288x64xbf16>
    %cst = arith.constant dense<0.000000e+00> : vector<64x64xf32>
    %32 = tpu.matmul %30, %31, %cst {dimension_numbers = #tpu.dot_dimension_numbers<[1], [0], [0], [1], [0, 0, 1, 1], [], []>} : vector<64x288xbf16>, vector<288x64xbf16>, vector<64x64xf32> -> vector<64x64xf32>
    %c0_36 = arith.constant 0 : index
    %c0_37 = arith.constant 0 : index
    %33 = vector.load %arg4[%c0_36, %c0_37] : memref<1x64xf32, #tpu.memory_space<vmem>>, vector<1x64xf32>
    %34 = vector.broadcast %33 : vector<1x64xf32> to vector<64x64xf32>
    %35 = arith.addf %32, %34 : vector<64x64xf32>
    %c0_38 = arith.constant 0 : index
    %c0_39 = arith.constant 0 : index
    %36 = vector.load %arg6[%c0_38, %c0_39] : memref<64x64xf32, #tpu.memory_space<vmem>>, vector<64x64xf32>
    %c0_40 = arith.constant 0 : index
    %c0_41 = arith.constant 0 : index
    %37 = vector.load %arg6[%c0_40, %c0_41] : memref<64x64xf32, #tpu.memory_space<vmem>>, vector<64x64xf32>
    %38 = arith.subf %35, %37 : vector<64x64xf32>
    %cst_42 = arith.constant 5.000000e-01 : f32
    %39 = vector.broadcast %cst_42 : f32 to vector<64x64xf32>
    %40 = arith.mulf %38, %39 : vector<64x64xf32>
    %41 = arith.addf %36, %40 : vector<64x64xf32>
    %cst_43 = arith.constant 1.000000e+00 : f32
    %42 = vector.broadcast %cst_43 : f32 to vector<64x64xf32>
    %43 = arith.cmpf oge, %41, %42 : vector<64x64xf32>
    %cst_44 = arith.constant 0.000000e+00 : f32
    %44 = vector.broadcast %cst_44 : f32 to vector<64x64xf32>
    %45 = arith.select %43, %44, %41 : vector<64x64xi1>, vector<64x64xf32>
    %c0_45 = arith.constant 0 : index
    %c0_46 = arith.constant 0 : index
    %46 = vector.load %arg6[%c0_45, %c0_46] : memref<64x64xf32, #tpu.memory_space<vmem>>, vector<64x64xf32>
    tpu.vector_store %arg6[%c0_45, %c0_46], %45 {strides = array<i32>} : memref<64x64xf32, #tpu.memory_space<vmem>>, vector<64x64xf32>,
    %47 = arith.extui %43 : vector<64x64xi1> to vector<64x64xi32>
    %48 = arith.sitofp %47 : vector<64x64xi32> to vector<64x64xf32>
    %cst_47 = arith.constant 0.000000e+00 : f32
    %49 = vector.broadcast %cst_47 : f32 to vector<8x64xf32>
    %50 = tpu.concatenate %49, %48, %49 in 0 : vector<8x64xf32>, vector<64x64xf32>, vector<8x64xf32> -> vector<80x64xf32>
    %51 = vector.extract_strided_slice %50 {offsets = [0, 0], sizes = [64, 64], strides = [1, 1]} : vector<80x64xf32> to vector<64x64xf32>
    %52 = arith.maximumf %51, %48 : vector<64x64xf32>
    %53 = vector.extract_strided_slice %50 {offsets = [16, 0], sizes = [64, 64], strides = [1, 1]} : vector<80x64xf32> to vector<64x64xf32>
    %54 = arith.maximumf %52, %53 : vector<64x64xf32>
    %cst_48 = arith.constant 0.000000e+00 : f32
    %55 = vector.broadcast %cst_48 : f32 to vector<1x64xf32>
    %56 = vector.extract_strided_slice %54 {offsets = [0, 0], sizes = [63, 64], strides = [1, 1]} : vector<64x64xf32> to vector<63x64xf32>
    %57 = tpu.concatenate %55, %56 in 0 : vector<1x64xf32>, vector<63x64xf32> -> vector<64x64xf32>
    %58 = tpu.iota {dimensions = array<i32: 1>} : vector<8x8x64xi32>
    %59 = vector.shape_cast %58 : vector<8x8x64xi32> to vector<64x64xi32>
    %c0_i32_49 = arith.constant 0 : i32
    %60 = vector.broadcast %c0_i32_49 : i32 to vector<64x64xi32>
    %61 = arith.cmpi eq, %59, %60 : vector<64x64xi32>
    %cst_50 = arith.constant 0.000000e+00 : f32
    %62 = vector.broadcast %cst_50 : f32 to vector<64x64xf32>
    %63 = arith.select %61, %62, %57 : vector<64x64xi1>, vector<64x64xf32>
    %64 = vector.extract_strided_slice %54 {offsets = [1, 0], sizes = [63, 64], strides = [1, 1]} : vector<64x64xf32> to vector<63x64xf32>
    %65 = tpu.concatenate %64, %55 in 0 : vector<63x64xf32>, vector<1x64xf32> -> vector<64x64xf32>
    %66 = arith.maximumf %63, %54 : vector<64x64xf32>
    %67 = arith.maximumf %66, %65 : vector<64x64xf32>
    %68 = vector.shape_cast %67 : vector<64x64xf32> to vector<32x2x64xf32>
    %69 = vector.extract_strided_slice %68 {offsets = [0, 0, 0], sizes = [32, 1, 64], strides = [1, 1, 1]} : vector<32x2x64xf32> to vector<32x1x64xf32>
    %70 = vector.shape_cast %69 : vector<32x1x64xf32> to vector<32x64xf32>
    %71 = vector.shape_cast %70 : vector<32x64xf32> to vector<4x2x4x64xf32>
    %72 = vector.extract_strided_slice %71 {offsets = [0, 0, 0, 0], sizes = [4, 1, 4, 64], strides = [1, 1, 1, 1]} : vector<4x2x4x64xf32> to vector<4x1x4x64xf32>
    %73 = vector.shape_cast %72 : vector<4x1x4x64xf32> to vector<4x4x64xf32>
    %74 = vector.shape_cast %73 : vector<4x4x64xf32> to vector<1x4x4x64xf32>
    %75 = arith.truncf %74 : vector<1x4x4x64xf32> to vector<1x4x4x64xbf16>
    %c0_51 = arith.constant 0 : index
    %c0_52 = arith.constant 0 : index
    %c0_53 = arith.constant 0 : index
    %c0_54 = arith.constant 0 : index
    %76 = vector.load %arg5[%c0_51, %c0_52, %c0_53, %c0_54] : memref<1x4x4x64xbf16, #tpu.memory_space<vmem>>, vector<1x4x4x64xbf16>
    tpu.vector_store %arg5[%c0_51, %c0_52, %c0_53, %c0_54], %75 {strides = array<i32>} : memref<1x4x4x64xbf16, #tpu.memory_space<vmem>>, vector<1x4x4x64xbf16>,
    return
  }
  func.func @transform_0(%arg0: i32, %arg1: i32) -> (i32, i32, i32, i32) {
    %c2_i32 = arith.constant 2 : i32
    %0 = arith.muli %arg1, %c2_i32 : i32
    %1 = arith.addi %0, %arg0 : i32
    %c0_i32 = arith.constant 0 : i32
    %c0_i32_0 = arith.constant 0 : i32
    %c0_i32_1 = arith.constant 0 : i32
    %c0_i32_2 = arith.constant 0 : i32
    return %1, %c0_i32, %c0_i32_0, %c0_i32_1 : i32, i32, i32, i32
  }
  func.func @transform_1(%arg0: i32, %arg1: i32) -> (i32, i32) {
    %c0_i32 = arith.constant 0 : i32
    %c0_i32_0 = arith.constant 0 : i32
    %c0_i32_1 = arith.constant 0 : i32
    return %c0_i32, %c0_i32_0 : i32, i32
  }
  func.func @transform_2(%arg0: i32, %arg1: i32) -> (i32, i32) {
    %c0_i32 = arith.constant 0 : i32
    %c0_i32_0 = arith.constant 0 : i32
    %c0_i32_1 = arith.constant 0 : i32
    return %c0_i32, %c0_i32_0 : i32, i32
  }
  func.func @transform_3(%arg0: i32, %arg1: i32) -> (i32, i32, i32, i32) {
    %c2_i32 = arith.constant 2 : i32
    %0 = arith.muli %arg1, %c2_i32 : i32
    %1 = arith.addi %0, %arg0 : i32
    %c0_i32 = arith.constant 0 : i32
    %c0_i32_0 = arith.constant 0 : i32
    %c0_i32_1 = arith.constant 0 : i32
    %c0_i32_2 = arith.constant 0 : i32
    return %1, %c0_i32, %c0_i32_0, %c0_i32_1 : i32, i32, i32, i32
  }
}

module attributes {stable_mosaic.version = 11 : i64} {
  func.func @_block_kernel(%arg0: i32, %arg1: memref<1x32x64xbf16, #tpu.memory_space<vmem>>, %arg2: memref<64x64xf32, #tpu.memory_space<vmem>>, %arg3: memref<64x192xbf16, #tpu.memory_space<vmem>>, %arg4: memref<1x192xf32, #tpu.memory_space<vmem>>, %arg5: memref<64x64xbf16, #tpu.memory_space<vmem>>, %arg6: memref<1x64xf32, #tpu.memory_space<vmem>>, %arg7: memref<64x256xbf16, #tpu.memory_space<vmem>>, %arg8: memref<1x256xf32, #tpu.memory_space<vmem>>, %arg9: memref<256x64xbf16, #tpu.memory_space<vmem>>, %arg10: memref<1x64xf32, #tpu.memory_space<vmem>>, %arg11: memref<1x32x64xbf16, #tpu.memory_space<vmem>>, %arg12: memref<32x192xf32, #tpu.memory_space<vmem>>, %arg13: memref<32x64xf32, #tpu.memory_space<vmem>>, %arg14: memref<32x64xf32, #tpu.memory_space<vmem>>, %arg15: memref<32x256xf32, #tpu.memory_space<vmem>>, %arg16: memref<32x64xf32, #tpu.memory_space<vmem>>) attributes {dimension_semantics = [#tpu.dimension_semantics<arbitrary>], iteration_bounds = array<i64: 4>, scalar_prefetch = 0 : i64, scratch_operands = 5 : i64, tpu.core_type = #tpu.core_type<tc>, window_params = [{transform_indices = @transform_0, window_bounds = array<i64: 1, 32, 64>}, {pipeline_mode = #tpu.pipeline_mode<synchronous>, transform_indices = @transform_1, window_bounds = array<i64: 64, 64>}, {pipeline_mode = #tpu.pipeline_mode<synchronous>, transform_indices = @transform_2, window_bounds = array<i64: 64, 192>}, {pipeline_mode = #tpu.pipeline_mode<synchronous>, transform_indices = @transform_3, window_bounds = array<i64: 1, 192>}, {pipeline_mode = #tpu.pipeline_mode<synchronous>, transform_indices = @transform_4, window_bounds = array<i64: 64, 64>}, {pipeline_mode = #tpu.pipeline_mode<synchronous>, transform_indices = @transform_5, window_bounds = array<i64: 1, 64>}, {pipeline_mode = #tpu.pipeline_mode<synchronous>, transform_indices = @transform_6, window_bounds = array<i64: 64, 256>}, {pipeline_mode = #tpu.pipeline_mode<synchronous>, transform_indices = @transform_7, window_bounds = array<i64: 1, 256>}, {pipeline_mode = #tpu.pipeline_mode<synchronous>, transform_indices = @transform_8, window_bounds = array<i64: 256, 64>}, {pipeline_mode = #tpu.pipeline_mode<synchronous>, transform_indices = @transform_9, window_bounds = array<i64: 1, 64>}, {transform_indices = @transform_10, window_bounds = array<i64: 1, 32, 64>}]} {
    %c0_i32 = arith.constant 0 : i32
    %0 = arith.cmpi eq, %arg0, %c0_i32 : i32
    %1 = arith.extui %0 : i1 to i32
    %c0_i32_0 = arith.constant 0 : i32
    %2 = arith.cmpi ne, %1, %c0_i32_0 : i32
    scf.if %2 {
      %cst_74 = arith.constant 0.000000e+00 : f32
      %114 = vector.broadcast %cst_74 : f32 to vector<32x192xf32>
      %c0_75 = arith.constant 0 : index
      %c0_76 = arith.constant 0 : index
      %115 = vector.load %arg12[%c0_75, %c0_76] : memref<32x192xf32, #tpu.memory_space<vmem>>, vector<32x192xf32>
      tpu.vector_store %arg12[%c0_75, %c0_76], %114 {strides = array<i32>} : memref<32x192xf32, #tpu.memory_space<vmem>>, vector<32x192xf32>,
      %cst_77 = arith.constant 0.000000e+00 : f32
      %116 = vector.broadcast %cst_77 : f32 to vector<32x64xf32>
      %c0_78 = arith.constant 0 : index
      %c0_79 = arith.constant 0 : index
      %117 = vector.load %arg13[%c0_78, %c0_79] : memref<32x64xf32, #tpu.memory_space<vmem>>, vector<32x64xf32>
      tpu.vector_store %arg13[%c0_78, %c0_79], %116 {strides = array<i32>} : memref<32x64xf32, #tpu.memory_space<vmem>>, vector<32x64xf32>,
      %cst_80 = arith.constant 0.000000e+00 : f32
      %118 = vector.broadcast %cst_80 : f32 to vector<32x64xf32>
      %c0_81 = arith.constant 0 : index
      %c0_82 = arith.constant 0 : index
      %119 = vector.load %arg14[%c0_81, %c0_82] : memref<32x64xf32, #tpu.memory_space<vmem>>, vector<32x64xf32>
      tpu.vector_store %arg14[%c0_81, %c0_82], %118 {strides = array<i32>} : memref<32x64xf32, #tpu.memory_space<vmem>>, vector<32x64xf32>,
      %cst_83 = arith.constant 0.000000e+00 : f32
      %120 = vector.broadcast %cst_83 : f32 to vector<32x256xf32>
      %c0_84 = arith.constant 0 : index
      %c0_85 = arith.constant 0 : index
      %121 = vector.load %arg15[%c0_84, %c0_85] : memref<32x256xf32, #tpu.memory_space<vmem>>, vector<32x256xf32>
      tpu.vector_store %arg15[%c0_84, %c0_85], %120 {strides = array<i32>} : memref<32x256xf32, #tpu.memory_space<vmem>>, vector<32x256xf32>,
      %cst_86 = arith.constant 0.000000e+00 : f32
      %122 = vector.broadcast %cst_86 : f32 to vector<32x64xf32>
      %c0_87 = arith.constant 0 : index
      %c0_88 = arith.constant 0 : index
      %123 = vector.load %arg16[%c0_87, %c0_88] : memref<32x64xf32, #tpu.memory_space<vmem>>, vector<32x64xf32>
      tpu.vector_store %arg16[%c0_87, %c0_88], %122 {strides = array<i32>} : memref<32x64xf32, #tpu.memory_space<vmem>>, vector<32x64xf32>,
    } else {
    }
    %c0 = arith.constant 0 : index
    %c0_1 = arith.constant 0 : index
    %c0_2 = arith.constant 0 : index
    %3 = vector.load %arg1[%c0, %c0_1, %c0_2] : memref<1x32x64xbf16, #tpu.memory_space<vmem>>, vector<1x32x64xbf16>
    %4 = vector.shape_cast %3 : vector<1x32x64xbf16> to vector<32x64xbf16>
    %c0_3 = arith.constant 0 : index
    %c0_4 = arith.constant 0 : index
    %5 = vector.load %arg3[%c0_3, %c0_4] : memref<64x192xbf16, #tpu.memory_space<vmem>>, vector<64x192xbf16>
    %cst = arith.constant dense<0.000000e+00> : vector<32x192xf32>
    %6 = tpu.matmul %4, %5, %cst {dimension_numbers = #tpu.dot_dimension_numbers<[1], [0], [0], [1], [0, 0, 1, 1], [], []>} : vector<32x64xbf16>, vector<64x192xbf16>, vector<32x192xf32> -> vector<32x192xf32>
    %c0_5 = arith.constant 0 : index
    %c0_6 = arith.constant 0 : index
    %7 = vector.load %arg4[%c0_5, %c0_6] : memref<1x192xf32, #tpu.memory_space<vmem>>, vector<1x192xf32>
    %8 = vector.broadcast %7 : vector<1x192xf32> to vector<32x192xf32>
    %9 = arith.addf %6, %8 : vector<32x192xf32>
    %c0_7 = arith.constant 0 : index
    %c0_8 = arith.constant 0 : index
    %10 = vector.load %arg12[%c0_7, %c0_8] : memref<32x192xf32, #tpu.memory_space<vmem>>, vector<32x192xf32>
    %c0_9 = arith.constant 0 : index
    %c0_10 = arith.constant 0 : index
    %11 = vector.load %arg12[%c0_9, %c0_10] : memref<32x192xf32, #tpu.memory_space<vmem>>, vector<32x192xf32>
    %12 = arith.subf %9, %11 : vector<32x192xf32>
    %cst_11 = arith.constant 5.000000e-01 : f32
    %13 = vector.broadcast %cst_11 : f32 to vector<32x192xf32>
    %14 = arith.mulf %12, %13 : vector<32x192xf32>
    %15 = arith.addf %10, %14 : vector<32x192xf32>
    %cst_12 = arith.constant 1.000000e+00 : f32
    %16 = vector.broadcast %cst_12 : f32 to vector<32x192xf32>
    %17 = arith.cmpf oge, %15, %16 : vector<32x192xf32>
    %cst_13 = arith.constant 0.000000e+00 : f32
    %18 = vector.broadcast %cst_13 : f32 to vector<32x192xf32>
    %19 = arith.select %17, %18, %15 : vector<32x192xi1>, vector<32x192xf32>
    %c0_14 = arith.constant 0 : index
    %c0_15 = arith.constant 0 : index
    %20 = vector.load %arg12[%c0_14, %c0_15] : memref<32x192xf32, #tpu.memory_space<vmem>>, vector<32x192xf32>
    tpu.vector_store %arg12[%c0_14, %c0_15], %19 {strides = array<i32>} : memref<32x192xf32, #tpu.memory_space<vmem>>, vector<32x192xf32>,
    %21 = arith.extui %17 : vector<32x192xi1> to vector<32x192xi32>
    %22 = arith.sitofp %21 : vector<32x192xi32> to vector<32x192xf32>
    %23 = arith.truncf %22 : vector<32x192xf32> to vector<32x192xbf16>
    %24 = vector.extract_strided_slice %23 {offsets = [0, 0], sizes = [32, 64], strides = [1, 1]} : vector<32x192xbf16> to vector<32x64xbf16>
    %25 = vector.shape_cast %24 : vector<32x64xbf16> to vector<2x16x64xbf16>
    %26 = vector.extract_strided_slice %23 {offsets = [0, 64], sizes = [32, 64], strides = [1, 1]} : vector<32x192xbf16> to vector<32x64xbf16>
    %27 = vector.shape_cast %26 : vector<32x64xbf16> to vector<2x16x64xbf16>
    %28 = vector.extract_strided_slice %23 {offsets = [0, 128], sizes = [32, 64], strides = [1, 1]} : vector<32x192xbf16> to vector<32x64xbf16>
    %29 = vector.shape_cast %28 : vector<32x64xbf16> to vector<2x16x64xbf16>
    %cst_16 = arith.constant dense<0.000000e+00> : vector<2x64x64xf32>
    %30 = tpu.matmul %27, %29, %cst_16 {dimension_numbers = #tpu.dot_dimension_numbers<[1], [1], [2], [2], [0, 0, 0, 2, 1, 2], [0], [0]>} : vector<2x16x64xbf16>, vector<2x16x64xbf16>, vector<2x64x64xf32> -> vector<2x64x64xf32>
    %c0_17 = arith.constant 0 : index
    %c0_18 = arith.constant 0 : index
    %31 = vector.load %arg2[%c0_17, %c0_18] : memref<64x64xf32, #tpu.memory_space<vmem>>, vector<64x64xf32>
    %32 = vector.shape_cast %31 : vector<64x64xf32> to vector<1x64x64xf32>
    %33 = vector.broadcast %32 : vector<1x64x64xf32> to vector<2x64x64xf32>
    %34 = arith.mulf %30, %33 : vector<2x64x64xf32>
    %35 = arith.truncf %34 : vector<2x64x64xf32> to vector<2x64x64xbf16>
    %cst_19 = arith.constant dense<0.000000e+00> : vector<2x16x64xf32>
    %36 = tpu.matmul %25, %35, %cst_19 {dimension_numbers = #tpu.dot_dimension_numbers<[2], [1], [1], [2], [0, 0, 0, 1, 1, 2], [0], [0]>} : vector<2x16x64xbf16>, vector<2x64x64xbf16>, vector<2x16x64xf32> -> vector<2x16x64xf32>
    %37 = vector.shape_cast %36 : vector<2x16x64xf32> to vector<32x64xf32>
    %c0_20 = arith.constant 0 : index
    %c0_21 = arith.constant 0 : index
    %38 = vector.load %arg13[%c0_20, %c0_21] : memref<32x64xf32, #tpu.memory_space<vmem>>, vector<32x64xf32>
    %c0_22 = arith.constant 0 : index
    %c0_23 = arith.constant 0 : index
    %39 = vector.load %arg13[%c0_22, %c0_23] : memref<32x64xf32, #tpu.memory_space<vmem>>, vector<32x64xf32>
    %40 = arith.subf %37, %39 : vector<32x64xf32>
    %cst_24 = arith.constant 5.000000e-01 : f32
    %41 = vector.broadcast %cst_24 : f32 to vector<32x64xf32>
    %42 = arith.mulf %40, %41 : vector<32x64xf32>
    %43 = arith.addf %38, %42 : vector<32x64xf32>
    %cst_25 = arith.constant 5.000000e-01 : f32
    %44 = vector.broadcast %cst_25 : f32 to vector<32x64xf32>
    %45 = arith.cmpf oge, %43, %44 : vector<32x64xf32>
    %cst_26 = arith.constant 0.000000e+00 : f32
    %46 = vector.broadcast %cst_26 : f32 to vector<32x64xf32>
    %47 = arith.select %45, %46, %43 : vector<32x64xi1>, vector<32x64xf32>
    %c0_27 = arith.constant 0 : index
    %c0_28 = arith.constant 0 : index
    %48 = vector.load %arg13[%c0_27, %c0_28] : memref<32x64xf32, #tpu.memory_space<vmem>>, vector<32x64xf32>
    tpu.vector_store %arg13[%c0_27, %c0_28], %47 {strides = array<i32>} : memref<32x64xf32, #tpu.memory_space<vmem>>, vector<32x64xf32>,
    %49 = arith.extui %45 : vector<32x64xi1> to vector<32x64xi32>
    %50 = arith.sitofp %49 : vector<32x64xi32> to vector<32x64xf32>
    %51 = arith.truncf %50 : vector<32x64xf32> to vector<32x64xbf16>
    %c0_29 = arith.constant 0 : index
    %c0_30 = arith.constant 0 : index
    %52 = vector.load %arg5[%c0_29, %c0_30] : memref<64x64xbf16, #tpu.memory_space<vmem>>, vector<64x64xbf16>
    %cst_31 = arith.constant dense<0.000000e+00> : vector<32x64xf32>
    %53 = tpu.matmul %51, %52, %cst_31 {dimension_numbers = #tpu.dot_dimension_numbers<[1], [0], [0], [1], [0, 0, 1, 1], [], []>} : vector<32x64xbf16>, vector<64x64xbf16>, vector<32x64xf32> -> vector<32x64xf32>
    %c0_32 = arith.constant 0 : index
    %c0_33 = arith.constant 0 : index
    %54 = vector.load %arg6[%c0_32, %c0_33] : memref<1x64xf32, #tpu.memory_space<vmem>>, vector<1x64xf32>
    %55 = vector.broadcast %54 : vector<1x64xf32> to vector<32x64xf32>
    %56 = arith.addf %53, %55 : vector<32x64xf32>
    %c0_34 = arith.constant 0 : index
    %c0_35 = arith.constant 0 : index
    %57 = vector.load %arg14[%c0_34, %c0_35] : memref<32x64xf32, #tpu.memory_space<vmem>>, vector<32x64xf32>
    %c0_36 = arith.constant 0 : index
    %c0_37 = arith.constant 0 : index
    %58 = vector.load %arg14[%c0_36, %c0_37] : memref<32x64xf32, #tpu.memory_space<vmem>>, vector<32x64xf32>
    %59 = arith.subf %56, %58 : vector<32x64xf32>
    %cst_38 = arith.constant 5.000000e-01 : f32
    %60 = vector.broadcast %cst_38 : f32 to vector<32x64xf32>
    %61 = arith.mulf %59, %60 : vector<32x64xf32>
    %62 = arith.addf %57, %61 : vector<32x64xf32>
    %cst_39 = arith.constant 1.000000e+00 : f32
    %63 = vector.broadcast %cst_39 : f32 to vector<32x64xf32>
    %64 = arith.cmpf oge, %62, %63 : vector<32x64xf32>
    %cst_40 = arith.constant 0.000000e+00 : f32
    %65 = vector.broadcast %cst_40 : f32 to vector<32x64xf32>
    %66 = arith.select %64, %65, %62 : vector<32x64xi1>, vector<32x64xf32>
    %c0_41 = arith.constant 0 : index
    %c0_42 = arith.constant 0 : index
    %67 = vector.load %arg14[%c0_41, %c0_42] : memref<32x64xf32, #tpu.memory_space<vmem>>, vector<32x64xf32>
    tpu.vector_store %arg14[%c0_41, %c0_42], %66 {strides = array<i32>} : memref<32x64xf32, #tpu.memory_space<vmem>>, vector<32x64xf32>,
    %68 = arith.extui %64 : vector<32x64xi1> to vector<32x64xi32>
    %69 = arith.sitofp %68 : vector<32x64xi32> to vector<32x64xf32>
    %70 = arith.extf %4 : vector<32x64xbf16> to vector<32x64xf32>
    %71 = arith.addf %70, %69 : vector<32x64xf32>
    %72 = arith.truncf %71 : vector<32x64xf32> to vector<32x64xbf16>
    %c0_43 = arith.constant 0 : index
    %c0_44 = arith.constant 0 : index
    %73 = vector.load %arg7[%c0_43, %c0_44] : memref<64x256xbf16, #tpu.memory_space<vmem>>, vector<64x256xbf16>
    %cst_45 = arith.constant dense<0.000000e+00> : vector<32x256xf32>
    %74 = tpu.matmul %72, %73, %cst_45 {dimension_numbers = #tpu.dot_dimension_numbers<[1], [0], [0], [1], [0, 0, 1, 1], [], []>} : vector<32x64xbf16>, vector<64x256xbf16>, vector<32x256xf32> -> vector<32x256xf32>
    %c0_46 = arith.constant 0 : index
    %c0_47 = arith.constant 0 : index
    %75 = vector.load %arg8[%c0_46, %c0_47] : memref<1x256xf32, #tpu.memory_space<vmem>>, vector<1x256xf32>
    %76 = vector.broadcast %75 : vector<1x256xf32> to vector<32x256xf32>
    %77 = arith.addf %74, %76 : vector<32x256xf32>
    %c0_48 = arith.constant 0 : index
    %c0_49 = arith.constant 0 : index
    %78 = vector.load %arg15[%c0_48, %c0_49] : memref<32x256xf32, #tpu.memory_space<vmem>>, vector<32x256xf32>
    %c0_50 = arith.constant 0 : index
    %c0_51 = arith.constant 0 : index
    %79 = vector.load %arg15[%c0_50, %c0_51] : memref<32x256xf32, #tpu.memory_space<vmem>>, vector<32x256xf32>
    %80 = arith.subf %77, %79 : vector<32x256xf32>
    %cst_52 = arith.constant 5.000000e-01 : f32
    %81 = vector.broadcast %cst_52 : f32 to vector<32x256xf32>
    %82 = arith.mulf %80, %81 : vector<32x256xf32>
    %83 = arith.addf %78, %82 : vector<32x256xf32>
    %cst_53 = arith.constant 1.000000e+00 : f32
    %84 = vector.broadcast %cst_53 : f32 to vector<32x256xf32>
    %85 = arith.cmpf oge, %83, %84 : vector<32x256xf32>
    %cst_54 = arith.constant 0.000000e+00 : f32
    %86 = vector.broadcast %cst_54 : f32 to vector<32x256xf32>
    %87 = arith.select %85, %86, %83 : vector<32x256xi1>, vector<32x256xf32>
    %c0_55 = arith.constant 0 : index
    %c0_56 = arith.constant 0 : index
    %88 = vector.load %arg15[%c0_55, %c0_56] : memref<32x256xf32, #tpu.memory_space<vmem>>, vector<32x256xf32>
    tpu.vector_store %arg15[%c0_55, %c0_56], %87 {strides = array<i32>} : memref<32x256xf32, #tpu.memory_space<vmem>>, vector<32x256xf32>,
    %89 = arith.extui %85 : vector<32x256xi1> to vector<32x256xi32>
    %90 = arith.sitofp %89 : vector<32x256xi32> to vector<32x256xf32>
    %91 = arith.truncf %90 : vector<32x256xf32> to vector<32x256xbf16>
    %c0_57 = arith.constant 0 : index
    %c0_58 = arith.constant 0 : index
    %92 = vector.load %arg9[%c0_57, %c0_58] : memref<256x64xbf16, #tpu.memory_space<vmem>>, vector<256x64xbf16>
    %cst_59 = arith.constant dense<0.000000e+00> : vector<32x64xf32>
    %93 = tpu.matmul %91, %92, %cst_59 {dimension_numbers = #tpu.dot_dimension_numbers<[1], [0], [0], [1], [0, 0, 1, 1], [], []>} : vector<32x256xbf16>, vector<256x64xbf16>, vector<32x64xf32> -> vector<32x64xf32>
    %c0_60 = arith.constant 0 : index
    %c0_61 = arith.constant 0 : index
    %94 = vector.load %arg10[%c0_60, %c0_61] : memref<1x64xf32, #tpu.memory_space<vmem>>, vector<1x64xf32>
    %95 = vector.broadcast %94 : vector<1x64xf32> to vector<32x64xf32>
    %96 = arith.addf %93, %95 : vector<32x64xf32>
    %c0_62 = arith.constant 0 : index
    %c0_63 = arith.constant 0 : index
    %97 = vector.load %arg16[%c0_62, %c0_63] : memref<32x64xf32, #tpu.memory_space<vmem>>, vector<32x64xf32>
    %c0_64 = arith.constant 0 : index
    %c0_65 = arith.constant 0 : index
    %98 = vector.load %arg16[%c0_64, %c0_65] : memref<32x64xf32, #tpu.memory_space<vmem>>, vector<32x64xf32>
    %99 = arith.subf %96, %98 : vector<32x64xf32>
    %cst_66 = arith.constant 5.000000e-01 : f32
    %100 = vector.broadcast %cst_66 : f32 to vector<32x64xf32>
    %101 = arith.mulf %99, %100 : vector<32x64xf32>
    %102 = arith.addf %97, %101 : vector<32x64xf32>
    %cst_67 = arith.constant 1.000000e+00 : f32
    %103 = vector.broadcast %cst_67 : f32 to vector<32x64xf32>
    %104 = arith.cmpf oge, %102, %103 : vector<32x64xf32>
    %cst_68 = arith.constant 0.000000e+00 : f32
    %105 = vector.broadcast %cst_68 : f32 to vector<32x64xf32>
    %106 = arith.select %104, %105, %102 : vector<32x64xi1>, vector<32x64xf32>
    %c0_69 = arith.constant 0 : index
    %c0_70 = arith.constant 0 : index
    %107 = vector.load %arg16[%c0_69, %c0_70] : memref<32x64xf32, #tpu.memory_space<vmem>>, vector<32x64xf32>
    tpu.vector_store %arg16[%c0_69, %c0_70], %106 {strides = array<i32>} : memref<32x64xf32, #tpu.memory_space<vmem>>, vector<32x64xf32>,
    %108 = arith.extui %104 : vector<32x64xi1> to vector<32x64xi32>
    %109 = arith.sitofp %108 : vector<32x64xi32> to vector<32x64xf32>
    %110 = arith.addf %71, %109 : vector<32x64xf32>
    %111 = vector.shape_cast %110 : vector<32x64xf32> to vector<1x32x64xf32>
    %112 = arith.truncf %111 : vector<1x32x64xf32> to vector<1x32x64xbf16>
    %c0_71 = arith.constant 0 : index
    %c0_72 = arith.constant 0 : index
    %c0_73 = arith.constant 0 : index
    %113 = vector.load %arg11[%c0_71, %c0_72, %c0_73] : memref<1x32x64xbf16, #tpu.memory_space<vmem>>, vector<1x32x64xbf16>
    tpu.vector_store %arg11[%c0_71, %c0_72, %c0_73], %112 {strides = array<i32>} : memref<1x32x64xbf16, #tpu.memory_space<vmem>>, vector<1x32x64xbf16>,
    return
  }
  func.func @transform_0(%arg0: i32) -> (i32, i32, i32) {
    %c0_i32 = arith.constant 0 : i32
    %c0_i32_0 = arith.constant 0 : i32
    %c0_i32_1 = arith.constant 0 : i32
    return %arg0, %c0_i32, %c0_i32_0 : i32, i32, i32
  }
  func.func @transform_1(%arg0: i32) -> (i32, i32) {
    %c0_i32 = arith.constant 0 : i32
    %c0_i32_0 = arith.constant 0 : i32
    %c0_i32_1 = arith.constant 0 : i32
    return %c0_i32, %c0_i32_0 : i32, i32
  }
  func.func @transform_2(%arg0: i32) -> (i32, i32) {
    %c0_i32 = arith.constant 0 : i32
    %c0_i32_0 = arith.constant 0 : i32
    %c0_i32_1 = arith.constant 0 : i32
    return %c0_i32, %c0_i32_0 : i32, i32
  }
  func.func @transform_3(%arg0: i32) -> (i32, i32) {
    %c0_i32 = arith.constant 0 : i32
    %c0_i32_0 = arith.constant 0 : i32
    %c0_i32_1 = arith.constant 0 : i32
    return %c0_i32, %c0_i32_0 : i32, i32
  }
  func.func @transform_4(%arg0: i32) -> (i32, i32) {
    %c0_i32 = arith.constant 0 : i32
    %c0_i32_0 = arith.constant 0 : i32
    %c0_i32_1 = arith.constant 0 : i32
    return %c0_i32, %c0_i32_0 : i32, i32
  }
  func.func @transform_5(%arg0: i32) -> (i32, i32) {
    %c0_i32 = arith.constant 0 : i32
    %c0_i32_0 = arith.constant 0 : i32
    %c0_i32_1 = arith.constant 0 : i32
    return %c0_i32, %c0_i32_0 : i32, i32
  }
  func.func @transform_6(%arg0: i32) -> (i32, i32) {
    %c0_i32 = arith.constant 0 : i32
    %c0_i32_0 = arith.constant 0 : i32
    %c0_i32_1 = arith.constant 0 : i32
    return %c0_i32, %c0_i32_0 : i32, i32
  }
  func.func @transform_7(%arg0: i32) -> (i32, i32) {
    %c0_i32 = arith.constant 0 : i32
    %c0_i32_0 = arith.constant 0 : i32
    %c0_i32_1 = arith.constant 0 : i32
    return %c0_i32, %c0_i32_0 : i32, i32
  }
  func.func @transform_8(%arg0: i32) -> (i32, i32) {
    %c0_i32 = arith.constant 0 : i32
    %c0_i32_0 = arith.constant 0 : i32
    %c0_i32_1 = arith.constant 0 : i32
    return %c0_i32, %c0_i32_0 : i32, i32
  }
  func.func @transform_9(%arg0: i32) -> (i32, i32) {
    %c0_i32 = arith.constant 0 : i32
    %c0_i32_0 = arith.constant 0 : i32
    %c0_i32_1 = arith.constant 0 : i32
    return %c0_i32, %c0_i32_0 : i32, i32
  }
  func.func @transform_10(%arg0: i32) -> (i32, i32, i32) {
    %c0_i32 = arith.constant 0 : i32
    %c0_i32_0 = arith.constant 0 : i32
    %c0_i32_1 = arith.constant 0 : i32
    return %arg0, %c0_i32, %c0_i32_0 : i32, i32, i32
  }
}

</mosaic_0001>

<bundles_post_ra>
// kernel: spikformer_block_forward.8
= control target key start
LH: loop header
LB: loop body
LE: loop exit
PB: predicated region body
PF: predicated region fallthrough
CT: control target
= control target key end

     0   :  { %s1781_s12 = smov 0   ;;  %s1783_s13 = smov 0   ;;  %s2089_s0 = inlined_call_operand.vmem [shape: bf16[8,6,6,64], index: 0, kind: input, shape index: {}]   ;;  %s2090_s1 = inlined_call_operand.vmem [shape: bf16[576,64], index: 1, kind: input, shape index: {}]   ;;  %s2091_s2 = inlined_call_operand.vmem [shape: f32[1,64], index: 2, kind: input, shape index: {}]   ;;  %s2092_s3 = inlined_call_operand.vmem [shape: bf16[4,32,64], index: 3, kind: output, shape index: {}]  }
   0x1   :  { %s1785_s14 = smov 0   ;;  %s1787_s15 = smov 0  }
   0x2   :  { %s1789_s16 = smov 0  }
   0x3 LB: > { %s22_s17 = sadd.s32 1, %s1746_s14  ;;  %s25_s18 = sadd.s32 1, %s1750_s15  ;;  %s1754_s16 = sphi %s1789_s16, %s13_s16   ;;  %s1750_s15 = sphi %s1787_s15, %s2102_s15   ;;  %s1746_s14 = sphi %s1785_s14, %s2101_s14   ;;  %s1742_s13 = sphi %s1783_s13, %s2100_s13   ;;  %s1738_s12 = sphi %s1781_s12, %s2099_s12  }
   0x4   : > { %p23_p0 = scmp.ge.s32.totalorder %s22_s17, 4  ;;  %p1448_p1 = scmp.ge.s32.totalorder %s1754_s16, 1 }
   0x5   : > { %p159_p2 = scmp.lt.s32.totalorder %s1754_s16, 9 }
   0x6   : > { %s2104_s17 = smov (%p23_p0, %s22_s17), 0  ;;  %s2106_s18 = smov (!%p23_p0, %s25_s18), %s1750_s15 }
   0x7   : > { %p160_p3 = pnand %p1448_p1, %p159_p2  ;;  %p27_p4 = scmp.ge.s32.totalorder %s2106_s18, 2 }
   0x8   : > { %s1449_s19 = sshll.u32 (!%p160_p3), %s1738_s12, 1  ;;  %s1451_s20 = sshll.u32 (!%p160_p3), %s1742_s13, 1 }
   0x9   : > { %s2108_s18 = smov (%p27_p4, %s2106_s18), 0  ;;  %163 = sbr.rel (%p160_p3) target bundleno = 418 (0x1a2), region = 32 }
   0xa   : > { %s190_s21 = sadd.s32 (!%p160_p3), %s1742_s13, %s1449_s19  ;;  %p199_p5 = scmp.lt.s32.totalorder (!%p160_p3), %s1738_s12, 3 }
   0xb   : > { %p191_p6 = scmp.lt.s32.totalorder (!%p160_p3), %s190_s21, 7  ;;  %p201_p7 = scmp.lt.s32.totalorder (!%p160_p3), %s1451_s20, 3 }
   0xc   : > { %p1454_p8 = scmp.ne.s32.totalorder (!%p160_p3), %s1738_s12, 0 }
  0x10   : > { %s200_s22 = scalar_select %p199_p5, %s1738_s12, 3 }
  0x11   : > { %s2110_s21 = smov (!%p191_p6, %s190_s21), 7  ;;  %s2112_s20 = smov (!%p201_p7, %s1451_s20), 3 }
  0x12   : > { %s1622_s23 = smul.u32 24, %s2110_s21  ;;  %s1452_s24 = sshll.u32 %s200_s22, 2  ;;  %vm213_vm0 = vcmask (!%p1454_p8), 523264   ;;  %v1756_v0 = vmov (!%p1454_p8), 0.0  }
  0x13   : > { %s204_s25 = sadd.s32 %s1452_s24, %s2112_s20  ;;  %212 = sbr.rel (%p1454_p8) target bundleno = 26 (0x1a), region = 36  ;;  %214 = vst.msk [vmem:[#allocation2] sm:$0xff] (!%p1454_p8), %vm213_vm0, %v1756_v0  ;;  %215 = vst.msk [vmem:[#allocation2 + $0x8] sm:$0xff] (!%p1454_p8), %vm213_vm0, %v1756_v0 }
  0x14   : > { %s1819_s28 = scalar_lea.vmem %s2089_s0, %s1622_s23  ;;  %s1453_s29 = sshll.u32 %s204_s25, 2 }
  0x15   : > { %s1824_s5 = scalar_lea.vmem %s2092_s3, %s1453_s29 }
  0x1a PF: > { %v713_v1 = vlaneseq  ;;  %v1757_v2 = vmov 1983009808   ;;  %v1710_v5 = vld.sshfl [vmem:[%s1819_s28 + $0x4] sm:$0xf pattern:$0x76325410] }
  0x1b   : > { %v711_v3 = vunpack.c.l.s4 %v1757_v2  ;;  %v1711_v6 = vld.sshfl [vmem:[%s1819_s28 + $0xc] sm:$0xf pattern:$0x76325410]  ;;  %vm260_vm1 = vsmask.f32 1280 }
  0x1c   : > { %v714_v4 = vshrl.u32 %v713_v1, 7  ;;  %vm261_vm2 = vsmask.f32 3336  ;;  %vm263_vm3 = vsmask.f32 5392  ;;  %vm363_vm7 = vcmask 1040384  }
  0x1d   : > { %v712_v7 = vunpack.c.0.s8 %v711_v3  ;;  %vm262_vm4 = vmor %vm260_vm1, %vm261_vm2  ;;  %vm265_vm5 = vsmask.f32 7448  ;;  %v1499_v8 = vld.sshfl [vmem:[%s1819_s28 + $0x8] sm:$0x13 pattern:$0x76325410]  ;;  %v781_v31 = vcombine.low %v1710_v5, %v1711_v6 }
  0x1e   : > { %v1500_v9 = vld.sshfl [vmem:[%s1819_s28 + $0xc] sm:$0x13 pattern:$0x76325410]  ;;  %v567_v10 = vcombine.high %v1499_v8, %v1499_v8  ;;  %v593_v11 = vshrl.u32 %v1499_v8, 16  ;;  %v596_v12 = vshll.u32 %v1499_v8, 16  ;;  %vm1834_vm6 = vmor %vm262_vm4, %vm263_vm3 }
  0x1f   : > { %v1831_v13 = vsub.s32 %v712_v7, %v714_v4  ;;  %v1501_v14 = vld.sshfl [vmem:[%s1819_s28 + $0x10] sm:$0x13 pattern:$0x76325410]  ;;  %v575_v15 = vcombine.high %v1500_v9, %v1500_v9  ;;  %v607_v16 = vshrl.u32 %v1500_v9, 16  ;;  %v610_v17 = vshll.u32 %v1500_v9, 16  ;;  %vm1848_vm9 = vmor %vm1834_vm6, %vm265_vm5 }
  0x20   : > { %v1502_v19 = vld.sshfl [vmem:[%s1819_s28 + $0x14] sm:$0x13 pattern:$0x76325410]  ;;  %v583_v20 = vcombine.high %v1501_v14, %v1501_v14  ;;  %v595_v21 = vrot.slane %v593_v11, 6  ;;  %v598_v22 = vrot.slane %v596_v12, 7 }
  0x21   : > { %vm364_vm8 = vcmask 1042434   ;;  %v591_v23 = vcombine.high %v1502_v19, %v1502_v19  ;;  %v602_v24 = vshll.u32 %v567_v10, 16  ;;  %v1670_v25 = vld [vmem:[%s2090_s1 + $0x40] sm:$0xff]   ;;  %v609_v27 = vrot.slane %v607_v16, 6  ;;  %v1672_v37 = vld [vmem:[%s2090_s1 + $0x48] sm:$0xff]   ;;  %s1758_s19 = smov 64  }
  0x22   : > { %v599_v26 = vor.u32 %v598_v22, %v595_v21  ;;  %v612_v28 = vrot.slane %v610_v17, 7  ;;  %v616_v29 = vshll.u32 %v575_v15, 16  ;;  %v1671_v30 = vld [vmem:[%s2090_s1] sm:$0xff]   ;;  %v621_v34 = vshrl.u32 %v1501_v14, 16  ;;  %1561 = vmatprep.subr.bf16.mxu0 %v1670_v25  ;;  %v1673_v42 = vld [vmem:[%s2090_s1 + $0x8] sm:$0xff]   ;;  %782 = vrot.lane.b32.xlu0 %v781_v31, %s1758_s19  ;;  %vm365_vm10 = vmor %vm363_vm7, %vm364_vm8 }
  0x23   : > { %v604_v33 = vrot.slane %v602_v24, 7  ;;  %v624_v35 = vshll.u32 %v1501_v14, 16  ;;  %v1455_v36 = vld.sshfl [vmem:[%s1819_s28] sm:$0x13 pattern:$0x76325410]  ;;  %1562 = vmatpush3.bf16.msra.mxu0 %v1671_v30 }
  0x24   : > { %v600_v38 = vrot.slane %v599_v26, 2  ;;  %v613_v39 = vor.u32 %v612_v28, %v609_v27  ;;  %v618_v40 = vrot.slane %v616_v29, 7  ;;  %v630_v41 = vshll.u32 %v583_v20, 16  ;;  %1563 = vmatprep.subr.bf16.mxu0 %v1672_v37  ;;  %v1674_v51 = vld [vmem:[%s2090_s1 + $0xc0] sm:$0xff]  }
  0x25   : > { %v623_v43 = vrot.slane %v621_v34, 6  ;;  %v626_v44 = vrot.slane %v624_v35, 7  ;;  %v635_v45 = vshrl.u32 %v1502_v19, 16  ;;  %v638_v46 = vshll.u32 %v1502_v19, 16  ;;  %1583 = vmatprep.subr.bf16.mxu1 %v1674_v51  ;;  %v1675_v34 = vld [vmem:[%s2090_s1 + $0x80] sm:$0xff]   ;;  %v1678_v51 = vld [vmem:[%s2090_s1 + $0xc8] sm:$0xff]  }
  0x26   : > { %v1862_v47 = vsel %vm1848_vm9, %v600_v38, %v604_v33  ;;  %v614_v48 = vrot.slane %v613_v39, 2  ;;  %v632_v49 = vrot.slane %v630_v41, 7  ;;  %v644_v50 = vshll.u32 %v591_v23, 16  ;;  %v1676_v39 = vld [vmem:[%s2090_s1 + $0x50] sm:$0xff]   ;;  %1584 = vmatpush3.bf16.msra.mxu1 %v1675_v34 }
  0x27   : > { %v627_v52 = vor.u32 %v626_v44, %v623_v43  ;;  %v637_v53 = vrot.slane %v635_v45, 6  ;;  %v640_v54 = vrot.slane %v638_v46, 7  ;;  %v1456_v55 = vld.sshfl [vmem:[%s1819_s28 + $0x4] sm:$0x13 pattern:$0x76325410]  ;;  %v235_v56 = vcombine.high %v1455_v36, %v1455_v36  ;;  %1564 = vmatpush3.bf16.msra.mxu0 %v1673_v42  ;;  %1585 = vmatprep.subr.bf16.mxu1 %v1678_v51 }
  0x28   : > { %v1870_v57 = vsel %vm1848_vm9, %v614_v48, %v618_v40  ;;  %v646_v58 = vrot.slane %v644_v50, 7  ;;  %v243_v59 = vcombine.high %v1456_v55, %v1456_v55  ;;  %v268_v60 = vshrl.u32 %v1455_v36, 16  ;;  %v1483_v1 = vld.sshfl [vmem:[%s1819_s28 + $0x4] sm:$0x12 pattern:$0x76325410]  ;;  %1565 = vmatprep.subr.bf16.mxu0 %v1676_v39 }
  0x29   : > { %v628_v61 = vrot.slane %v627_v52, 2  ;;  %v641_v62 = vor.u32 %v640_v54, %v637_v53  ;;  %v841_v63 = vcombine.low %v1862_v47, %v1870_v57  ;;  %v271_v0 = vshll.u32 %v1455_v36, 16  ;;  %v1484_v6 = vld.sshfl [vmem:[%s1819_s28 + $0x8] sm:$0x12 pattern:$0x76325410] }
  0x2a   : > { %v270_v2 = vrot.slane %v268_v60, 6  ;;  %v277_v3 = vshll.u32 %v235_v56, 16  ;;  %v282_v4 = vshrl.u32 %v1456_v55, 16  ;;  %v285_v5 = vshll.u32 %v1456_v55, 16  ;;  %v1677_v44 = vld [vmem:[%s2090_s1 + $0x10] sm:$0xff]   ;;  %v1679_v55 = vld [vmem:[%s2090_s1 + $0x88] sm:$0xff]  }
  0x2b   : > { %v1878_v7 = vsel %vm1848_vm9, %v628_v61, %v632_v49  ;;  %v642_v8 = vrot.slane %v641_v62, 2  ;;  %v1881_v9 = vrot.slane %v841_v63, %v1831_v13  ;;  %v273_v10 = vrot.slane %v271_v0, 7  ;;  %v1485_v11 = vld.sshfl [vmem:[%s1819_s28 + $0xc] sm:$0x12 pattern:$0x76325410]  ;;  %1566 = vmatpush3.bf16.msra.mxu0 %v1677_v44  ;;  %1586 = vmatpush3.bf16.msra.mxu1 %v1679_v55 }
  0x2c   : > { %v279_v12 = vrot.slane %v277_v3, 7  ;;  %v284_v14 = vrot.slane %v282_v4, 6  ;;  %v287_v15 = vrot.slane %v285_v5, 7  ;;  %v291_v16 = vshll.u32 %v243_v59, 16  ;;  %v1680_v60 = vld [vmem:[%s2090_s1 + $0x58] sm:$0xff]   ;;  %v1682_v3 = vld [vmem:[%s2090_s1 + $0xd0] sm:$0xff]  }
  0x2d   : > { %v647_v17 = vsel %vm1848_vm9, %v642_v8, %v646_v58  ;;  %v274_v18 = vor.u32 %v273_v10, %v270_v2  ;;  %vm366_vm11 = vcmask 1044484   ;;  %vm368_vm12 = vcmask 1046534   ;;  %v1486_v19 = vld.sshfl [vmem:[%s1819_s28 + $0x10] sm:$0x12 pattern:$0x76325410]  ;;  %1567 = vmatprep.subr.bf16.mxu0 %v1680_v60  ;;  %1587 = vmatprep.subr.bf16.mxu1 %v1682_v3 }
  0x2e   : > { %v842_v20 = vcombine.low %v1878_v7, %v647_v17  ;;  %v288_v21 = vor.u32 %v287_v15, %v284_v14  ;;  %v293_v22 = vrot.slane %v291_v16, 7  ;;  %vm367_vm13 = vmor %vm365_vm10, %vm366_vm11  ;;  %v506_v23 = vcombine.high %v1483_v1, %v1483_v1  ;;  %v1681_v0 = vld [vmem:[%s2090_s1 + $0x18] sm:$0xff]   ;;  %v1683_v5 = vld [vmem:[%s2090_s1 + $0x90] sm:$0xff]  }
  0x2f   : > { %v275_v24 = vrot.slane %v274_v18, 2  ;;  %vm1890_vm14 = vmor %vm367_vm13, %vm368_vm12  ;;  %v514_v26 = vcombine.high %v1484_v6, %v1484_v6  ;;  %v522_v27 = vcombine.high %v1485_v11, %v1485_v11  ;;  %v530_v28 = vcombine.high %v1486_v19, %v1486_v19  ;;  %1568 = vmatpush3.bf16.msra.mxu0 %v1681_v0  ;;  %v1684_v8 = vld [vmem:[%s2090_s1 + $0x60] sm:$0xff]   ;;  %1588 = vmatpush3.bf16.msra.mxu1 %v1683_v5  ;;  %v1688_v14 = vld [vmem:[%s2090_s1 + $0x68] sm:$0xff]  }
  0x30   : > { %v856_v29 = vrot.slane %v842_v20, %v1831_v13  ;;  %v289_v30 = vrot.slane %v288_v21, 2  ;;  %v1487_v31 = vrot.slane %v1483_v1, 9  ;;  %v533_v33 = vrot.slane %v506_v23, 7  ;;  %v1685_v10 = vld [vmem:[%s2090_s1 + $0x20] sm:$0xff]   ;;  %1569 = vmatprep.subr.bf16.mxu0 %v1684_v8  ;;  %v1689_v15 = vld [vmem:[%s2090_s1 + $0x28] sm:$0xff]   ;;  %v1692_v18 = vld [vmem:[%s2090_s1 + $0x70] sm:$0xff]  }
  0x31   : > { %v280_v35 = vsel %vm1848_vm9, %v275_v24, %v279_v12  ;;  %v1488_v36 = vrot.slane %v1484_v6, 9  ;;  %v537_v37 = vrot.slane %v514_v26, 7  ;;  %v1489_v38 = vrot.slane %v1485_v11, 9  ;;  %v1686_v11 = vld [vmem:[%s2090_s1 + $0xd8] sm:$0xff]   ;;  %v1690_v16 = vld [vmem:[%s2090_s1 + $0xe0] sm:$0xff]   ;;  %v1694_v20 = vld [vmem:[%s2090_s1 + $0xe8] sm:$0xff]  }
  0x32   : > { %v857_v40 = vcombine.low %v1881_v9, %v856_v29  ;;  %v1906_v41 = vsel %vm1848_vm9, %v289_v30, %v293_v22  ;;  %v1910_v42 = vsel %vm1890_vm14, %v1487_v31, %v533_v33  ;;  %v541_v43 = vrot.slane %v522_v27, 7  ;;  %v1687_v12 = vld [vmem:[%s2090_s1 + $0x98] sm:$0xff]   ;;  %1589 = vmatprep.subr.bf16.mxu1 %v1686_v11  ;;  %v1691_v17 = vld [vmem:[%s2090_s1 + $0xa0] sm:$0xff]   ;;  %v1695_v21 = vld [vmem:[%s2090_s1 + $0xa8] sm:$0xff]  }
  0x33   : > { %v725_v45 = vcombine.low %v280_v35, %v1906_v41  ;;  %v538_v46 = vsel %vm1890_vm14, %v1488_v36, %v537_v37  ;;  %v1490_v48 = vrot.slane %v1486_v19, 9  ;;  %v545_v49 = vrot.slane %v530_v28, 7  ;;  %1570 = vmatpush3.bf16.msra.mxu0 %v1685_v10  ;;  %1590 = vmatpush3.bf16.msra.mxu1 %v1687_v12  ;;  %v1693_v19 = vld [vmem:[%s2090_s1 + $0x30] sm:$0xff]   ;;  %v1696_v22 = vld [vmem:[%s2090_s1 + $0x78] sm:$0xff]   ;;  %v1515_v10 = vld [vmem:[%s2091_s2] ss:$0 sm:$0xff] }
  0x34   : > { %858 = vrot.lane.b32.xlu1 %v857_v40, %s1758_s19  ;;  %v542_v32 = vsel %vm1890_vm14, %v1489_v38, %v541_v43  ;;  %v801_v50 = vcombine.low %v1910_v42, %v538_v46  ;;  %v784_v52 = vcombine.low %v1906_v41, %v1862_v47  ;;  %v785_v61 = vcombine.low %v1870_v57, %v1878_v7  ;;  %v1697_v23 = vld [vmem:[%s2090_s1 + $0x38] sm:$0xff]   ;;  %v1459_v24 = vld.sshfl [vmem:[%s1819_s28] sm:$0x12 pattern:$0x76325410]  ;;  %v1698_v28 = vld [vmem:[%s2090_s1 + $0xf0] sm:$0xff]  }
  0x35   : > { %v733_v53 = vrot.slane %v725_v45, %v1831_v13  ;;  %v1930_v54 = vsel %vm1890_vm14, %v1490_v48, %v545_v49  ;;  %v745_v56 = vcombine.low %v538_v46, %v542_v32  ;;  %1571 = vmatprep.subr.bf16.mxu0 %v1688_v14  ;;  %1591 = vmatprep.subr.bf16.mxu1 %v1690_v16  ;;  %v1463_v27 = vrot.slane %v1459_v24, 9  ;;  %v1699_v29 = vld [vmem:[%s2090_s1 + $0xb0] sm:$0xff]   ;;  %v1702_v33 = vld [vmem:[%s2090_s1 + $0xf8] sm:$0xff]  }
  0x36   : > { %v802_v58 = vcombine.low %v542_v32, %v1930_v54  ;;  %v809_v59 = vrot.slane %v801_v50, %v1831_v13  ;;  %v1943_v62 = vrot.slane %v784_v52, %v1831_v13  ;;  %v1957_v4 = vrot.slane %v785_v61, %v1831_v13  ;;  %v1704_v36 = vld [vmem:[%s2090_s1 + $0xb8] sm:$0xff]   ;;  %v1510_v39 = vld.sshfl [vmem:[%s1819_s28 + $0x14] sm:$0x12 pattern:$0x76325410]  ;;  %v1707_v61 = vld [vmem:[%s2090_s1 + $0x108] sm:$0xff]  }
  0x37   : > { %v741_v63 = vcombine.low %v733_v53, %v1881_v9  ;;  %v1950_v1 = vrot.slane %v745_v56, %v1831_v13  ;;  %1572 = vmatpush3.bf16.msra.mxu0 %v1689_v15  ;;  %1592 = vmatpush3.bf16.msra.mxu1 %v1691_v17  ;;  %v338_v26 = vcombine.high %v1459_v24, %v1459_v24  ;;  %v1759_v30 = vmov 0.0   ;;  %v1712_v50 = vld.sshfl [vmem:[%s1819_s28 + $0x8] sm:$0xf pattern:$0x76325410]  ;;  %v1708_v0 = vld [vmem:[%s2090_s1 + $0x110] sm:$0xff]  }
  0x38   : > { %v816_v2 = vrot.slane %v802_v58, %v1831_v13  ;;  %v800_v9 = vcombine.low %v1943_v62, %v1957_v4  ;;  %1573 = vmatprep.subr.bf16.mxu0 %v1692_v18  ;;  %1593 = vmatprep.subr.bf16.mxu1 %v1694_v20  ;;  %v687_v40 = vcombine.high %v1510_v39, %v1510_v39  ;;  %v1514_v43 = vrot.slane %v1510_v39, 9  ;;  %v1713_v51 = vld.sshfl [vmem:[%s1819_s28 + $0x10] sm:$0xf pattern:$0x76325410] }
  0x39   : > { %742 = vrot.lane.b32.xlu0 %v741_v63, %s1758_s19  ;;  %v372_v31 = vrot.slane %v338_v26, 7  ;;  %vm877_vm15 = vcmask 523264   ;;  %v1714_v52 = vld.sshfl [vmem:[%s1819_s28] sm:$0xf pattern:$0x76325410]  ;;  %v840_v55 = vcombine.low %v1712_v50, %v1713_v51  ;;  %v1333_v62 = vunpack.c.l.bf16 %v1906_v41 }
  0x3a   : > { %v817_v6 = vcombine.low %v809_v59, %v816_v2  ;;  %v702_v44 = vrot.slane %v687_v40, 7  ;;  %v1715_v53 = vld.sshfl [vmem:[%s1819_s28 + $0x8] sm:$0xf pattern:$0x76325410]  ;;  %vm1760_vm0 = vmmov 0   ;;  %v1334_v2 = vunpack.c.l.bf16 %v1862_v47 }
  0x3b   : > { %1574 = vmatpush3.bf16.msra.mxu0 %v1693_v19  ;;  %1594 = vmatpush3.bf16.msra.mxu1 %v1695_v21  ;;  %v373_v34 = vsel %vm1890_vm14, %v1463_v27, %v372_v31  ;;  %v724_v58 = vcombine.low %v1714_v52, %v1715_v53  ;;  %v1335_v3 = vunpack.c.l.bf16 %v1870_v57  ;;  %v1336_v4 = vunpack.c.l.bf16 %v1878_v7 }
  0x3c   : > { %818 = vrot.lane.b32.xlu1 %v817_v6, %s1758_s19  ;;  %1575 = vmatprep.subr.bf16.mxu0 %v1696_v22  ;;  %v744_v35 = vcombine.low %v373_v34, %v1910_v42  ;;  %v703_v42 = vsel %vm1890_vm14, %v1514_v43, %v702_v44  ;;  %v1341_v5 = vcombine.low %v1333_v62, %v1334_v2  ;;  %vm1355_vm3 = vcmask 519168  }
  0x3d   : > { %1595 = vmatprep.subr.bf16.mxu1 %v1698_v28  ;;  %v861_v45 = vcombine.low %v1930_v54, %v703_v42  ;;  %v1342_v6 = vcombine.low %v1335_v3, %v1336_v4  ;;  %v1316_v28 = vld [vmem:[#allocation2 + $0x8] sm:$0xff] }
  0x3e   : > { %v752_v37 = vrot.slane %v744_v35, %v1831_v13 }
  0x3f   : > { %1576 = vmatpush3.bf16.msra.mxu0 %v1697_v23  ;;  %1596 = vmatpush3.bf16.msra.mxu1 %v1699_v29  ;;  %v875_v46 = vrot.slane %v861_v45, %v1831_v13  ;;  %v1703_v13 = vld [vmem:[%s2090_s1 + $0x100] sm:$0xff]  }
  0x40   : > { %1610 = vmatprep.subr.bf16.mxu0 %v1759_v30  ;;  %1597 = vmatprep.subr.bf16.mxu1 %v1702_v33  ;;  %v760_v38 = vcombine.low %v752_v37, %v1950_v1  ;;  %v1315_v23 = vld [vmem:[#allocation2] sm:$0xff] }
  0x41   : > { %v876_v48 = vcombine.low %v1950_v1, %v875_v46  ;;  %v1709_v1 = vld [vmem:[%s2090_s1 + $0x118] sm:$0xff]  }
  0x43   : > { %1598 = vmatpush3.bf16.msra.mxu1 %v1704_v36 }
  0x94   : > { %v783_v49 = vpop.permute.xlu0 %782 }
  0x95   : > { %v884_v32 = vsel %vm877_vm15, %v760_v38, %v783_v49 }
  0x96   : > { %1224 = vmatprep.mubr.bf16.mxu0 %v884_v32 }
  0xa6   : > { %v859_v56 = vpop.permute.xlu1 %858 }
  0xa7   : > { %v892_v25 = vsel %vm877_vm15, %v840_v55, %v859_v56 }
  0xa8   : > { %1265 = vmatprep.mubr.bf16.mxu1 %v892_v25 }
  0xab   : > { %v743_v54 = vpop.permute.xlu0 %742 }
  0xac   : > { %v880_v59 = vsel %vm877_vm15, %v724_v58, %v743_v54 }
  0xad   : > { %1225 = vmatmul.mubr.bf16.vlgmr.msra.gmra.mrb[0].mxu0 %v880_v59 }
  0xae   : > { %1611 = vmatpush3.bf16.msra.mxu0 %v1703_v13  ;;  %v819_v60 = vpop.permute.xlu1 %818  ;;  %1618 = vmatprep.mubr.msk.bf16.mxu0 %vm1760_vm0, %v1759_v30 }
  0xaf   : > { %1612 = vmatprep.subr.bf16.mxu0 %v1759_v30  ;;  %v888_v63 = vsel %vm877_vm15, %v800_v9, %v819_v60 }
  0xb0   : > { %1266 = vmatmul.mubr.bf16.vlgmr.msra.gmra.mrb[0].mxu1 %v888_v63 }
  0xb2   : > { %1613 = vmatpush3.bf16.msra.mxu0 %v1707_v61 }
  0xb3   : > { %1614 = vmatprep.subr.bf16.mxu0 %v1759_v30 }
  0xb6   : > { %1615 = vmatpush3.bf16.msra.mxu0 %v1708_v0 }
  0xb7   : > { %1616 = vmatprep.subr.bf16.mxu0 %v1759_v30 }
  0xba   : > { %1617 = vmatpush3.bf16.msra.mxu0 %v1709_v1 }
  0xbd   : > { %1619 = vmatmul.mubr.msk.bf16.vlgmr.msra.gmra.mrb[4].mxu0 %vm877_vm15, %v876_v48 }
 0x180   : > { %v1577_v8 = vpop.f32.mrb[0].mxu0 }
 0x181   : > { %v1578_v9 = vpop.f32.mrb[1].mxu0 }
 0x182   : > { %v1579_v11 = vadd.f32 %v1578_v9, %v1577_v8  ;;  %v1580_v12 = vpop.f32.mrb[2].mxu0 }
 0x183   : > { %v1581_v14 = vpop.f32.mrb[3].mxu0  ;;  %v1599_v15 = vpop.f32.mrb[0].mxu1 }
 0x184   : > { %v1582_v16 = vadd.f32 %v1581_v14, %v1580_v12  ;;  %v1600_v41 = vpop.f32.mrb[1].mxu1  ;;  %v1227_v17 = vadd.f32 %v1579_v11, %v1515_v10 }
 0x185   : > { %v1601_v47 = vadd.f32 %v1600_v41, %v1599_v15  ;;  %v1602_v18 = vpop.f32.mrb[2].mxu1 }
 0x186   : > { %v1603_v57 = vpop.f32.mrb[3].mxu1  ;;  %v1230_v19 = vadd.f32 %v1582_v16, %v1515_v10 }
 0x187   : > { %v1604_v7 = vadd.f32 %v1603_v57, %v1602_v18  ;;  %v1268_v20 = vadd.f32 %v1601_v47, %v1227_v17 }
 0x189   : > { %v1271_v21 = vadd.f32 %v1604_v7, %v1230_v19 }
 0x190   : > { %v1308_v22 = vpop.f32.mrb[4].mxu0 }
 0x191   : > { %v1309_v24 = vadd.f32 %v1308_v22, %v1268_v20  ;;  %v1620_v26 = vpop.f32.mrb[5].mxu0 }
 0x192   : > { %v1311_v27 = vpop.f32.mrb[6].mxu0 }
 0x193   : > { %v1317_v29 = vsub.f32 %v1309_v24, %v1315_v23  ;;  %v1312_v31 = vadd.f32 %v1311_v27, %v1271_v21  ;;  %v1621_v33 = vpop.f32.mrb[7].mxu0 }
 0x195   : > { %v1319_v34 = vmul.f32 0.5, %v1317_v29  ;;  %v1318_v35 = vsub.f32 %v1312_v31, %v1316_v28 }
 0x197   : > { %v1321_v36 = vadd.f32 %v1319_v34, %v1315_v23  ;;  %v1320_v37 = vmul.f32 0.5, %v1318_v35 }
 0x199   : > { %vm1323_vm1 = vcmp.ge.f32.partialorder %v1321_v36, 1.0  ;;  %v1322_v38 = vadd.f32 %v1320_v37, %v1316_v28 }
 0x19a   : > { %v1325_v39 = vsel %vm1323_vm1, 0.0, %v1321_v36  ;;  %v1553_v40 = vsel %vm1323_vm1, 1.0, %v1759_v30 }
 0x19b   : > { %1327 = vst.msk [vmem:[#allocation2] sm:$0xff] %vm877_vm15, %v1325_v39  ;;  %v1345_v43 = vadd.f32 %v1553_v40, %v1341_v5  ;;  %vm1324_vm2 = vcmp.ge.f32.partialorder %v1322_v38, 1.0 }
 0x19c   : > { %v1326_v44 = vsel %vm1324_vm2, 0.0, %v1322_v38  ;;  %v1554_v42 = vsel %vm1324_vm2, 1.0, %v1759_v30 }
 0x19d   : > { %v1559_v45 = vpack.c.bf16 %v1345_v43, %v1345_v43  ;;  %1328 = vst.msk [vmem:[#allocation2 + $0x8] sm:$0xff] %vm877_vm15, %v1326_v44  ;;  %v1346_v46 = vadd.f32 %v1554_v42, %v1342_v6 }
 0x19f   : > { %1356 = vst.msk [vmem:[%s1824_s5] sm:$0xf] %vm1355_vm3, %v1559_v45  ;;  %v1560_v48 = vpack.c.bf16 %v1346_v46, %v1346_v46 }
 0x1a1   : > { %1357 = vst.msk [vmem:[%s1824_s5 + $0x4] sm:$0xf] %vm1355_vm3, %v1560_v48 }
 0x1a2 PF: > { %s13_s16 = sadd.s32 1, %s1754_s16   ;;  %s2099_s12 = smov %s1746_s14 }
 0x1a3   : > { %p10_p9 = scmp.ge.s32.totalorder %s13_s16, 10   ;;  %s2100_s13 = smov %s1750_s15 }
 0x1a4   : > { %s2101_s14 = smov %s2104_s17  ;;  %s2102_s15 = smov %s2108_s18 }
 0x1a5   :  { %12 = sbr.rel (!%p10_p9) target bundleno = 3 (0x3), region = 68 }

// kernel: spikformer_block_forward.7
= control target key start
LH: loop header
LB: loop body
LE: loop exit
PB: predicated region body
PF: predicated region fallthrough
CT: control target
= control target key end

     0   :  { %s2340_s12 = smov 0   ;;  %s2342_s13 = smov 0   ;;  %s3064_s0 = inlined_call_operand.vmem [shape: bf16[8,10,10,32], index: 0, kind: input, shape index: {}]   ;;  %s3065_s1 = inlined_call_operand.vmem [shape: bf16[288,64], index: 1, kind: input, shape index: {}]   ;;  %s3066_s2 = inlined_call_operand.vmem [shape: f32[1,64], index: 2, kind: input, shape index: {}]   ;;  %s3067_s3 = inlined_call_operand.vmem [shape: bf16[8,4,4,64], index: 3, kind: output, shape index: {}]  }
   0x1   :  { %s2344_s14 = smov 0   ;;  %s2346_s15 = smov 0  }
   0x2   :  { %s2348_s16 = smov 0  }
   0x3 LB: > { %s22_s17 = sadd.s32 1, %s2304_s14  ;;  %s25_s18 = sadd.s32 1, %s2308_s15  ;;  %s2312_s16 = sphi %s2348_s16, %s13_s16   ;;  %s2308_s15 = sphi %s2346_s15, %s3081_s15   ;;  %s2304_s14 = sphi %s2344_s14, %s3080_s14   ;;  %s2300_s13 = sphi %s2342_s13, %s3079_s13   ;;  %s2296_s12 = sphi %s2340_s12, %s3078_s12  }
   0x4   : > { %p23_p0 = scmp.ge.s32.totalorder %s22_s17, 4  ;;  %p1974_p1 = scmp.ge.s32.totalorder %s2312_s16, 1 }
   0x5   : > { %p161_p2 = scmp.lt.s32.totalorder %s2312_s16, 9 }
   0x6   : > { %s3083_s17 = smov (%p23_p0, %s22_s17), 0  ;;  %s3085_s18 = smov (!%p23_p0, %s25_s18), %s2308_s15 }
   0x7   : > { %p162_p3 = pnand %p1974_p1, %p161_p2  ;;  %p27_p4 = scmp.ge.s32.totalorder %s3085_s18, 2 }
   0x8   : > { %s1975_s19 = sshll.u32 (!%p162_p3), %s2296_s12, 1  ;;  %p1980_p6 = scmp.ne.s32.totalorder (!%p162_p3), %s2296_s12, 0 }
   0x9   : > { %s3087_s18 = smov (%p27_p4, %s3085_s18), 0  ;;  %165 = sbr.rel (%p162_p3) target bundleno = 481 (0x1e1), region = 32 }
   0xa   : > { %s190_s20 = sadd.s32 (!%p162_p3), %s2300_s13, %s1975_s19 }
   0xb   : > { %p191_p5 = scmp.lt.s32.totalorder (!%p162_p3), %s190_s20, 7 }
  0x10   : > { %s3089_s20 = smov (!%p191_p5, %s190_s20), 7  ;;  %211 = sbr.rel (%p1980_p6) target bundleno = 23 (0x17), region = 36 }
  0x11   : > { %s2197_s21 = smul.u32 80, %s3089_s20  ;;  %s2122_s22 = sshll.u32 %s3089_s20, 3  ;;  %vm212_vm0 = vcmask (!%p1980_p6), 523264   ;;  %v2314_v0 = vmov (!%p1980_p6), 0.0  }
  0x12   : > { %s2373_s25 = scalar_lea.vmem %s3067_s3, %s2122_s22  ;;  %213 = vst.msk [vmem:[#allocation2] sm:$0xff] (!%p1980_p6), %vm212_vm0, %v2314_v0  ;;  %214 = vst.msk [vmem:[#allocation2 + $0x8] sm:$0xff] (!%p1980_p6), %vm212_vm0, %v2314_v0 }
  0x13   : > { %s2378_s28 = scalar_lea.vmem %s3064_s0, %s2197_s21  ;;  %215 = vst.msk [vmem:[#allocation2 + $0x10] sm:$0xff] (!%p1980_p6), %vm212_vm0, %v2314_v0  ;;  %216 = vst.msk [vmem:[#allocation2 + $0x18] sm:$0xff] (!%p1980_p6), %vm212_vm0, %v2314_v0 }
  0x14   : > { %217 = vst.msk [vmem:[#allocation2 + $0x20] sm:$0xff] (!%p1980_p6), %vm212_vm0, %v2314_v0  ;;  %218 = vst.msk [vmem:[#allocation2 + $0x28] sm:$0xff] (!%p1980_p6), %vm212_vm0, %v2314_v0 }
  0x15   : > { %219 = vst.msk [vmem:[#allocation2 + $0x30] sm:$0xff] (!%p1980_p6), %vm212_vm0, %v2314_v0  ;;  %220 = vst.msk [vmem:[#allocation2 + $0x38] sm:$0xff] (!%p1980_p6), %vm212_vm0, %v2314_v0 }
  0x17 PF: > { %v2021_v1 = vld [vmem:[%s2378_s28 + $0x10] sm:$0xf]  ;;  %v2022_v2 = vld [vmem:[%s2378_s28 + $0x18] sm:$0xf]  ;;  %vm376_vm1 = vcmask 1042432   ;;  %vm377_vm2 = vcmask 1046532  }
  0x18   : > { %v628_v3 = vshrl.u32 %v2022_v2, 16  ;;  %v631_v4 = vshll.u32 %v2022_v2, 16  ;;  %v2077_v5 = vcombine.low %v2021_v1, %v2022_v2  ;;  %v614_v6 = vshrl.u32 %v2021_v1, 16  ;;  %v1997_v7 = vld [vmem:[%s2378_s28 + $0xc] sm:$0x1]  ;;  %s2315_s29 = smov 64   ;;  %vm2386_vm3 = vmor %vm376_vm1, %vm377_vm2 }
  0x19   : > { %v617_v8 = vshll.u32 %v2021_v1, 16  ;;  %v1998_v9 = vld [vmem:[%s2378_s28 + $0x14] sm:$0x1]  ;;  %v438_v10 = vshll.u32 %v1997_v7, 16  ;;  %v566_v11 = vrot.slane %v1997_v7, 5  ;;  %s2316_s30 = smov 32  }
  0x1a   : > { %v630_v12 = vrot.slane %v628_v3, 4  ;;  %v633_v13 = vrot.slane %v631_v4, 5  ;;  %921 = vrot.lane.b32.xlu1 %v2077_v5, %s2315_s29  ;;  %v616_v14 = vrot.slane %v614_v6, 4  ;;  %v452_v16 = vshll.u32 %v1998_v9, 16  ;;  %v2005_v17 = vld [vmem:[%s2378_s28 + $0x8] sm:$0xe] }
  0x1b   : > { %v619_v18 = vrot.slane %v617_v8, 5  ;;  %v2006_v19 = vld [vmem:[%s2378_s28 + $0x10] sm:$0xe]  ;;  %v2013_v20 = vrot.slane %v2005_v17, 9  ;;  %v570_v21 = vrot.slane %v1998_v9, 5  ;;  %v2392_v23 = vrot.slane %v438_v10, 5 }
  0x1c   : > { %v634_v22 = vor.u32 %v633_v13, %v630_v12  ;;  %v2014_v24 = vrot.slane %v2006_v19, 9  ;;  %v2395_v25 = vld [vmem:[%s2378_s28 + $0x4] sm:$0x1]  ;;  %v2398_v26 = vld [vmem:[%s2378_s28 + $0xc] sm:$0x1]  ;;  %v2406_v33 = vrot.slane %v452_v16, 5 }
  0x1d   : > { %v620_v27 = vor.u32 %v619_v18, %v616_v14  ;;  %v567_v28 = vsel %vm2386_vm3, %v2013_v20, %v566_v11  ;;  %v352_v29 = vld [vmem:[%s2378_s28] sm:$0xe]  ;;  %v353_v30 = vld [vmem:[%s2378_s28 + $0x8] sm:$0xe]  ;;  %v381_v31 = vrot.slane %v2395_v25, 5  ;;  %v385_v32 = vrot.slane %v2398_v26, 5 }
  0x1e   : > { %v571_v34 = vsel %vm2386_vm3, %v2014_v24, %v570_v21  ;;  %v1981_v35 = vrot.slane %v352_v29, 9  ;;  %v1982_v36 = vrot.slane %v353_v30, 9  ;;  %v2411_v37 = vld [vmem:[%s2378_s28 + $0x3c] sm:$0x1]  ;;  %v2413_v38 = vrot.slane %v634_v22, 4  ;;  %v2252_v54 = vld [vmem:[%s3065_s1 + $0x40] sm:$0xff]  }
  0x1f   : > { %v2415_v39 = vrot.slane %v620_v27, 4  ;;  %v2073_v40 = vcombine.low %v567_v28, %v571_v34  ;;  %v2418_v41 = vld [vmem:[%s2378_s28 + $0x44] sm:$0x1]  ;;  %v2011_v42 = vld [vmem:[%s2378_s28 + $0x38] sm:$0xe]  ;;  %v522_v45 = vshll.u32 %v2411_v37, 16  ;;  %2123 = vmatprep.subr.bf16.mxu0 %v2252_v54  ;;  %2181 = vmatprep.subr.bf16.mxu1 %v2252_v54 }
  0x20   : > { %v382_v43 = vsel %vm2386_vm3, %v1981_v35, %v381_v31  ;;  %v386_v44 = vsel %vm2386_vm3, %v1982_v36, %v385_v32  ;;  %v2012_v46 = vld [vmem:[%s2378_s28 + $0x40] sm:$0xe]  ;;  %v2019_v47 = vrot.slane %v2011_v42, 9  ;;  %v1989_v48 = vld [vmem:[%s2378_s28 + $0x8] sm:$0xf]  ;;  %v590_v50 = vrot.slane %v2411_v37, 5 }
  0x21   : > { %893 = vrot.lane.b32.xlu0 %v2073_v40, %s2316_s30  ;;  %v2061_v49 = vcombine.low %v382_v43, %v386_v44  ;;  %v2020_v51 = vrot.slane %v2012_v46, 9  ;;  %v594_v52 = vrot.slane %v2418_v41, 5  ;;  %v1990_v53 = vld [vmem:[%s2378_s28 + $0x10] sm:$0xf]  ;;  %v536_v55 = vshll.u32 %v2418_v41, 16  ;;  %v2253_v5 = vld [vmem:[%s3065_s1] sm:$0xff]  }
  0x22   : > { %v429_v56 = vshrl.u32 %v1989_v48, 16  ;;  %v432_v57 = vshll.u32 %v1989_v48, 16  ;;  %v443_v58 = vshrl.u32 %v1990_v53, 16  ;;  %v2437_v59 = vld [vmem:[%s2378_s28] sm:$0xf]  ;;  %v591_v60 = vsel %vm2386_vm3, %v2019_v47, %v590_v50  ;;  %v2254_v10 = vld [vmem:[%s3065_s1 + $0x48] sm:$0xff]   ;;  %2124 = vmatpush3.bf16.msra.mxu0 %v2253_v5  ;;  %2189 = vmatpush3.bf16.msra.mxu1 %v2253_v5 }
  0x23   : > { %833 = vrot.lane.b32.xlu1 %v2061_v49, %s2315_s29  ;;  %v595_v61 = vsel %vm2386_vm3, %v2020_v51, %v594_v52  ;;  %v2065_v62 = vcombine.low %v1989_v48, %v1990_v53  ;;  %v2445_v63 = vld [vmem:[%s2378_s28 + $0x8] sm:$0xf]  ;;  %vm237_vm4 = vsmask.f32 3328  ;;  %v446_v3 = vshll.u32 %v1990_v53, 16  ;;  %s2317_s12 = smov 96   ;;  %2125 = vmatprep.subr.bf16.mxu0 %v2254_v10 }
  0x24   : > { %v2076_v0 = vcombine.low %v591_v60, %v595_v61  ;;  %v431_v1 = vrot.slane %v429_v56, 4  ;;  %v434_v2 = vrot.slane %v432_v57, 5  ;;  %v2448_v4 = vld [vmem:[%s2378_s28 + $0x30] sm:$0xf]  ;;  %v2453_v6 = vrot.slane %v443_v58, 4  ;;  %v2255_v14 = vld [vmem:[%s3065_s1 + $0x8] sm:$0xff]   ;;  %2182 = vmatprep.subr.bf16.mxu1 %v2254_v10 }
  0x25   : > { %v241_v7 = vshrl.u32 %v2437_v59, 16  ;;  %v244_v8 = vshll.u32 %v2437_v59, 16  ;;  %v2458_v9 = vld [vmem:[%s2378_s28 + $0x38] sm:$0xf]  ;;  %vm238_vm5 = vsmask.f32 7440 }
  0x26   : > { %899 = vrot.lane.b32.xlu0 %v2076_v0, %s2316_s30  ;;  %v250_v11 = vshll.u32 %v2395_v25, 16  ;;  %v255_v12 = vshrl.u32 %v2445_v63, 16  ;;  %v258_v13 = vshll.u32 %v2445_v63, 16  ;;  %v264_v18 = vshll.u32 %v2398_v26, 16  ;;  %v2473_v19 = vld [vmem:[%s2378_s28 + $0x34] sm:$0x1]  ;;  %vm2489_vm6 = vmor %vm237_vm4, %vm238_vm5  ;;  %2126 = vmatpush3.bf16.msra.mxu0 %v2255_v14 }
  0x27   : > { %861 = vrot.lane.b32.xlu1 %v2065_v62, %s2317_s12  ;;  %v243_v16 = vrot.slane %v241_v7, 4  ;;  %v246_v17 = vrot.slane %v244_v8, 5  ;;  %v2256_v20 = vld [vmem:[%s3065_s1 + $0x50] sm:$0xff]   ;;  %v435_v21 = vor.u32 %v434_v2, %v431_v1  ;;  %v2478_v22 = vrot.slane %v446_v3, 5  ;;  %v2481_v27 = vld [vmem:[%s2378_s28 + $0x3c] sm:$0x1]  ;;  %2190 = vmatpush3.bf16.msra.mxu1 %v2255_v14 }
  0x28   : > { %v257_v24 = vrot.slane %v255_v12, 4  ;;  %v260_v25 = vrot.slane %v258_v13, 5  ;;  %v252_v29 = vrot.slane %v250_v11, 5  ;;  %v266_v30 = vrot.slane %v264_v18, 5  ;;  %v2485_v31 = vld [vmem:[%s2378_s28 + $0x14] sm:$0x1]  ;;  %2127 = vmatprep.subr.bf16.mxu0 %v2256_v20  ;;  %2183 = vmatprep.subr.bf16.mxu1 %v2256_v20 }
  0x29   : > { %v247_v28 = vor.u32 %v246_v17, %v243_v16  ;;  %v325_v26 = vshrl.u32 %v2448_v4, 16  ;;  %v328_v35 = vshll.u32 %v2448_v4, 16  ;;  %v334_v36 = vshll.u32 %v2473_v19, 16  ;;  %v2497_v42 = vld [vmem:[%s2378_s28 + $0x1c] sm:$0x1]  ;;  %v2257_v43 = vld [vmem:[%s3065_s1 + $0x10] sm:$0xff]  }
  0x2a   : > { %v261_v34 = vor.u32 %v260_v25, %v257_v24  ;;  %v339_v40 = vshrl.u32 %v2458_v9, 16  ;;  %v342_v47 = vshll.u32 %v2458_v9, 16  ;;  %v348_v48 = vshll.u32 %v2481_v27, 16  ;;  %v2258_v49 = vld [vmem:[%s3065_s1 + $0x58] sm:$0xff]   ;;  %v358_v60 = vld [vmem:[%s2378_s28 + $0x30] sm:$0xe]  ;;  %2128 = vmatpush3.bf16.msra.mxu0 %v2257_v43 }
  0x2b   : > { %v248_v44 = vrot.slane %v247_v28, 4  ;;  %v327_v46 = vrot.slane %v325_v26, 4  ;;  %v449_v50 = vor.u32 %v2478_v22, %v2453_v6  ;;  %v330_v52 = vrot.slane %v328_v35, 5  ;;  %v359_v2 = vld [vmem:[%s2378_s28 + $0x38] sm:$0xe]  ;;  %2129 = vmatprep.subr.bf16.mxu0 %v2258_v49  ;;  %2191 = vmatpush3.bf16.msra.mxu1 %v2257_v43  ;;  %v2260_v25 = vld [vmem:[%s3065_s1 + $0x60] sm:$0xff]  }
  0x2c   : > { %v262_v51 = vrot.slane %v261_v34, 4  ;;  %v341_v53 = vrot.slane %v339_v40, 4  ;;  %v2509_v54 = vrot.slane %v435_v21, 4  ;;  %v344_v57 = vrot.slane %v342_v47, 5  ;;  %v2259_v3 = vld [vmem:[%s3065_s1 + $0x18] sm:$0xff]   ;;  %2184 = vmatprep.subr.bf16.mxu1 %v2258_v49 }
  0x2d   : > { %v253_v56 = vsel %vm2489_vm6, %v248_v44, %v252_v29  ;;  %v623_v58 = vshll.u32 %v2485_v31, 16  ;;  %v331_v62 = vor.u32 %v330_v52, %v327_v46  ;;  %v336_v0 = vrot.slane %v334_v36, 5  ;;  %v2027_v11 = vld [vmem:[%s2378_s28 + $0x40] sm:$0xf]  ;;  %v2028_v24 = vld [vmem:[%s2378_s28 + $0x48] sm:$0xf] }
  0x2e   : > { %v267_v61 = vsel %vm2489_vm6, %v262_v51, %v266_v30  ;;  %v637_v1 = vshll.u32 %v2497_v42, 16  ;;  %v345_v7 = vor.u32 %v344_v57, %v341_v53  ;;  %v350_v8 = vrot.slane %v348_v48, 5  ;;  %2130 = vmatpush3.bf16.msra.mxu0 %v2259_v3  ;;  %v2262_v36 = vld [vmem:[%s3065_s1 + $0x68] sm:$0xff]   ;;  %v2554_v47 = vld [vmem:[%s2378_s28 + $0x40] sm:$0xf] }
  0x2f   : > { %v2057_v5 = vcombine.low %v253_v56, %v267_v61  ;;  %v625_v10 = vrot.slane %v623_v58, 5  ;;  %v332_v12 = vrot.slane %v331_v62, 4  ;;  %v1987_v14 = vrot.slane %v358_v60, 9  ;;  %2131 = vmatprep.subr.bf16.mxu0 %v2260_v25  ;;  %v2557_v48 = vld [vmem:[%s2378_s28 + $0x44] sm:$0x1]  ;;  %2192 = vmatpush3.bf16.msra.mxu1 %v2259_v3  ;;  %v2263_v62 = vld [vmem:[%s3065_s1 + $0x28] sm:$0xff]  }
  0x30   : > { %v639_v13 = vrot.slane %v637_v1, 5  ;;  %v405_v16 = vrot.slane %v2473_v19, 5  ;;  %v346_v17 = vrot.slane %v345_v7, 4  ;;  %v1988_v20 = vrot.slane %v359_v2, 9  ;;  %v2562_v56 = vld [vmem:[%s2378_s28 + $0x4c] sm:$0x1]  ;;  %2185 = vmatprep.subr.bf16.mxu1 %v2260_v25 }
  0x31   : > { %813 = vrot.lane.b32.xlu0 %v2057_v5, %s2316_s30  ;;  %v626_v18 = vsel %vm2489_vm6, %v2415_v39, %v625_v10  ;;  %v409_v21 = vrot.slane %v2481_v27, 5  ;;  %v337_v19 = vsel %vm2489_vm6, %v332_v12, %v336_v0  ;;  %v698_v29 = vshrl.u32 %v2027_v11, 16  ;;  %v2261_v27 = vld [vmem:[%s3065_s1 + $0x20] sm:$0xff]  }
  0x32   : > { %v640_v28 = vsel %vm2489_vm6, %v2413_v38, %v639_v13  ;;  %v406_v39 = vsel %vm2386_vm3, %v1987_v14, %v405_v16  ;;  %v351_v30 = vsel %vm2489_vm6, %v346_v17, %v350_v8  ;;  %v701_v35 = vshll.u32 %v2027_v11, 16  ;;  %v2548_v38 = vld [vmem:[%s2378_s28 + $0x38] sm:$0xf]  ;;  %2132 = vmatpush3.bf16.msra.mxu0 %v2261_v27  ;;  %v2588_v13 = vld [vmem:[%s2378_s28 + $0x14] sm:$0x1] }
  0x33   : > { %v2081_v26 = vcombine.low %v626_v18, %v640_v28  ;;  %v410_v34 = vsel %vm2386_vm3, %v1988_v20, %v409_v21  ;;  %v2060_v40 = vcombine.low %v337_v19, %v351_v30  ;;  %v700_v44 = vrot.slane %v698_v29, 4  ;;  %2133 = vmatprep.subr.bf16.mxu0 %v2262_v36  ;;  %2193 = vmatpush3.bf16.msra.mxu1 %v2261_v27  ;;  %v2264_v14 = vld [vmem:[%s3065_s1 + $0x70] sm:$0xff]   ;;  %v2598_v21 = vld [vmem:[%s2378_s28 + $0x18] sm:$0xf]  ;;  %v2606_v29 = vld [vmem:[%s2378_s28 + $0x1c] sm:$0x1] }
  0x34   : > { %v2064_v43 = vcombine.low %v406_v39, %v410_v34  ;;  %v712_v46 = vshrl.u32 %v2028_v24, 16  ;;  %v703_v49 = vrot.slane %v701_v35, 5  ;;  %v715_v51 = vshll.u32 %v2028_v24, 16  ;;  %2186 = vmatprep.subr.bf16.mxu1 %v2262_v36  ;;  %v2615_v35 = vld [vmem:[%s2378_s28 + $0x24] sm:$0x1]  ;;  %v2265_v36 = vld [vmem:[%s3065_s1 + $0x30] sm:$0xff]  }
  0x35   : > { %941 = vrot.lane.b32.xlu0 %v2081_v26, %s2317_s12  ;;  %v2080_v52 = vcombine.low %v2027_v11, %v2028_v24  ;;  %v513_v53 = vshrl.u32 %v2548_v38, 16  ;;  %819 = vrot.lane.b32.xlu1 %v2060_v40, %s2316_s30  ;;  %v516_v58 = vshll.u32 %v2548_v38, 16  ;;  %v527_v60 = vshrl.u32 %v2554_v47, 16  ;;  %v2582_v11 = vld [vmem:[%s2378_s28 + $0x10] sm:$0xf] }
  0x36   : > { %v714_v57 = vrot.slane %v712_v46, 4  ;;  %v530_v61 = vshll.u32 %v2554_v47, 16  ;;  %v2574_v0 = vrot.slane %v449_v50, 4  ;;  %v717_v1 = vrot.slane %v715_v51, 5  ;;  %v2601_v24 = vld [vmem:[%s2378_s28 + $0x1c] sm:$0x1]  ;;  %2134 = vmatpush3.bf16.msra.mxu0 %v2263_v62 }
  0x37   : > { %v515_v2 = vrot.slane %v513_v53, 4  ;;  %v704_v3 = vor.u32 %v703_v49, %v700_v44  ;;  %v518_v5 = vrot.slane %v516_v58, 5  ;;  %v2576_v7 = vrot.slane %v527_v60, 4  ;;  %2135 = vmatprep.subr.bf16.mxu0 %v2264_v14  ;;  %2194 = vmatpush3.bf16.msra.mxu1 %v2263_v62  ;;  %v2268_v49 = vld [vmem:[%s3065_s1 + $0x78] sm:$0xff]   ;;  %v354_v58 = vld [vmem:[%s2378_s28 + $0x10] sm:$0xe] }
  0x38   : > { %v2578_v8 = vrot.slane %v530_v61, 5  ;;  %v707_v10 = vshll.u32 %v2557_v48, 16  ;;  %v718_v50 = vor.u32 %v717_v1, %v714_v57  ;;  %v721_v12 = vshll.u32 %v2562_v56, 16  ;;  %2187 = vmatprep.subr.bf16.mxu1 %v2264_v14  ;;  %v2269_v60 = vld [vmem:[%s3065_s1 + $0x38] sm:$0xff]  }
  0x39   : > { %927 = vrot.lane.b32.xlu0 %v2080_v52, %s2315_s29  ;;  %v705_v22 = vrot.slane %v704_v3, 4  ;;  %839 = vrot.lane.b32.xlu1 %v2064_v43, %s2315_s29  ;;  %v519_v17 = vor.u32 %v518_v5, %v515_v2  ;;  %v2068_v18 = vcombine.low %v2548_v38, %v2554_v47  ;;  %v269_v28 = vshrl.u32 %v2582_v11, 16  ;;  %v2007_v38 = vld [vmem:[%s2378_s28 + $0x18] sm:$0xe]  ;;  %v2008_v47 = vld [vmem:[%s2378_s28 + $0x20] sm:$0xe] }
  0x3a   : > { %v709_v20 = vrot.slane %v707_v10, 5  ;;  %v719_v25 = vrot.slane %v718_v50, 4  ;;  %v723_v19 = vrot.slane %v721_v12, 5  ;;  %v272_v39 = vshll.u32 %v2582_v11, 16  ;;  %2136 = vmatpush3.bf16.msra.mxu0 %v2265_v36  ;;  %v355_v3 = vld [vmem:[%s2378_s28 + $0x18] sm:$0xe] }
  0x3b   : > { %v533_v27 = vor.u32 %v2578_v8, %v2576_v7  ;;  %v278_v34 = vshll.u32 %v2588_v13, 16  ;;  %v271_v43 = vrot.slane %v269_v28, 4  ;;  %v283_v46 = vshrl.u32 %v2598_v21, 16  ;;  %2137 = vmatprep.subr.bf16.mxu0 %v2268_v49  ;;  %v2023_v12 = vld [vmem:[%s2378_s28 + $0x20] sm:$0xf]  ;;  %2195 = vmatpush3.bf16.msra.mxu1 %v2265_v36 }
  0x3c   : > { %v710_v30 = vsel %vm2489_vm6, %v705_v22, %v709_v20  ;;  %v724_v40 = vsel %vm2489_vm6, %v719_v25, %v723_v19  ;;  %v274_v44 = vrot.slane %v272_v39, 5  ;;  %v286_v53 = vshll.u32 %v2598_v21, 16  ;;  %2188 = vmatprep.subr.bf16.mxu1 %v2268_v49  ;;  %v2646_v25 = vld [vmem:[%s3065_s1 + $0x80] sm:$0xff]   ;;  %v2660_v49 = vld [vmem:[%s2378_s28 + $0x18] sm:$0xf] }
  0x3d   : > { %867 = vrot.lane.b32.xlu1 %v2068_v18, %s2317_s12  ;;  %v2084_v52 = vcombine.low %v710_v30, %v724_v40  ;;  %v292_v57 = vshll.u32 %v2601_v24, 16  ;;  %v2636_v61 = vrot.slane %v519_v17, 4  ;;  %v280_v1 = vrot.slane %v278_v34, 5  ;;  %v2024_v34 = vld [vmem:[%s2378_s28 + $0x28] sm:$0xf] }
  0x3e   : > { %v275_v62 = vor.u32 %v274_v44, %v271_v43  ;;  %v285_v2 = vrot.slane %v283_v46, 4  ;;  %v288_v5 = vrot.slane %v286_v53, 5  ;;  %v2015_v22 = vrot.slane %v2007_v38, 9  ;;  %2138 = vmatpush3.bf16.msra.mxu0 %v2269_v60 }
  0x3f   : > { %947 = vrot.lane.b32.xlu0 %v2084_v52, %s2317_s12  ;;  %v294_v10 = vrot.slane %v292_v57, 5  ;;  %v574_v50 = vrot.slane %v2606_v29, 5  ;;  %v2016_v18 = vrot.slane %v2008_v47, 9  ;;  %v578_v17 = vrot.slane %v2615_v35, 5  ;;  %2196 = vmatpush3.bf16.msra.mxu1 %v2269_v60 }
  0x40   : > { %v276_v14 = vrot.slane %v275_v62, 4  ;;  %v1983_v20 = vrot.slane %v354_v58, 9  ;;  %v289_v19 = vor.u32 %v288_v5, %v285_v2  ;;  %v389_v39 = vrot.slane %v2588_v13, 5  ;;  %v2665_v62 = vld [vmem:[%s2378_s28 + $0x20] sm:$0xf]  ;;  %2169 = vmatprep.subr.bf16.mxu1 %v2646_v25 }
  0x41   : > { %v575_v28 = vsel %vm2386_vm3, %v2015_v22, %v574_v50  ;;  %v1984_v30 = vrot.slane %v355_v3, 9  ;;  %v579_v36 = vsel %vm2386_vm3, %v2016_v18, %v578_v17  ;;  %v393_v40 = vrot.slane %v2601_v24, 5  ;;  %v2677_v3 = vld [vmem:[%s2378_s28 + $0x24] sm:$0x1]  ;;  %v2680_v5 = vld [vmem:[%s2378_s28 + $0x2c] sm:$0x1] }
  0x42   : > { %v281_v38 = vsel %vm2489_vm6, %v276_v14, %v280_v1  ;;  %v642_v43 = vshrl.u32 %v2023_v12, 16  ;;  %v290_v44 = vrot.slane %v289_v19, 4  ;;  %v2074_v46 = vcombine.low %v575_v28, %v579_v36  ;;  %v2687_v17 = vld [vmem:[%s2378_s28 + $0x20] sm:$0xf] }
  0x43   : > { %v390_v47 = vsel %vm2386_vm3, %v1983_v20, %v389_v39  ;;  %v645_v13 = vshll.u32 %v2023_v12, 16  ;;  %v394_v52 = vsel %vm2386_vm3, %v1984_v30, %v393_v40  ;;  %v656_v57 = vshrl.u32 %v2024_v34, 16  ;;  %v2695_v30 = vld [vmem:[%s2378_s28 + $0x28] sm:$0xf] }
  0x44   : > { %v644_v53 = vrot.slane %v642_v43, 4  ;;  %v659_v58 = vshll.u32 %v2024_v34, 16  ;;  %v2671_v24 = vrot.slane %v533_v27, 4  ;;  %v295_v60 = vsel %vm2489_vm6, %v290_v44, %v294_v10  ;;  %895 = vrot.lane.b32.xlu0 %v2074_v46, %s2316_s30 }
  0x45   : > { %v647_v1 = vrot.slane %v645_v13, 5  ;;  %v2078_v2 = vcombine.low %v2023_v12, %v2024_v34  ;;  %v2058_v22 = vcombine.low %v281_v38, %v295_v60  ;;  %v658_v50 = vrot.slane %v656_v57, 4  ;;  %v2690_v12 = vld [vmem:[%s2378_s28 + $0x24] sm:$0x1]  ;;  %v234_v13 = vld [vmem:[%s2378_s28 + $0x2c] sm:$0x1] }
  0x46   : > { %v661_v14 = vrot.slane %v659_v58, 5  ;;  %v457_v7 = vshrl.u32 %v2660_v49, 16  ;;  %v2062_v8 = vcombine.low %v390_v47, %v394_v52  ;;  %v460_v27 = vshll.u32 %v2660_v49, 16  ;;  %v2705_v60 = vld [vmem:[%s2378_s28 + $0x2c] sm:$0x1] }
  0x47   : > { %v471_v18 = vshrl.u32 %v2665_v62, 16  ;;  %v474_v10 = vshll.u32 %v2665_v62, 16  ;;  %815 = vrot.lane.b32.xlu1 %v2058_v22, %s2316_s30  ;;  %v648_v19 = vor.u32 %v647_v1, %v644_v53  ;;  %v651_v28 = vshll.u32 %v2677_v3, 16  ;;  %v2009_v1 = vld [vmem:[%s2378_s28 + $0x28] sm:$0xe] }
  0x48   : > { %v459_v20 = vrot.slane %v457_v7, 4  ;;  %v662_v39 = vor.u32 %v661_v14, %v658_v50  ;;  %923 = vrot.lane.b32.xlu0 %v2078_v2, %s2315_s29  ;;  %v462_v34 = vrot.slane %v460_v27, 5  ;;  %v665_v40 = vshll.u32 %v2680_v5, 16  ;;  %v2715_v7 = vld [vmem:[%s2378_s28 + $0x34] sm:$0x1] }
  0x49   : > { %v473_v38 = vrot.slane %v471_v18, 4  ;;  %v476_v36 = vrot.slane %v474_v10, 5  ;;  %v466_v43 = vshll.u32 %v2606_v29, 16  ;;  %v649_v44 = vrot.slane %v648_v19, 4  ;;  %v356_v10 = vld [vmem:[%s2378_s28 + $0x20] sm:$0xe] }
  0x4a   : > { %v653_v46 = vrot.slane %v651_v28, 5  ;;  %v663_v47 = vrot.slane %v662_v39, 4  ;;  %v480_v52 = vshll.u32 %v2615_v35, 16  ;;  %v463_v53 = vor.u32 %v462_v34, %v459_v20  ;;  %v357_v34 = vld [vmem:[%s2378_s28 + $0x28] sm:$0xe] }
  0x4b   : > { %v2066_v57 = vcombine.low %v2660_v49, %v2665_v62  ;;  %v667_v58 = vrot.slane %v665_v40, 5  ;;  %835 = vrot.lane.b32.xlu1 %v2062_v8, %s2315_s29  ;;  %v297_v22 = vshrl.u32 %v2687_v17, 16  ;;  %v300_v50 = vshll.u32 %v2687_v17, 16  ;;  %v2010_v49 = vld [vmem:[%s2378_s28 + $0x30] sm:$0xe] }
  0x4c   : > { %v654_v2 = vsel %vm2489_vm6, %v649_v44, %v653_v46  ;;  %v306_v14 = vshll.u32 %v2690_v12, 16  ;;  %v477_v62 = vor.u32 %v476_v36, %v473_v38  ;;  %v311_v18 = vshrl.u32 %v2695_v30, 16  ;;  %v2025_v46 = vld [vmem:[%s2378_s28 + $0x30] sm:$0xf] }
  0x4d   : > { %v668_v27 = vsel %vm2489_vm6, %v663_v47, %v667_v58  ;;  %v299_v28 = vrot.slane %v297_v22, 4  ;;  %v302_v39 = vrot.slane %v300_v50, 5  ;;  %v2725_v40 = vrot.slane %v463_v53, 4 }
  0x4e   : > { %v2082_v19 = vcombine.low %v654_v2, %v668_v27  ;;  %v313_v44 = vrot.slane %v311_v18, 4  ;;  %v314_v38 = vshll.u32 %v2695_v30, 16  ;;  %v320_v36 = vshll.u32 %v234_v13, 16  ;;  %v2026_v2 = vld [vmem:[%s2378_s28 + $0x38] sm:$0xf] }
  0x4f   : > { %863 = vrot.lane.b32.xlu1 %v2066_v57, %s2317_s12  ;;  %v303_v47 = vor.u32 %v302_v39, %v299_v28  ;;  %v308_v58 = vrot.slane %v306_v14, 5  ;;  %v2017_v51 = vrot.slane %v2009_v1, 9  ;;  %v582_v26 = vrot.slane %v2705_v60, 5 }
  0x50   : > { %943 = vrot.lane.b32.xlu0 %v2082_v19, %s2317_s12  ;;  %v316_v22 = vrot.slane %v314_v38, 5  ;;  %v322_v50 = vrot.slane %v320_v36, 5  ;;  %v2018_v53 = vrot.slane %v2010_v49, 9  ;;  %v586_v27 = vrot.slane %v2715_v7, 5 }
  0x51   : > { %v304_v18 = vrot.slane %v303_v47, 4  ;;  %v583_v20 = vsel %vm2386_vm3, %v2017_v51, %v582_v26  ;;  %v1985_v57 = vrot.slane %v356_v10, 9  ;;  %v397_v19 = vrot.slane %v2690_v12, 5  ;;  %v2744_v26 = vld [vmem:[%s2378_s28 + $0x28] sm:$0xf] }
  0x52   : > { %v317_v14 = vor.u32 %v316_v22, %v313_v44  ;;  %v587_v1 = vsel %vm2386_vm3, %v2018_v53, %v586_v27  ;;  %v1986_v28 = vrot.slane %v357_v34, 9  ;;  %v401_v39 = vrot.slane %v234_v13, 5  ;;  %v1994_v22 = vld [vmem:[%s2378_s28 + $0x30] sm:$0xf]  ;;  %v2750_v53 = vld [vmem:[%s2378_s28 + $0x34] sm:$0x1] }
  0x53   : > { %v2739_v38 = vrot.slane %v477_v62, 4  ;;  %v309_v49 = vsel %vm2489_vm6, %v304_v18, %v308_v58  ;;  %v2075_v36 = vcombine.low %v583_v20, %v587_v1  ;;  %v670_v47 = vshrl.u32 %v2025_v46, 16  ;;  %v2756_v58 = vld [vmem:[%s2378_s28 + $0x3c] sm:$0x1] }
  0x54   : > { %v318_v51 = vrot.slane %v317_v14, 4  ;;  %v398_v12 = vsel %vm2386_vm3, %v1985_v57, %v397_v19  ;;  %v673_v10 = vshll.u32 %v2025_v46, 16  ;;  %v684_v44 = vshrl.u32 %v2026_v2, 16 }
  0x55   : > { %897 = vrot.lane.b32.xlu0 %v2075_v36, %s2316_s30  ;;  %v402_v13 = vsel %vm2386_vm3, %v1986_v28, %v401_v39  ;;  %v672_v62 = vrot.slane %v670_v47, 4  ;;  %v687_v34 = vshll.u32 %v2026_v2, 16  ;;  %v2079_v20 = vcombine.low %v2025_v46, %v2026_v2 }
  0x56   : > { %v323_v27 = vsel %vm2489_vm6, %v318_v51, %v322_v50  ;;  %v675_v18 = vrot.slane %v673_v10, 5  ;;  %v686_v57 = vrot.slane %v684_v44, 4  ;;  %v485_v19 = vshrl.u32 %v2744_v26, 16 }
  0x57   : > { %v2059_v14 = vcombine.low %v309_v49, %v323_v27  ;;  %v689_v1 = vrot.slane %v687_v34, 5  ;;  %v488_v8 = vshll.u32 %v2744_v26, 16  ;;  %v499_v36 = vshrl.u32 %v1994_v22, 16 }
  0x58   : > { %v2063_v16 = vcombine.low %v398_v12, %v402_v13  ;;  %v487_v6 = vrot.slane %v485_v19, 4  ;;  %v502_v28 = vshll.u32 %v1994_v22, 16  ;;  %v676_v39 = vor.u32 %v675_v18, %v672_v62 }
  0x59   : > { %817 = vrot.lane.b32.xlu1 %v2059_v14, %s2316_s30  ;;  %925 = vrot.lane.b32.xlu0 %v2079_v20, %s2315_s29  ;;  %v490_v46 = vrot.slane %v488_v8, 5  ;;  %v501_v2 = vrot.slane %v499_v36, 4  ;;  %v679_v50 = vshll.u32 %v2750_v53, 16  ;;  %v690_v47 = vor.u32 %v689_v1, %v686_v57  ;;  %v2040_v14 = vld [vmem:[%s2378_s28 + $0x28] sm:$0xe] }
  0x5a   : > { %v494_v51 = vshll.u32 %v2705_v60, 16  ;;  %v504_v49 = vrot.slane %v502_v28, 5  ;;  %v677_v10 = vrot.slane %v676_v39, 4  ;;  %v693_v44 = vshll.u32 %v2756_v58, 16 }
  0x5b   : > { %v508_v12 = vshll.u32 %v2715_v7, 16  ;;  %v2067_v13 = vcombine.low %v2744_v26, %v1994_v22  ;;  %v681_v62 = vrot.slane %v679_v50, 5  ;;  %v691_v34 = vrot.slane %v690_v47, 4  ;;  %v2042_v50 = vld [vmem:[%s2378_s28 + $0x38] sm:$0xe] }
  0x5c   : > { %v491_v27 = vor.u32 %v490_v46, %v487_v6  ;;  %v505_v18 = vor.u32 %v504_v49, %v501_v2  ;;  %v695_v8 = vrot.slane %v693_v44, 5  ;;  %v441_v60 = vsel %vm2489_vm6, %v2509_v54, %v2392_v23  ;;  %v2043_v49 = vld [vmem:[%s2378_s28 + $0x40] sm:$0xe] }
  0x5d   : > { %837 = vrot.lane.b32.xlu1 %v2063_v16, %s2315_s29  ;;  %v682_v20 = vsel %vm2489_vm6, %v677_v10, %v681_v62  ;;  %v767_v7 = vrot.slane %v2750_v53, 5  ;;  %v455_v6 = vsel %vm2489_vm6, %v2574_v0, %v2406_v33  ;;  %v524_v26 = vrot.slane %v522_v45, 5  ;;  %v2037_v45 = vld [vmem:[%s2378_s28 + $0x10] sm:$0xe]  ;;  %v2038_v0 = vld [vmem:[%s2378_s28 + $0x18] sm:$0xe] }
  0x5e   : > { %v696_v23 = vsel %vm2489_vm6, %v691_v34, %v695_v8  ;;  %v771_v54 = vrot.slane %v2756_v58, 5  ;;  %v2069_v16 = vcombine.low %v441_v60, %v455_v6  ;;  %v538_v22 = vrot.slane %v536_v55, 5  ;;  %v2044_v10 = vld [vmem:[%s2378_s28 + $0x48] sm:$0xe] }
  0x5f   : > { %v2083_v53 = vcombine.low %v682_v20, %v696_v23  ;;  %v525_v57 = vsel %vm2489_vm6, %v2636_v61, %v524_v26  ;;  %v2053_v33 = vcombine.low %v2437_v59, %v2445_v63  ;;  %v2056_v37 = vcombine.low %v2448_v4, %v2458_v9  ;;  %v2039_v61 = vld [vmem:[%s2378_s28 + $0x20] sm:$0xe] }
  0x60   : > { %v492_v19 = vrot.slane %v491_v27, 4  ;;  %v506_v58 = vrot.slane %v505_v18, 4  ;;  %v539_v41 = vsel %vm2489_vm6, %v2671_v24, %v538_v22  ;;  %v2054_v55 = vcombine.low %v2582_v11, %v2598_v21  ;;  %v2041_v24 = vld [vmem:[%s2378_s28 + $0x30] sm:$0xe] }
  0x61   : > { %865 = vrot.lane.b32.xlu1 %v2067_v13, %s2317_s12  ;;  %945 = vrot.lane.b32.xlu0 %v2083_v53, %s2317_s12  ;;  %v2072_v59 = vcombine.low %v525_v57, %v539_v41  ;;  %v468_v63 = vrot.slane %v466_v43, 5  ;;  %v482_v1 = vrot.slane %v480_v52, 5  ;;  %v2045_v36 = vrot.slane %v2037_v45, 9 }
  0x62   : > { %v2046_v28 = vrot.slane %v2038_v0, 9  ;;  %v2047_v39 = vrot.slane %v2039_v61, 9  ;;  %v2048_v46 = vrot.slane %v2040_v14, 9  ;;  %v2055_v2 = vcombine.low %v2687_v17, %v2695_v30 }
  0x63   : > { %v469_v47 = vsel %vm2489_vm6, %v2725_v40, %v468_v63  ;;  %v483_v29 = vsel %vm2489_vm6, %v2739_v38, %v482_v1  ;;  %v3072_v35 = vrot.slane %v2485_v31, 5  ;;  %v496_v52 = vrot.slane %v494_v51, 5 }
  0x64   : > { %v2826_v44 = vcombine.low %v469_v47, %v483_v29  ;;  %v3073_v13 = vrot.slane %v2497_v42, 5  ;;  %v3074_v40 = vrot.slane %v2677_v3, 5  ;;  %v3075_v31 = vrot.slane %v2680_v5, 5 }
  0x65   : > { %v752_v43 = vsel %vm2386_vm3, %v2045_v36, %v3072_v35  ;;  %v497_v18 = vsel %vm2489_vm6, %v492_v19, %v496_v52  ;;  %v510_v8 = vrot.slane %v508_v12, 5  ;;  %v2049_v42 = vrot.slane %v2041_v24, 9  ;;  %v2272_v35 = vld [vmem:[%s3065_s1 + $0x88] sm:$0xff]  }
  0x66   : > { %v756_v62 = vsel %vm2386_vm3, %v2046_v28, %v3073_v13  ;;  %v760_v38 = vsel %vm2386_vm3, %v2047_v39, %v3074_v40  ;;  %v764_v34 = vsel %vm2386_vm3, %v2048_v46, %v3075_v31  ;;  %v2050_v60 = vrot.slane %v2042_v50, 9 }
  0x67   : > { %v2085_v51 = vcombine.low %v752_v43, %v756_v62  ;;  %v2086_v27 = vcombine.low %v760_v38, %v764_v34  ;;  %v2051_v20 = vrot.slane %v2043_v49, 9  ;;  %v2052_v6 = vrot.slane %v2044_v10, 9 }
  0x68   : > { %v511_v3 = vsel %vm2489_vm6, %v506_v58, %v510_v8  ;;  %v768_v5 = vsel %vm2386_vm3, %v2049_v42, %v767_v7  ;;  %v772_v23 = vsel %vm2386_vm3, %v2050_v60, %v771_v54  ;;  %v3076_v22 = vrot.slane %v2557_v48, 5 }
  0x69   : > { %v2844_v26 = vcombine.low %v497_v18, %v511_v3  ;;  %v2087_v53 = vcombine.low %v768_v5, %v772_v23  ;;  %v3077_v57 = vrot.slane %v2562_v56, 5  ;;  %vm961_vm7 = vcmask 261120  }
  0x6a   : > { %v776_v12 = vsel %vm2386_vm3, %v2051_v20, %v3076_v22  ;;  %vm974_vm8 = vcmask 523264   ;;  %vm983_vm9 = vcmask 785408   ;;  %vm1417_vm13 = vcmask 1040384  }
  0x6b   : > { %v780_v32 = vsel %vm2386_vm3, %v2052_v6, %v3077_v57  ;;  %v2904_v57 = vld [vmem:[%s3066_s2] ss:$0 sm:$0xff]  ;;  %vm1440_vm2 = vcmask 1046528   ;;  %vm1826_vm3 = vcmask 1041409   ;;  %vm1829_vm5 = vcmask 1042434  }
  0x6c   : > { %v2088_v45 = vcombine.low %v776_v12, %v780_v32 }
  0x8c   : > { %v922_v0 = vpop.permute.xlu1 %921 }
  0x93   : > { %v894_v19 = vpop.permute.xlu0 %893 }
  0x94   : > { %v998_v54 = vsel %vm961_vm7, %v2069_v16, %v894_v19  ;;  %v1321_v19 = vld [vmem:[#allocation2] sm:$0xff] }
  0x95   : > { %v834_v58 = vpop.permute.xlu1 %833  ;;  %v1009_v15 = vsel %vm974_vm8, %v998_v54, %v922_v0  ;;  %v1322_v54 = vld [vmem:[#allocation2 + $0x8] sm:$0xff] }
  0x98   : > { %v900_v41 = vpop.permute.xlu0 %899 }
  0x99   : > { %v862_v7 = vpop.permute.xlu1 %861 }
  0xa3   : > { %v814_v61 = vpop.permute.xlu0 %813 }
  0xa4   : > { %v964_v48 = vsel %vm961_vm7, %v2053_v33, %v814_v61  ;;  %v1007_v33 = vsel %vm961_vm7, %v2072_v59, %v900_v41 }
  0xa5   : > { %v976_v14 = vsel %vm974_vm8, %v964_v48, %v834_v58 }
  0xa6   : > { %v985_v36 = vsel %vm983_vm9, %v976_v14, %v862_v7 }
  0xa7   : > { %v942_v56 = vpop.permute.xlu0 %941  ;;  %v820_v63 = vpop.permute.xlu1 %819 }
  0xa8   : > { %v1017_v1 = vsel %vm983_vm9, %v1009_v15, %v942_v56  ;;  %v973_v16 = vsel %vm961_vm7, %v2056_v37, %v820_v63 }
  0xa9   : > { %1223 = vmatprep.mubr.bf16.mxu0 %v1017_v1 }
  0xaa   : > { %1224 = vmatmul.mubr.bf16.vlgmr.msra.gmra.mrb[0].mxu0 %v985_v36 }
  0xab   : > { %v840_v24 = vpop.permute.xlu1 %839  ;;  %v928_v28 = vpop.permute.xlu0 %927 }
  0xac   : > { %v1015_v46 = vsel %vm974_vm8, %v1007_v33, %v928_v28  ;;  %v982_v47 = vsel %vm974_vm8, %v973_v16, %v840_v24  ;;  %v1327_v28 = vld [vmem:[#allocation2 + $0x30] sm:$0xff] }
  0xaf   : > { %v868_v39 = vpop.permute.xlu1 %867 }
  0xb0   : > { %v994_v43 = vsel %vm983_vm9, %v982_v47, %v868_v39 }
  0xb1   : > { %v948_v50 = vpop.permute.xlu0 %947 }
  0xb2   : > { %v1026_v29 = vsel %vm983_vm9, %v1015_v46, %v948_v50 }
  0xb3   : > { %1247 = vmatprep.mubr.bf16.mxu1 %v1026_v29 }
  0xb4   : > { %1248 = vmatmul.mubr.bf16.vlgmr.msra.gmra.mrb[0].mxu1 %v994_v43  ;;  %v2318_v43 = vmov 0.0  }
  0xb5   : > { %2170 = vmatpush3.bf16.msra.mxu1 %v2646_v25  ;;  %2173 = vmatprep.mubr.msk.bf16.mxu1 %vm961_vm7, %v2085_v51 }
  0xb6   : > { %2171 = vmatprep.subr.bf16.mxu1 %v2272_v35  ;;  %v896_v4 = vpop.permute.xlu0 %895 }
  0xb7   : > { %v1001_v25 = vsel %vm961_vm7, %v2826_v44, %v896_v4 }
  0xb9   : > { %2172 = vmatpush3.bf16.msra.mxu1 %v2272_v35  ;;  %v816_v9 = vpop.permute.xlu1 %815 }
  0xba   : > { %v924_v37 = vpop.permute.xlu0 %923  ;;  %v967_v52 = vsel %vm961_vm7, %v2054_v55, %v816_v9 }
  0xbb   : > { %v1011_v49 = vsel %vm974_vm8, %v1001_v25, %v924_v37 }
  0xbc   : > { %2174 = vmatmul.mubr.msk.bf16.vlgmr.msra.gmra.mrb[4].mxu1 %vm961_vm7, %v2086_v27 }
  0xbd   : > { %2177 = vmatprep.mubr.msk.bf16.mxu1 %vm961_vm7, %v2087_v53  ;;  %v836_v59 = vpop.permute.xlu1 %835 }
  0xbe   : > { %v978_v62 = vsel %vm974_vm8, %v967_v52, %v836_v59  ;;  %v1328_v52 = vld [vmem:[#allocation2 + $0x38] sm:$0xff] }
  0xc1   : > { %v864_v10 = vpop.permute.xlu1 %863 }
  0xc2   : > { %v944_v13 = vpop.permute.xlu0 %943  ;;  %v988_v38 = vsel %vm983_vm9, %v978_v62, %v864_v10  ;;  %v1433_v10 = vlaneseq }
  0xc3   : > { %v1020_v40 = vsel %vm983_vm9, %v1011_v49, %v944_v13 }
  0xc4   : > { %1231 = vmatprep.mubr.bf16.mxu0 %v1020_v40  ;;  %2178 = vmatmul.mubr.msk.bf16.gmra.mrb[8].mxu1 %vm961_vm7, %v2088_v45 }
  0xc5   : > { %1232 = vmatmul.mubr.bf16.gmra.mrb[4].mxu0 %v988_v38 }
  0xc7   : > { %v898_v11 = vpop.permute.xlu0 %897 }
  0xc8   : > { %v1004_v34 = vsel %vm961_vm7, %v2844_v26, %v898_v11 }
  0xcb   : > { %v818_v21 = vpop.permute.xlu1 %817  ;;  %v926_v55 = vpop.permute.xlu0 %925 }
  0xcc   : > { %v970_v44 = vsel %vm961_vm7, %v2055_v2, %v818_v21  ;;  %v1013_v51 = vsel %vm974_vm8, %v1004_v34, %v926_v55  ;;  %vm1832_vm7 = vcmask 1043459  }
  0xcf   : > { %v838_v31 = vpop.permute.xlu1 %837 }
  0xd0   : > { %v980_v8 = vsel %vm974_vm8, %v970_v44, %v838_v31  ;;  %v1323_v44 = vld [vmem:[#allocation2 + $0x10] sm:$0xff] }
  0xd3   : > { %v866_v27 = vpop.permute.xlu1 %865  ;;  %v946_v18 = vpop.permute.xlu0 %945 }
  0xd4   : > { %v1023_v42 = vsel %vm983_vm9, %v1013_v51, %v946_v18  ;;  %v991_v60 = vsel %vm983_vm9, %v980_v8, %v866_v27  ;;  %v1324_v8 = vld [vmem:[#allocation2 + $0x18] sm:$0xff]  ;;  %vm1888_vm9 = vcmask 517120  }
  0xd5   : > { %1239 = vmatprep.mubr.bf16.mxu0 %v1023_v42 }
  0xd6   : > { %1240 = vmatmul.mubr.bf16.gmra.mrb[8].mxu0 %v991_v60 }
 0x17d   : > { %v2139_v20 = vpop.f32.mrb[0].mxu0 }
 0x17e   : > { %v2140_v6 = vpop.f32.mrb[1].mxu0 }
 0x17f   : > { %v2141_v17 = vadd.f32 %v2140_v6, %v2139_v20  ;;  %v2142_v30 = vpop.f32.mrb[2].mxu0 }
 0x180   : > { %v2143_v2 = vpop.f32.mrb[3].mxu0 }
 0x181   : > { %v2144_v3 = vadd.f32 %v2143_v2, %v2142_v30  ;;  %v1226_v45 = vadd.f32 %v2141_v17, %v2904_v57  ;;  %v2920_v30 = vshrl.u32 %v1433_v10, 7 }
 0x183   : > { %v1229_v7 = vadd.f32 %v2144_v3, %v2904_v57  ;;  %vm1435_vm15 = vcmp.eq.s32.totalorder %v2920_v30, 0 }
 0x187   : > { %v2157_v5 = vpop.f32.mrb[0].mxu1 }
 0x188   : > { %v2158_v26 = vpop.f32.mrb[1].mxu1 }
 0x189   : > { %v2159_v23 = vadd.f32 %v2158_v26, %v2157_v5  ;;  %v2160_v22 = vpop.f32.mrb[2].mxu1 }
 0x18a   : > { %v2161_v12 = vpop.f32.mrb[3].mxu1 }
 0x18b   : > { %v2162_v53 = vadd.f32 %v2161_v12, %v2160_v22  ;;  %v1250_v63 = vadd.f32 %v2159_v23, %v2904_v57  ;;  %v2319_v23 = vmov 1983009808  }
 0x18c   : > { %v1471_v22 = vunpack.c.l.s4 %v2319_v23 }
 0x18d   : > { %v1253_v47 = vadd.f32 %v2162_v53, %v2904_v57 }
 0x18f   : > { %v2175_v32 = vpop.f32.mrb[4].mxu1 }
 0x190   : > { %v1290_v0 = vpop.f32.mrb[5].mxu1 }
 0x191   : > { %v1291_v58 = vadd.f32 %v1290_v0, %v1226_v45  ;;  %v2176_v41 = vpop.f32.mrb[6].mxu1 }
 0x192   : > { %v1293_v61 = vpop.f32.mrb[7].mxu1 }
 0x193   : > { %v1329_v48 = vsub.f32 %v1291_v58, %v1321_v19  ;;  %v1294_v14 = vadd.f32 %v1293_v61, %v1229_v7  ;;  %v1472_v7 = vunpack.c.0.s8 %v1471_v22 }
 0x195   : > { %v1337_v56 = vmul.f32 0.5, %v1329_v48  ;;  %v1330_v15 = vsub.f32 %v1294_v14, %v1322_v54 }
 0x197   : > { %v1345_v1 = vadd.f32 %v1337_v56, %v1321_v19  ;;  %v1338_v36 = vmul.f32 0.5, %v1330_v15  ;;  %v2179_v24 = vpop.f32.mrb[8].mxu1 }
 0x198   : > { %v2145_v16 = vpop.f32.mrb[4].mxu0  ;;  %v1315_v33 = vadd.f32 %v2179_v24, %v1250_v63  ;;  %v2909_v39 = vpop.f32.mrb[9].mxu1 }
 0x199   : > { %vm1353_vm10 = vcmp.ge.f32.partialorder %v1345_v1, 1.0  ;;  %v1346_v46 = vadd.f32 %v1338_v36, %v1322_v54  ;;  %v2146_v50 = vpop.f32.mrb[5].mxu0  ;;  %v2180_v29 = vpop.f32.mrb[10].mxu1 }
 0x19a   : > { %v1361_v35 = vsel %vm1353_vm10, 0.0, %v1345_v1  ;;  %v2112_v4 = vsel %vm1353_vm10, 1.0, %v2318_v43  ;;  %v2147_v9 = vadd.f32 %v2146_v50, %v2145_v16  ;;  %v2148_v37 = vpop.f32.mrb[6].mxu0  ;;  %v1335_v59 = vsub.f32 %v1315_v33, %v1327_v28  ;;  %v2913_v25 = vpop.f32.mrb[11].mxu1 }
 0x19b   : > { %1369 = vst.msk [vmem:[#allocation2] sm:$0xff] %vm974_vm8, %v1361_v35  ;;  %v1393_v49 = vmax.f32 %v2112_v4, 0.0  ;;  %vm1354_vm11 = vcmp.ge.f32.partialorder %v1346_v46, 1.0  ;;  %v2149_v13 = vpop.f32.mrb[7].mxu0  ;;  %v1318_v62 = vadd.f32 %v2180_v29, %v1253_v47 }
 0x19c   : > { %v1362_v40 = vsel %vm1354_vm11, 0.0, %v1346_v46  ;;  %v2113_v38 = vsel %vm1354_vm11, 1.0, %v2318_v43  ;;  %v1234_v11 = vadd.f32 %v2147_v9, %v2904_v57  ;;  %v2150_v21 = vadd.f32 %v2149_v13, %v2148_v37 }
 0x19d   : > { %1370 = vst.msk [vmem:[#allocation2 + $0x8] sm:$0xff] %vm974_vm8, %v1362_v40  ;;  %v1394_v55 = vmax.f32 %v2112_v4, %v2113_v38  ;;  %v1401_v31 = vmax.f32 %v1393_v49, %v2113_v38  ;;  %v1343_v34 = vmul.f32 0.5, %v1335_v59  ;;  %v1336_v51 = vsub.f32 %v1318_v62, %v1328_v52 }
 0x19e   : > { %v1299_v27 = vadd.f32 %v2175_v32, %v1234_v11  ;;  %v1237_v18 = vadd.f32 %v2150_v21, %v2904_v57  ;;  %v2952_v46 = vsub.s32 %v1472_v7, %v2920_v30 }
 0x19f   : > { %v1351_v42 = vadd.f32 %v1343_v34, %v1327_v28  ;;  %v1344_v60 = vmul.f32 0.5, %v1336_v51  ;;  %v1418_v17 = vrot.slane %v1401_v31, 7  ;;  %v1441_v1 = vrot.slane %v1401_v31, 1  ;;  %v1326_v51 = vld [vmem:[#allocation2 + $0x28] sm:$0xff] }
 0x1a0   : > { %v1331_v20 = vsub.f32 %v1299_v27, %v1323_v44  ;;  %v1302_v6 = vadd.f32 %v2176_v41, %v1237_v18 }
 0x1a1   : > { %vm1359_vm12 = vcmp.ge.f32.partialorder %v1351_v42, 1.0  ;;  %v1352_v2 = vadd.f32 %v1344_v60, %v1328_v52  ;;  %v1432_v19 = vsel %vm1417_vm13, 0.0, %v1418_v17 }
 0x1a2   : > { %v1339_v3 = vmul.f32 0.5, %v1331_v20  ;;  %v1332_v5 = vsub.f32 %v1302_v6, %v1324_v8  ;;  %v1367_v26 = vsel %vm1359_vm12, 0.0, %v1351_v42  ;;  %v2924_v12 = vsel %vm1359_vm12, 1.0, %v2318_v43 }
 0x1a3   : > { %1375 = vst.msk [vmem:[#allocation2 + $0x30] sm:$0xff] %vm974_vm8, %v1367_v26  ;;  %vm1360_vm14 = vcmp.ge.f32.partialorder %v1352_v2, 1.0  ;;  %v1436_v48 = vsel %vm1435_vm15, 0.0, %v1432_v19 }
 0x1a4   : > { %v1347_v53 = vadd.f32 %v1339_v3, %v1323_v44  ;;  %v1340_v32 = vmul.f32 0.5, %v1332_v5  ;;  %v1368_v45 = vsel %vm1360_vm14, 0.0, %v1352_v2  ;;  %v2927_v0 = vsel %vm1360_vm14, 1.0, %v2318_v43 }
 0x1a5   : > { %1376 = vst.msk [vmem:[#allocation2 + $0x38] sm:$0xff] %vm974_vm8, %v1368_v45  ;;  %v1400_v58 = vmax.f32 %v2924_v12, %v2927_v0  ;;  %v1457_v33 = vmax.f32 %v1436_v48, %v1401_v31 }
 0x1a6   : > { %vm1355_vm0 = vcmp.ge.f32.partialorder %v1347_v53, 1.0  ;;  %v1348_v41 = vadd.f32 %v1340_v32, %v1324_v8 }
 0x1a7   : > { %v1363_v61 = vsel %vm1355_vm0, 0.0, %v1347_v53  ;;  %v2935_v54 = vsel %vm1355_vm0, 1.0, %v2318_v43  ;;  %v1408_v7 = vmax.f32 %v1400_v58, 0.0 }
 0x1a8   : > { %1371 = vst.msk [vmem:[#allocation2 + $0x10] sm:$0xff] %vm974_vm8, %v1363_v61  ;;  %v1395_v14 = vmax.f32 %v2113_v38, %v2935_v54  ;;  %v1402_v56 = vmax.f32 %v1394_v55, %v2935_v54  ;;  %vm1356_vm1 = vcmp.ge.f32.partialorder %v1348_v41, 1.0  ;;  %v1325_v38 = vld [vmem:[#allocation2 + $0x20] sm:$0xff] }
 0x1a9   : > { %v1364_v15 = vsel %vm1356_vm1, 0.0, %v1348_v41  ;;  %v2943_v63 = vsel %vm1356_vm1, 1.0, %v2318_v43  ;;  %v2151_v16 = vpop.f32.mrb[8].mxu0 }
 0x1aa   : > { %v1442_v36 = vrot.slane %v1402_v56, 1  ;;  %1372 = vst.msk [vmem:[#allocation2 + $0x18] sm:$0xff] %vm974_vm8, %v1364_v15  ;;  %v1396_v24 = vmax.f32 %v2935_v54, %v2943_v63  ;;  %v2949_v28 = vmax.f32 %v1395_v14, %v2943_v63  ;;  %v2152_v50 = vpop.f32.mrb[9].mxu0  ;;  %v1419_v47 = vrot.slane %v1402_v56, 7 }
 0x1ab   : > { %v2153_v4 = vadd.f32 %v2152_v50, %v2151_v16  ;;  %v2154_v9 = vpop.f32.mrb[10].mxu0 }
 0x1ac   : > { %v1443_v29 = vsel %vm1440_vm2, %v1441_v1, %v1442_v36  ;;  %v1420_v35 = vrot.slane %v2949_v28, 7  ;;  %v2155_v59 = vpop.f32.mrb[11].mxu0  ;;  %v1444_v50 = vrot.slane %v2949_v28, 1 }
 0x1ad   : > { %v1461_v37 = vmax.f32 %v1457_v33, %v1443_v29  ;;  %v1242_v49 = vadd.f32 %v2153_v4, %v2904_v57  ;;  %v2156_v10 = vadd.f32 %v2155_v59, %v2154_v9 }
 0x1ae   : > { %v1421_v52 = vsel %vm1417_vm13, %v1419_v47, %v1420_v35 }
 0x1af   : > { %v1469_v13 = vcombine.high %v1461_v37, %v1461_v37  ;;  %v1476_v62 = vrot.slane %v1461_v37, %v2952_v46  ;;  %v1437_v40 = vsel %vm1435_vm15, 0.0, %v1421_v52  ;;  %v1307_v21 = vadd.f32 %v2909_v39, %v1242_v49 }
 0x1b0   : > { %v1458_v11 = vmax.f32 %v1437_v40, %v2949_v28  ;;  %v1245_v55 = vadd.f32 %v2156_v10, %v2904_v57 }
 0x1b1   : > { %v1483_v31 = vrot.slane %v1469_v13, %v2952_v46  ;;  %v1484_v44 = vcombine.high %v1476_v62, %v1476_v62  ;;  %v1553_v34 = vpack.c.bf16 %v1476_v62, %v1476_v62  ;;  %v1333_v27 = vsub.f32 %v1307_v21, %v1325_v38 }
 0x1b2   : > { %v1310_v18 = vadd.f32 %v2913_v25, %v1245_v55 }
 0x1b3   : > { %v1485_v8 = vcombine.high %v1483_v31, %v1483_v31  ;;  %v1554_v42 = vpack.c.bf16 %v1484_v44, %v1484_v44  ;;  %v1555_v60 = vpack.c.bf16 %v1483_v31, %v1483_v31  ;;  %v1591_v20 = vrot.slane %v1553_v34, %v2952_v46 }
 0x1b4   : > { %v1341_v6 = vmul.f32 0.5, %v1333_v27  ;;  %v1334_v17 = vsub.f32 %v1310_v18, %v1326_v51 }
 0x1b5   : > { %v1556_v2 = vpack.c.bf16 %v1485_v8, %v1485_v8  ;;  %v1598_v39 = vrot.slane %v1554_v42, %v2952_v46  ;;  %v1605_v57 = vrot.slane %v1555_v60, %v2952_v46  ;;  %v1703_v22 = vrot.slane %v1591_v20, %v2952_v46 }
 0x1b6   : > { %v1349_v3 = vadd.f32 %v1341_v6, %v1325_v38  ;;  %v1342_v5 = vmul.f32 0.5, %v1334_v17 }
 0x1b7   : > { %v1612_v26 = vrot.slane %v1556_v2, %v2952_v46  ;;  %v1710_v23 = vrot.slane %v1598_v39, %v2952_v46  ;;  %v1717_v25 = vrot.slane %v1605_v57, %v2952_v46  ;;  %v1809_v15 = vunpack.c.l.b16 %v1703_v22 }
 0x1b8   : > { %vm1357_vm4 = vcmp.ge.f32.partialorder %v1349_v3, 1.0  ;;  %v1350_v53 = vadd.f32 %v1342_v5, %v1326_v51 }
 0x1b9   : > { %v1724_v32 = vrot.slane %v1612_v26, %v2952_v46  ;;  %v1810_v45 = vunpack.c.l.b16 %v1710_v23  ;;  %v1811_v19 = vunpack.c.l.b16 %v1717_v25  ;;  %v1365_v41 = vsel %vm1357_vm4, 0.0, %v1349_v3 }
 0x1ba   : > { %1373 = vst.msk [vmem:[#allocation2 + $0x20] sm:$0xff] %vm974_vm8, %v1365_v41  ;;  %v2116_v61 = vsel %vm1357_vm4, 1.0, %v2318_v43  ;;  %vm1358_vm6 = vcmp.ge.f32.partialorder %v1350_v53, 1.0 }
 0x1bb   : > { %v1812_v54 = vunpack.c.l.b16 %v1724_v32  ;;  %v1825_v48 = vrot.slane %v1810_v45, 7  ;;  %v1828_v14 = vrot.slane %v1811_v19, 6  ;;  %v1404_v56 = vmax.f32 %v1396_v24, %v2116_v61 }
 0x1bc   : > { %v1366_v1 = vsel %vm1358_vm6, 0.0, %v1350_v53  ;;  %v2117_v36 = vsel %vm1358_vm6, 1.0, %v2318_v43  ;;  %v1397_v16 = vmax.f32 %v2943_v63, %v2116_v61  ;;  %v1451_v24 = vrot.slane %v1408_v7, 1 }
 0x1bd   : > { %v1831_v33 = vrot.slane %v1812_v54, 5  ;;  %v1445_v58 = vrot.slane %v1404_v56, 1  ;;  %1374 = vst.msk [vmem:[#allocation2 + $0x28] sm:$0xff] %vm974_vm8, %v1366_v1  ;;  %v1398_v47 = vmax.f32 %v2116_v61, %v2117_v36  ;;  %v1399_v29 = vmax.f32 %v2117_v36, %v2924_v12 }
 0x1be   : > { %v1405_v35 = vmax.f32 %v1397_v16, %v2117_v36  ;;  %v1827_v4 = vsel %vm1826_vm3, %v1825_v48, %v1809_v15  ;;  %v1422_v37 = vrot.slane %v1404_v56, 7 }
 0x1bf   : > { %v1446_v9 = vsel %vm1440_vm2, %v1444_v50, %v1445_v58  ;;  %v1406_v43 = vmax.f32 %v1398_v47, %v2924_v12  ;;  %v1830_v63 = vsel %vm1829_vm5, %v1828_v14, %v1827_v4  ;;  %v1407_v28 = vmax.f32 %v1399_v29, %v2927_v0 }
 0x1c0   : > { %v1462_v59 = vmax.f32 %v1458_v11, %v1446_v9  ;;  %v1423_v52 = vrot.slane %v1405_v35, 7  ;;  %v1447_v10 = vrot.slane %v1405_v35, 1  ;;  %v1833_v62 = vsel %vm1832_vm7, %v1831_v33, %v1830_v63 }
 0x1c1   : > { %v1425_v49 = vrot.slane %v1406_v43, 7  ;;  %v1448_v13 = vrot.slane %v1406_v43, 1  ;;  %v1426_v55 = vrot.slane %v1407_v28, 7  ;;  %v1450_v11 = vrot.slane %v1407_v28, 1 }
 0x1c2   : > { %v1486_v40 = vcombine.high %v1462_v59, %v1462_v59  ;;  %v1493_v38 = vrot.slane %v1462_v59, %v2952_v46  ;;  %v1424_v21 = vsel %vm1417_vm13, %v1422_v37, %v1423_v52  ;;  %v1852_v0 = vpack.c.b16 %v1833_v62, %v1833_v62 }
 0x1c3   : > { %v1438_v12 = vsel %vm1435_vm15, 0.0, %v1424_v21  ;;  %v1449_v31 = vsel %vm1440_vm2, %v1447_v10, %v1448_v13  ;;  %v1427_v27 = vsel %vm1417_vm13, %v1425_v49, %v1426_v55  ;;  %v1452_v8 = vsel %vm1440_vm2, %v1450_v11, %v1451_v24 }
 0x1c4   : > { %v1500_v44 = vrot.slane %v1486_v40, %v2952_v46  ;;  %v1501_v34 = vcombine.high %v1493_v38, %v1493_v38  ;;  %v1557_v51 = vpack.c.bf16 %v1493_v38, %v1493_v38  ;;  %v1439_v18 = vsel %vm1435_vm15, 0.0, %v1427_v27 }
 0x1c5   : > { %v1459_v42 = vmax.f32 %v1438_v12, %v1405_v35  ;;  %v1862_v60 = vrot.slane %v1852_v0, %v2952_v46  ;;  %v1460_v39 = vmax.f32 %v1439_v18, %v1407_v28 }
 0x1c6   : > { %v1502_v20 = vcombine.high %v1500_v44, %v1500_v44  ;;  %v1558_v6 = vpack.c.bf16 %v1501_v34, %v1501_v34  ;;  %v1559_v17 = vpack.c.bf16 %v1500_v44, %v1500_v44  ;;  %v1619_v2 = vrot.slane %v1557_v51, %v2952_v46 }
 0x1c7   : > { %v1463_v57 = vmax.f32 %v1459_v42, %v1449_v31  ;;  %1889 = vst.msk [vmem:[%s2373_s25] sm:$0x3] %vm1888_vm9, %v1862_v60  ;;  %v1464_v23 = vmax.f32 %v1460_v39, %v1452_v8 }
 0x1c8   : > { %v1560_v3 = vpack.c.bf16 %v1502_v20, %v1502_v20  ;;  %v1626_v5 = vrot.slane %v1558_v6, %v2952_v46  ;;  %v1633_v30 = vrot.slane %v1559_v17, %v2952_v46  ;;  %v1731_v26 = vrot.slane %v1619_v2, %v2952_v46 }
 0x1c9   : > { %v1503_v25 = vcombine.high %v1463_v57, %v1463_v57  ;;  %v1510_v22 = vrot.slane %v1463_v57, %v2952_v46  ;;  %v1520_v61 = vcombine.high %v1464_v23, %v1464_v23  ;;  %v1527_v54 = vrot.slane %v1464_v23, %v2952_v46 }
 0x1ca   : > { %v1640_v53 = vrot.slane %v1560_v3, %v2952_v46  ;;  %v1738_v32 = vrot.slane %v1626_v5, %v2952_v46  ;;  %v1745_v45 = vrot.slane %v1633_v30, %v2952_v46  ;;  %v1813_v19 = vunpack.c.l.b16 %v1731_v26 }
 0x1cb   : > { %v1517_v41 = vrot.slane %v1503_v25, %v2952_v46  ;;  %v1518_v7 = vcombine.high %v1510_v22, %v1510_v22  ;;  %v1561_v15 = vpack.c.bf16 %v1510_v22, %v1510_v22  ;;  %v1534_v36 = vrot.slane %v1520_v61, %v2952_v46 }
 0x1cc   : > { %v1752_v48 = vrot.slane %v1640_v53, %v2952_v46  ;;  %v1814_v14 = vunpack.c.l.b16 %v1738_v32  ;;  %v1815_v56 = vunpack.c.l.b16 %v1745_v45  ;;  %v1535_v16 = vcombine.high %v1527_v54, %v1527_v54 }
 0x1cd   : > { %v1519_v1 = vcombine.high %v1517_v41, %v1517_v41  ;;  %v1562_v33 = vpack.c.bf16 %v1518_v7, %v1518_v7  ;;  %v1563_v29 = vpack.c.bf16 %v1517_v41, %v1517_v41  ;;  %v1536_v35 = vcombine.high %v1534_v36, %v1534_v36 }
 0x1ce   : > { %v1816_v50 = vunpack.c.l.b16 %v1752_v48  ;;  %v1834_v58 = vrot.slane %v1814_v14, 7  ;;  %v1836_v47 = vrot.slane %v1815_v56, 6  ;;  %v1565_v24 = vpack.c.bf16 %v1527_v54, %v1527_v54 }
 0x1cf   : > { %v1564_v4 = vpack.c.bf16 %v1519_v1, %v1519_v1  ;;  %v1566_v9 = vpack.c.bf16 %v1535_v16, %v1535_v16  ;;  %v1567_v63 = vpack.c.bf16 %v1534_v36, %v1534_v36  ;;  %v1647_v37 = vrot.slane %v1561_v15, %v2952_v46 }
 0x1d0   : > { %v1838_v43 = vrot.slane %v1816_v50, 5  ;;  %v1654_v59 = vrot.slane %v1562_v33, %v2952_v46  ;;  %v1568_v28 = vpack.c.bf16 %v1536_v35, %v1536_v35  ;;  %v1661_v52 = vrot.slane %v1563_v29, %v2952_v46 }
 0x1d1   : > { %v1668_v49 = vrot.slane %v1564_v4, %v2952_v46  ;;  %v1675_v10 = vrot.slane %v1565_v24, %v2952_v46  ;;  %v1682_v13 = vrot.slane %v1566_v9, %v2952_v46  ;;  %v1689_v62 = vrot.slane %v1567_v63, %v2952_v46 }
 0x1d2   : > { %v1759_v40 = vrot.slane %v1647_v37, %v2952_v46  ;;  %v1766_v38 = vrot.slane %v1654_v59, %v2952_v46  ;;  %v1696_v21 = vrot.slane %v1568_v28, %v2952_v46  ;;  %v1773_v55 = vrot.slane %v1661_v52, %v2952_v46 }
 0x1d3   : > { %v1780_v12 = vrot.slane %v1668_v49, %v2952_v46  ;;  %v1787_v31 = vrot.slane %v1675_v10, %v2952_v46  ;;  %v1794_v11 = vrot.slane %v1682_v13, %v2952_v46  ;;  %v1801_v0 = vrot.slane %v1689_v62, %v2952_v46 }
 0x1d4   : > { %v1817_v44 = vunpack.c.l.b16 %v1759_v40  ;;  %v1818_v34 = vunpack.c.l.b16 %v1766_v38  ;;  %v1808_v51 = vrot.slane %v1696_v21, %v2952_v46  ;;  %v1819_v27 = vunpack.c.l.b16 %v1773_v55 }
 0x1d5   : > { %v1820_v18 = vunpack.c.l.b16 %v1780_v12  ;;  %v1821_v8 = vunpack.c.l.b16 %v1787_v31  ;;  %v1822_v42 = vunpack.c.l.b16 %v1794_v11  ;;  %v1823_v60 = vunpack.c.l.b16 %v1801_v0 }
 0x1d6   : > { %v1835_v20 = vsel %vm1826_vm3, %v1834_v58, %v1813_v19  ;;  %v1840_v6 = vrot.slane %v1818_v34, 7  ;;  %v1824_v17 = vunpack.c.l.b16 %v1808_v51  ;;  %v1842_v39 = vrot.slane %v1819_v27, 6 }
 0x1d7   : > { %v1837_v2 = vsel %vm1829_vm5, %v1836_v47, %v1835_v20  ;;  %v1844_v57 = vrot.slane %v1820_v18, 5  ;;  %v1846_v30 = vrot.slane %v1822_v42, 7  ;;  %v1848_v26 = vrot.slane %v1823_v60, 6 }
 0x1d8   : > { %v1839_v3 = vsel %vm1832_vm7, %v1838_v43, %v1837_v2  ;;  %v1841_v5 = vsel %vm1826_vm3, %v1840_v6, %v1817_v44  ;;  %v1850_v25 = vrot.slane %v1824_v17, 5 }
 0x1d9   : > { %v1843_v23 = vsel %vm1829_vm5, %v1842_v39, %v1841_v5  ;;  %v1853_v22 = vpack.c.b16 %v1839_v3, %v1839_v3  ;;  %v1847_v32 = vsel %vm1826_vm3, %v1846_v30, %v1821_v8 }
 0x1da   : > { %v1845_v53 = vsel %vm1832_vm7, %v1844_v57, %v1843_v23  ;;  %v1849_v45 = vsel %vm1829_vm5, %v1848_v26, %v1847_v32 }
 0x1db   : > { %v1854_v19 = vpack.c.b16 %v1845_v53, %v1845_v53  ;;  %v1869_v41 = vrot.slane %v1853_v22, %v2952_v46  ;;  %v1851_v7 = vsel %vm1832_vm7, %v1850_v25, %v1849_v45 }
 0x1dc   : > { %v1855_v61 = vpack.c.b16 %v1851_v7, %v1851_v7 }
 0x1dd   : > { %v1876_v54 = vrot.slane %v1854_v19, %v2952_v46  ;;  %1890 = vst.msk [vmem:[%s2373_s25 + $0x2] sm:$0x3] %vm1888_vm9, %v1869_v41 }
 0x1de   : > { %v1883_v48 = vrot.slane %v1855_v61, %v2952_v46 }
 0x1df   : > { %1891 = vst.msk [vmem:[%s2373_s25 + $0x4] sm:$0x3] %vm1888_vm9, %v1876_v54 }
 0x1e0   : > { %1892 = vst.msk [vmem:[%s2373_s25 + $0x6] sm:$0x3] %vm1888_vm9, %v1883_v48 }
 0x1e1 PF: > { %s13_s16 = sadd.s32 1, %s2312_s16   ;;  %s3078_s12 = smov %s2304_s14 }
 0x1e2   : > { %p10_p7 = scmp.ge.s32.totalorder %s13_s16, 10   ;;  %s3079_s13 = smov %s2308_s15 }
 0x1e3   : > { %s3080_s14 = smov %s3083_s17  ;;  %s3081_s15 = smov %s3087_s18 }
 0x1e4   :  { %12 = sbr.rel (!%p10_p7) target bundleno = 3 (0x3), region = 68 }

// kernel: spikformer_block_forward.9
= control target key start
LH: loop header
LB: loop body
LE: loop exit
PB: predicated region body
PF: predicated region fallthrough
CT: control target
= control target key end

     0   :  { %s1951_s13 = smov 0   ;;  %s2268_s0 = inlined_call_operand.vmem [shape: bf16[4,32,64], index: 0, kind: input, shape index: {}]   ;;  %s2269_s1 = inlined_call_operand.vmem [shape: f32[64,64], index: 1, kind: input, shape index: {}]   ;;  %s2270_s2 = inlined_call_operand.vmem [shape: bf16[64,192], index: 2, kind: input, shape index: {}]   ;;  %s2271_s3 = inlined_call_operand.vmem [shape: f32[1,192], index: 3, kind: input, shape index: {}]   ;;  %s2272_s4 = inlined_call_operand.vmem [shape: bf16[64,64], index: 4, kind: input, shape index: {}]   ;;  %s2273_s5 = inlined_call_operand.vmem [shape: f32[1,64], index: 5, kind: input, shape index: {}]   ;;  %s2274_s6 = inlined_call_operand.vmem [shape: bf16[64,256], index: 6, kind: input, shape index: {}]   ;;  %s2275_s7 = inlined_call_operand.vmem [shape: f32[1,256], index: 7, kind: input, shape index: {}]   ;;  %s2276_s8 = inlined_call_operand.vmem [shape: bf16[256,64], index: 8, kind: input, shape index: {}]   ;;  %s2277_s9 = inlined_call_operand.vmem [shape: f32[1,64], index: 9, kind: input, shape index: {}]   ;;  %s2278_s10 = inlined_call_operand.vmem [shape: bf16[4,32,64], index: 10, kind: output, shape index: {}]  }
   0x1 LB: > { %s1592_s14 = sadd.s32 4294967295, %s1888_s13   ;;  %p1596_p0 = scmp.ge.s32.totalorder %s1888_s13, 1  ;;  %s1888_s13 = sphi %s1951_s13, %s20_s13  }
   0x2   : > { %p312_p1 = scmp.lt.s32.totalorder %s1888_s13, 5 }
   0x4   : > { %p313_p2 = pnand %p1596_p0, %p312_p1 }
   0x5   : > { %p350_p3 = scmp.lt.s32.totalorder (!%p313_p2), %s1592_s14, 3  ;;  %p1601_p4 = scmp.ne.s32.totalorder (!%p313_p2), %s1592_s14, 0 }
   0x6   : > { %316 = sbr.rel (%p313_p2) target bundleno = 1664 (0x680), region = 60 }
   0xd   : > { %s351_s15 = scalar_select %p350_p3, %s1592_s14, 3 }
   0xe   : > { %364 = sbr.rel (%p1601_p4) target bundleno = 29 (0x1d), region = 64  ;;  %vm366_vm0 = vcmask (!%p1601_p4), 523264   ;;  %v1890_v0 = vmov (!%p1601_p4), 0.0  }
   0xf   : > { %s1704_s16 = sshll.u32 %s351_s15, 4  ;;  %365 = vst [vmem:[#allocation2] sm:$0xff] (!%p1601_p4), %v1890_v0  ;;  %368 = vst [vmem:[#allocation2 + $0x10] sm:$0xff] (!%p1601_p4), %v1890_v0 }
  0x10   : > { %s1962_s19 = scalar_lea.vmem %s2268_s0, %s1704_s16  ;;  %s1967_s22 = scalar_lea.vmem %s2278_s10, %s1704_s16  ;;  %370 = vst [vmem:[#allocation2 + $0x20] sm:$0xff] (!%p1601_p4), %v1890_v0  ;;  %372 = vst [vmem:[#allocation2 + $0x30] sm:$0xff] (!%p1601_p4), %v1890_v0 }
  0x11   : > { %382 = vst [vmem:[#allocation5] sm:$0xff] (!%p1601_p4), %v1890_v0  ;;  %383 = vst [vmem:[#allocation5 + $0x8] sm:$0xff] (!%p1601_p4), %v1890_v0 }
  0x12   : > { %384 = vst [vmem:[#allocation5 + $0x10] sm:$0xff] (!%p1601_p4), %v1890_v0  ;;  %385 = vst [vmem:[#allocation5 + $0x18] sm:$0xff] (!%p1601_p4), %v1890_v0 }
  0x13   : > { %386 = vst [vmem:[#allocation5 + $0x20] sm:$0xff] (!%p1601_p4), %v1890_v0  ;;  %387 = vst [vmem:[#allocation5 + $0x28] sm:$0xff] (!%p1601_p4), %v1890_v0 }
  0x14   : > { %388 = vst [vmem:[#allocation5 + $0x30] sm:$0xff] (!%p1601_p4), %v1890_v0  ;;  %389 = vst [vmem:[#allocation5 + $0x38] sm:$0xff] (!%p1601_p4), %v1890_v0 }
  0x15   : > { %367 = vst.msk [vmem:[#allocation2 + $0x8] sm:$0xff] %vm366_vm0, %v1890_v0  ;;  %369 = vst.msk [vmem:[#allocation2 + $0x18] sm:$0xff] %vm366_vm0, %v1890_v0 }
  0x16   : > { %371 = vst.msk [vmem:[#allocation2 + $0x28] sm:$0xff] %vm366_vm0, %v1890_v0  ;;  %373 = vst.msk [vmem:[#allocation2 + $0x38] sm:$0xff] %vm366_vm0, %v1890_v0 }
  0x17   : > { %374 = vst.msk [vmem:[#allocation3] sm:$0xff] %vm366_vm0, %v1890_v0  ;;  %375 = vst.msk [vmem:[#allocation3 + $0x8] sm:$0xff] %vm366_vm0, %v1890_v0 }
  0x18   : > { %376 = vst.msk [vmem:[#allocation3 + $0x10] sm:$0xff] %vm366_vm0, %v1890_v0  ;;  %377 = vst.msk [vmem:[#allocation3 + $0x18] sm:$0xff] %vm366_vm0, %v1890_v0 }
  0x19   : > { %378 = vst.msk [vmem:[#allocation4] sm:$0xff] %vm366_vm0, %v1890_v0  ;;  %379 = vst.msk [vmem:[#allocation4 + $0x8] sm:$0xff] %vm366_vm0, %v1890_v0 }
  0x1a   : > { %380 = vst.msk [vmem:[#allocation4 + $0x10] sm:$0xff] %vm366_vm0, %v1890_v0  ;;  %381 = vst.msk [vmem:[#allocation4 + $0x18] sm:$0xff] %vm366_vm0, %v1890_v0 }
  0x1b   : > { %390 = vst.msk [vmem:[#allocation6] sm:$0xff] %vm366_vm0, %v1890_v0  ;;  %391 = vst.msk [vmem:[#allocation6 + $0x8] sm:$0xff] %vm366_vm0, %v1890_v0 }
  0x1c   : > { %392 = vst.msk [vmem:[#allocation6 + $0x10] sm:$0xff] %vm366_vm0, %v1890_v0  ;;  %393 = vst.msk [vmem:[#allocation6 + $0x18] sm:$0xff] %vm366_vm0, %v1890_v0 }
  0x1d PF: > { %v1834_v1 = vld [vmem:[%s2270_s2 + $0x4] ss:$8 sps:$4 sm:$0xff]   ;;  %v1836_v2 = vld [vmem:[%s2270_s2] ss:$8 sps:$4 sm:$0xff]   ;;  %v1891_v3 = vmov 0   ;;  %vm468_vm1 = vcmask 523264   ;;  %v408_v12 = vlaneseq }
  0x1e   : > { %507 = vmatprep.mubr.bf16.mxu0 %v1891_v3  ;;  %475 = vmatprep.subr.bf16.mxu0 %v1834_v1  ;;  %v1837_v4 = vld [vmem:[%s2270_s2 + $0x14] ss:$8 sps:$4 sm:$0xff]   ;;  %v1839_v5 = vld [vmem:[%s2270_s2 + $0x10] ss:$8 sps:$4 sm:$0xff]   ;;  %v1840_v6 = vld [vmem:[%s2270_s2 + $0x24] ss:$8 sps:$4 sm:$0xff]  }
  0x1f   : > { %476 = vmatpush1.bf16.msra.mxu0 %v1836_v2  ;;  %v1842_v7 = vld [vmem:[%s2270_s2 + $0x20] ss:$8 sps:$4 sm:$0xff]   ;;  %v1843_v8 = vld [vmem:[%s2270_s2 + $0x34] ss:$8 sps:$4 sm:$0xff]   ;;  %v1845_v9 = vld [vmem:[%s2270_s2 + $0x30] ss:$8 sps:$4 sm:$0xff]  }
  0x20   : > { %477 = vmatprep.subr.bf16.mxu0 %v1837_v4  ;;  %v2011_v10 = vld [vmem:[%s1962_s19] sm:$0xff]   ;;  %v2014_v11 = vld [vmem:[%s1962_s19 + $0x8] sm:$0xff]   ;;  %v2021_v13 = vshrl.u32 %v408_v12, 7  ;;  %v530_v26 = vld [vmem:[#allocation2 + $0x10] sm:$0xff]  ;;  %v1892_v51 = vmov 0.0   ;;  %s1894_s19 = smov 64  }
  0x21   : > { %v406_v15 = vld [vmem:[%s2271_s3] sm:$0x3]  ;;  %v533_v46 = vld [vmem:[#allocation2 + $0x28] sm:$0xff]  ;;  %v534_v49 = vld [vmem:[#allocation2 + $0x30] sm:$0xff]  ;;  %v1893_v2 = vmov 1.0|1.0  }
  0x22   : > { %v410_v14 = vsub.s32 0, %v2021_v13  ;;  %v414_v16 = vsub.s32 1, %v2021_v13  ;;  %v528_v20 = vld [vmem:[#allocation2] sm:$0xff]  ;;  %v535_v57 = vld [vmem:[#allocation2 + $0x38] sm:$0xff]  ;;  %vm624_vm12 = vcmask 130048   ;;  %vm1895_vm13 = vmmov 0  }
  0x23   : > { %478 = vmatpush1.bf16.msra.mxu0 %v1839_v5  ;;  %v532_v41 = vld [vmem:[#allocation2 + $0x20] sm:$0xff] }
  0x24   : > { %479 = vmatprep.subr.bf16.mxu0 %v1840_v6  ;;  %v411_v17 = vrot.slane %v406_v15, %v410_v14  ;;  %v415_v18 = vrot.slane %v406_v15, %v414_v16  ;;  %v529_v23 = vld [vmem:[#allocation2 + $0x8] sm:$0xff]  ;;  %v531_v30 = vld [vmem:[#allocation2 + $0x18] sm:$0xff] }
  0x27   : > { %480 = vmatpush1.bf16.msra.mxu0 %v1842_v7 }
  0x28   : > { %481 = vmatprep.subr.bf16.mxu0 %v1843_v8 }
  0x2b   : > { %482 = vmatpush1.bf16.msra.mxu0 %v1845_v9 }
  0x2e   : > { %1612 = vmatmul.mubr.msk.bf16.vlgmr.msra.gmra.mrb[0].mxu0 %vm468_vm1, %v2011_v10 }
  0x2f   : > { %517 = vmatprep.mubr.bf16.mxu0 %v1891_v3 }
  0x36   : > { %1613 = vmatmul.mubr.msk.bf16.gmra.mrb[4].mxu0 %vm468_vm1, %v2014_v11 }
 0x101   : > { %v509_v19 = vpop.f32.mrb[0].mxu0 }
 0x102   : > { %v510_v21 = vadd.f32 %v509_v19, %v411_v17  ;;  %v511_v22 = vpop.f32.mrb[1].mxu0 }
 0x103   : > { %v512_v24 = vadd.f32 %v511_v22, %v415_v18  ;;  %v513_v25 = vpop.f32.mrb[2].mxu0 }
 0x104   : > { %v536_v27 = vsub.f32 %v510_v21, %v528_v20  ;;  %v514_v28 = vadd.f32 %v513_v25, %v411_v17  ;;  %v515_v29 = vpop.f32.mrb[3].mxu0 }
 0x105   : > { %v537_v31 = vsub.f32 %v512_v24, %v529_v23  ;;  %v516_v32 = vadd.f32 %v515_v29, %v415_v18 }
 0x106   : > { %v544_v33 = vmul.f32 0.5, %v536_v27  ;;  %v538_v34 = vsub.f32 %v514_v28, %v530_v26 }
 0x107   : > { %v545_v35 = vmul.f32 0.5, %v537_v31  ;;  %v539_v36 = vsub.f32 %v516_v32, %v531_v30 }
 0x108   : > { %v552_v37 = vadd.f32 %v544_v33, %v528_v20  ;;  %v546_v38 = vmul.f32 0.5, %v538_v34 }
 0x109   : > { %v547_v39 = vmul.f32 0.5, %v539_v36  ;;  %v519_v40 = vpop.f32.mrb[4].mxu0  ;;  %v553_v42 = vadd.f32 %v545_v35, %v529_v23  ;;  %v801_v36 = vld [vmem:[%s2269_s1 + $0x10] sm:$0xff] }
 0x10a   : > { %v554_v43 = vadd.f32 %v546_v38, %v530_v26  ;;  %v520_v44 = vadd.f32 %v519_v40, %v411_v17  ;;  %v521_v45 = vpop.f32.mrb[5].mxu0  ;;  %vm560_vm2 = vcmp.ge.f32.partialorder %v552_v37, 1.0  ;;  %v800_v40 = vld [vmem:[%s2269_s1 + $0x8] sm:$0xff] }
 0x10b   : > { %v522_v47 = vadd.f32 %v521_v45, %v415_v18  ;;  %v523_v48 = vpop.f32.mrb[6].mxu0  ;;  %v555_v50 = vadd.f32 %v547_v39, %v531_v30  ;;  %vm561_vm3 = vcmp.ge.f32.partialorder %v553_v42, 1.0  ;;  %v1614_v52 = vsel %vm560_vm2, 1.0, %v1892_v51  ;;  %v799_v39 = vld [vmem:[%s2269_s1] sm:$0xff] }
 0x10c   : > { %v540_v53 = vsub.f32 %v520_v44, %v532_v41  ;;  %v524_v54 = vadd.f32 %v523_v48, %v411_v17  ;;  %v569_v55 = vsel %vm561_vm3, 0.0, %v553_v42  ;;  %v525_v56 = vpop.f32.mrb[7].mxu0  ;;  %vm562_vm4 = vcmp.ge.f32.partialorder %v554_v43, 1.0 }
 0x10d   : > { %v541_v58 = vsub.f32 %v522_v47, %v533_v46  ;;  %vm563_vm5 = vcmp.ge.f32.partialorder %v555_v50, 1.0  ;;  %577 = vst.msk [vmem:[#allocation2 + $0x8] sm:$0xff] %vm468_vm1, %v569_v55  ;;  %v526_v59 = vadd.f32 %v525_v56, %v415_v18  ;;  %v570_v60 = vsel %vm562_vm4, 0.0, %v554_v43  ;;  %v804_v55 = vld [vmem:[%s2269_s1 + $0x28] sm:$0xff] }
 0x10e   : > { %v548_v61 = vmul.f32 0.5, %v540_v53  ;;  %v542_v62 = vsub.f32 %v524_v54, %v534_v49  ;;  %v571_v63 = vsel %vm563_vm5, 0.0, %v555_v50  ;;  %vm1622_vm6 = vmpackc.low %vm563_vm5, %vm561_vm3  ;;  %578 = vst [vmem:[#allocation2 + $0x10] sm:$0xff] %v570_v60  ;;  %v1616_v0 = vsel %vm562_vm4, 1.0, %v1892_v51  ;;  %v805_v50 = vld [vmem:[%s2269_s1 + $0x30] sm:$0xff]  ;;  %v803_v54 = vld [vmem:[%s2269_s1 + $0x20] sm:$0xff] }
 0x10f   : > { %v549_v1 = vmul.f32 0.5, %v541_v58  ;;  %579 = vst.msk [vmem:[#allocation2 + $0x18] sm:$0xff] %vm468_vm1, %v571_v63  ;;  %1764 = vmatprep.subr.msk.bf16.mxu1 %vm1622_vm6, %v1893_v2  ;;  %v543_v4 = vsub.f32 %v526_v59, %v535_v57  ;;  %v2040_v5 = vpack.c.bf16 %v1616_v0, %v1614_v52  ;;  %v568_v6 = vsel %vm560_vm2, 0.0, %v552_v37  ;;  %v802_v37 = vld [vmem:[%s2269_s1 + $0x18] sm:$0xff] }
 0x110   : > { %v556_v7 = vadd.f32 %v548_v61, %v532_v41  ;;  %v550_v8 = vmul.f32 0.5, %v542_v62  ;;  %1765 = vmatpush3.bf16.msk.msra.mxu1 %vm1622_vm6, %v1893_v2  ;;  %576 = vst [vmem:[#allocation2] sm:$0xff] %v568_v6  ;;  %v806_v52 = vld [vmem:[%s2269_s1 + $0x38] sm:$0xff] }
 0x111   : > { %v557_v9 = vadd.f32 %v549_v1, %v533_v46  ;;  %v551_v12 = vmul.f32 0.5, %v543_v4  ;;  %605 = vrot.lane.b32.xlu0 %v2040_v5, %s1894_s19 }
 0x112   : > { %v558_v15 = vadd.f32 %v550_v8, %v534_v49  ;;  %vm564_vm7 = vcmp.ge.f32.partialorder %v556_v7, 1.0 }
 0x113   : > { %v559_v17 = vadd.f32 %v551_v12, %v535_v57  ;;  %vm565_vm8 = vcmp.ge.f32.partialorder %v557_v9, 1.0  ;;  %v572_v18 = vsel %vm564_vm7, 0.0, %v556_v7  ;;  %v1618_v19 = vsel %vm564_vm7, 1.0, %v1892_v51 }
 0x114   : > { %v573_v20 = vsel %vm565_vm8, 0.0, %v557_v9  ;;  %vm566_vm9 = vcmp.ge.f32.partialorder %v558_v15, 1.0  ;;  %580 = vst [vmem:[#allocation2 + $0x20] sm:$0xff] %v572_v18 }
 0x115   : > { %vm567_vm10 = vcmp.ge.f32.partialorder %v559_v17, 1.0  ;;  %581 = vst.msk [vmem:[#allocation2 + $0x28] sm:$0xff] %vm468_vm1, %v573_v20  ;;  %v574_v21 = vsel %vm566_vm9, 0.0, %v558_v15  ;;  %v1620_v22 = vsel %vm566_vm9, 1.0, %v1892_v51 }
 0x116   : > { %v575_v23 = vsel %vm567_vm10, 0.0, %v559_v17  ;;  %vm1628_vm11 = vmpackc.low %vm567_vm10, %vm565_vm8  ;;  %582 = vst [vmem:[#allocation2 + $0x30] sm:$0xff] %v574_v21  ;;  %v2048_v24 = vpack.c.bf16 %v1620_v22, %v1618_v19 }
 0x117   : > { %583 = vst.msk [vmem:[#allocation2 + $0x38] sm:$0xff] %vm468_vm1, %v575_v23  ;;  %1774 = vmatprep.subr.msk.bf16.mxu1 %vm1628_vm11, %v1893_v2 }
 0x118   : > { %703 = vrot.lane.b32.xlu0 %v2048_v24, %s1894_s19 }
 0x183   : > { %v606_v25 = vpop.permute.xlu0 %605 }
 0x184   : > { %608 = vxpose.xlu1.c.b16.start.end [1/1] (short) (narrow) %v606_v25, 64 }
 0x18a   : > { %v704_v26 = vpop.permute.xlu0 %703 }
 0x191   : > { %706 = vxpose.xlu1.c.b16.start.end [1/1] (short) (narrow) %v704_v26, 64 }
 0x1ea   : > { %v616_v27 = vpop.trf.xlu1 }
 0x1eb   : > { %1766 = vmatprep.mubr.msk.bf16.mxu1 %vm624_vm12, %v616_v27 }
 0x1ee   : > { %v617_v28 = vpop.trf.xlu1 }
 0x1ef   : > { %1767 = vmatmul.mubr.msk.bf16.vlgmr.msra.gmra.mrb[0].mxu1 %vm624_vm12, %v617_v28 }
 0x1f0   : > { %1775 = vmatpush3.bf16.msk.msra.mxu1 %vm1628_vm11, %v1893_v2 }
 0x1f1   : > { %1784 = vmatprep.subr.bf16.mxu1 %v1892_v51 }
 0x1f2   : > { %v618_v29 = vpop.trf.xlu1 }
 0x1f3   : > { %1770 = vmatprep.mubr.msk.bf16.mxu1 %vm624_vm12, %v618_v29  ;;  %v1849_v29 = vld [vmem:[%s2272_s4 + $0x8] sm:$0xff]  }
 0x1f6   : > { %v619_v30 = vpop.trf.xlu1 }
 0x1f7   : > { %1771 = vmatmul.mubr.msk.bf16.gmra.mrb[4].mxu1 %vm624_vm12, %v619_v30  ;;  %v1850_v30 = vld [vmem:[%s2272_s4 + $0x10] sm:$0xff]  }
 0x1fa   : > { %v714_v31 = vpop.trf.xlu1 }
 0x1fb   : > { %1776 = vmatprep.mubr.msk.bf16.mxu1 %vm624_vm12, %v714_v31  ;;  %v919_v31 = vld [vmem:[#allocation3] sm:$0xff] }
 0x1fe   : > { %v715_v32 = vpop.trf.xlu1 }
 0x1ff   : > { %1777 = vmatmul.mubr.msk.bf16.vlgmr.msra.gmra.mrb[8].mxu1 %vm624_vm12, %v715_v32 }
 0x202   : > { %v716_v33 = vpop.trf.xlu1 }
 0x203   : > { %1780 = vmatprep.mubr.msk.bf16.mxu1 %vm624_vm12, %v716_v33  ;;  %v920_v33 = vld [vmem:[#allocation3 + $0x8] sm:$0xff] }
 0x206   : > { %v717_v34 = vpop.trf.xlu1 }
 0x207   : > { %1781 = vmatmul.mubr.msk.bf16.gmra.mrb[12].mxu1 %vm624_vm12, %v717_v34 }
 0x208   : > { %1792 = vmatprep.mubr.msk.bf16.mxu1 %vm1895_vm13, %v1892_v51 }
 0x2c2   : > { %v1768_v35 = vpop.f32.mrb[0].mxu1 }
 0x2c3   : > { %v671_v38 = vpop.f32.mrb[1].mxu1  ;;  %v809_v42 = vmul.f32 %v1768_v35, %v801_v36 }
 0x2c4   : > { %v1769_v41 = vpop.f32.mrb[2].mxu1  ;;  %v807_v45 = vmul.f32 %v799_v39, %v671_v38 }
 0x2c5   : > { %v810_v43 = vmul.f32 %v1769_v41, %v802_v37  ;;  %v674_v44 = vpop.f32.mrb[3].mxu1 }
 0x2c6   : > { %v808_v46 = vmul.f32 %v800_v40, %v674_v44 }
 0x2c7   : > { %v824_v47 = vpack.c.bf16 %v810_v43, %v809_v42 }
 0x2c8   : > { %v823_v48 = vpack.c.bf16 %v808_v46, %v807_v45 }
 0x2ca   : > { %v1772_v49 = vpop.f32.mrb[4].mxu1  ;;  %1785 = vmatpush3.bf16.msra.mxu1 %v823_v48  ;;  %v921_v48 = vld [vmem:[#allocation3 + $0x10] sm:$0xff] }
 0x2cb   : > { %v687_v53 = vpop.f32.mrb[5].mxu1  ;;  %1786 = vmatprep.subr.bf16.mxu1 %v1892_v51  ;;  %v813_v57 = vmul.f32 %v1772_v49, %v805_v50 }
 0x2cc   : > { %v1773_v56 = vpop.f32.mrb[6].mxu1  ;;  %v811_v60 = vmul.f32 %v803_v54, %v687_v53 }
 0x2cd   : > { %v814_v58 = vmul.f32 %v1773_v56, %v806_v52  ;;  %v690_v59 = vpop.f32.mrb[7].mxu1 }
 0x2ce   : > { %v812_v61 = vmul.f32 %v804_v55, %v690_v59  ;;  %1787 = vmatpush3.bf16.msra.mxu1 %v824_v47 }
 0x2cf   : > { %v826_v62 = vpack.c.bf16 %v814_v58, %v813_v57  ;;  %1788 = vmatprep.subr.bf16.mxu1 %v1892_v51 }
 0x2d0   : > { %v825_v63 = vpack.c.bf16 %v812_v61, %v811_v60 }
 0x2d2   : > { %v1778_v0 = vpop.f32.mrb[8].mxu1  ;;  %1789 = vmatpush3.bf16.msra.mxu1 %v825_v63 }
 0x2d3   : > { %v768_v1 = vpop.f32.mrb[9].mxu1  ;;  %1790 = vmatprep.subr.bf16.mxu1 %v1892_v51  ;;  %v817_v6 = vmul.f32 %v1778_v0, %v801_v36 }
 0x2d4   : > { %v1779_v4 = vpop.f32.mrb[10].mxu1  ;;  %v815_v9 = vmul.f32 %v799_v39, %v768_v1 }
 0x2d5   : > { %v818_v7 = vmul.f32 %v1779_v4, %v802_v37  ;;  %v771_v8 = vpop.f32.mrb[11].mxu1  ;;  %v1854_v4 = vld [vmem:[%s2274_s6 + $0x4] ss:$8 sps:$4 sm:$0xff]  }
 0x2d6   : > { %v816_v12 = vmul.f32 %v800_v40, %v771_v8  ;;  %1791 = vmatpush3.bf16.msra.mxu1 %v826_v62  ;;  %v1855_v8 = vld [vmem:[%s2274_s6 + $0x10] ss:$8 sps:$4 sm:$0xff]  }
 0x2d7   : > { %v828_v15 = vpack.c.bf16 %v818_v7, %v817_v6  ;;  %1796 = vmatprep.subr.bf16.mxu1 %v1892_v51  ;;  %v1852_v6 = vld [vmem:[%s2274_s6] ss:$8 sps:$4 sm:$0xff]   ;;  %v1857_v7 = vld [vmem:[%s2274_s6 + $0x14] ss:$8 sps:$4 sm:$0xff]  }
 0x2d8   : > { %v827_v17 = vpack.c.bf16 %v816_v12, %v815_v9  ;;  %v1860_v9 = vld [vmem:[%s2274_s6 + $0x24] ss:$8 sps:$4 sm:$0xff]   ;;  %v1858_v12 = vld [vmem:[%s2274_s6 + $0x20] ss:$8 sps:$4 sm:$0xff]  }
 0x2d9   : > { %1793 = vmatmul.mubr.msk.bf16.vlgmr.msra.gmra.mrb[16].mxu1 %vm468_vm1, %v2040_v5  ;;  %v1848_v5 = vld [vmem:[%s2272_s4] sm:$0xff]  }
 0x2da   : > { %v1782_v18 = vpop.f32.mrb[12].mxu1  ;;  %1797 = vmatpush3.bf16.msra.mxu1 %v827_v17  ;;  %1804 = vmatprep.mubr.msk.bf16.mxu1 %vm1895_vm13, %v1892_v51  ;;  %v1861_v17 = vld [vmem:[%s2274_s6 + $0x30] ss:$8 sps:$4 sm:$0xff]  }
 0x2db   : > { %v784_v19 = vpop.f32.mrb[13].mxu1  ;;  %1798 = vmatprep.subr.bf16.mxu1 %v1892_v51  ;;  %v821_v21 = vmul.f32 %v1782_v18, %v805_v50  ;;  %1808 = vmatprep.subr.bf16.mxu0 %v1848_v5  ;;  %v922_v50 = vld [vmem:[#allocation3 + $0x18] sm:$0xff]  ;;  %v1864_v18 = vld [vmem:[%s2276_s8 + $0x40] sm:$0xff]  }
 0x2dc   : > { %v1783_v20 = vpop.f32.mrb[14].mxu1  ;;  %v819_v25 = vmul.f32 %v803_v54, %v784_v19  ;;  %1809 = vmatpush3.bf16.msra.mxu0 %v1848_v5  ;;  %v1865_v19 = vld [vmem:[%s2276_s8] sm:$0xff]  }
 0x2dd   : > { %v822_v22 = vmul.f32 %v1783_v20, %v806_v52  ;;  %v787_v23 = vpop.f32.mrb[15].mxu1  ;;  %1810 = vmatprep.subr.bf16.mxu0 %v1849_v29  ;;  %v1866_v20 = vld [vmem:[%s2276_s8 + $0x48] sm:$0xff]  }
 0x2de   : > { %v820_v26 = vmul.f32 %v804_v55, %v787_v23  ;;  %1799 = vmatpush3.bf16.msra.mxu1 %v828_v15  ;;  %v1863_v15 = vld [vmem:[%s2274_s6 + $0x34] ss:$8 sps:$4 sm:$0xff]  }
 0x2df   : > { %v830_v27 = vpack.c.bf16 %v822_v22, %v821_v21  ;;  %1800 = vmatprep.subr.bf16.mxu1 %v1892_v51  ;;  %v1867_v21 = vld [vmem:[%s2276_s8 + $0x8] sm:$0xff]   ;;  %v1868_v22 = vld [vmem:[%s2276_s8 + $0x50] sm:$0xff]  }
 0x2e0   : > { %v829_v28 = vpack.c.bf16 %v820_v26, %v819_v25  ;;  %1811 = vmatpush3.bf16.msra.mxu0 %v1849_v29  ;;  %v1869_v23 = vld [vmem:[%s2276_s8 + $0x10] sm:$0xff]   ;;  %v1870_v25 = vld [vmem:[%s2276_s8 + $0x58] sm:$0xff]  }
 0x2e1   : > { %1812 = vmatprep.subr.bf16.mxu0 %v1850_v30  ;;  %v1871_v26 = vld [vmem:[%s2276_s8 + $0x18] sm:$0xff]   ;;  %v1053_v29 = vld [vmem:[#allocation4 + $0x10] sm:$0xff] }
 0x2e2   : > { %1801 = vmatpush3.bf16.msra.mxu1 %v829_v28  ;;  %v1640_v28 = vld [vmem:[%s2273_s5] ss:$0 sm:$0xff] }
 0x2e3   : > { %1802 = vmatprep.subr.bf16.mxu1 %v1892_v51 }
 0x2e4   : > { %1813 = vmatpush3.bf16.msra.mxu0 %v1850_v30 }
 0x2e6   : > { %1803 = vmatpush3.bf16.msra.mxu1 %v830_v27  ;;  %v1872_v27 = vld [vmem:[%s2276_s8 + $0x60] sm:$0xff]  }
 0x2e7   : > { %1163 = vmatprep.subr.bf16.mxu1 %v1854_v4 }
 0x2e9   : > { %1805 = vmatmul.mubr.msk.bf16.vlgmr.msra.gmra.mrb[20].mxu1 %vm468_vm1, %v2048_v24  ;;  %v1851_v24 = vld [vmem:[%s2272_s4 + $0x18] sm:$0xff]  }
 0x2ea   : > { %1195 = vmatprep.mubr.bf16.mxu1 %v1891_v3  ;;  %1814 = vmatprep.subr.bf16.mxu0 %v1851_v24 }
 0x2eb   : > { %1815 = vmatpush3.bf16.msra.mxu0 %v1851_v24  ;;  %1164 = vmatpush1.bf16.msra.mxu1 %v1852_v6 }
 0x2ec   : > { %1165 = vmatprep.subr.bf16.mxu1 %v1857_v7  ;;  %1736 = vmatprep.subr.bf16.mxu0 %v1864_v18  ;;  %v1873_v7 = vld [vmem:[%s2276_s8 + $0x20] sm:$0xff]  }
 0x2ed   : > { %v1105_v18 = vld [vmem:[%s2275_s7] sm:$0x3] }
 0x2ef   : > { %1166 = vmatpush1.bf16.msra.mxu1 %v1855_v8  ;;  %v1874_v8 = vld [vmem:[%s2276_s8 + $0x68] sm:$0xff]  }
 0x2f0   : > { %1167 = vmatprep.subr.bf16.mxu1 %v1860_v9  ;;  %v1875_v9 = vld [vmem:[%s2276_s8 + $0x28] sm:$0xff]  }
 0x2f3   : > { %1168 = vmatpush1.bf16.msra.mxu1 %v1858_v12  ;;  %v1877_v12 = vld [vmem:[%s2276_s8 + $0x30] sm:$0xff]  }
 0x2f4   : > { %1169 = vmatprep.subr.bf16.mxu1 %v1863_v15  ;;  %v1878_v15 = vld [vmem:[%s2276_s8 + $0x78] sm:$0xff]  }
 0x2f7   : > { %1170 = vmatpush1.bf16.msra.mxu1 %v1861_v17  ;;  %v1879_v17 = vld [vmem:[%s2276_s8 + $0x38] sm:$0xff]  }
 0x3ac   : > { %v868_v32 = vpop.f32.mrb[16].mxu1 }
 0x3ad   : > { %v923_v34 = vsub.f32 %v868_v32, %v919_v31  ;;  %v1794_v35 = vpop.f32.mrb[17].mxu1 }
 0x3ae   : > { %v871_v36 = vpop.f32.mrb[18].mxu1 }
 0x3af   : > { %v927_v37 = vmul.f32 0.5, %v923_v34  ;;  %v924_v38 = vsub.f32 %v871_v36, %v920_v33  ;;  %v1795_v39 = vpop.f32.mrb[19].mxu1  ;;  %v1054_v34 = vld [vmem:[#allocation4 + $0x18] sm:$0xff] }
 0x3b1   : > { %v931_v40 = vadd.f32 %v927_v37, %v919_v31  ;;  %v928_v41 = vmul.f32 0.5, %v924_v38  ;;  %v1051_v31 = vld [vmem:[#allocation4] sm:$0xff]  ;;  %v1052_v38 = vld [vmem:[#allocation4 + $0x8] sm:$0xff] }
 0x3b3   : > { %vm935_vm14 = vcmp.ge.f32.partialorder %v931_v40, 0.5  ;;  %v932_v42 = vadd.f32 %v928_v41, %v920_v33 }
 0x3b4   : > { %v939_v43 = vsel %vm935_vm14, 0.0, %v931_v40  ;;  %v1636_v44 = vsel %vm935_vm14, 1.0, %v1892_v51 }
 0x3b5   : > { %943 = vst.msk [vmem:[#allocation3] sm:$0xff] %vm468_vm1, %v939_v43  ;;  %vm936_vm15 = vcmp.ge.f32.partialorder %v932_v42, 0.5 }
 0x3b6   : > { %v940_v45 = vsel %vm936_vm15, 0.0, %v932_v42  ;;  %v1637_v46 = vsel %vm936_vm15, 1.0, %v1892_v51 }
 0x3b7   : > { %944 = vst.msk [vmem:[#allocation3 + $0x8] sm:$0xff] %vm468_vm1, %v940_v45  ;;  %v955_v47 = vpack.c.bf16 %v1637_v46, %v1636_v44  ;;  %v1089_v45 = vunpack.c.l.bf16 %v2014_v11 }
 0x3b9   : > { %1816 = vmatprep.mubr.msk.bf16.mxu0 %vm468_vm1, %v955_v47 }
 0x3bc   : > { %v912_v49 = vpop.f32.mrb[20].mxu1 }
 0x3bd   : > { %v925_v52 = vsub.f32 %v912_v49, %v921_v48  ;;  %v1806_v53 = vpop.f32.mrb[21].mxu1 }
 0x3be   : > { %v915_v54 = vpop.f32.mrb[22].mxu1  ;;  %v1090_v53 = vunpack.c.h.bf16 %v2014_v11 }
 0x3bf   : > { %v929_v55 = vmul.f32 0.5, %v925_v52  ;;  %v926_v56 = vsub.f32 %v915_v54, %v922_v50  ;;  %v1807_v57 = vpop.f32.mrb[23].mxu1  ;;  %v1088_v52 = vunpack.c.h.bf16 %v2011_v10 }
 0x3c1   : > { %v933_v58 = vadd.f32 %v929_v55, %v921_v48  ;;  %v930_v59 = vmul.f32 0.5, %v926_v56  ;;  %v1087_v48 = vunpack.c.l.bf16 %v2011_v10 }
 0x3c3   : > { %vm937_vm0 = vcmp.ge.f32.partialorder %v933_v58, 0.5  ;;  %v934_v60 = vadd.f32 %v930_v59, %v922_v50 }
 0x3c4   : > { %v941_v61 = vsel %vm937_vm0, 0.0, %v933_v58  ;;  %v1638_v62 = vsel %vm937_vm0, 1.0, %v1892_v51 }
 0x3c5   : > { %945 = vst.msk [vmem:[#allocation3 + $0x10] sm:$0xff] %vm468_vm1, %v941_v61  ;;  %vm938_vm2 = vcmp.ge.f32.partialorder %v934_v60, 0.5 }
 0x3c6   : > { %v942_v63 = vsel %vm938_vm2, 0.0, %v934_v60  ;;  %v1639_v0 = vsel %vm938_vm2, 1.0, %v1892_v51 }
 0x3c7   : > { %946 = vst.msk [vmem:[#allocation3 + $0x18] sm:$0xff] %vm468_vm1, %v942_v63  ;;  %v956_v1 = vpack.c.bf16 %v1639_v0, %v1638_v62 }
 0x3c9   : > { %1817 = vmatmul.mubr.msk.bf16.vlgmr.msra.gmra.mrb[8].mxu0 %vm468_vm1, %v956_v1 }
 0x3ca   : > { %1737 = vmatpush3.bf16.msra.mxu0 %v1865_v19  ;;  %v1110_v19 = vrot.slane %v1105_v18, %v410_v14 }
 0x3cb   : > { %1738 = vmatprep.subr.bf16.mxu0 %v1866_v20  ;;  %v1114_v20 = vrot.slane %v1105_v18, %v414_v16 }
 0x3ce   : > { %1739 = vmatpush3.bf16.msra.mxu0 %v1867_v21 }
 0x3cf   : > { %1740 = vmatprep.subr.bf16.mxu0 %v1868_v22  ;;  %v1216_v22 = vld [vmem:[#allocation5] sm:$0xff] }
 0x3d2   : > { %1741 = vmatpush3.bf16.msra.mxu0 %v1869_v23 }
 0x3d3   : > { %1742 = vmatprep.subr.bf16.mxu0 %v1870_v25 }
 0x3d6   : > { %1743 = vmatpush3.bf16.msra.mxu0 %v1871_v26  ;;  %v1217_v26 = vld [vmem:[#allocation5 + $0x8] sm:$0xff] }
 0x3d7   : > { %1744 = vmatprep.subr.bf16.mxu0 %v1872_v27 }
 0x3da   : > { %1745 = vmatpush3.bf16.msra.mxu0 %v1873_v7 }
 0x3db   : > { %1746 = vmatprep.subr.bf16.mxu0 %v1874_v8 }
 0x3de   : > { %1747 = vmatpush3.bf16.msra.mxu0 %v1875_v9 }
 0x49c   : > { %v1818_v5 = vpop.f32.mrb[8].mxu0 }
 0x49d   : > { %v1045_v30 = vadd.f32 %v1818_v5, %v1640_v28  ;;  %v1036_v24 = vpop.f32.mrb[9].mxu0  ;;  %v1218_v5 = vld [vmem:[#allocation5 + $0x10] sm:$0xff] }
 0x49e   : > { %v1037_v32 = vadd.f32 %v1640_v28, %v1036_v24  ;;  %v1819_v33 = vpop.f32.mrb[10].mxu0 }
 0x49f   : > { %v1057_v35 = vsub.f32 %v1045_v30, %v1053_v29  ;;  %v1048_v36 = vadd.f32 %v1819_v33, %v1640_v28  ;;  %v1039_v37 = vpop.f32.mrb[11].mxu0 }
 0x4a0   : > { %v1055_v39 = vsub.f32 %v1037_v32, %v1051_v31  ;;  %v1040_v40 = vadd.f32 %v1640_v28, %v1039_v37 }
 0x4a1   : > { %v1061_v41 = vmul.f32 0.5, %v1057_v35  ;;  %v1058_v42 = vsub.f32 %v1048_v36, %v1054_v34 }
 0x4a2   : > { %v1059_v43 = vmul.f32 0.5, %v1055_v39  ;;  %v1056_v44 = vsub.f32 %v1040_v40, %v1052_v38  ;;  %v1220_v40 = vld [vmem:[#allocation5 + $0x20] sm:$0xff] }
 0x4a3   : > { %v1065_v46 = vadd.f32 %v1061_v41, %v1053_v29  ;;  %v1062_v47 = vmul.f32 0.5, %v1058_v42 }
 0x4a4   : > { %v1063_v49 = vadd.f32 %v1059_v43, %v1051_v31  ;;  %v1060_v50 = vmul.f32 0.5, %v1056_v44  ;;  %v1219_v31 = vld [vmem:[#allocation5 + $0x18] sm:$0xff]  ;;  %v1221_v44 = vld [vmem:[#allocation5 + $0x28] sm:$0xff] }
 0x4a5   : > { %vm1069_vm3 = vcmp.ge.f32.partialorder %v1065_v46, 1.0  ;;  %v1066_v54 = vadd.f32 %v1062_v47, %v1054_v34 }
 0x4a6   : > { %v1073_v55 = vsel %vm1069_vm3, 0.0, %v1065_v46  ;;  %v1649_v56 = vsel %vm1069_vm3, 1.0, %v1892_v51  ;;  %vm1067_vm4 = vcmp.ge.f32.partialorder %v1063_v49, 1.0  ;;  %v1064_v57 = vadd.f32 %v1060_v50, %v1052_v38 }
 0x4a7   : > { %1077 = vst.msk [vmem:[#allocation4 + $0x10] sm:$0xff] %vm468_vm1, %v1073_v55  ;;  %v2185_v58 = vadd.f32 %v1649_v56, %v1089_v45  ;;  %v1071_v59 = vsel %vm1067_vm4, 0.0, %v1063_v49  ;;  %v1647_v60 = vsel %vm1067_vm4, 1.0, %v1892_v51  ;;  %vm1070_vm5 = vcmp.ge.f32.partialorder %v1066_v54, 1.0 }
 0x4a8   : > { %1075 = vst.msk [vmem:[#allocation4] sm:$0xff] %vm468_vm1, %v1071_v59  ;;  %v2189_v10 = vadd.f32 %v1647_v60, %v1087_v48  ;;  %v1074_v11 = vsel %vm1070_vm5, 0.0, %v1066_v54  ;;  %v1650_v61 = vsel %vm1070_vm5, 1.0, %v1892_v51  ;;  %vm1068_vm6 = vcmp.ge.f32.partialorder %v1064_v57, 1.0  ;;  %v1222_v48 = vld [vmem:[#allocation5 + $0x30] sm:$0xff]  ;;  %v1223_v54 = vld [vmem:[#allocation5 + $0x38] sm:$0xff] }
 0x4a9   : > { %1078 = vst.msk [vmem:[#allocation4 + $0x18] sm:$0xff] %vm468_vm1, %v1074_v11  ;;  %v2193_v62 = vadd.f32 %v1650_v61, %v1090_v53  ;;  %v1072_v63 = vsel %vm1068_vm6, 0.0, %v1064_v57  ;;  %v1648_v0 = vsel %vm1068_vm6, 1.0, %v1892_v51  ;;  %vm1532_vm6 = vcmask 519168  }
 0x4aa   : > { %1076 = vst.msk [vmem:[#allocation4 + $0x8] sm:$0xff] %vm468_vm1, %v1072_v63  ;;  %v2197_v1 = vadd.f32 %v1648_v0, %v1088_v52 }
 0x4ab   : > { %v1096_v6 = vpack.c.bf16 %v2193_v62, %v2185_v58 }
 0x4ac   : > { %v1095_v4 = vpack.c.bf16 %v2197_v1, %v2189_v10 }
 0x4ae   : > { %1659 = vmatmul.mubr.msk.bf16.vlgmr.msra.gmra.mrb[24].mxu1 %vm468_vm1, %v1095_v4 }
 0x4af   : > { %1205 = vmatprep.mubr.bf16.mxu1 %v1891_v3  ;;  %v1876_v3 = vld [vmem:[%s2276_s8 + $0x70] sm:$0xff]  }
 0x4b0   : > { %1748 = vmatprep.subr.bf16.mxu0 %v1876_v3 }
 0x4b1   : > { %1749 = vmatpush3.bf16.msra.mxu0 %v1877_v12 }
 0x4b2   : > { %1750 = vmatprep.subr.bf16.mxu0 %v1878_v15 }
 0x4b5   : > { %1751 = vmatpush3.bf16.msra.mxu0 %v1879_v17 }
 0x4b6   : > { %1660 = vmatmul.mubr.msk.bf16.gmra.mrb[28].mxu1 %vm468_vm1, %v1096_v6 }
 0x581   : > { %v1197_v21 = vpop.f32.mrb[24].mxu1 }
 0x582   : > { %v1198_v23 = vadd.f32 %v1197_v21, %v1110_v19  ;;  %v1199_v25 = vpop.f32.mrb[25].mxu1 }
 0x583   : > { %v1200_v27 = vadd.f32 %v1199_v25, %v1114_v20  ;;  %v1201_v28 = vpop.f32.mrb[26].mxu1  ;;  %v1476_v25 = vld [vmem:[#allocation6] sm:$0xff] }
 0x584   : > { %v1224_v29 = vsub.f32 %v1198_v23, %v1216_v22  ;;  %v1202_v30 = vadd.f32 %v1201_v28, %v1110_v19  ;;  %v1203_v24 = vpop.f32.mrb[27].mxu1 }
 0x585   : > { %v1225_v32 = vsub.f32 %v1200_v27, %v1217_v26  ;;  %v1204_v33 = vadd.f32 %v1203_v24, %v1114_v20 }
 0x586   : > { %v1232_v34 = vmul.f32 0.5, %v1224_v29  ;;  %v1226_v35 = vsub.f32 %v1202_v30, %v1218_v5 }
 0x587   : > { %v1233_v14 = vmul.f32 0.5, %v1225_v32  ;;  %v1227_v36 = vsub.f32 %v1204_v33, %v1219_v31 }
 0x588   : > { %v1240_v13 = vadd.f32 %v1232_v34, %v1216_v22  ;;  %v1234_v16 = vmul.f32 0.5, %v1226_v35 }
 0x589   : > { %v1241_v37 = vadd.f32 %v1233_v14, %v1217_v26  ;;  %v1235_v38 = vmul.f32 0.5, %v1227_v36  ;;  %v1207_v39 = vpop.f32.mrb[28].mxu1  ;;  %v1478_v36 = vld [vmem:[#allocation6 + $0x10] sm:$0xff] }
 0x58a   : > { %v1242_v41 = vadd.f32 %v1234_v16, %v1218_v5  ;;  %v1208_v42 = vadd.f32 %v1207_v39, %v1110_v19  ;;  %v1209_v43 = vpop.f32.mrb[29].mxu1  ;;  %vm1248_vm7 = vcmp.ge.f32.partialorder %v1240_v13, 1.0  ;;  %v1477_v5 = vld [vmem:[#allocation6 + $0x8] sm:$0xff] }
 0x58b   : > { %v1243_v45 = vadd.f32 %v1235_v38, %v1219_v31  ;;  %v1210_v46 = vadd.f32 %v1209_v43, %v1114_v20  ;;  %v1211_v47 = vpop.f32.mrb[30].mxu1  ;;  %vm1249_vm8 = vcmp.ge.f32.partialorder %v1241_v37, 1.0  ;;  %v1256_v49 = vsel %vm1248_vm7, 0.0, %v1240_v13 }
 0x58c   : > { %v1228_v50 = vsub.f32 %v1208_v42, %v1220_v40  ;;  %v1212_v52 = vadd.f32 %v1211_v47, %v1110_v19  ;;  %v1213_v53 = vpop.f32.mrb[31].mxu1  ;;  %v1257_v55 = vsel %vm1249_vm8, 0.0, %v1241_v37  ;;  %vm1250_vm9 = vcmp.ge.f32.partialorder %v1242_v41, 1.0  ;;  %1264 = vst [vmem:[#allocation5] sm:$0xff] %v1256_v49 }
 0x58d   : > { %v1229_v56 = vsub.f32 %v1210_v46, %v1221_v44  ;;  %v1214_v57 = vadd.f32 %v1213_v53, %v1114_v20  ;;  %vm1251_vm10 = vcmp.ge.f32.partialorder %v1243_v45, 1.0  ;;  %1265 = vst [vmem:[#allocation5 + $0x8] sm:$0xff] %v1257_v55  ;;  %v1258_v59 = vsel %vm1250_vm9, 0.0, %v1242_v41  ;;  %vm1688_vm11 = vmpackc.low %vm1250_vm9, %vm1248_vm7  ;;  %v1669_v20 = vld [vmem:[%s2277_s9] ss:$0 sm:$0xff]  ;;  %v1479_v41 = vld [vmem:[#allocation6 + $0x18] sm:$0xff] }
 0x58e   : > { %v1236_v60 = vmul.f32 0.5, %v1228_v50  ;;  %v1230_v11 = vsub.f32 %v1212_v52, %v1222_v48  ;;  %v1259_v61 = vsel %vm1251_vm10, 0.0, %v1243_v45  ;;  %vm1686_vm12 = vmpackc.low %vm1251_vm10, %vm1249_vm8  ;;  %1266 = vst [vmem:[#allocation5 + $0x10] sm:$0xff] %v1258_v59 }
 0x58f   : > { %v1237_v63 = vmul.f32 0.5, %v1229_v56  ;;  %v1231_v0 = vsub.f32 %v1214_v57, %v1223_v54  ;;  %1267 = vst [vmem:[#allocation5 + $0x18] sm:$0xff] %v1259_v61  ;;  %1687 = vmatprep.mubr.msk.bf16.mxu0 %vm1686_vm12, %v1893_v2 }
 0x590   : > { %v1244_v4 = vadd.f32 %v1236_v60, %v1220_v40  ;;  %v1238_v6 = vmul.f32 0.5, %v1230_v11  ;;  %1689 = vmatmul.mubr.msk.bf16.vlgmr.msra.gmra.mrb[12].mxu0 %vm1688_vm11, %v1893_v2 }
 0x591   : > { %v1245_v7 = vadd.f32 %v1237_v63, %v1221_v44  ;;  %v1239_v8 = vmul.f32 0.5, %v1231_v0 }
 0x592   : > { %v1246_v9 = vadd.f32 %v1238_v6, %v1222_v48  ;;  %vm1252_vm13 = vcmp.ge.f32.partialorder %v1244_v4, 1.0 }
 0x593   : > { %v1247_v3 = vadd.f32 %v1239_v8, %v1223_v54  ;;  %vm1253_vm14 = vcmp.ge.f32.partialorder %v1245_v7, 1.0  ;;  %v1260_v12 = vsel %vm1252_vm13, 0.0, %v1244_v4 }
 0x594   : > { %v1261_v15 = vsel %vm1253_vm14, 0.0, %v1245_v7  ;;  %vm1254_vm15 = vcmp.ge.f32.partialorder %v1246_v9, 1.0  ;;  %1268 = vst [vmem:[#allocation5 + $0x20] sm:$0xff] %v1260_v12 }
 0x595   : > { %vm1255_vm0 = vcmp.ge.f32.partialorder %v1247_v3, 1.0  ;;  %1269 = vst [vmem:[#allocation5 + $0x28] sm:$0xff] %v1261_v15  ;;  %v1262_v17 = vsel %vm1254_vm15, 0.0, %v1246_v9  ;;  %vm1692_vm2 = vmpackc.low %vm1254_vm15, %vm1252_vm13 }
 0x596   : > { %v1263_v18 = vsel %vm1255_vm0, 0.0, %v1247_v3  ;;  %vm1690_vm3 = vmpackc.low %vm1255_vm0, %vm1253_vm14  ;;  %1270 = vst [vmem:[#allocation5 + $0x30] sm:$0xff] %v1262_v17 }
 0x597   : > { %1271 = vst [vmem:[#allocation5 + $0x38] sm:$0xff] %v1263_v18  ;;  %1691 = vmatprep.mubr.msk.bf16.mxu0 %vm1690_vm3, %v1893_v2 }
 0x598   : > { %1693 = vmatmul.mubr.msk.bf16.gmra.mrb[16].mxu0 %vm1692_vm2, %v1893_v2 }
 0x663   : > { %v1752_v19 = vpop.f32.mrb[12].mxu0 }
 0x664   : > { %v1753_v21 = vpop.f32.mrb[13].mxu0 }
 0x665   : > { %v1754_v22 = vadd.f32 %v1753_v21, %v1752_v19  ;;  %v1755_v23 = vpop.f32.mrb[14].mxu0 }
 0x666   : > { %v1756_v26 = vpop.f32.mrb[15].mxu0 }
 0x667   : > { %v1462_v27 = vadd.f32 %v1754_v22, %v1669_v20  ;;  %v1757_v28 = vadd.f32 %v1756_v26, %v1755_v23 }
 0x669   : > { %v1480_v29 = vsub.f32 %v1462_v27, %v1476_v25  ;;  %v1465_v30 = vadd.f32 %v1757_v28, %v1669_v20 }
 0x66b   : > { %v1484_v24 = vmul.f32 0.5, %v1480_v29  ;;  %v1481_v31 = vsub.f32 %v1465_v30, %v1477_v5  ;;  %v1758_v32 = vpop.f32.mrb[16].mxu0 }
 0x66c   : > { %v1759_v33 = vpop.f32.mrb[17].mxu0 }
 0x66d   : > { %v1488_v2 = vadd.f32 %v1484_v24, %v1476_v25  ;;  %v1485_v34 = vmul.f32 0.5, %v1481_v31  ;;  %v1760_v35 = vadd.f32 %v1759_v33, %v1758_v32  ;;  %v1761_v14 = vpop.f32.mrb[18].mxu0 }
 0x66e   : > { %v1762_v13 = vpop.f32.mrb[19].mxu0 }
 0x66f   : > { %vm1492_vm4 = vcmp.ge.f32.partialorder %v1488_v2, 1.0  ;;  %v1489_v16 = vadd.f32 %v1485_v34, %v1477_v5  ;;  %v1470_v37 = vadd.f32 %v1760_v35, %v1669_v20  ;;  %v1763_v38 = vadd.f32 %v1762_v13, %v1761_v14 }
 0x670   : > { %v1496_v39 = vsel %vm1492_vm4, 0.0, %v1488_v2  ;;  %v1694_v40 = vsel %vm1492_vm4, 1.0, %v1892_v51 }
 0x671   : > { %1500 = vst.msk [vmem:[#allocation6] sm:$0xff] %vm468_vm1, %v1496_v39  ;;  %v1512_v42 = vadd.f32 %v1694_v40, %v2189_v10  ;;  %vm1493_vm5 = vcmp.ge.f32.partialorder %v1489_v16, 1.0  ;;  %v1482_v43 = vsub.f32 %v1470_v37, %v1478_v36  ;;  %v1473_v44 = vadd.f32 %v1763_v38, %v1669_v20 }
 0x672   : > { %v1497_v45 = vsel %vm1493_vm5, 0.0, %v1489_v16  ;;  %v1695_v46 = vsel %vm1493_vm5, 1.0, %v1892_v51 }
 0x673   : > { %v1706_v47 = vpack.c.bf16 %v1512_v42, %v1512_v42  ;;  %1501 = vst.msk [vmem:[#allocation6 + $0x8] sm:$0xff] %vm468_vm1, %v1497_v45  ;;  %v1513_v48 = vadd.f32 %v1695_v46, %v2197_v1  ;;  %v1486_v49 = vmul.f32 0.5, %v1482_v43  ;;  %v1483_v50 = vsub.f32 %v1473_v44, %v1479_v41 }
 0x675   : > { %1533 = vst.msk [vmem:[%s1967_s22] sm:$0xf] %vm1532_vm6, %v1706_v47  ;;  %v1707_v52 = vpack.c.bf16 %v1513_v48, %v1513_v48  ;;  %v1490_v10 = vadd.f32 %v1486_v49, %v1478_v36  ;;  %v1487_v53 = vmul.f32 0.5, %v1483_v50 }
 0x677   : > { %1534 = vst.msk [vmem:[%s1967_s22 + $0x4] sm:$0xf] %vm1532_vm6, %v1707_v52  ;;  %vm1494_vm7 = vcmp.ge.f32.partialorder %v1490_v10, 1.0  ;;  %v1491_v54 = vadd.f32 %v1487_v53, %v1479_v41 }
 0x678   : > { %v1498_v55 = vsel %vm1494_vm7, 0.0, %v1490_v10  ;;  %v1696_v56 = vsel %vm1494_vm7, 1.0, %v1892_v51 }
 0x679   : > { %1502 = vst.msk [vmem:[#allocation6 + $0x10] sm:$0xff] %vm468_vm1, %v1498_v55  ;;  %v1514_v1 = vadd.f32 %v1696_v56, %v2185_v58  ;;  %vm1495_vm8 = vcmp.ge.f32.partialorder %v1491_v54, 1.0 }
 0x67a   : > { %v1499_v57 = vsel %vm1495_vm8, 0.0, %v1491_v54  ;;  %v1697_v59 = vsel %vm1495_vm8, 1.0, %v1892_v51 }
 0x67b   : > { %v1708_v60 = vpack.c.bf16 %v1514_v1, %v1514_v1  ;;  %1503 = vst.msk [vmem:[#allocation6 + $0x18] sm:$0xff] %vm468_vm1, %v1499_v57  ;;  %v1515_v11 = vadd.f32 %v1697_v59, %v2193_v62 }
 0x67d   : > { %1535 = vst.msk [vmem:[%s1967_s22 + $0x8] sm:$0xf] %vm1532_vm6, %v1708_v60  ;;  %v1709_v61 = vpack.c.bf16 %v1515_v11, %v1515_v11 }
 0x67f   : > { %1536 = vst.msk [vmem:[%s1967_s22 + $0xc] sm:$0xf] %vm1532_vm6, %v1709_v61 }
 0x680 PF: > { %s20_s13 = sadd.s32 1, %s1888_s13  }
 0x681   : > { %p17_p5 = scmp.ge.s32.totalorder %s20_s13, 6  }
 0x683   :  { %19 = sbr.rel (!%p17_p5) target bundleno = 1 (0x1), region = 94 }

// kernel: spikformer_block_forward.6
= control target key start
LH: loop header
LB: loop body
LE: loop exit
PB: predicated region body
PF: predicated region fallthrough
CT: control target
= control target key end

     0   :  { %s5523_s12 = smov 0   ;;  %s5525_s13 = smov 0   ;;  %s7959_s0 = inlined_call_operand.vmem [shape: bf16[8,18,18,2], index: 0, kind: input, shape index: {}]   ;;  %s7960_s1 = inlined_call_operand.vmem [shape: bf16[18,32], index: 1, kind: input, shape index: {}]   ;;  %s7961_s2 = inlined_call_operand.vmem [shape: f32[1,32], index: 2, kind: input, shape index: {}]   ;;  %s7962_s3 = inlined_call_operand.vmem [shape: bf16[8,8,8,32], index: 3, kind: output, shape index: {}]  }
   0x1   :  { %s5527_s14 = smov 0   ;;  %s5529_s15 = smov 0  }
   0x2   :  { %s5531_s16 = smov 0  }
   0x3 LB: > { %s22_s17 = sadd.s32 1, %s5482_s14  ;;  %s25_s18 = sadd.s32 1, %s5486_s15  ;;  %s5490_s16 = sphi %s5531_s16, %s13_s16   ;;  %s5486_s15 = sphi %s5529_s15, %s7983_s15   ;;  %s5482_s14 = sphi %s5527_s14, %s7982_s14   ;;  %s5478_s13 = sphi %s5525_s13, %s7981_s13   ;;  %s5474_s12 = sphi %s5523_s12, %s7980_s12  }
   0x4   : > { %p23_p0 = scmp.ge.s32.totalorder %s22_s17, 4  ;;  %p4754_p1 = scmp.ge.s32.totalorder %s5490_s16, 1 }
   0x5   : > { %p161_p2 = scmp.lt.s32.totalorder %s5490_s16, 9 }
   0x6   : > { %s7985_s17 = smov (%p23_p0, %s22_s17), 0  ;;  %s7987_s18 = smov (!%p23_p0, %s25_s18), %s5486_s15 }
   0x7   : > { %p162_p3 = pnand %p4754_p1, %p161_p2  ;;  %p27_p4 = scmp.ge.s32.totalorder %s7987_s18, 2 }
   0x8   : > { %s4755_s19 = sshll.u32 (!%p162_p3), %s5474_s12, 1  ;;  %p4760_p6 = scmp.ne.s32.totalorder (!%p162_p3), %s5474_s12, 0 }
   0x9   : > { %s7989_s18 = smov (%p27_p4, %s7987_s18), 0  ;;  %165 = sbr.rel (%p162_p3) target bundleno = 782 (0x30e), region = 32 }
   0xa   : > { %s190_s20 = sadd.s32 (!%p162_p3), %s5478_s13, %s4755_s19 }
   0xb   : > { %p191_p5 = scmp.lt.s32.totalorder (!%p162_p3), %s190_s20, 7 }
  0x10   : > { %s7991_s20 = smov (!%p191_p5, %s190_s20), 7  ;;  %211 = sbr.rel (%p4760_p6) target bundleno = 34 (0x22), region = 36 }
  0x11   : > { %s5323_s21 = smul.u32 216, %s7991_s20  ;;  %s5198_s22 = sshll.u32 %s7991_s20, 5  ;;  %vm212_vm0 = vcmask (!%p4760_p6), 261120   ;;  %v5492_v0 = vmov (!%p4760_p6), 0.0  }
  0x12   : > { %s5556_s25 = scalar_lea.vmem %s7962_s3, %s5198_s22  ;;  %213 = vst.msk [vmem:[#allocation2] sm:$0xff] (!%p4760_p6), %vm212_vm0, %v5492_v0  ;;  %214 = vst.msk [vmem:[#allocation2 + $0x8] sm:$0xff] (!%p4760_p6), %vm212_vm0, %v5492_v0 }
  0x13   : > { %s5561_s28 = scalar_lea.vmem %s7959_s0, %s5323_s21  ;;  %215 = vst.msk [vmem:[#allocation2 + $0x10] sm:$0xff] (!%p4760_p6), %vm212_vm0, %v5492_v0  ;;  %216 = vst.msk [vmem:[#allocation2 + $0x18] sm:$0xff] (!%p4760_p6), %vm212_vm0, %v5492_v0 }
  0x14   : > { %217 = vst.msk [vmem:[#allocation2 + $0x20] sm:$0xff] (!%p4760_p6), %vm212_vm0, %v5492_v0  ;;  %218 = vst.msk [vmem:[#allocation2 + $0x28] sm:$0xff] (!%p4760_p6), %vm212_vm0, %v5492_v0 }
  0x15   : > { %219 = vst.msk [vmem:[#allocation2 + $0x30] sm:$0xff] (!%p4760_p6), %vm212_vm0, %v5492_v0  ;;  %220 = vst.msk [vmem:[#allocation2 + $0x38] sm:$0xff] (!%p4760_p6), %vm212_vm0, %v5492_v0 }
  0x16   : > { %221 = vst.msk [vmem:[#allocation2 + $0x40] sm:$0xff] (!%p4760_p6), %vm212_vm0, %v5492_v0  ;;  %222 = vst.msk [vmem:[#allocation2 + $0x48] sm:$0xff] (!%p4760_p6), %vm212_vm0, %v5492_v0 }
  0x17   : > { %223 = vst.msk [vmem:[#allocation2 + $0x50] sm:$0xff] %vm212_vm0, %v5492_v0  ;;  %224 = vst.msk [vmem:[#allocation2 + $0x58] sm:$0xff] %vm212_vm0, %v5492_v0 }
  0x18   : > { %225 = vst.msk [vmem:[#allocation2 + $0x60] sm:$0xff] %vm212_vm0, %v5492_v0  ;;  %226 = vst.msk [vmem:[#allocation2 + $0x68] sm:$0xff] %vm212_vm0, %v5492_v0 }
  0x19   : > { %227 = vst.msk [vmem:[#allocation2 + $0x70] sm:$0xff] %vm212_vm0, %v5492_v0  ;;  %228 = vst.msk [vmem:[#allocation2 + $0x78] sm:$0xff] %vm212_vm0, %v5492_v0 }
  0x1a   : > { %229 = vst.msk [vmem:[#allocation2 + $0x80] sm:$0xff] %vm212_vm0, %v5492_v0  ;;  %230 = vst.msk [vmem:[#allocation2 + $0x88] sm:$0xff] %vm212_vm0, %v5492_v0 }
  0x1b   : > { %231 = vst.msk [vmem:[#allocation2 + $0x90] sm:$0xff] %vm212_vm0, %v5492_v0  ;;  %232 = vst.msk [vmem:[#allocation2 + $0x98] sm:$0xff] %vm212_vm0, %v5492_v0 }
  0x1c   : > { %233 = vst.msk [vmem:[#allocation2 + $0xa0] sm:$0xff] %vm212_vm0, %v5492_v0  ;;  %234 = vst.msk [vmem:[#allocation2 + $0xa8] sm:$0xff] %vm212_vm0, %v5492_v0 }
  0x1d   : > { %235 = vst.msk [vmem:[#allocation2 + $0xb0] sm:$0xff] %vm212_vm0, %v5492_v0  ;;  %236 = vst.msk [vmem:[#allocation2 + $0xb8] sm:$0xff] %vm212_vm0, %v5492_v0 }
  0x1e   : > { %237 = vst.msk [vmem:[#allocation2 + $0xc0] sm:$0xff] %vm212_vm0, %v5492_v0  ;;  %238 = vst.msk [vmem:[#allocation2 + $0xc8] sm:$0xff] %vm212_vm0, %v5492_v0 }
  0x1f   : > { %239 = vst.msk [vmem:[#allocation2 + $0xd0] sm:$0xff] %vm212_vm0, %v5492_v0  ;;  %240 = vst.msk [vmem:[#allocation2 + $0xd8] sm:$0xff] %vm212_vm0, %v5492_v0 }
  0x20   : > { %241 = vst.msk [vmem:[#allocation2 + $0xe0] sm:$0xff] %vm212_vm0, %v5492_v0  ;;  %242 = vst.msk [vmem:[#allocation2 + $0xe8] sm:$0xff] %vm212_vm0, %v5492_v0 }
  0x21   : > { %243 = vst.msk [vmem:[#allocation2 + $0xf0] sm:$0xff] %vm212_vm0, %v5492_v0  ;;  %244 = vst.msk [vmem:[#allocation2 + $0xf8] sm:$0xff] %vm212_vm0, %v5492_v0 }
  0x22 PF: > { %v4777_v1 = vld [vmem:[%s5561_s28 + $0xc] sm:$0xf]  ;;  %v5597_v2 = vld [vmem:[%s5561_s28 + $0x10] sm:$0xf]  ;;  %vm744_vm1 = vcmask 1042432   ;;  %vm745_vm2 = vcmask 1046532  }
  0x23   : > { %v918_v3 = vshll.u32 %v5597_v2, 16  ;;  %v922_v4 = vshrl.u32 %v5597_v2, 16  ;;  %v4985_v5 = vcombine.low %v4777_v1, %v5597_v2  ;;  %v909_v6 = vshrl.u32 %v4777_v1, 16  ;;  %v5603_v7 = vld [vmem:[%s5561_s28 + $0x10] sm:$0xf]  ;;  %s5493_s29 = smov 6   ;;  %vm5614_vm3 = vmor %vm744_vm1, %vm745_vm2 }
  0x24   : > { %v912_v8 = vshll.u32 %v4777_v1, 16  ;;  %v5606_v9 = vld [vmem:[%s5561_s28 + $0x14] sm:$0x1]  ;;  %v681_v10 = vld [vmem:[%s5561_s28 + $0xc] sm:$0xe]  ;;  %v756_v18 = vrot.slane %v5603_v7, 5 }
  0x25   : > { %v5609_v11 = vrot.slane %v922_v4, 4  ;;  %2365 = vrot.lane.b32.xlu1 %v4985_v5, %s5493_s29  ;;  %v911_v12 = vrot.slane %v909_v6, 4  ;;  %v340_v13 = vshll.u32 %v5606_v9, 16  ;;  %v4762_v15 = vrot.slane %v681_v10, 9  ;;  %v246_v16 = vld [vmem:[%s5561_s28 + $0x4] sm:$0xf] }
  0x26   : > { %v914_v17 = vrot.slane %v912_v8, 5  ;;  %v759_v19 = vrot.slane %v5606_v9, 5  ;;  %v277_v20 = vld [vmem:[%s5561_s28 + $0x8] sm:$0x1]  ;;  %v749_v21 = vrot.slane %v246_v16, 5  ;;  %v306_v25 = vshll.u32 %v246_v16, 16 }
  0x27   : > { %v680_v22 = vld [vmem:[%s5561_s28] sm:$0xe]  ;;  %v752_v23 = vrot.slane %v277_v20, 5  ;;  %v262_v24 = vld [vmem:[%s5561_s28 + $0x64] sm:$0xf]  ;;  %v757_v27 = vsel %vm5614_vm3, %v4762_v15, %v756_v18  ;;  %v758_v28 = vrot.slane %v756_v18, 4 }
  0x28   : > { %v915_v26 = vor.u32 %v914_v17, %v911_v12  ;;  %v4761_v29 = vrot.slane %v680_v22, 9  ;;  %v285_v30 = vld [vmem:[%s5561_s28 + $0x68] sm:$0x1]  ;;  %v688_v31 = vld [vmem:[%s5561_s28 + $0x60] sm:$0xe]  ;;  %v751_v32 = vrot.slane %v749_v21, 4 }
  0x29   : > { %v4769_v33 = vrot.slane %v688_v31, 9  ;;  %v805_v34 = vrot.slane %v262_v24, 5  ;;  %v808_v35 = vrot.slane %v285_v30, 5  ;;  %v245_v36 = vld [vmem:[%s5561_s28] sm:$0xf]  ;;  %v760_v38 = vsel %vm5614_vm3, %v758_v28, %v759_v19  ;;  %s5494_s30 = smov 4  }
  0x2a   : > { %v5629_v37 = vrot.slane %v915_v26, 4  ;;  %v750_v39 = vsel %vm5614_vm3, %v4761_v29, %v749_v21  ;;  %vm293_vm4 = vsmask.f32 3328  ;;  %v4970_v40 = vcombine.low %v757_v27, %v760_v38  ;;  %v261_v44 = vld [vmem:[%s5561_s28 + $0x60] sm:$0xf]  ;;  %s5495_s4 = smov 2  }
  0x2b   : > { %v753_v41 = vsel %vm5614_vm3, %v751_v32, %v752_v23  ;;  %v806_v42 = vsel %vm5614_vm3, %v4769_v33, %v805_v34  ;;  %v807_v43 = vrot.slane %v805_v34, 4  ;;  %vm294_vm5 = vsmask.f32 7440  ;;  %v247_v56 = vld [vmem:[%s5561_s28 + $0xc] sm:$0xf]  ;;  %s5496_s5 = smov 8  }
  0x2c   : > { %v4969_v45 = vcombine.low %v750_v39, %v753_v41  ;;  %v297_v46 = vshrl.u32 %v245_v36, 16  ;;  %v300_v47 = vshll.u32 %v245_v36, 16  ;;  %2271 = vrot.lane.b32.xlu0 %v4970_v40, %s5494_s30  ;;  %v308_v49 = vrot.slane %v306_v25, 5  ;;  %vm5647_vm6 = vmor %vm293_vm4, %vm294_vm5  ;;  %v5657_v25 = vld [vmem:[%s5561_s28 + $0x14] sm:$0x1]  ;;  %s5497_s6 = smov 10  }
  0x2d   : > { %v809_v48 = vsel %vm5614_vm3, %v807_v43, %v808_v35  ;;  %v310_v50 = vshrl.u32 %v246_v16, 16  ;;  %v316_v51 = vshll.u32 %v277_v20, 16  ;;  %v489_v55 = vshrl.u32 %v261_v44, 16  ;;  %v263_v26 = vld [vmem:[%s5561_s28 + $0x6c] sm:$0xf]  ;;  %s5498_s7 = smov 12  }
  0x2e   : > { %2269 = vrot.lane.b32.xlu1 %v4969_v45, %s5494_s30  ;;  %v4977_v52 = vcombine.low %v806_v42, %v809_v48  ;;  %v299_v53 = vrot.slane %v297_v46, 4  ;;  %v302_v54 = vrot.slane %v300_v47, 5  ;;  %v492_v59 = vshll.u32 %v261_v44, 16  ;;  %v5673_v40 = vld [vmem:[%s5561_s28 + $0x70] sm:$0xf]  ;;  %s5499_s8 = smov 14  }
  0x2f   : > { %v312_v57 = vrot.slane %v310_v50, 4  ;;  %v318_v58 = vrot.slane %v316_v51, 5  ;;  %v498_v60 = vshll.u32 %v262_v24, 16  ;;  %v491_v62 = vrot.slane %v489_v55, 4  ;;  %v5676_v41 = vld [vmem:[%s5561_s28 + $0x74] sm:$0x1] }
  0x30   : > { %v303_v61 = vor.u32 %v302_v54, %v299_v53  ;;  %v502_v63 = vshrl.u32 %v262_v24, 16  ;;  %v508_v0 = vshll.u32 %v285_v30, 16  ;;  %v494_v5 = vrot.slane %v492_v59, 5  ;;  %v4793_v46 = vld [vmem:[%s5561_s28 + $0x6c] sm:$0xf]  ;;  %s5500_s9 = smov 16  }
  0x31   : > { %v313_v4 = vor.u32 %v312_v57, %v308_v49  ;;  %v500_v6 = vrot.slane %v498_v60, 5  ;;  %v321_v8 = vshrl.u32 %v247_v56, 16  ;;  %v324_v16 = vshll.u32 %v247_v56, 16  ;;  %v5692_v55 = vld [vmem:[%s5561_s28 + $0x70] sm:$0xf] }
  0x32   : > { %2285 = vrot.lane.b32.xlu1 %v4977_v52, %s5494_s30  ;;  %v304_v10 = vrot.slane %v303_v61, 4  ;;  %v504_v12 = vrot.slane %v502_v63, 4  ;;  %v510_v15 = vrot.slane %v508_v0, 5  ;;  %v495_v18 = vor.u32 %v494_v5, %v491_v62  ;;  %v5697_v62 = vld [vmem:[%s5561_s28 + $0x18] sm:$0xf] }
  0x33   : > { %v314_v17 = vrot.slane %v313_v4, 4  ;;  %v323_v19 = vrot.slane %v321_v8, 4  ;;  %v330_v20 = vshll.u32 %v5603_v7, 16  ;;  %v326_v23 = vrot.slane %v324_v16, 5  ;;  %v5700_v63 = vld [vmem:[%s5561_s28 + $0x1c] sm:$0xf] }
  0x34   : > { %v309_v21 = vsel %vm5647_vm6, %v304_v10, %v308_v49  ;;  %v505_v22 = vor.u32 %v504_v12, %v500_v6  ;;  %v334_v24 = vshrl.u32 %v5603_v7, 16  ;;  %v496_v28 = vrot.slane %v495_v18, 4  ;;  %v4825_v8 = vld [vmem:[%s5561_s28 + $0xc] sm:$0xe] }
  0x35   : > { %v319_v27 = vsel %vm5647_vm6, %v314_v17, %v318_v58  ;;  %v332_v29 = vrot.slane %v330_v20, 5  ;;  %v342_v30 = vrot.slane %v340_v13, 5  ;;  %v327_v33 = vor.u32 %v326_v23, %v323_v19  ;;  %v689_v17 = vld [vmem:[%s5561_s28 + $0x6c] sm:$0xe] }
  0x36   : > { %v4953_v31 = vcombine.low %v309_v21, %v319_v27  ;;  %v506_v32 = vrot.slane %v505_v22, 4  ;;  %v336_v34 = vrot.slane %v334_v24, 4  ;;  %v501_v7 = vsel %vm5647_vm6, %v496_v28, %v500_v6 }
  0x37   : > { %v920_v35 = vrot.slane %v918_v3, 5  ;;  %v928_v36 = vshll.u32 %v5657_v25, 16  ;;  %v513_v38 = vshrl.u32 %v263_v26, 16  ;;  %v328_v13 = vrot.slane %v327_v33, 4 }
  0x38   : > { %2189 = vrot.lane.b32.xlu0 %v4953_v31, %s5495_s4  ;;  %v511_v9 = vsel %vm5647_vm6, %v506_v32, %v510_v15  ;;  %v337_v39 = vor.u32 %v336_v34, %v332_v29  ;;  %v516_v42 = vshll.u32 %v263_v26, 16  ;;  %v522_v52 = vshll.u32 %v5673_v40, 16 }
  0x39   : > { %v4961_v43 = vcombine.low %v501_v7, %v511_v9  ;;  %v921_v3 = vsel %vm5647_vm6, %v5629_v37, %v920_v35  ;;  %v925_v44 = vor.u32 %v5609_v11, %v920_v35  ;;  %v930_v45 = vrot.slane %v928_v36, 5  ;;  %v5723_v7 = vld [vmem:[%s5561_s28 + $0x74] sm:$0x1] }
  0x3a   : > { %v333_v47 = vsel %vm5647_vm6, %v328_v13, %v332_v29  ;;  %v338_v48 = vrot.slane %v337_v39, 4  ;;  %v515_v49 = vrot.slane %v513_v38, 4  ;;  %v518_v50 = vrot.slane %v516_v42, 5 }
  0x3b   : > { %2205 = vrot.lane.b32.xlu1 %v4961_v43, %s5495_s4  ;;  %v926_v51 = vrot.slane %v925_v44, 4  ;;  %v526_v53 = vshrl.u32 %v5673_v40, 16  ;;  %v532_v37 = vshll.u32 %v5676_v41, 16  ;;  %v1101_v56 = vshrl.u32 %v4793_v46, 16  ;;  %v5738_v44 = vld [vmem:[%s5561_s28 + $0x18] sm:$0xf] }
  0x3c   : > { %v343_v11 = vsel %vm5647_vm6, %v338_v48, %v342_v30  ;;  %v519_v54 = vor.u32 %v518_v50, %v515_v49  ;;  %v1104_v57 = vshll.u32 %v4793_v46, 16  ;;  %v524_v60 = vrot.slane %v522_v52, 5  ;;  %v5744_v49 = vld [vmem:[%s5561_s28 + $0x1c] sm:$0xf] }
  0x3d   : > { %v4954_v58 = vcombine.low %v333_v47, %v343_v11  ;;  %v931_v59 = vsel %vm5647_vm6, %v926_v51, %v930_v45  ;;  %v528_v61 = vrot.slane %v526_v53, 4  ;;  %v534_v5 = vrot.slane %v532_v37, 5 }
  0x3e   : > { %v5001_v0 = vcombine.low %v921_v3, %v931_v59  ;;  %v520_v4 = vrot.slane %v519_v54, 4  ;;  %v1103_v6 = vrot.slane %v1101_v56, 4  ;;  %v1106_v12 = vrot.slane %v1104_v57, 5  ;;  %v5752_v57 = vld [vmem:[%s5561_s28 + $0x78] sm:$0xf] }
  0x3f   : > { %2191 = vrot.lane.b32.xlu0 %v4954_v58, %s5495_s4  ;;  %v529_v10 = vor.u32 %v528_v61, %v524_v60  ;;  %v1114_v15 = vshrl.u32 %v5692_v55, 16  ;;  %v4993_v16 = vcombine.low %v4793_v46, %v5692_v55  ;;  %v933_v19 = vshrl.u32 %v5697_v62, 16 }
  0x40   : > { %2445 = vrot.lane.b32.xlu1 %v5001_v0, %s5496_s5  ;;  %v525_v18 = vsel %vm5647_vm6, %v520_v4, %v524_v60  ;;  %v936_v20 = vshll.u32 %v5697_v62, 16  ;;  %v946_v21 = vshrl.u32 %v5700_v63, 16  ;;  %v4986_v23 = vcombine.low %v5697_v62, %v5700_v63  ;;  %v5760_v62 = vld [vmem:[%s5561_s28 + $0x7c] sm:$0xf] }
  0x41   : > { %v530_v22 = vrot.slane %v529_v10, 4  ;;  %v4841_v24 = vrot.slane %v4825_v8, 9  ;;  %v1358_v26 = vrot.slane %v5597_v2, 5  ;;  %v935_v27 = vrot.slane %v933_v19, 4  ;;  %v4833_v8 = vld [vmem:[%s5561_s28 + $0x6c] sm:$0xe] }
  0x42   : > { %v938_v28 = vrot.slane %v936_v20, 5  ;;  %v1361_v29 = vrot.slane %v5657_v25, 5  ;;  %v4770_v30 = vrot.slane %v689_v17, 9  ;;  %v812_v34 = vrot.slane %v5673_v40, 5  ;;  %v5733_v40 = vld [vmem:[%s5561_s28 + $0x20] sm:$0x1] }
  0x43   : > { %v535_v31 = vsel %vm5647_vm6, %v530_v22, %v534_v5  ;;  %v1359_v32 = vsel %vm5614_vm3, %v4841_v24, %v1358_v26  ;;  %v1360_v33 = vrot.slane %v1358_v26, 4  ;;  %v815_v2 = vrot.slane %v5676_v41, 5  ;;  %v4826_v17 = vld [vmem:[%s5561_s28 + $0x18] sm:$0xe] }
  0x44   : > { %v4962_v35 = vcombine.low %v525_v18, %v535_v31  ;;  %2381 = vrot.lane.b32.xlu1 %v4993_v16, %s5493_s29  ;;  %v1107_v25 = vor.u32 %v1106_v12, %v1103_v6  ;;  %v1110_v36 = vshll.u32 %v5692_v55, 16  ;;  %v813_v9 = vsel %vm5614_vm3, %v4770_v30, %v812_v34  ;;  %v5781_v31 = vld [vmem:[%s5561_s28 + $0x20] sm:$0x1] }
  0x45   : > { %v1362_v38 = vsel %vm5614_vm3, %v1360_v33, %v1361_v29  ;;  %v814_v13 = vrot.slane %v812_v34, 4  ;;  %v1116_v39 = vrot.slane %v1114_v15, 4  ;;  %v1120_v41 = vshll.u32 %v5723_v7, 16 }
  0x46   : > { %2207 = vrot.lane.b32.xlu0 %v4962_v35, %s5495_s4  ;;  %v5017_v42 = vcombine.low %v1359_v32, %v1362_v38  ;;  %v1108_v43 = vrot.slane %v1107_v25, 4  ;;  %v1112_v3 = vrot.slane %v1110_v36, 5  ;;  %v939_v46 = vor.u32 %v938_v28, %v935_v27 }
  0x47   : > { %v816_v45 = vsel %vm5614_vm3, %v814_v13, %v815_v2  ;;  %v942_v47 = vshll.u32 %v5700_v63, 16  ;;  %v948_v48 = vrot.slane %v946_v21, 4  ;;  %v1122_v53 = vrot.slane %v1120_v41, 5  ;;  %v5803_v41 = vld [vmem:[%s5561_s28 + $0x7c] sm:$0xf] }
  0x48   : > { %2525 = vrot.lane.b32.xlu1 %v5017_v42, %s5497_s6  ;;  %v4978_v50 = vcombine.low %v813_v9, %v816_v45  ;;  %v1113_v51 = vsel %vm5647_vm6, %v1108_v43, %v1112_v3  ;;  %v1117_v52 = vor.u32 %v1116_v39, %v1112_v3  ;;  %v940_v37 = vrot.slane %v939_v46, 4  ;;  %v5794_v9 = vld [vmem:[%s5561_s28 + $0x80] sm:$0x1]  ;;  %v5800_v3 = vld [vmem:[%s5561_s28 + $0x78] sm:$0xf] }
  0x49   : > { %v944_v11 = vrot.slane %v942_v47, 5  ;;  %v952_v54 = vshll.u32 %v5733_v40, 16  ;;  %v1518_v56 = vshrl.u32 %v5738_v44, 16  ;;  %v1521_v59 = vshll.u32 %v5738_v44, 16 }
  0x4a   : > { %2367 = vrot.lane.b32.xlu0 %v4986_v23, %s5493_s29  ;;  %v1118_v58 = vrot.slane %v1117_v52, 4  ;;  %v1531_v60 = vshrl.u32 %v5744_v49, 16  ;;  %v5033_v61 = vcombine.low %v5738_v44, %v5744_v49  ;;  %v1125_v15 = vshrl.u32 %v5752_v57, 16 }
  0x4b   : > { %v945_v0 = vsel %vm5647_vm6, %v940_v37, %v944_v11  ;;  %v949_v4 = vor.u32 %v948_v48, %v944_v11  ;;  %v954_v5 = vrot.slane %v952_v54, 5  ;;  %v1520_v6 = vrot.slane %v1518_v56, 4  ;;  %v5807_v48 = vld [vmem:[%s5561_s28 + $0x24] sm:$0xf] }
  0x4c   : > { %v1123_v10 = vsel %vm5647_vm6, %v1118_v58, %v1122_v53  ;;  %v1523_v12 = vrot.slane %v1521_v59, 5  ;;  %v1128_v16 = vshll.u32 %v5752_v57, 16  ;;  %v1138_v20 = vshrl.u32 %v5760_v62, 16 }
  0x4d   : > { %v5009_v18 = vcombine.low %v1113_v51, %v1123_v10  ;;  %v950_v19 = vrot.slane %v949_v4, 4  ;;  %v4994_v21 = vcombine.low %v5752_v57, %v5760_v62  ;;  %v1127_v22 = vrot.slane %v1125_v15, 4  ;;  %v5817_v57 = vld [vmem:[%s5561_s28 + $0x28] sm:$0xf]  ;;  %v4834_v10 = vld [vmem:[%s5561_s28 + $0x78] sm:$0xe] }
  0x4e   : > { %2287 = vrot.lane.b32.xlu0 %v4978_v50, %s5494_s30  ;;  %v1130_v23 = vrot.slane %v1128_v16, 5  ;;  %v4849_v24 = vrot.slane %v4833_v8, 9  ;;  %v1414_v26 = vrot.slane %v5692_v55, 5  ;;  %v1417_v28 = vrot.slane %v5723_v7, 5 }
  0x4f   : > { %2461 = vrot.lane.b32.xlu1 %v5009_v18, %s5496_s5  ;;  %v955_v27 = vsel %vm5647_vm6, %v950_v19, %v954_v5  ;;  %v4842_v29 = vrot.slane %v4826_v17, 9  ;;  %v1365_v30 = vrot.slane %v5700_v63, 5  ;;  %v1368_v55 = vrot.slane %v5733_v40, 5 }
  0x50   : > { %v5002_v32 = vcombine.low %v945_v0, %v955_v27  ;;  %v1415_v33 = vsel %vm5614_vm3, %v4849_v24, %v1414_v26  ;;  %v1416_v34 = vrot.slane %v1414_v26, 4  ;;  %v1524_v7 = vor.u32 %v1523_v12, %v1520_v6  ;;  %v4905_v0 = vld [vmem:[%s5561_s28 + $0x18] sm:$0xe]  ;;  %v5841_v27 = vld [vmem:[%s5561_s28 + $0x84] sm:$0xf] }
  0x51   : > { %v1366_v35 = vsel %vm5614_vm3, %v4842_v29, %v1365_v30  ;;  %v1367_v2 = vrot.slane %v1365_v30, 4  ;;  %v1527_v25 = vshll.u32 %v5744_v49, 16  ;;  %v1533_v36 = vrot.slane %v1531_v60, 4 }
  0x52   : > { %2447 = vrot.lane.b32.xlu0 %v5002_v32, %s5496_s5  ;;  %v1418_v63 = vsel %vm5614_vm3, %v1416_v34, %v1417_v28  ;;  %v1537_v38 = vshll.u32 %v5781_v31, 16  ;;  %v1131_v13 = vor.u32 %v1130_v23, %v1127_v22  ;;  %v1525_v42 = vrot.slane %v1524_v7, 4  ;;  %v5849_v32 = vld [vmem:[%s5561_s28 + $0x88] sm:$0xf] }
  0x53   : > { %2621 = vrot.lane.b32.xlu1 %v5033_v61, %s5498_s7  ;;  %v5025_v39 = vcombine.low %v1415_v33, %v1418_v63  ;;  %v1369_v40 = vsel %vm5614_vm3, %v1367_v2, %v1368_v55  ;;  %v1529_v43 = vrot.slane %v1527_v25, 5  ;;  %v1134_v47 = vshll.u32 %v5760_v62, 16  ;;  %v4906_v63 = vld [vmem:[%s5561_s28 + $0x24] sm:$0xe] }
  0x54   : > { %v5018_v44 = vcombine.low %v1366_v35, %v1369_v40  ;;  %v1539_v45 = vrot.slane %v1537_v38, 5  ;;  %v1132_v46 = vrot.slane %v1131_v13, 4  ;;  %v1140_v52 = vrot.slane %v1138_v20, 4  ;;  %v4890_v35 = vld [vmem:[%s5561_s28 + $0x2c] sm:$0x1] }
  0x55   : > { %v1530_v50 = vsel %vm5647_vm6, %v1525_v42, %v1529_v43  ;;  %v1534_v51 = vor.u32 %v1533_v36, %v1529_v43  ;;  %v1144_v53 = vshll.u32 %v5794_v9, 16  ;;  %v1136_v37 = vrot.slane %v1134_v47, 5 }
  0x56   : > { %2383 = vrot.lane.b32.xlu0 %v4994_v21, %s5493_s29  ;;  %v1710_v11 = vshrl.u32 %v5800_v3, 16  ;;  %v1713_v54 = vshll.u32 %v5800_v3, 16  ;;  %v1723_v56 = vshrl.u32 %v5803_v41, 16  ;;  %v5041_v60 = vcombine.low %v5800_v3, %v5803_v41 }
  0x57   : > { %2541 = vrot.lane.b32.xlu1 %v5025_v39, %s5497_s6  ;;  %v1535_v58 = vrot.slane %v1534_v51, 4  ;;  %v1146_v59 = vrot.slane %v1144_v53, 5  ;;  %v1542_v61 = vshrl.u32 %v5807_v48, 16  ;;  %v1137_v4 = vsel %vm5647_vm6, %v1132_v46, %v1136_v37  ;;  %v249_v39 = vld [vmem:[%s5561_s28 + $0x18] sm:$0xf] }
  0x58   : > { %v1141_v5 = vor.u32 %v1140_v52, %v1136_v37  ;;  %v5826_v6 = vrot.slane %v1710_v11, 4  ;;  %v5828_v8 = vrot.slane %v1713_v54, 5  ;;  %v1545_v16 = vshll.u32 %v5807_v48, 16  ;;  %v279_v53 = vld [vmem:[%s5561_s28 + $0x20] sm:$0x1] }
  0x59   : > { %v1540_v12 = vsel %vm5647_vm6, %v1535_v58, %v1539_v45  ;;  %v1544_v15 = vrot.slane %v1542_v61, 4  ;;  %v1555_v17 = vshrl.u32 %v5817_v57, 16  ;;  %v5034_v20 = vcombine.low %v5807_v48, %v5817_v57 }
  0x5a   : > { %2527 = vrot.lane.b32.xlu0 %v5018_v44, %s5497_s6  ;;  %v5049_v18 = vcombine.low %v1530_v50, %v1540_v12  ;;  %v1142_v19 = vrot.slane %v1141_v5, 4  ;;  %v4921_v21 = vrot.slane %v4905_v0, 9  ;;  %v1547_v22 = vrot.slane %v1545_v16, 5  ;;  %v250_v44 = vld [vmem:[%s5561_s28 + $0x1c] sm:$0xf] }
  0x5b   : > { %v1967_v23 = vrot.slane %v5744_v49, 5  ;;  %v1970_v24 = vrot.slane %v5781_v31, 5  ;;  %v4850_v26 = vrot.slane %v4834_v10, 9  ;;  %v1421_v29 = vrot.slane %v5760_v62, 5 }
  0x5c   : > { %2701 = vrot.lane.b32.xlu1 %v5049_v18, %s5499_s8  ;;  %v1147_v28 = vsel %vm5647_vm6, %v1142_v19, %v1146_v59  ;;  %v1424_v30 = vrot.slane %v5794_v9, 5  ;;  %v1734_v49 = vshrl.u32 %v5841_v27, 16  ;;  %v1737_v55 = vshll.u32 %v5841_v27, 16 }
  0x5d   : > { %v5010_v31 = vcombine.low %v1137_v4, %v1147_v28  ;;  %v1968_v33 = vsel %vm5614_vm3, %v4921_v21, %v1967_v23  ;;  %v1969_v34 = vrot.slane %v1967_v23, 4  ;;  %v1422_v2 = vsel %vm5614_vm3, %v4850_v26, %v1421_v29  ;;  %v4897_v28 = vld [vmem:[%s5561_s28 + $0x80] sm:$0x1] }
  0x5e   : > { %v1423_v62 = vrot.slane %v1421_v29, 4  ;;  %v5858_v7 = vrot.slane %v1734_v49, 4  ;;  %v1747_v25 = vshrl.u32 %v5849_v32, 16  ;;  %v5865_v38 = vrot.slane %v1737_v55, 5 }
  0x5f   : > { %2463 = vrot.lane.b32.xlu0 %v5010_v31, %s5496_s5  ;;  %v1971_v36 = vsel %vm5614_vm3, %v1969_v34, %v1970_v24  ;;  %v5042_v9 = vcombine.low %v5841_v27, %v5849_v32  ;;  %v1548_v13 = vor.u32 %v1547_v22, %v1544_v15  ;;  %v1551_v43 = vshll.u32 %v5817_v57, 16 }
  0x60   : > { %2637 = vrot.lane.b32.xlu1 %v5041_v60, %s5498_s7  ;;  %v5065_v40 = vcombine.low %v1968_v33, %v1971_v36  ;;  %v1425_v42 = vsel %vm5614_vm3, %v1423_v62, %v1424_v30  ;;  %v1557_v3 = vrot.slane %v1555_v17, 4  ;;  %v1561_v47 = vshll.u32 %v4890_v35, 16  ;;  %v682_v60 = vld [vmem:[%s5561_s28 + $0x18] sm:$0xe] }
  0x61   : > { %v5026_v45 = vcombine.low %v1422_v2, %v1425_v42  ;;  %v1549_v46 = vrot.slane %v1548_v13, 4  ;;  %v4922_v48 = vrot.slane %v4906_v63, 9  ;;  %v1553_v50 = vrot.slane %v1551_v43, 5  ;;  %v4913_v30 = vld [vmem:[%s5561_s28 + $0x78] sm:$0xe] }
  0x62   : > { %v1974_v51 = vrot.slane %v5817_v57, 5  ;;  %v1977_v52 = vrot.slane %v4890_v35, 5  ;;  %v345_v37 = vshrl.u32 %v249_v39, 16  ;;  %v1563_v11 = vrot.slane %v1561_v47, 5  ;;  %v251_v63 = vld [vmem:[%s5561_s28 + $0x24] sm:$0xf] }
  0x63   : > { %2623 = vrot.lane.b32.xlu0 %v5034_v20, %s5498_s7  ;;  %v348_v54 = vshll.u32 %v249_v39, 16  ;;  %v354_v58 = vshll.u32 %v250_v44, 16  ;;  %v358_v59 = vshrl.u32 %v250_v44, 16  ;;  %v1554_v61 = vsel %vm5647_vm6, %v1549_v46, %v1553_v50  ;;  %v252_v42 = vld [vmem:[%s5561_s28 + $0x28] sm:$0xf] }
  0x64   : > { %2781 = vrot.lane.b32.xlu1 %v5065_v40, %s5500_s9  ;;  %v1558_v0 = vor.u32 %v1557_v3, %v1553_v50  ;;  %v1975_v57 = vsel %vm5614_vm3, %v4922_v48, %v1974_v51  ;;  %v1976_v4 = vrot.slane %v1974_v51, 4  ;;  %v347_v5 = vrot.slane %v345_v37, 4  ;;  %v280_v43 = vld [vmem:[%s5561_s28 + $0x2c] sm:$0x1]  ;;  %v683_v47 = vld [vmem:[%s5561_s28 + $0x24] sm:$0xe] }
  0x65   : > { %v350_v10 = vrot.slane %v348_v54, 5  ;;  %v356_v12 = vrot.slane %v354_v58, 5  ;;  %v360_v15 = vrot.slane %v358_v59, 4  ;;  %v364_v18 = vshll.u32 %v279_v53, 16 }
  0x66   : > { %v1559_v16 = vrot.slane %v1558_v0, 4  ;;  %v1978_v17 = vsel %vm5614_vm3, %v1976_v4, %v1977_v52  ;;  %v4763_v19 = vrot.slane %v682_v60, 9  ;;  %v763_v23 = vrot.slane %v250_v44, 5 }
  0x67   : > { %2543 = vrot.lane.b32.xlu0 %v5026_v45, %s5497_s6  ;;  %v5066_v20 = vcombine.low %v1975_v57, %v1978_v17  ;;  %v351_v21 = vor.u32 %v350_v10, %v347_v5  ;;  %v361_v22 = vor.u32 %v360_v15, %v356_v12  ;;  %v366_v26 = vrot.slane %v364_v18, 5  ;;  %v5400_v17 = vld [vmem:[%s7960_s1] sm:$0xff]  }
  0x68   : > { %2639 = vrot.lane.b32.xlu1 %v5042_v9, %s5498_s7  ;;  %v1564_v24 = vsel %vm5647_vm6, %v1559_v16, %v1563_v11  ;;  %v766_v27 = vrot.slane %v279_v53, 5  ;;  %v1716_v29 = vor.u32 %v5828_v8, %v5826_v6  ;;  %v764_v34 = vsel %vm5614_vm3, %v4763_v19, %v763_v23  ;;  %v4898_v16 = vld [vmem:[%s5561_s28 + $0x8c] sm:$0x1]  ;;  %5281 = vmatprep.subr.bf16.mxu0 %v5400_v17 }
  0x69   : > { %v5050_v49 = vcombine.low %v1554_v61, %v1564_v24  ;;  %v352_v31 = vrot.slane %v351_v21, 4  ;;  %v362_v33 = vrot.slane %v361_v22, 4  ;;  %v765_v55 = vrot.slane %v763_v23, 4  ;;  %v4914_v22 = vld [vmem:[%s5561_s28 + $0x84] sm:$0xe]  ;;  %5282 = vmatpush3.bf16.msra.mxu0 %v5400_v17  ;;  %5317 = vmatprep.subr.bf16.mxu1 %v5400_v17 }
  0x6a   : > { %v1717_v35 = vrot.slane %v1716_v29, 4  ;;  %v1719_v2 = vshll.u32 %v5803_v41, 16  ;;  %v1725_v62 = vrot.slane %v1723_v56, 4  ;;  %v1729_v36 = vshll.u32 %v4897_v28, 16  ;;  %5319 = vmatpush3.bf16.msra.mxu1 %v5400_v17 }
  0x6b   : > { %2703 = vrot.lane.b32.xlu0 %v5050_v49, %s5499_s8  ;;  %v357_v6 = vsel %vm5647_vm6, %v352_v31, %v356_v12  ;;  %v367_v8 = vsel %vm5647_vm6, %v362_v33, %v366_v26  ;;  %v4929_v9 = vrot.slane %v4913_v30, 9  ;;  %v767_v39 = vsel %vm5614_vm3, %v765_v55, %v766_v27 }
  0x6c   : > { %2783 = vrot.lane.b32.xlu1 %v5066_v20, %s5500_s9  ;;  %v4955_v13 = vcombine.low %v357_v6, %v367_v8  ;;  %v1721_v40 = vrot.slane %v1719_v2, 5  ;;  %v2023_v56 = vrot.slane %v5803_v41, 5  ;;  %v4971_v3 = vcombine.low %v764_v34, %v767_v39  ;;  %v265_v34 = vld [vmem:[%s5561_s28 + $0x78] sm:$0xf] }
  0x6d   : > { %v1731_v44 = vrot.slane %v1729_v36, 5  ;;  %v2026_v45 = vrot.slane %v4897_v28, 5  ;;  %v369_v46 = vshrl.u32 %v251_v63, 16  ;;  %v372_v37 = vshll.u32 %v251_v63, 16  ;;  %v287_v63 = vld [vmem:[%s5561_s28 + $0x80] sm:$0x1] }
  0x6e   : > { %v1722_v48 = vsel %vm5647_vm6, %v1717_v35, %v1721_v40  ;;  %v1726_v50 = vor.u32 %v1725_v62, %v1721_v40  ;;  %v2024_v51 = vsel %vm5614_vm3, %v4929_v9, %v2023_v56  ;;  %v2025_v52 = vrot.slane %v2023_v56, 4  ;;  %v266_v62 = vld [vmem:[%s5561_s28 + $0x7c] sm:$0xf]  ;;  %v690_v9 = vld [vmem:[%s5561_s28 + $0x78] sm:$0xe] }
  0x6f   : > { %2193 = vrot.lane.b32.xlu0 %v4955_v13, %s5495_s4  ;;  %v371_v53 = vrot.slane %v369_v46, 4  ;;  %v378_v41 = vshll.u32 %v252_v42, 16  ;;  %v382_v11 = vshrl.u32 %v252_v42, 16  ;;  %v388_v59 = vshll.u32 %v280_v43, 16 }
  0x70   : > { %2273 = vrot.lane.b32.xlu1 %v4971_v3, %s5494_s30  ;;  %v1727_v54 = vrot.slane %v1726_v50, 4  ;;  %v2027_v58 = vsel %vm5614_vm3, %v2025_v52, %v2026_v45  ;;  %v4764_v60 = vrot.slane %v683_v47, 9  ;;  %v374_v0 = vrot.slane %v372_v37, 5  ;;  %v5954_v45 = vld [vmem:[%s5561_s28 + $0x24] sm:$0xf] }
  0x71   : > { %v5073_v61 = vcombine.low %v2024_v51, %v2027_v58  ;;  %v380_v57 = vrot.slane %v378_v41, 5  ;;  %v384_v4 = vrot.slane %v382_v11, 4  ;;  %v390_v10 = vrot.slane %v388_v59, 5  ;;  %v5961_v41 = vld [vmem:[%s5561_s28 + $0x28] sm:$0xf] }
  0x72   : > { %v1732_v5 = vsel %vm5647_vm6, %v1727_v54, %v1731_v44  ;;  %v770_v12 = vrot.slane %v252_v42, 5  ;;  %v773_v15 = vrot.slane %v280_v43, 5  ;;  %v375_v19 = vor.u32 %v374_v0, %v371_v53 }
  0x73   : > { %v5057_v18 = vcombine.low %v1722_v48, %v1732_v5  ;;  %v385_v20 = vor.u32 %v384_v4, %v380_v57  ;;  %v1740_v21 = vor.u32 %v5865_v38, %v5858_v7  ;;  %v1743_v26 = vshll.u32 %v5849_v32, 16 }
  0x74   : > { %2797 = vrot.lane.b32.xlu1 %v5073_v61, %s5500_s9  ;;  %v771_v23 = vsel %vm5614_vm3, %v4764_v60, %v770_v12  ;;  %v772_v24 = vrot.slane %v770_v12, 4  ;;  %v1749_v27 = vrot.slane %v1747_v25, 4  ;;  %v376_v28 = vrot.slane %v375_v19, 4 }
  0x75   : > { %2717 = vrot.lane.b32.xlu0 %v5057_v18, %s5499_s8  ;;  %v386_v7 = vrot.slane %v385_v20, 4  ;;  %v1741_v38 = vrot.slane %v1740_v21, 4  ;;  %v1753_v29 = vshll.u32 %v4898_v16, 16  ;;  %v1745_v49 = vrot.slane %v1743_v26, 5  ;;  %v267_v20 = vld [vmem:[%s5561_s28 + $0x84] sm:$0xf] }
  0x76   : > { %v774_v30 = vsel %vm5614_vm3, %v772_v24, %v773_v15  ;;  %v4930_v31 = vrot.slane %v4914_v22, 9  ;;  %v2030_v33 = vrot.slane %v5849_v32, 5  ;;  %v381_v25 = vsel %vm5647_vm6, %v376_v28, %v380_v57  ;;  %v5971_v15 = vld [vmem:[%s5561_s28 + $0x2c] sm:$0x1]  ;;  %v5982_v26 = vld [vmem:[%s5561_s28 + $0x88] sm:$0xf] }
  0x77   : > { %v391_v55 = vsel %vm5647_vm6, %v386_v7, %v390_v10  ;;  %v4972_v35 = vcombine.low %v771_v23, %v774_v30  ;;  %v1755_v2 = vrot.slane %v1753_v29, 5  ;;  %v1746_v8 = vsel %vm5647_vm6, %v1741_v38, %v1745_v49  ;;  %v5988_v29 = vld [vmem:[%s5561_s28 + $0x8c] sm:$0x1] }
  0x78   : > { %v4956_v6 = vcombine.low %v381_v25, %v391_v55  ;;  %v1750_v36 = vor.u32 %v1749_v27, %v1745_v49  ;;  %v2031_v32 = vsel %vm5614_vm3, %v4930_v31, %v2030_v33  ;;  %v2032_v13 = vrot.slane %v2030_v33, 4 }
  0x79   : > { %2275 = vrot.lane.b32.xlu1 %v4972_v35, %s5494_s30  ;;  %v2033_v39 = vrot.slane %v4898_v16, 5  ;;  %v537_v40 = vshrl.u32 %v265_v34, 16  ;;  %v540_v56 = vshll.u32 %v265_v34, 16  ;;  %v546_v43 = vshll.u32 %v266_v62, 16  ;;  %v4797_v34 = vld [vmem:[%s5561_s28 + $0x84] sm:$0xf] }
  0x7a   : > { %2195 = vrot.lane.b32.xlu0 %v4956_v6, %s5495_s4  ;;  %v1751_v42 = vrot.slane %v1750_v36, 4  ;;  %v550_v3 = vshrl.u32 %v266_v62, 16  ;;  %v556_v44 = vshll.u32 %v287_v63, 16  ;;  %v4771_v50 = vrot.slane %v690_v9, 9  ;;  %v5997_v36 = vld [vmem:[%s5561_s28 + $0x88] sm:$0xf] }
  0x7b   : > { %v2034_v46 = vsel %vm5614_vm3, %v2032_v13, %v2033_v39  ;;  %v539_v47 = vrot.slane %v537_v40, 4  ;;  %v542_v48 = vrot.slane %v540_v56, 5  ;;  %v548_v53 = vrot.slane %v546_v43, 5  ;;  %v4783_v40 = vld [vmem:[%s5561_s28 + $0x30] sm:$0xf] }
  0x7c   : > { %v1756_v51 = vsel %vm5647_vm6, %v1751_v42, %v1755_v2  ;;  %v5074_v52 = vcombine.low %v2031_v32, %v2034_v46  ;;  %v552_v37 = vrot.slane %v550_v3, 4  ;;  %v558_v58 = vrot.slane %v556_v44, 5  ;;  %v6003_v44 = vld [vmem:[%s5561_s28 + $0x34] sm:$0xf] }
  0x7d   : > { %v5058_v11 = vcombine.low %v1746_v8, %v1756_v51  ;;  %v543_v54 = vor.u32 %v542_v48, %v539_v47  ;;  %v819_v59 = vrot.slane %v266_v62, 5  ;;  %v822_v61 = vrot.slane %v287_v63, 5 }
  0x7e   : > { %2799 = vrot.lane.b32.xlu1 %v5074_v52, %s5500_s9  ;;  %v553_v60 = vor.u32 %v552_v37, %v548_v53  ;;  %v957_v0 = vshrl.u32 %v5954_v45, 16  ;;  %v960_v57 = vshll.u32 %v5954_v45, 16  ;;  %v970_v12 = vshrl.u32 %v5961_v41, 16 }
  0x7f   : > { %2719 = vrot.lane.b32.xlu0 %v5058_v11, %s5499_s8  ;;  %v544_v4 = vrot.slane %v543_v54, 4  ;;  %v820_v5 = vsel %vm5614_vm3, %v4771_v50, %v819_v59  ;;  %v821_v10 = vrot.slane %v819_v59, 4  ;;  %v4987_v19 = vcombine.low %v5954_v45, %v5961_v41  ;;  %v4827_v50 = vld [vmem:[%s5561_s28 + $0x24] sm:$0xe] }
  0x80   : > { %v554_v16 = vrot.slane %v553_v60, 4  ;;  %v959_v17 = vrot.slane %v957_v0, 4  ;;  %v962_v18 = vrot.slane %v960_v57, 5  ;;  %v966_v23 = vshll.u32 %v5961_v41, 16  ;;  %v691_v60 = vld [vmem:[%s5561_s28 + $0x84] sm:$0xe] }
  0x81   : > { %v549_v21 = vsel %vm5647_vm6, %v544_v4, %v548_v53  ;;  %v823_v22 = vsel %vm5614_vm3, %v821_v10, %v822_v61  ;;  %v972_v24 = vrot.slane %v970_v12, 4  ;;  %v976_v38 = vshll.u32 %v5971_v15, 16 }
  0x82   : > { %v559_v27 = vsel %vm5647_vm6, %v554_v16, %v558_v58  ;;  %v4979_v28 = vcombine.low %v820_v5, %v823_v22  ;;  %v963_v7 = vor.u32 %v962_v18, %v959_v17  ;;  %v968_v49 = vrot.slane %v966_v23, 5  ;;  %v6022_v17 = vld [vmem:[%s5561_s28 + $0x8c] sm:$0x1] }
  0x83   : > { %v4963_v30 = vcombine.low %v549_v21, %v559_v27  ;;  %v561_v31 = vshrl.u32 %v267_v20, 16  ;;  %v564_v33 = vshll.u32 %v267_v20, 16  ;;  %v978_v55 = vrot.slane %v976_v38, 5 }
  0x84   : > { %2289 = vrot.lane.b32.xlu1 %v4979_v28, %s5494_s30  ;;  %v964_v25 = vrot.slane %v963_v7, 4  ;;  %v570_v35 = vshll.u32 %v5982_v26, 16  ;;  %v574_v2 = vshrl.u32 %v5982_v26, 16  ;;  %v973_v62 = vor.u32 %v972_v24, %v968_v49 }
  0x85   : > { %2209 = vrot.lane.b32.xlu0 %v4963_v30, %s5495_s4  ;;  %v563_v63 = vrot.slane %v561_v31, 4  ;;  %v566_v6 = vrot.slane %v564_v33, 5  ;;  %v580_v8 = vshll.u32 %v5988_v29, 16  ;;  %v1149_v39 = vshrl.u32 %v4797_v34, 16  ;;  %v6037_v30 = vld [vmem:[%s5561_s28 + $0x38] sm:$0x1] }
  0x86   : > { %v969_v32 = vsel %vm5647_vm6, %v964_v25, %v968_v49  ;;  %v572_v9 = vrot.slane %v570_v35, 5  ;;  %v576_v13 = vrot.slane %v574_v2, 4  ;;  %v974_v56 = vrot.slane %v973_v62, 4  ;;  %v4861_v31 = vld [vmem:[%s5561_s28 + $0x30] sm:$0xf] }
  0x87   : > { %v567_v42 = vor.u32 %v566_v6, %v563_v63  ;;  %v582_v43 = vrot.slane %v580_v8, 5  ;;  %v1152_v3 = vshll.u32 %v4797_v34, 16  ;;  %v1151_v46 = vrot.slane %v1149_v39, 4  ;;  %v6044_v35 = vld [vmem:[%s5561_s28 + $0x34] sm:$0xf] }
  0x88   : > { %v577_v45 = vor.u32 %v576_v13, %v572_v9  ;;  %v1162_v47 = vshrl.u32 %v5997_v36, 16  ;;  %v4995_v48 = vcombine.low %v4797_v34, %v5997_v36  ;;  %v979_v51 = vsel %vm5647_vm6, %v974_v56, %v978_v55  ;;  %v4799_v39 = vld [vmem:[%s5561_s28 + $0x90] sm:$0xf] }
  0x89   : > { %2369 = vrot.lane.b32.xlu0 %v4987_v19, %s5493_s29  ;;  %v568_v52 = vrot.slane %v567_v42, 4  ;;  %v1154_v53 = vrot.slane %v1152_v3, 5  ;;  %v981_v37 = vshrl.u32 %v4783_v40, 16  ;;  %v5003_v11 = vcombine.low %v969_v32, %v979_v51  ;;  %v6055_v3 = vld [vmem:[%s5561_s28 + $0x94] sm:$0xf] }
  0x8a   : > { %v578_v54 = vrot.slane %v577_v45, 4  ;;  %v984_v58 = vshll.u32 %v4783_v40, 16  ;;  %v994_v59 = vshrl.u32 %v6003_v44, 16  ;;  %v4988_v57 = vcombine.low %v4783_v40, %v6003_v44 }
  0x8b   : > { %v573_v61 = vsel %vm5647_vm6, %v568_v52, %v572_v9  ;;  %v983_v0 = vrot.slane %v981_v37, 4  ;;  %v4843_v4 = vrot.slane %v4827_v50, 9  ;;  %2449 = vrot.lane.b32.xlu1 %v5003_v11, %s5496_s5  ;;  %v1372_v12 = vrot.slane %v5961_v41, 5  ;;  %v4835_v50 = vld [vmem:[%s5561_s28 + $0x84] sm:$0xe] }
  0x8c   : > { %v583_v5 = vsel %vm5647_vm6, %v578_v54, %v582_v43  ;;  %v986_v10 = vrot.slane %v984_v58, 5  ;;  %v1375_v16 = vrot.slane %v5971_v15, 5  ;;  %v4772_v19 = vrot.slane %v691_v60, 9  ;;  %v4828_v11 = vld [vmem:[%s5561_s28 + $0x30] sm:$0xe] }
  0x8d   : > { %v4964_v18 = vcombine.low %v573_v61, %v583_v5  ;;  %v826_v20 = vrot.slane %v5982_v26, 5  ;;  %v829_v21 = vrot.slane %v5988_v29, 5  ;;  %v1373_v22 = vsel %vm5614_vm3, %v4843_v4, %v1372_v12 }
  0x8e   : > { %v1374_v23 = vrot.slane %v1372_v12, 4  ;;  %v1155_v24 = vor.u32 %v1154_v53, %v1151_v46  ;;  %v1158_v27 = vshll.u32 %v5997_v36, 16  ;;  %v1164_v28 = vrot.slane %v1162_v47, 4 }
  0x8f   : > { %2211 = vrot.lane.b32.xlu0 %v4964_v18, %s5495_s4  ;;  %v827_v41 = vsel %vm5614_vm3, %v4772_v19, %v826_v20  ;;  %v828_v15 = vrot.slane %v826_v20, 4  ;;  %v1168_v26 = vshll.u32 %v6022_v17, 16  ;;  %2385 = vrot.lane.b32.xlu1 %v4995_v48, %s5493_s29  ;;  %v987_v49 = vor.u32 %v986_v10, %v983_v0  ;;  %v6073_v18 = vld [vmem:[%s5561_s28 + $0x38] sm:$0x1] }
  0x90   : > { %v1376_v7 = vsel %vm5614_vm3, %v1374_v23, %v1375_v16  ;;  %v1156_v38 = vrot.slane %v1155_v24, 4  ;;  %v1160_v29 = vrot.slane %v1158_v27, 5  ;;  %v990_v55 = vshll.u32 %v6003_v44, 16 }
  0x91   : > { %v5019_v33 = vcombine.low %v1373_v22, %v1376_v7  ;;  %v830_v34 = vsel %vm5614_vm3, %v828_v15, %v829_v21  ;;  %v1170_v25 = vrot.slane %v1168_v26, 5  ;;  %v988_v6 = vrot.slane %v987_v49, 4 }
  0x92   : > { %v4980_v2 = vcombine.low %v827_v41, %v830_v34  ;;  %v1161_v62 = vsel %vm5647_vm6, %v1156_v38, %v1160_v29  ;;  %v1165_v63 = vor.u32 %v1164_v28, %v1160_v29  ;;  %v992_v8 = vrot.slane %v990_v55, 5  ;;  %v6088_v28 = vld [vmem:[%s5561_s28 + $0x98] sm:$0x1] }
  0x93   : > { %2371 = vrot.lane.b32.xlu0 %v4988_v57, %s5493_s29  ;;  %v996_v32 = vrot.slane %v994_v59, 4  ;;  %v1000_v9 = vshll.u32 %v6037_v30, 16  ;;  %v1566_v13 = vshrl.u32 %v4861_v31, 16  ;;  %2529 = vrot.lane.b32.xlu1 %v5019_v33, %s5497_s6  ;;  %v1569_v56 = vshll.u32 %v4861_v31, 16  ;;  %v6095_v33 = vld [vmem:[%s5561_s28 + $0x3c] sm:$0xf] }
  0x94   : > { %v1166_v40 = vrot.slane %v1165_v63, 4  ;;  %v1579_v42 = vshrl.u32 %v6044_v35, 16  ;;  %v5035_v43 = vcombine.low %v4861_v31, %v6044_v35  ;;  %v993_v45 = vsel %vm5647_vm6, %v988_v6, %v992_v8  ;;  %v4877_v6 = vld [vmem:[%s5561_s28 + $0x90] sm:$0xf] }
  0x95   : > { %v997_v46 = vor.u32 %v996_v32, %v992_v8  ;;  %v1002_v47 = vrot.slane %v1000_v9, 5  ;;  %v1568_v48 = vrot.slane %v1566_v13, 4  ;;  %v1571_v52 = vrot.slane %v1569_v56, 5  ;;  %v6101_v8 = vld [vmem:[%s5561_s28 + $0x94] sm:$0xf] }
  0x96   : > { %v1171_v51 = vsel %vm5647_vm6, %v1166_v40, %v1170_v25  ;;  %v1173_v53 = vshrl.u32 %v4799_v39, 16  ;;  %v1176_v37 = vshll.u32 %v4799_v39, 16  ;;  %v1186_v59 = vshrl.u32 %v6055_v3, 16 }
  0x97   : > { %2291 = vrot.lane.b32.xlu0 %v4980_v2, %s5494_s30  ;;  %v5011_v54 = vcombine.low %v1161_v62, %v1171_v51  ;;  %v998_v58 = vrot.slane %v997_v46, 4  ;;  %v4996_v60 = vcombine.low %v4799_v39, %v6055_v3  ;;  %v4851_v57 = vrot.slane %v4835_v50, 9  ;;  %v6081_v27 = vpop.permute.xlu1 %2365  ;;  %v4907_v39 = vld [vmem:[%s5561_s28 + $0x30] sm:$0xe]  ;;  %v6117_v51 = vld [vmem:[%s5561_s28 + $0x40] sm:$0xf] }
  0x98   : > { %v1175_v61 = vrot.slane %v1173_v53, 4  ;;  %v1178_v0 = vrot.slane %v1176_v37, 5  ;;  %v1428_v4 = vrot.slane %v5997_v36, 5  ;;  %v1431_v10 = vrot.slane %v6022_v17, 5  ;;  %v4836_v46 = vld [vmem:[%s5561_s28 + $0x90] sm:$0xe] }
  0x99   : > { %2465 = vrot.lane.b32.xlu1 %v5011_v54, %s5496_s5  ;;  %v1003_v5 = vsel %vm5647_vm6, %v998_v58, %v1002_v47  ;;  %v4844_v12 = vrot.slane %v4828_v11, 9  ;;  %v1379_v16 = vrot.slane %v6003_v44, 5  ;;  %v1382_v36 = vrot.slane %v6037_v30, 5 }
  0x9a   : > { %v5004_v19 = vcombine.low %v993_v45, %v1003_v5  ;;  %v1429_v20 = vsel %vm5614_vm3, %v4851_v57, %v1428_v4  ;;  %v1430_v21 = vrot.slane %v1428_v4, 4  ;;  %v1572_v24 = vor.u32 %v1571_v52, %v1568_v48 }
  0x9b   : > { %v1380_v22 = vsel %vm5614_vm3, %v4844_v12, %v1379_v16  ;;  %v1381_v23 = vrot.slane %v1379_v16, 4  ;;  %v1575_v17 = vshll.u32 %v6044_v35, 16  ;;  %v1581_v41 = vrot.slane %v1579_v42, 4 }
  0x9c   : > { %2451 = vrot.lane.b32.xlu0 %v5004_v19, %s5496_s5  ;;  %v1432_v44 = vsel %vm5614_vm3, %v1430_v21, %v1431_v10  ;;  %v1585_v15 = vshll.u32 %v6073_v18, 16  ;;  %v1179_v26 = vor.u32 %v1178_v0, %v1175_v61  ;;  %v1573_v29 = vrot.slane %v1572_v24, 4  ;;  %v6130_v10 = vld [vmem:[%s5561_s28 + $0x9c] sm:$0xf]  ;;  %v4892_v21 = vld [vmem:[%s5561_s28 + $0x44] sm:$0x1] }
  0x9d   : > { %2625 = vrot.lane.b32.xlu1 %v5035_v43, %s5498_s7  ;;  %v5027_v7 = vcombine.low %v1429_v20, %v1432_v44  ;;  %v1383_v38 = vsel %vm5614_vm3, %v1381_v23, %v1382_v36  ;;  %v1577_v30 = vrot.slane %v1575_v17, 5  ;;  %v1182_v31 = vshll.u32 %v6055_v3, 16  ;;  %v6138_v20 = vld [vmem:[%s5561_s28 + $0xa0] sm:$0xf]  ;;  %v4908_v17 = vld [vmem:[%s5561_s28 + $0x3c] sm:$0xe] }
  0x9e   : > { %v1587_v49 = vrot.slane %v1585_v15, 5  ;;  %v1180_v25 = vrot.slane %v1179_v26, 4  ;;  %v1188_v55 = vrot.slane %v1186_v59, 4  ;;  %v1192_v2 = vshll.u32 %v6088_v28, 16  ;;  %v6132_v12 = vpop.permute.xlu0 %2271  ;;  %v253_v26 = vld [vmem:[%s5561_s28 + $0x30] sm:$0xf] }
  0x9f   : > { %v1582_v34 = vor.u32 %v1581_v41, %v1577_v30  ;;  %v5020_v62 = vcombine.low %v1380_v22, %v1383_v38  ;;  %v1184_v63 = vrot.slane %v1182_v31, 5  ;;  %v1578_v32 = vsel %vm5647_vm6, %v1573_v29, %v1577_v30 }
  0xa0   : > { %2387 = vrot.lane.b32.xlu0 %v4996_v60, %s5493_s29  ;;  %v1590_v13 = vshrl.u32 %v6095_v33, 16  ;;  %v6108_v40 = vpop.permute.xlu1 %2269  ;;  %v1194_v42 = vrot.slane %v1192_v2, 5  ;;  %v1758_v43 = vshrl.u32 %v4877_v6, 16  ;;  %v1761_v45 = vshll.u32 %v4877_v6, 16 }
  0xa1   : > { %2545 = vrot.lane.b32.xlu1 %v5027_v7, %s5497_s6  ;;  %v1583_v9 = vrot.slane %v1582_v34, 4  ;;  %v1189_v56 = vor.u32 %v1188_v55, %v1184_v63  ;;  %v1185_v48 = vsel %vm5647_vm6, %v1180_v25, %v1184_v63  ;;  %v5043_v50 = vcombine.low %v4877_v6, %v6101_v8 }
  0xa2   : > { %v1593_v52 = vshll.u32 %v6095_v33, 16  ;;  %v1592_v11 = vrot.slane %v1590_v13, 4  ;;  %v4923_v54 = vrot.slane %v4907_v39, 9  ;;  %v1981_v59 = vrot.slane %v6044_v35, 5 }
  0xa3   : > { %v1588_v47 = vsel %vm5647_vm6, %v1583_v9, %v1587_v49  ;;  %v1190_v37 = vrot.slane %v1189_v56, 4  ;;  %v1984_v60 = vrot.slane %v6073_v18, 5  ;;  %v4852_v61 = vrot.slane %v4836_v46, 9  ;;  %v6162_v49 = vld [vmem:[%s5561_s28 + $0x34] sm:$0xf] }
  0xa4   : > { %2531 = vrot.lane.b32.xlu0 %v5020_v62, %s5497_s6  ;;  %v5051_v53 = vcombine.low %v1578_v32, %v1588_v47  ;;  %v1595_v58 = vrot.slane %v1593_v52, 5  ;;  %v1603_v57 = vshrl.u32 %v6117_v51, 16  ;;  %v1435_v4 = vrot.slane %v6055_v3, 5  ;;  %v6141_v36 = vpop.permute.xlu1 %2285  ;;  %v281_v9 = vld [vmem:[%s5561_s28 + $0x38] sm:$0x1] }
  0xa5   : > { %v1195_v0 = vsel %vm5647_vm6, %v1190_v37, %v1194_v42  ;;  %v1438_v5 = vrot.slane %v6088_v28, 5  ;;  %v1771_v16 = vshrl.u32 %v6101_v8, 16  ;;  %v1982_v18 = vsel %vm5614_vm3, %v4923_v54, %v1981_v59 }
  0xa6   : > { %2705 = vrot.lane.b32.xlu1 %v5051_v53, %s5499_s8  ;;  %v5012_v35 = vcombine.low %v1185_v48, %v1195_v0  ;;  %v1983_v19 = vrot.slane %v1981_v59, 4  ;;  %v6143_v3 = vrot.slane %v1758_v43, 4  ;;  %v6145_v22 = vrot.slane %v1761_v45, 5  ;;  %v684_v0 = vld [vmem:[%s5561_s28 + $0x30] sm:$0xe] }
  0xa7   : > { %v5036_v23 = vcombine.low %v6095_v33, %v6117_v51  ;;  %v1437_v24 = vrot.slane %v1435_v4, 4  ;;  %v1436_v41 = vsel %vm5614_vm3, %v4852_v61, %v1435_v4  ;;  %v1782_v15 = vshrl.u32 %v6130_v10, 16 }
  0xa8   : > { %2467 = vrot.lane.b32.xlu0 %v5012_v35, %s5496_s5  ;;  %v1985_v44 = vsel %vm5614_vm3, %v1983_v19, %v1984_v60  ;;  %v1596_v28 = vor.u32 %v1595_v58, %v1592_v11  ;;  %v1599_v29 = vshll.u32 %v6117_v51, 16  ;;  %v1605_v30 = vrot.slane %v1603_v57, 4  ;;  %v5425_v35 = vld [vmem:[%s5561_s28 + $0x4] sm:$0xf] }
  0xa9   : > { %v5067_v7 = vcombine.low %v1982_v18, %v1985_v44  ;;  %v1439_v38 = vsel %vm5614_vm3, %v1437_v24, %v1438_v5  ;;  %v5044_v31 = vcombine.low %v6130_v10, %v6138_v20  ;;  %v1609_v34 = vshll.u32 %v4892_v21, 16  ;;  %v5426_v18 = vld [vmem:[%s5561_s28] sm:$0xf] }
  0xaa   : > { %2641 = vrot.lane.b32.xlu1 %v5043_v50, %s5498_s7  ;;  %v1597_v33 = vrot.slane %v1596_v28, 4  ;;  %v4924_v25 = vrot.slane %v4908_v17, 9  ;;  %v1601_v55 = vrot.slane %v1599_v29, 5  ;;  %v1988_v2 = vrot.slane %v6117_v51, 5  ;;  %v6167_v6 = vpop.permute.xlu0 %2189  ;;  %v4899_v28 = vld [vmem:[%s5561_s28 + $0x98] sm:$0x1] }
  0xab   : > { %v1991_v62 = vrot.slane %v4892_v21, 5  ;;  %v393_v63 = vshrl.u32 %v253_v26, 16  ;;  %v5028_v32 = vcombine.low %v1436_v41, %v1439_v38  ;;  %v396_v13 = vshll.u32 %v253_v26, 16 }
  0xac   : > { %2627 = vrot.lane.b32.xlu0 %v5036_v23, %s5498_s7  ;;  %v402_v39 = vshll.u32 %v6162_v49, 16  ;;  %v406_v56 = vshrl.u32 %v6162_v49, 16  ;;  %v1606_v43 = vor.u32 %v1605_v30, %v1601_v55  ;;  %v1611_v45 = vrot.slane %v1609_v34, 5 }
  0xad   : > { %v6173_v42 = vpop.permute.xlu1 %2205  ;;  %v1989_v46 = vsel %vm5614_vm3, %v4924_v25, %v1988_v2  ;;  %v1990_v47 = vrot.slane %v1988_v2, 4  ;;  %v395_v48 = vrot.slane %v393_v63, 4  ;;  %v398_v50 = vrot.slane %v396_v13, 5  ;;  %v256_v13 = vld [vmem:[%s5561_s28 + $0x40] sm:$0xf] }
  0xae   : > { %2785 = vrot.lane.b32.xlu1 %v5067_v7, %s5500_s9  ;;  %v404_v51 = vrot.slane %v402_v39, 5  ;;  %v408_v52 = vrot.slane %v406_v56, 4  ;;  %v1602_v53 = vsel %vm5647_vm6, %v1597_v33, %v1601_v55  ;;  %v1607_v37 = vrot.slane %v1606_v43, 4 }
  0xaf   : > { %v1992_v11 = vsel %vm5614_vm3, %v1990_v47, %v1991_v62  ;;  %v412_v54 = vshll.u32 %v281_v9, 16  ;;  %v6183_v58 = vrot.slane %v1782_v15, 4  ;;  %v1785_v59 = vshll.u32 %v6130_v10, 16  ;;  %v282_v47 = vld [vmem:[%s5561_s28 + $0x44] sm:$0x1] }
  0xb0   : > { %2547 = vrot.lane.b32.xlu0 %v5028_v32, %s5497_s6  ;;  %v399_v60 = vor.u32 %v398_v50, %v395_v48  ;;  %v409_v61 = vor.u32 %v408_v52, %v404_v51  ;;  %v1612_v57 = vsel %vm5647_vm6, %v1607_v37, %v1611_v45  ;;  %v5068_v4 = vcombine.low %v1989_v46, %v1992_v11  ;;  %v5427_v50 = vld [vmem:[%s5561_s28 + $0x64] sm:$0xf] }
  0xb1   : > { %v414_v5 = vrot.slane %v412_v54, 5  ;;  %v4937_v19 = vcombine.low %v5426_v18, %v5425_v35  ;;  %v6192_v21 = vpop.permute.xlu0 %2191  ;;  %v5052_v10 = vcombine.low %v1602_v53, %v1612_v57  ;;  %vm2813_vm7 = vcmask 15360  }
  0xb2   : > { %2643 = vrot.lane.b32.xlu1 %v5044_v31, %s5498_s7  ;;  %v6194_v23 = vpop.permute.xlu1 %2445  ;;  %v400_v24 = vrot.slane %v399_v60, 4  ;;  %v410_v17 = vrot.slane %v409_v61, 4  ;;  %v4765_v44 = vrot.slane %v684_v0, 9  ;;  %v777_v41 = vrot.slane %v6162_v49, 5  ;;  %v4915_v49 = vld [vmem:[%s5561_s28 + $0x90] sm:$0xe] }
  0xb3   : > { %v780_v15 = vrot.slane %v281_v9, 5  ;;  %v1764_v26 = vor.u32 %v6145_v22, %v6143_v3  ;;  %v1767_v29 = vshll.u32 %v6101_v8, 16  ;;  %v1773_v30 = vrot.slane %v1771_v16, 4  ;;  %v255_v16 = vld [vmem:[%s5561_s28 + $0x3c] sm:$0xf] }
  0xb4   : > { %2707 = vrot.lane.b32.xlu0 %v5052_v10, %s5499_s8  ;;  %v405_v7 = vsel %vm5647_vm6, %v400_v24, %v404_v51  ;;  %v415_v38 = vsel %vm5647_vm6, %v410_v17, %v414_v5  ;;  %v778_v3 = vsel %vm5614_vm3, %v4765_v44, %v777_v41  ;;  %v779_v22 = vrot.slane %v777_v41, 4  ;;  %v5428_v51 = vld [vmem:[%s5561_s28 + $0x60] sm:$0xf]  ;;  %v685_v24 = vld [vmem:[%s5561_s28 + $0x3c] sm:$0xe] }
  0xb5   : > { %v4957_v31 = vcombine.low %v405_v7, %v415_v38  ;;  %v1765_v33 = vrot.slane %v1764_v26, 4  ;;  %v1795_v25 = vshrl.u32 %v6138_v20, 16  ;;  %vm2862_vm8 = vcmask 31744   ;;  %v5430_v26 = vld [vmem:[%s5561_s28 + $0xc] sm:$0xf] }
  0xb6   : > { %2787 = vrot.lane.b32.xlu1 %v5068_v4, %s5500_s9  ;;  %v6212_v34 = vpop.permute.xlu1 %2381  ;;  %v1769_v55 = vrot.slane %v1767_v29, 5  ;;  %v1777_v2 = vshll.u32 %v4899_v28, 16  ;;  %v781_v62 = vsel %vm5614_vm3, %v779_v22, %v780_v15  ;;  %v4931_v63 = vrot.slane %v4915_v49, 9 }
  0xb7   : > { %v2037_v32 = vrot.slane %v6101_v8, 5  ;;  %v2040_v9 = vrot.slane %v4899_v28, 5  ;;  %v2816_v56 = vsel %vm2813_vm7, %v4937_v19, %v6167_v6  ;;  %v4973_v43 = vcombine.low %v778_v3, %v781_v62  ;;  %v5429_v28 = vld [vmem:[%s5561_s28 + $0x10] sm:$0xf] }
  0xb8   : > { %v6220_v39 = vpop.permute.xlu0 %2207  ;;  %2197 = vrot.lane.b32.xlu0 %v4957_v31, %s5495_s4  ;;  %v1774_v45 = vor.u32 %v1773_v30, %v1769_v55  ;;  %v1779_v46 = vrot.slane %v1777_v2, 5  ;;  %v1770_v48 = vsel %vm5647_vm6, %v1765_v33, %v1769_v55  ;;  %v4945_v52 = vcombine.low %v5428_v51, %v5427_v50  ;;  %v4900_v31 = vld [vmem:[%s5561_s28 + $0xa4] sm:$0x1] }
  0xb9   : > { %v2038_v8 = vsel %vm5614_vm3, %v4931_v63, %v2037_v32  ;;  %v2039_v53 = vrot.slane %v2037_v32, 4  ;;  %v417_v11 = vshrl.u32 %v255_v16, 16  ;;  %v420_v6 = vshll.u32 %v255_v16, 16 }
  0xba   : > { %2277 = vrot.lane.b32.xlu1 %v4973_v43, %s5494_s30  ;;  %v1775_v37 = vrot.slane %v1774_v45, 4  ;;  %v426_v54 = vshll.u32 %v256_v13, 16  ;;  %v6233_v60 = vpop.permute.xlu1 %2525  ;;  %v1787_v61 = vrot.slane %v1785_v59, 5  ;;  %v430_v57 = vshrl.u32 %v256_v13, 16 }
  0xbb   : > { %v2041_v0 = vsel %vm5614_vm3, %v2039_v53, %v2040_v9  ;;  %v436_v4 = vshll.u32 %v282_v47, 16  ;;  %v419_v19 = vrot.slane %v417_v11, 4  ;;  %v422_v10 = vrot.slane %v420_v6, 5 }
  0xbc   : > { %v6237_v5 = vpop.permute.xlu0 %2367  ;;  %v1780_v35 = vsel %vm5647_vm6, %v1775_v37, %v1779_v46  ;;  %v5075_v18 = vcombine.low %v2038_v8, %v2041_v0  ;;  %v2864_v17 = vsel %vm2862_vm8, %v2816_v56, %v6108_v40  ;;  %v428_v44 = vrot.slane %v426_v54, 5  ;;  %v4916_v56 = vld [vmem:[%s5561_s28 + $0x9c] sm:$0xe]  ;;  %v5432_v8 = vld [vmem:[%s5561_s28 + $0x70] sm:$0xf] }
  0xbd   : > { %v5059_v59 = vcombine.low %v1770_v48, %v1780_v35  ;;  %v432_v41 = vrot.slane %v430_v57, 4  ;;  %v6246_v15 = vsel %vm2813_vm7, %v4945_v52, %v6173_v42  ;;  %v4938_v7 = vcombine.low %v5430_v26, %v5429_v28  ;;  %v269_v48 = vld [vmem:[%s5561_s28 + $0x90] sm:$0xf]  ;;  %v5431_v52 = vld [vmem:[%s5561_s28 + $0x6c] sm:$0xf] }
  0xbe   : > { %2801 = vrot.lane.b32.xlu1 %v5075_v18, %s5500_s9  ;;  %v423_v38 = vor.u32 %v422_v10, %v419_v19  ;;  %vm2895_vm9 = vcmask 48128   ;;  %v438_v30 = vrot.slane %v436_v4, 5  ;;  %v4766_v40 = vrot.slane %v685_v24, 9  ;;  %v270_v37 = vld [vmem:[%s5561_s28 + $0x94] sm:$0xf] }
  0xbf   : > { %2721 = vrot.lane.b32.xlu0 %v5059_v59, %s5499_s8  ;;  %v433_v29 = vor.u32 %v432_v41, %v428_v44  ;;  %v784_v49 = vrot.slane %v256_v13, 5  ;;  %vm2928_vm10 = vcmask 64512   ;;  %v787_v42 = vrot.slane %v282_v47, 5  ;;  %v289_v57 = vld [vmem:[%s5561_s28 + $0x98] sm:$0x1] }
  0xc0   : > { %v6253_v3 = vpop.permute.xlu0 %2287  ;;  %v424_v22 = vrot.slane %v423_v38, 4  ;;  %v1788_v33 = vor.u32 %v1787_v61, %v6183_v58  ;;  %v1791_v63 = vshll.u32 %v6138_v20, 16  ;;  %v1797_v13 = vrot.slane %v1795_v25, 4 }
  0xc1   : > { %v6256_v55 = vpop.permute.xlu1 %2461  ;;  %v434_v2 = vrot.slane %v433_v29, 4  ;;  %v785_v16 = vsel %vm5614_vm3, %v4766_v40, %v784_v49  ;;  %v786_v62 = vrot.slane %v784_v49, 4  ;;  %v1801_v58 = vshll.u32 %v4900_v31, 16 }
  0xc2   : > { %v429_v32 = vsel %vm5647_vm6, %v424_v22, %v428_v44  ;;  %v1789_v9 = vrot.slane %v1788_v33, 4  ;;  %v6268_v43 = vsel %vm2813_vm7, %v4938_v7, %v6192_v21  ;;  %v1793_v47 = vrot.slane %v1791_v63, 5  ;;  %v6316_v63 = vld [vmem:[%s5561_s28 + $0x40] sm:$0xf] }
  0xc3   : > { %v439_v45 = vsel %vm5647_vm6, %v434_v2, %v438_v30  ;;  %v788_v46 = vsel %vm5614_vm3, %v786_v62, %v787_v42  ;;  %v2897_v25 = vsel %vm2895_vm9, %v2864_v17, %v6081_v27  ;;  %v4946_v53 = vcombine.low %v5431_v52, %v5432_v8  ;;  %v692_v30 = vld [vmem:[%s5561_s28 + $0x90] sm:$0xe]  ;;  %v6313_v42 = vld [vmem:[%s5561_s28 + $0x3c] sm:$0xf] }
  0xc4   : > { %v6275_v50 = vpop.permute.xlu0 %2447  ;;  %v4958_v51 = vcombine.low %v429_v32, %v439_v45  ;;  %v4974_v21 = vcombine.low %v785_v16, %v788_v46  ;;  %v6286_v6 = vsel %vm2928_vm10, %v2897_v25, %v6194_v23  ;;  %v1798_v54 = vor.u32 %v1797_v13, %v1793_v47  ;;  %v6337_v25 = vld [vmem:[%s5561_s28 + $0x44] sm:$0x1] }
  0xc5   : > { %v6282_v11 = vpop.permute.xlu1 %2621  ;;  %v1803_v61 = vrot.slane %v1801_v58, 5  ;;  %v4932_v0 = vrot.slane %v4916_v56, 9  ;;  %v1794_v27 = vsel %vm5647_vm6, %v1789_v9, %v1793_v47  ;;  %v2044_v4 = vrot.slane %v6138_v20, 5 }
  0xc6   : > { %2199 = vrot.lane.b32.xlu0 %v4958_v51, %s5495_s4  ;;  %2279 = vrot.lane.b32.xlu1 %v4974_v21, %s5494_s30  ;;  %v2047_v35 = vrot.slane %v4900_v31, 5  ;;  %v585_v18 = vshrl.u32 %v269_v48, 16  ;;  %v1799_v19 = vrot.slane %v1798_v54, 4  ;;  %v588_v10 = vshll.u32 %v269_v48, 16  ;;  %v6345_v54 = vld [vmem:[%s5561_s28 + $0xa0] sm:$0xf] }
  0xc7   : > { %v594_v23 = vshll.u32 %v270_v37, 16  ;;  %v598_v24 = vshrl.u32 %v270_v37, 16  ;;  %v2045_v59 = vsel %vm5614_vm3, %v4932_v0, %v2044_v4  ;;  %v2046_v44 = vrot.slane %v2044_v4, 4  ;;  %v6352_v0 = vld [vmem:[%s5561_s28 + $0xa4] sm:$0x1] }
  0xc8   : > { %v6294_v17 = vpop.permute.xlu0 %2383  ;;  %v587_v41 = vrot.slane %v585_v18, 4  ;;  %v604_v28 = vshll.u32 %v289_v57, 16  ;;  %v1804_v20 = vsel %vm5647_vm6, %v1799_v19, %v1803_v61  ;;  %v590_v7 = vrot.slane %v588_v10, 5 }
  0xc9   : > { %v6298_v26 = vpop.permute.xlu1 %2541  ;;  %v596_v38 = vrot.slane %v594_v23, 5  ;;  %v600_v29 = vrot.slane %v598_v24, 4  ;;  %v6305_v40 = vsel %vm2813_vm7, %v4946_v53, %v6220_v39  ;;  %v5060_v49 = vcombine.low %v1794_v27, %v1804_v20 }
  0xca   : > { %v2880_v31 = vsel %vm2862_vm8, %v6246_v15, %v6141_v36  ;;  %v2048_v22 = vsel %vm5614_vm3, %v2046_v44, %v2047_v35  ;;  %v591_v2 = vor.u32 %v590_v7, %v587_v41  ;;  %v606_v62 = vrot.slane %v604_v28, 5  ;;  %v6366_v7 = vld [vmem:[%s5561_s28 + $0x9c] sm:$0xf] }
  0xcb   : > { %v5076_v33 = vcombine.low %v2045_v59, %v2048_v22  ;;  %v601_v16 = vor.u32 %v600_v29, %v596_v38  ;;  %2723 = vrot.lane.b32.xlu0 %v5060_v49, %s5499_s8  ;;  %v6323_v39 = vsel %vm2895_vm9, %v2880_v31, %v6212_v34  ;;  %v4773_v36 = vrot.slane %v692_v30, 9 }
  0xcc   : > { %v6318_v32 = vpop.permute.xlu0 %2527  ;;  %v833_v15 = vrot.slane %v270_v37, 5  ;;  %v836_v9 = vrot.slane %v289_v57, 5  ;;  %v592_v13 = vrot.slane %v591_v2, 4  ;;  %v1005_v56 = vshrl.u32 %v6313_v42, 16  ;;  %v271_v37 = vld [vmem:[%s5561_s28 + $0x9c] sm:$0xf] }
  0xcd   : > { %2803 = vrot.lane.b32.xlu1 %v5076_v33, %s5500_s9  ;;  %v602_v58 = vrot.slane %v601_v16, 4  ;;  %v1008_v45 = vshll.u32 %v6313_v42, 16  ;;  %v2866_v34 = vsel %vm2862_vm8, %v6268_v43, %v6132_v12  ;;  %v1018_v51 = vshrl.u32 %v6316_v63, 16 }
  0xce   : > { %v6328_v46 = vpop.permute.xlu1 %2701  ;;  %v834_v47 = vsel %vm5614_vm3, %v4773_v36, %v833_v15  ;;  %v835_v48 = vrot.slane %v833_v15, 4  ;;  %v597_v52 = vsel %vm5647_vm6, %v592_v13, %v596_v38  ;;  %v1007_v53 = vrot.slane %v1005_v56, 4 }
  0xcf   : > { %v607_v8 = vsel %vm5647_vm6, %v602_v58, %v606_v62  ;;  %v1010_v21 = vrot.slane %v1008_v45, 5  ;;  %vm2961_vm11 = vcmask 80896   ;;  %v4989_v61 = vcombine.low %v6313_v42, %v6316_v63  ;;  %v6398_v45 = vld [vmem:[%s5561_s28 + $0xa0] sm:$0xf] }
  0xd0   : > { %v4965_v12 = vcombine.low %v597_v52, %v607_v8  ;;  %v837_v43 = vsel %vm5614_vm3, %v835_v48, %v836_v9  ;;  %v1014_v35 = vshll.u32 %v6316_v63, 16  ;;  %v1020_v18 = vrot.slane %v1018_v51, 4 }
  0xd1   : > { %v6354_v57 = vpop.permute.xlu0 %2463  ;;  %v4981_v27 = vcombine.low %v834_v47, %v837_v43  ;;  %v1011_v4 = vor.u32 %v1010_v21, %v1007_v53  ;;  %v1024_v10 = vshll.u32 %v6337_v25, 16  ;;  %v609_v23 = vshrl.u32 %v271_v37, 16 }
  0xd2   : > { %v6357_v19 = vpop.permute.xlu1 %2637  ;;  %2213 = vrot.lane.b32.xlu0 %v4965_v12, %s5495_s4  ;;  %v612_v24 = vshll.u32 %v271_v37, 16  ;;  %v618_v59 = vshll.u32 %v6345_v54, 16  ;;  %v1016_v41 = vrot.slane %v1014_v35, 5  ;;  %v622_v28 = vshrl.u32 %v6345_v54, 16  ;;  %v693_v37 = vld [vmem:[%s5561_s28 + $0x9c] sm:$0xe] }
  0xd3   : > { %2293 = vrot.lane.b32.xlu1 %v4981_v27, %s5494_s30  ;;  %v1012_v44 = vrot.slane %v1011_v4, 4  ;;  %v628_v20 = vshll.u32 %v6352_v0, 16  ;;  %v2899_v38 = vsel %vm2895_vm9, %v2866_v34, %v6237_v5  ;;  %v611_v29 = vrot.slane %v609_v23, 4  ;;  %v6420_v4 = vld [vmem:[%s5561_s28 + $0x4c] sm:$0xf] }
  0xd4   : > { %v614_v30 = vrot.slane %v612_v24, 5  ;;  %v620_v49 = vrot.slane %v618_v59, 5  ;;  %v6375_v22 = vsel %vm2961_vm11, %v6286_v6, %v6233_v60  ;;  %v1021_v42 = vor.u32 %v1020_v18, %v1016_v41  ;;  %v4787_v60 = vld [vmem:[%s5561_s28 + $0x48] sm:$0xf] }
  0xd5   : > { %v6370_v31 = vpop.permute.xlu0 %2623  ;;  %v1026_v33 = vrot.slane %v1024_v10, 5  ;;  %v624_v2 = vrot.slane %v622_v28, 4  ;;  %v2882_v5 = vsel %vm2862_vm8, %v6305_v40, %v6253_v3  ;;  %v1017_v62 = vsel %vm5647_vm6, %v1012_v44, %v1016_v41 }
  0xd6   : > { %v6377_v16 = vpop.permute.xlu1 %2781  ;;  %2373 = vrot.lane.b32.xlu0 %v4989_v61, %s5493_s29  ;;  %v615_v36 = vor.u32 %v614_v30, %v611_v29  ;;  %v1197_v15 = vshrl.u32 %v6366_v7, 16  ;;  %v1022_v6 = vrot.slane %v1021_v42, 4  ;;  %v630_v13 = vrot.slane %v628_v20, 5  ;;  %v6435_v29 = vld [vmem:[%s5561_s28 + $0xa4] sm:$0x1] }
  0xd7   : > { %v625_v9 = vor.u32 %v624_v2, %v620_v49  ;;  %v1200_v58 = vshll.u32 %v6366_v7, 16  ;;  %v6391_v56 = vsel %vm2928_vm10, %v6323_v39, %v6256_v55  ;;  %v6395_v3 = vsel %vm2928_vm10, %v2899_v38, %v6275_v50  ;;  %v4829_v55 = vld [vmem:[%s5561_s28 + $0x3c] sm:$0xe] }
  0xd8   : > { %v616_v40 = vrot.slane %v615_v36, 4  ;;  %vm2994_vm12 = vcmask 97280   ;;  %v1027_v47 = vsel %vm5647_vm6, %v1022_v6, %v1026_v33  ;;  %v1199_v51 = vrot.slane %v1197_v15, 4 }
  0xd9   : > { %v6400_v34 = vpop.permute.xlu0 %2543  ;;  %v626_v48 = vrot.slane %v625_v9, 4  ;;  %v1029_v52 = vshrl.u32 %v4787_v60, 16  ;;  %v5005_v8 = vcombine.low %v1017_v62, %v1027_v47  ;;  %v1202_v53 = vrot.slane %v1200_v58, 5  ;;  %v6458_v47 = vld [vmem:[%s5561_s28 + $0x48] sm:$0xf] }
  0xda   : > { %v6405_v39 = vpop.permute.xlu1 %2639  ;;  %v621_v50 = vsel %vm5647_vm6, %v616_v40, %v620_v49  ;;  %v1032_v21 = vshll.u32 %v4787_v60, 16  ;;  %v6414_v43 = vsel %vm2895_vm9, %v2882_v5, %v6294_v17  ;;  %v1210_v61 = vshrl.u32 %v6398_v45, 16 }
  0xdb   : > { %v631_v12 = vsel %vm5647_vm6, %v626_v48, %v630_v13  ;;  %v4997_v27 = vcombine.low %v6366_v7, %v6398_v45  ;;  %2453 = vrot.lane.b32.xlu1 %v5005_v8, %s5496_s5  ;;  %v1031_v18 = vrot.slane %v1029_v52, 4  ;;  %v4845_v23 = vrot.slane %v4829_v55, 9 }
  0xdc   : > { %v4966_v35 = vcombine.low %v621_v50, %v631_v12  ;;  %v1034_v10 = vrot.slane %v1032_v21, 5  ;;  %v1386_v59 = vrot.slane %v6316_v63, 5  ;;  %v1389_v17 = vrot.slane %v6337_v25, 5  ;;  %v6472_v12 = vld [vmem:[%s5561_s28 + $0xa8] sm:$0xf] }
  0xdd   : > { %v6423_v24 = vpop.permute.xlu0 %2703  ;;  %v4774_v44 = vrot.slane %v693_v37, 9  ;;  %v840_v41 = vrot.slane %v6345_v54, 5  ;;  %v1042_v20 = vshrl.u32 %v6420_v4, 16  ;;  %v4990_v7 = vcombine.low %v4787_v60, %v6420_v4  ;;  %v6469_v37 = vld [vmem:[%s5561_s28 + $0x4c] sm:$0xf] }
  0xde   : > { %v6428_v28 = vpop.permute.xlu1 %2783  ;;  %2215 = vrot.lane.b32.xlu0 %v4966_v35, %s5495_s4  ;;  %v843_v38 = vrot.slane %v6352_v0, 5  ;;  %v1203_v30 = vor.u32 %v1202_v53, %v1199_v51  ;;  %v1387_v63 = vsel %vm5614_vm3, %v4845_v23, %v1386_v59  ;;  %v1388_v25 = vrot.slane %v1386_v59, 4  ;;  %v6444_v0 = vld [vmem:[%s5561_s28 + $0x50] sm:$0x1] }
  0xdf   : > { %v841_v54 = vsel %vm5614_vm3, %v4774_v44, %v840_v41  ;;  %v842_v49 = vrot.slane %v840_v41, 4  ;;  %2389 = vrot.lane.b32.xlu1 %v4997_v27, %s5493_s29  ;;  %vm3027_vm13 = vcmask 113664   ;;  %v1206_v33 = vshll.u32 %v6398_v45, 16 }
  0xe0   : > { %v1204_v42 = vrot.slane %v1203_v30, 4  ;;  %v1212_v2 = vrot.slane %v1210_v61, 4  ;;  %v1390_v62 = vsel %vm5614_vm3, %v1388_v25, %v1389_v17  ;;  %v1216_v15 = vshll.u32 %v6435_v29, 16  ;;  %v4830_v25 = vld [vmem:[%s5561_s28 + $0x48] sm:$0xe] }
  0xe1   : > { %v6446_v5 = vpop.permute.xlu0 %2193  ;;  %v844_v36 = vsel %vm5614_vm3, %v842_v49, %v843_v38  ;;  %v1035_v60 = vor.u32 %v1034_v10, %v1031_v18  ;;  %v5021_v9 = vcombine.low %v1387_v63, %v1390_v62  ;;  %v1208_v58 = vrot.slane %v1206_v33, 5 }
  0xe2   : > { %v6453_v6 = vpop.permute.xlu1 %2273  ;;  %2375 = vrot.lane.b32.xlu0 %v4990_v7, %s5493_s29  ;;  %v4982_v13 = vcombine.low %v841_v54, %v844_v36  ;;  %v1038_v40 = vshll.u32 %v6420_v4, 16  ;;  %v2996_v48 = vsel %vm2994_vm12, %v6375_v22, %v6282_v11  ;;  %v1044_v52 = vrot.slane %v1042_v20, 4  ;;  %v4837_v20 = vld [vmem:[%s5561_s28 + $0x9c] sm:$0xe] }
  0xe3   : > { %v1036_v51 = vrot.slane %v1035_v60, 4  ;;  %v1048_v55 = vshll.u32 %v6444_v0, 16  ;;  %v2965_v8 = vsel %vm2961_vm11, %v6395_v3, %v6318_v32  ;;  %2533 = vrot.lane.b32.xlu1 %v5021_v9, %s5497_s6  ;;  %v1213_v50 = vor.u32 %v1212_v2, %v1208_v58 }
  0xe4   : > { %v1218_v53 = vrot.slane %v1216_v15, 5  ;;  %v1040_v21 = vrot.slane %v1038_v40, 5  ;;  %v3029_v11 = vsel %vm3027_vm13, %v2996_v48, %v6328_v46  ;;  %v1209_v22 = vsel %vm5647_vm6, %v1204_v42, %v1208_v58  ;;  %v6486_v46 = vld [vmem:[%s5561_s28 + $0xac] sm:$0xf] }
  0xe5   : > { %v1614_v61 = vshrl.u32 %v6458_v47, 16  ;;  %v1617_v32 = vshll.u32 %v6458_v47, 16  ;;  %v1214_v27 = vrot.slane %v1213_v50, 4  ;;  %v1050_v10 = vrot.slane %v1048_v55, 5  ;;  %v6524_v50 = vld [vmem:[%s5561_s28 + $0x50] sm:$0x1] }
  0xe6   : > { %v6480_v3 = vpop.permute.xlu1 %2797  ;;  %2295 = vrot.lane.b32.xlu0 %v4982_v13, %s5494_s30  ;;  %v1041_v35 = vsel %vm5647_vm6, %v1036_v51, %v1040_v21  ;;  %v1045_v18 = vor.u32 %v1044_v52, %v1040_v21  ;;  %v1627_v44 = vshrl.u32 %v6469_v37, 16  ;;  %v1221_v41 = vshrl.u32 %v6472_v12, 16  ;;  %v5401_v40 = vld [vmem:[%s7960_s1 + $0x8] ss:$0 sps:$4 sm:$0x11]  }
  0xe7   : > { %v6488_v23 = vpop.permute.xlu0 %2717  ;;  %v1616_v59 = vrot.slane %v1614_v61, 4  ;;  %v1619_v17 = vrot.slane %v1617_v32, 5  ;;  %v1219_v7 = vsel %vm5647_vm6, %v1214_v27, %v1218_v53  ;;  %v5037_v30 = vcombine.low %v6458_v47, %v6469_v37 }
  0xe8   : > { %v1046_v38 = vrot.slane %v1045_v18, 4  ;;  %v1224_v63 = vshll.u32 %v6472_v12, 16  ;;  %v5013_v54 = vcombine.low %v1209_v22, %v1219_v7  ;;  %v1223_v49 = vrot.slane %v1221_v41, 4 }
  0xe9   : > { %v1234_v42 = vshrl.u32 %v6486_v46, 16  ;;  %v4998_v33 = vcombine.low %v6472_v12, %v6486_v46  ;;  %v4853_v36 = vrot.slane %v4837_v20, 9  ;;  %v1442_v15 = vrot.slane %v6398_v45, 5 }
  0xea   : > { %v1051_v2 = vsel %vm5647_vm6, %v1046_v38, %v1050_v10  ;;  %v1226_v62 = vrot.slane %v1224_v63, 5  ;;  %2469 = vrot.lane.b32.xlu1 %v5013_v54, %s5496_s5  ;;  %v1445_v9 = vrot.slane %v6435_v29, 5  ;;  %v4846_v13 = vrot.slane %v4830_v25, 9 }
  0xeb   : > { %v5006_v60 = vcombine.low %v1041_v35, %v1051_v2  ;;  %v1393_v58 = vrot.slane %v6420_v4, 5  ;;  %v6513_v48 = vpop.permute.xlu1 %2275  ;;  %v1443_v45 = vsel %vm5614_vm3, %v4853_v36, %v1442_v15  ;;  %v1444_v51 = vrot.slane %v1442_v15, 4  ;;  %v5433_v2 = vld [vmem:[%s5561_s28 + $0x18] sm:$0xf]  ;;  %v4881_v15 = vld [vmem:[%s5561_s28 + $0xa8] sm:$0xf] }
  0xec   : > { %v6511_v47 = vpop.permute.xlu0 %2195  ;;  %v1396_v52 = vrot.slane %v6444_v0, 5  ;;  %vm3060_vm14 = vcmask 130048   ;;  %vm3112_vm15 = vcmask 146432   ;;  %v2948_v53 = vsel %vm2928_vm10, %v6414_v43, %v6354_v57  ;;  %v6540_v43 = vld [vmem:[%s5561_s28 + $0xb0] sm:$0x1] }
  0xed   : > { %2455 = vrot.lane.b32.xlu0 %v5006_v60, %s5496_s5  ;;  %v1394_v4 = vsel %vm5614_vm3, %v4846_v13, %v1393_v58  ;;  %v1395_v29 = vrot.slane %v1393_v58, 4  ;;  %v3062_v55 = vsel %vm3060_vm14, %v3029_v11, %v6377_v16  ;;  %v2998_v0 = vsel %vm2994_vm12, %v2965_v8, %v6370_v31  ;;  %v6580_v60 = vld [vmem:[%s5561_s28 + $0xac] sm:$0xf] }
  0xee   : > { %v1446_v21 = vsel %vm5614_vm3, %v1444_v51, %v1445_v9  ;;  %5285 = vmatprep.mubr.msk.bf16.mxu0 %vm3112_vm15, %v3062_v55  ;;  %vm3145_vm0 = vcmask 1040384   ;;  %2629 = vrot.lane.b32.xlu1 %v5037_v30, %s5498_s7  ;;  %v1620_v11 = vor.u32 %v1619_v17, %v1616_v59  ;;  %v1623_v57 = vshll.u32 %v6469_v37, 16  ;;  %v4838_v55 = vld [vmem:[%s5561_s28 + $0xa8] sm:$0xe] }
  0xef   : > { %v5029_v12 = vcombine.low %v1443_v45, %v1446_v21  ;;  %v1397_v16 = vsel %vm5614_vm3, %v1395_v29, %v1396_v52  ;;  %5321 = vmatprep.subr.msk.bf16.mxu0 %vm3145_vm0, %v5401_v40  ;;  %v1629_v8 = vrot.slane %v1627_v44, 4  ;;  %v1633_v22 = vshll.u32 %v6524_v50, 16  ;;  %5322 = vmatprep.subr.msk.bf16.mxu1 %vm3145_vm0, %v5401_v40 }
  0xf0   : > { %v5022_v31 = vcombine.low %v1394_v4, %v1397_v16  ;;  %v1227_v61 = vor.u32 %v1226_v62, %v1223_v49  ;;  %v1621_v27 = vrot.slane %v1620_v11, 4  ;;  %v1625_v35 = vrot.slane %v1623_v57, 5  ;;  %v6548_v59 = vpop.permute.xlu1 %2799  ;;  %v6565_v49 = vld [vmem:[%s5561_s28 + $0x54] sm:$0xf]  ;;  %v5434_v62 = vld [vmem:[%s5561_s28 + $0x1c] sm:$0xf] }
  0xf1   : > { %v6543_v32 = vpop.permute.xlu0 %2719  ;;  %2391 = vrot.lane.b32.xlu0 %v4998_v33, %s5493_s29  ;;  %v1230_v18 = vshll.u32 %v6486_v46, 16  ;;  %v1236_v10 = vrot.slane %v1234_v42, 4  ;;  %v3031_v17 = vsel %vm3027_vm13, %v2998_v0, %v6423_v24  ;;  %v1240_v41 = vshll.u32 %v6540_v43, 16 }
  0xf2   : > { %v1228_v44 = vrot.slane %v1227_v61, 4  ;;  %v3147_v20 = vsel %vm3145_vm0, %v5401_v40, 0  ;;  %2549 = vrot.lane.b32.xlu1 %v5029_v12, %s5497_s6  ;;  %v1630_v7 = vor.u32 %v1629_v8, %v1625_v35  ;;  %v1635_v38 = vrot.slane %v1633_v22, 5  ;;  %v4909_v40 = vld [vmem:[%s5561_s28 + $0x48] sm:$0xe] }
  0xf3   : > { %v1232_v30 = vrot.slane %v1230_v18, 5  ;;  %5284 = vmatpush3.bf16.msra.mxu0 %v3147_v20  ;;  %v3064_v63 = vsel %vm3060_vm14, %v3031_v17, %v6428_v28  ;;  %v2979_v24 = vsel %vm2961_vm11, %v6391_v56, %v6298_v26  ;;  %v2981_v25 = vsel %vm2961_vm11, %v2948_v53, %v6400_v34  ;;  %5320 = vmatpush3.bf16.msra.mxu1 %v3147_v20  ;;  %v6600_v12 = vld [vmem:[%s5561_s28 + $0x58] sm:$0xf] }
  0xf4   : > { %v1626_v54 = vsel %vm5647_vm6, %v1621_v27, %v1625_v35  ;;  %v1631_v42 = vrot.slane %v1630_v7, 4  ;;  %v1242_v28 = vrot.slane %v1240_v41, 5  ;;  %v4939_v36 = vcombine.low %v5433_v2, %v5434_v62  ;;  %v4894_v41 = vld [vmem:[%s5561_s28 + $0x5c] sm:$0x1]  ;;  %v4910_v2 = vld [vmem:[%s5561_s28 + $0x54] sm:$0xe] }
  0xf5   : > { %2535 = vrot.lane.b32.xlu0 %v5022_v31, %s5497_s6  ;;  %v1237_v33 = vor.u32 %v1236_v10, %v1232_v30  ;;  %v3012_v26 = vsel %vm2994_vm12, %v2979_v24, %v6357_v19  ;;  %v6574_v56 = vsel %vm2994_vm12, %v2981_v25, %v6405_v39  ;;  %v1233_v34 = vsel %vm5647_vm6, %v1228_v44, %v1232_v30  ;;  %v5436_v24 = vld [vmem:[%s5561_s28 + $0x28] sm:$0xf] }
  0xf6   : > { %5286 = vmatmul.mubr.msk.bf16.vlgmr.msra.gmra.mrb[0].mxu0 %vm3112_vm15, %v3064_v63  ;;  %v1636_v13 = vsel %vm5647_vm6, %v1631_v42, %v1635_v38  ;;  %v1638_v58 = vshrl.u32 %v6565_v49, 16  ;;  %v1641_v39 = vshll.u32 %v6565_v49, 16  ;;  %v6590_v45 = vpop.permute.xlu1 %2289  ;;  %v1806_v52 = vshrl.u32 %v4881_v15, 16  ;;  %v5435_v63 = vld [vmem:[%s5561_s28 + $0x24] sm:$0xf] }
  0xf7   : > { %v6583_v9 = vpop.permute.xlu0 %2209  ;;  %v1238_v19 = vrot.slane %v1237_v33, 4  ;;  %v5053_v51 = vcombine.low %v1626_v54, %v1636_v13  ;;  %v1809_v4 = vshll.u32 %v4881_v15, 16  ;;  %v1819_v29 = vshrl.u32 %v6580_v60, 16  ;;  %v6636_v54 = vld [vmem:[%s5561_s28 + $0xb4] sm:$0xf] }
  0xf8   : > { %v2822_v0 = vsel %vm2813_vm7, %v4939_v36, %v6446_v5  ;;  %v5045_v21 = vcombine.low %v4881_v15, %v6580_v60  ;;  %v1640_v16 = vrot.slane %v1638_v58, 4  ;;  %v4925_v57 = vrot.slane %v4909_v40, 9  ;;  %v258_v15 = vld [vmem:[%s5561_s28 + $0x4c] sm:$0xf] }
  0xf9   : > { %v1243_v53 = vsel %vm5647_vm6, %v1238_v19, %v1242_v28  ;;  %2709 = vrot.lane.b32.xlu1 %v5053_v51, %s5499_s8  ;;  %v1995_v31 = vrot.slane %v6469_v37, 5  ;;  %v1998_v8 = vrot.slane %v6524_v50, 5  ;;  %v1643_v61 = vrot.slane %v1641_v39, 5 }
  0xfa   : > { %v5014_v11 = vcombine.low %v1233_v34, %v1243_v53  ;;  %v4854_v27 = vrot.slane %v4838_v55, 9  ;;  %v1449_v5 = vrot.slane %v6486_v46, 5  ;;  %v1452_v35 = vrot.slane %v6540_v43, 5 }
  0xfb   : > { %v6605_v22 = vpop.permute.xlu0 %2369  ;;  %v1651_v18 = vshrl.u32 %v6600_v12, 16  ;;  %v5038_v37 = vcombine.low %v6565_v49, %v6600_v12  ;;  %v1996_v50 = vsel %vm5614_vm3, %v4925_v57, %v1995_v31  ;;  %v1997_v10 = vrot.slane %v1995_v31, 4  ;;  %v6639_v49 = vld [vmem:[%s5561_s28 + $0xb8] sm:$0xf] }
  0xfc   : > { %2471 = vrot.lane.b32.xlu0 %v5014_v11, %s5496_s5  ;;  %v6615_v17 = vrot.slane %v1806_v52, 4  ;;  %v6617_v46 = vrot.slane %v1809_v4, 5  ;;  %v1450_v43 = vsel %vm5614_vm3, %v4854_v27, %v1449_v5  ;;  %v1451_v44 = vrot.slane %v1449_v5, 4 }
  0xfd   : > { %v6622_v20 = vpop.permute.xlu1 %2449  ;;  %2645 = vrot.lane.b32.xlu1 %v5045_v21, %s5498_s7  ;;  %v6627_v7 = vsel %vm2862_vm8, %v2822_v0, %v6453_v6  ;;  %v3045_v38 = vsel %vm3027_vm13, %v3012_v26, %v6488_v23  ;;  %v1999_v30 = vsel %vm5614_vm3, %v1997_v10, %v1998_v8  ;;  %v4940_v25 = vcombine.low %v5435_v63, %v5436_v24  ;;  %v257_v23 = vld [vmem:[%s5561_s28 + $0x48] sm:$0xf]  ;;  %v283_v21 = vld [vmem:[%s5561_s28 + $0x50] sm:$0x1] }
  0xfe   : > { %v5069_v42 = vcombine.low %v1996_v50, %v1999_v30  ;;  %v1453_v33 = vsel %vm5614_vm3, %v1451_v44, %v1452_v35  ;;  %v1830_v6 = vshrl.u32 %v6636_v54, 16  ;;  %v1644_v28 = vor.u32 %v1643_v61, %v1640_v16  ;;  %v686_v35 = vld [vmem:[%s5561_s28 + $0x48] sm:$0xe] }
  0xff   : > { %v5030_v62 = vcombine.low %v1450_v43, %v1453_v33  ;;  %v1647_v36 = vshll.u32 %v6600_v12, 16  ;;  %v1653_v26 = vrot.slane %v1651_v18, 4  ;;  %v1657_v34 = vshll.u32 %v4894_v41, 16 }
 0x100   : > { %2631 = vrot.lane.b32.xlu0 %v5038_v37, %s5498_s7  ;;  %v5046_v19 = vcombine.low %v6636_v54, %v6639_v49  ;;  %v1645_v58 = vrot.slane %v1644_v28, 4  ;;  %v3078_v39 = vsel %vm3060_vm14, %v3045_v38, %v6480_v3  ;;  %v3047_v40 = vsel %vm3027_vm13, %v6574_v56, %v6543_v32 }
 0x101   : > { %v6649_v13 = vpop.permute.xlu0 %2211  ;;  %v6658_v51 = vpop.permute.xlu1 %2385  ;;  %2789 = vrot.lane.b32.xlu1 %v5069_v42, %s5500_s9  ;;  %v1649_v52 = vrot.slane %v1647_v36, 5  ;;  %v1659_v4 = vrot.slane %v1657_v34, 5  ;;  %5301 = vmatprep.mubr.msk.bf16.mxu1 %vm3112_vm15, %v3078_v39  ;;  %v4926_v55 = vrot.slane %v4910_v2, 9  ;;  %v2002_v53 = vrot.slane %v6600_v12, 5  ;;  %v4901_v36 = vld [vmem:[%s5561_s28 + $0xb0] sm:$0x1] }
 0x102   : > { %v2005_v0 = vrot.slane %v4894_v41, 5  ;;  %v441_v16 = vshrl.u32 %v257_v23, 16  ;;  %v444_v3 = vshll.u32 %v257_v23, 16  ;;  %v450_v11 = vshll.u32 %v258_v15, 16 }
 0x103   : > { %v1650_v32 = vsel %vm5647_vm6, %v1645_v58, %v1649_v52  ;;  %v1654_v56 = vor.u32 %v1653_v26, %v1649_v52  ;;  %v2003_v57 = vsel %vm5614_vm3, %v4926_v55, %v2002_v53  ;;  %v2004_v31 = vrot.slane %v2002_v53, 4  ;;  %v4917_v52 = vld [vmem:[%s5561_s28 + $0xa8] sm:$0xe]  ;;  %v6711_v53 = vld [vmem:[%s5561_s28 + $0x54] sm:$0xf] }
 0x104   : > { %2551 = vrot.lane.b32.xlu0 %v5030_v62, %s5497_s6  ;;  %v443_v61 = vrot.slane %v441_v16, 4  ;;  %v446_v12 = vrot.slane %v444_v3, 5  ;;  %v452_v27 = vrot.slane %v450_v11, 5  ;;  %v454_v5 = vshrl.u32 %v258_v15, 16 }
 0x105   : > { %v6669_v8 = vpop.permute.xlu0 %2371  ;;  %v6672_v18 = vpop.permute.xlu1 %2529  ;;  %2647 = vrot.lane.b32.xlu1 %v5046_v19, %s5498_s7  ;;  %v1655_v37 = vrot.slane %v1654_v56, 4  ;;  %v2006_v50 = vsel %vm5614_vm3, %v2004_v31, %v2005_v0  ;;  %v460_v10 = vshll.u32 %v283_v21, 16  ;;  %v3080_v43 = vsel %vm3060_vm14, %v3047_v40, %v6548_v59 }
 0x106   : > { %v1833_v44 = vshll.u32 %v6636_v54, 16  ;;  %v5070_v41 = vcombine.low %v2003_v57, %v2006_v50  ;;  %v447_v38 = vor.u32 %v446_v12, %v443_v61  ;;  %v456_v30 = vrot.slane %v454_v5, 4  ;;  %5302 = vmatmul.mubr.msk.bf16.vlgmr.msra.gmra.mrb[0].mxu1 %vm3112_vm15, %v3080_v43  ;;  %v284_v57 = vld [vmem:[%s5561_s28 + $0x5c] sm:$0x1] }
 0x107   : > { %v6683_v63 = vsel %vm2813_vm7, %v4940_v25, %v6511_v47  ;;  %v1660_v24 = vsel %vm5647_vm6, %v1655_v37, %v1659_v4  ;;  %v4767_v42 = vrot.slane %v686_v35, 9  ;;  %v791_v33 = vrot.slane %v258_v15, 5 }
 0x108   : > { %v5054_v2 = vcombine.low %v1650_v32, %v1660_v24  ;;  %v448_v59 = vrot.slane %v447_v38, 4  ;;  %v457_v23 = vor.u32 %v456_v30, %v452_v27  ;;  %v462_v62 = vrot.slane %v460_v10, 5 }
 0x109   : > { %v6687_v28 = vpop.permute.xlu0 %2291  ;;  %2791 = vrot.lane.b32.xlu1 %v5070_v41, %s5500_s9  ;;  %v792_v47 = vsel %vm5614_vm3, %v4767_v42, %v791_v33  ;;  %v793_v25 = vrot.slane %v791_v33, 4  ;;  %v794_v26 = vrot.slane %v283_v21, 5  ;;  %v1812_v34 = vor.u32 %v6617_v46, %v6615_v17 }
 0x10a   : > { %2711 = vrot.lane.b32.xlu0 %v5054_v2, %s5499_s8  ;;  %v453_v19 = vsel %vm5647_vm6, %v448_v59, %v452_v27  ;;  %v458_v58 = vrot.slane %v457_v23, 4  ;;  %v1815_v39 = vshll.u32 %v6580_v60, 16  ;;  %v1821_v40 = vrot.slane %v1819_v29, 4  ;;  %v6716_v29 = vld [vmem:[%s5561_s28 + $0x58] sm:$0xf] }
 0x10b   : > { %v6695_v15 = vpop.permute.xlu1 %2465  ;;  %v6706_v4 = vrot.slane %v1830_v6, 4  ;;  %v795_v17 = vsel %vm5614_vm3, %v793_v25, %v794_v26  ;;  %v1813_v46 = vrot.slane %v1812_v34, 4  ;;  %v1825_v55 = vshll.u32 %v4901_v36, 16  ;;  %v687_v2 = vld [vmem:[%s5561_s28 + $0x54] sm:$0xe] }
 0x10c   : > { %v1835_v0 = vrot.slane %v1833_v44, 5  ;;  %v463_v21 = vsel %vm5647_vm6, %v458_v58, %v462_v62  ;;  %v4975_v16 = vcombine.low %v792_v47, %v795_v17  ;;  %v1817_v3 = vrot.slane %v1815_v39, 5  ;;  %v5437_v23 = vld [vmem:[%s5561_s28 + $0x78] sm:$0xf]  ;;  %v5438_v62 = vld [vmem:[%s5561_s28 + $0x7c] sm:$0xf] }
 0x10d   : > { %v4959_v54 = vcombine.low %v453_v19, %v463_v21  ;;  %v1827_v6 = vrot.slane %v1825_v55, 5  ;;  %v4933_v32 = vrot.slane %v4917_v52, 9  ;;  %v2051_v56 = vrot.slane %v6580_v60, 5 }
 0x10e   : > { %v6718_v11 = vpop.permute.xlu0 %2451  ;;  %2281 = vrot.lane.b32.xlu1 %v4975_v16, %s5494_s30  ;;  %v1818_v61 = vsel %vm5647_vm6, %v1813_v46, %v1817_v3  ;;  %v1822_v12 = vor.u32 %v1821_v40, %v1817_v3  ;;  %v2054_v27 = vrot.slane %v4901_v36, 5  ;;  %v465_v5 = vshrl.u32 %v6711_v53, 16  ;;  %v4902_v46 = vld [vmem:[%s5561_s28 + $0xbc] sm:$0x1] }
 0x10f   : > { %v6722_v31 = vpop.permute.xlu1 %2625  ;;  %2201 = vrot.lane.b32.xlu0 %v4959_v54, %s5495_s4  ;;  %v2052_v35 = vsel %vm5614_vm3, %v4933_v32, %v2051_v56  ;;  %v2053_v60 = vrot.slane %v2051_v56, 4  ;;  %v468_v37 = vshll.u32 %v6711_v53, 16  ;;  %v474_v50 = vshll.u32 %v6716_v29, 16 }
 0x110   : > { %v1823_v10 = vrot.slane %v1822_v12, 4  ;;  %v467_v43 = vrot.slane %v465_v5, 4  ;;  %v478_v44 = vshrl.u32 %v6716_v29, 16  ;;  %v484_v41 = vshll.u32 %v284_v57, 16  ;;  %v4918_v5 = vld [vmem:[%s5561_s28 + $0xb4] sm:$0xe] }
 0x111   : > { %v1843_v30 = vshrl.u32 %v6639_v49, 16  ;;  %v2055_v24 = vsel %vm5614_vm3, %v2053_v60, %v2054_v27  ;;  %v470_v42 = vrot.slane %v468_v37, 5  ;;  %v476_v33 = vrot.slane %v474_v50, 5 }
 0x112   : > { %v6734_v38 = vpop.permute.xlu0 %2387  ;;  %v4947_v36 = vcombine.low %v5437_v23, %v5438_v62  ;;  %v1828_v47 = vsel %vm5647_vm6, %v1823_v10, %v1827_v6  ;;  %v5077_v25 = vcombine.low %v2052_v35, %v2055_v24  ;;  %v480_v26 = vrot.slane %v478_v44, 4  ;;  %v6768_v35 = vld [vmem:[%s5561_s28 + $0xa8] sm:$0xf] }
 0x113   : > { %v6740_v59 = vpop.permute.xlu1 %2545  ;;  %v5061_v34 = vcombine.low %v1818_v61, %v1828_v47  ;;  %v471_v19 = vor.u32 %v470_v42, %v467_v43  ;;  %v486_v58 = vrot.slane %v484_v41, 5  ;;  %v801_v39 = vrot.slane %v284_v57, 5 }
 0x114   : > { %2805 = vrot.lane.b32.xlu1 %v5077_v25, %s5500_s9  ;;  %v481_v40 = vor.u32 %v480_v26, %v476_v33  ;;  %v4768_v52 = vrot.slane %v687_v2, 9  ;;  %v798_v17 = vrot.slane %v6716_v29, 5  ;;  %v1836_v55 = vor.u32 %v1835_v0, %v6706_v4 }
 0x115   : > { %v2058_v16 = vrot.slane %v6639_v49, 5  ;;  %2725 = vrot.lane.b32.xlu0 %v5061_v34, %s5499_s8  ;;  %v472_v3 = vrot.slane %v471_v19, 4  ;;  %v1839_v54 = vshll.u32 %v6639_v49, 16  ;;  %v1845_v6 = vrot.slane %v1843_v30, 4  ;;  %v291_v30 = vld [vmem:[%s5561_s28 + $0xb0] sm:$0x1] }
 0x116   : > { %v6750_v21 = vpop.permute.xlu0 %2531  ;;  %v482_v32 = vrot.slane %v481_v40, 4  ;;  %v799_v56 = vsel %vm5614_vm3, %v4768_v52, %v798_v17  ;;  %v800_v57 = vrot.slane %v798_v17, 4  ;;  %v1837_v61 = vrot.slane %v1836_v55, 4  ;;  %v6800_v55 = vld [vmem:[%s5561_s28 + $0x54] sm:$0xf] }
 0x117   : > { %v6762_v0 = vsel %vm2862_vm8, %v6683_v63, %v6513_v48  ;;  %v477_v12 = vsel %vm5647_vm6, %v472_v3, %v476_v33  ;;  %v1841_v49 = vrot.slane %v1839_v54, 5  ;;  %v1849_v27 = vshll.u32 %v4902_v46, 16  ;;  %v6777_v48 = vld [vmem:[%s5561_s28 + $0xac] sm:$0xf]  ;;  %v5439_v54 = vld [vmem:[%s5561_s28 + $0x84] sm:$0xf] }
 0x118   : > { %v6757_v4 = vpop.permute.xlu1 %2705  ;;  %v2846_v60 = vsel %vm2813_vm7, %v4947_v36, %v6583_v9  ;;  %v487_v37 = vsel %vm5647_vm6, %v482_v32, %v486_v58  ;;  %v802_v50 = vsel %vm5614_vm3, %v800_v57, %v801_v39  ;;  %v2061_v10 = vrot.slane %v4902_v46, 5  ;;  %v694_v39 = vld [vmem:[%s5561_s28 + $0xa8] sm:$0xe] }
 0x119   : > { %v4960_v63 = vcombine.low %v477_v12, %v487_v37  ;;  %v4976_v43 = vcombine.low %v799_v56, %v802_v50  ;;  %v1842_v44 = vsel %vm5647_vm6, %v1837_v61, %v1841_v49  ;;  %v1846_v41 = vor.u32 %v1845_v6, %v1841_v49  ;;  %v5440_v6 = vld [vmem:[%s5561_s28 + $0x88] sm:$0xf]  ;;  %v6809_v61 = vld [vmem:[%s5561_s28 + $0x58] sm:$0xf] }
 0x11a   : > { %v6782_v24 = vpop.permute.xlu0 %2467  ;;  %v1851_v9 = vrot.slane %v1849_v27, 5  ;;  %v4934_v42 = vrot.slane %v4918_v5, 9  ;;  %v2060_v33 = vrot.slane %v2058_v16, 4  ;;  %v633_v2 = vshrl.u32 %v6768_v35, 16 }
 0x11b   : > { %2203 = vrot.lane.b32.xlu0 %v4960_v63, %s5495_s4  ;;  %2283 = vrot.lane.b32.xlu1 %v4976_v43, %s5494_s30  ;;  %v1847_v62 = vrot.slane %v1846_v41, 4  ;;  %v636_v36 = vshll.u32 %v6768_v35, 16  ;;  %v642_v47 = vshll.u32 %v6777_v48, 16  ;;  %v646_v25 = vshrl.u32 %v6777_v48, 16 }
 0x11c   : > { %v6785_v23 = vpop.permute.xlu1 %2641  ;;  %v2059_v26 = vsel %vm5614_vm3, %v4934_v42, %v2058_v16  ;;  %v2062_v34 = vsel %vm5614_vm3, %v2060_v33, %v2061_v10  ;;  %v635_v19 = vrot.slane %v633_v2, 4  ;;  %v652_v58 = vshll.u32 %v291_v30, 16 }
 0x11d   : > { %v1852_v40 = vsel %vm5647_vm6, %v1847_v62, %v1851_v9  ;;  %v5078_v52 = vcombine.low %v2059_v26, %v2062_v34  ;;  %v638_v17 = vrot.slane %v636_v36, 5  ;;  %v644_v46 = vrot.slane %v642_v47, 5  ;;  %v6822_v9 = vld [vmem:[%s5561_s28 + $0xb4] sm:$0xf]  ;;  %v6830_v36 = vld [vmem:[%s5561_s28 + $0x5c] sm:$0x1] }
 0x11e   : > { %v6802_v3 = vpop.permute.xlu0 %2627  ;;  %v2884_v16 = vsel %vm2862_vm8, %v2846_v60, %v6590_v45  ;;  %v4948_v32 = vcombine.low %v5439_v54, %v5440_v6  ;;  %v5062_v56 = vcombine.low %v1842_v44, %v1852_v40  ;;  %v648_v57 = vrot.slane %v646_v25, 4  ;;  %v6849_v40 = vld [vmem:[%s5561_s28 + $0xbc] sm:$0x1] }
 0x11f   : > { %2807 = vrot.lane.b32.xlu1 %v5078_v52, %s5500_s9  ;;  %v639_v49 = vor.u32 %v638_v17, %v635_v19  ;;  %v654_v27 = vrot.slane %v652_v58, 5  ;;  %v4775_v5 = vrot.slane %v694_v39, 9  ;;  %v847_v37 = vrot.slane %v6777_v48, 5  ;;  %v6841_v19 = vld [vmem:[%s5561_s28 + $0xb8] sm:$0xf] }
 0x120   : > { %v6811_v12 = vpop.permute.xlu1 %2785  ;;  %2727 = vrot.lane.b32.xlu0 %v5062_v56, %s5499_s8  ;;  %v649_v45 = vor.u32 %v648_v57, %v644_v46  ;;  %v850_v60 = vrot.slane %v291_v30, 5  ;;  %v1053_v50 = vshrl.u32 %v6800_v55, 16  ;;  %v1056_v10 = vshll.u32 %v6800_v55, 16 }
 0x121   : > { %v640_v63 = vrot.slane %v639_v49, 4  ;;  %v848_v43 = vsel %vm5614_vm3, %v4775_v5, %v847_v37  ;;  %v849_v44 = vrot.slane %v847_v37, 4  ;;  %v1066_v41 = vshrl.u32 %v6809_v61, 16 }
 0x122   : > { %v6824_v42 = vpop.permute.xlu0 %2547  ;;  %v2901_v30 = vsel %vm2895_vm9, %v6627_v7, %v6605_v22  ;;  %v650_v33 = vrot.slane %v649_v45, 4  ;;  %v1055_v2 = vrot.slane %v1053_v50, 4  ;;  %v1058_v62 = vrot.slane %v1056_v10, 5  ;;  %v4805_v45 = vld [vmem:[%s5561_s28 + $0xb4] sm:$0xf] }
 0x123   : > { %v2934_v47 = vsel %vm2928_vm10, %v2901_v30, %v6622_v20  ;;  %v2849_v25 = vsel %vm2813_vm7, %v4948_v32, %v6649_v13  ;;  %v645_v26 = vsel %vm5647_vm6, %v640_v63, %v644_v46  ;;  %v851_v34 = vsel %vm5614_vm3, %v849_v44, %v850_v60 }
 0x124   : > { %v6843_v22 = vpop.permute.xlu1 %2643  ;;  %v655_v7 = vsel %vm5647_vm6, %v650_v33, %v654_v27  ;;  %v4983_v58 = vcombine.low %v848_v43, %v851_v34  ;;  %v1059_v39 = vor.u32 %v1058_v62, %v1055_v2  ;;  %v1062_v20 = vshll.u32 %v6809_v61, 16  ;;  %v6865_v43 = vld [vmem:[%s5561_s28 + $0x60] sm:$0xf] }
 0x125   : > { %v4967_v13 = vcombine.low %v645_v26, %v655_v7  ;;  %v1068_v52 = vrot.slane %v1066_v41, 4  ;;  %v1072_v17 = vshll.u32 %v6830_v36, 16  ;;  %v657_v46 = vshrl.u32 %v6822_v9, 16  ;;  %v6877_v26 = vld [vmem:[%s5561_s28 + $0xb8] sm:$0xf] }
 0x126   : > { %v6853_v54 = vpop.permute.xlu0 %2707  ;;  %2297 = vrot.lane.b32.xlu1 %v4983_v58, %s5494_s30  ;;  %v1060_v6 = vrot.slane %v1059_v39, 4  ;;  %v1064_v32 = vrot.slane %v1062_v20, 5  ;;  %v660_v56 = vshll.u32 %v6822_v9, 16  ;;  %v666_v57 = vshll.u32 %v6841_v19, 16 }
 0x127   : > { %2217 = vrot.lane.b32.xlu0 %v4967_v13, %s5495_s4  ;;  %v4991_v49 = vcombine.low %v6800_v55, %v6809_v61  ;;  %v659_v27 = vrot.slane %v657_v46, 4  ;;  %v670_v5 = vshrl.u32 %v6841_v19, 16  ;;  %v676_v37 = vshll.u32 %v6849_v40, 16  ;;  %v4831_v13 = vld [vmem:[%s5561_s28 + $0x54] sm:$0xe] }
 0x128   : > { %v1069_v60 = vor.u32 %v1068_v52, %v1064_v32  ;;  %v1074_v50 = vrot.slane %v1072_v17, 5  ;;  %v662_v10 = vrot.slane %v660_v56, 5  ;;  %v668_v63 = vrot.slane %v666_v57, 5  ;;  %v6874_v33 = vpop.permute.xlu1 %2787  ;;  %v6905_v57 = vld [vmem:[%s5561_s28 + $0x64] sm:$0xf] }
 0x129   : > { %v2917_v44 = vsel %vm2895_vm9, %v2884_v16, %v6658_v51  ;;  %v2903_v55 = vsel %vm2895_vm9, %v6762_v0, %v6669_v8  ;;  %v1065_v41 = vsel %vm5647_vm6, %v1060_v6, %v1064_v32  ;;  %v672_v30 = vrot.slane %v670_v5, 4  ;;  %v695_v32 = vld [vmem:[%s5561_s28 + $0xb4] sm:$0xe] }
 0x12a   : > { %v1070_v2 = vrot.slane %v1069_v60, 4  ;;  %v663_v62 = vor.u32 %v662_v10, %v659_v27  ;;  %v1245_v34 = vshrl.u32 %v4805_v45, 16  ;;  %v1248_v7 = vshll.u32 %v4805_v45, 16  ;;  %v6885_v58 = vpop.permute.xlu0 %2197 }
 0x12b   : > { %v6881_v51 = vsel %vm2961_vm11, %v2934_v47, %v6672_v18  ;;  %2377 = vrot.lane.b32.xlu0 %v4991_v49, %s5493_s29  ;;  %v673_v8 = vor.u32 %v672_v30, %v668_v63  ;;  %v678_v0 = vrot.slane %v676_v37, 5  ;;  %v1077_v16 = vshrl.u32 %v6865_v43, 16 }
 0x12c   : > { %v6889_v39 = vsel %vm2862_vm8, %v2849_v25, %v6687_v28  ;;  %v6893_v20 = vsel %vm2928_vm10, %v2917_v44, %v6695_v15  ;;  %v1075_v18 = vsel %vm5647_vm6, %v1070_v2, %v1074_v50  ;;  %v664_v47 = vrot.slane %v663_v62, 4  ;;  %v6910_v60 = vpop.permute.xlu1 %2277 }
 0x12d   : > { %v5007_v52 = vcombine.low %v1065_v41, %v1075_v18  ;;  %v674_v17 = vrot.slane %v673_v8, 4  ;;  %v1258_v46 = vshrl.u32 %v6877_v26, 16  ;;  %v1080_v6 = vshll.u32 %v6865_v43, 16  ;;  %v6915_v41 = vld [vmem:[%s5561_s28 + $0xbc] sm:$0x1] }
 0x12e   : > { %v669_v28 = vsel %vm5647_vm6, %v664_v47, %v668_v63  ;;  %v1247_v25 = vrot.slane %v1245_v34, 4  ;;  %v1250_v56 = vrot.slane %v1248_v7, 5  ;;  %v4999_v15 = vcombine.low %v4805_v45, %v6877_v26 }
 0x12f   : > { %2457 = vrot.lane.b32.xlu1 %v5007_v52, %s5496_s5  ;;  %v679_v49 = vsel %vm5647_vm6, %v674_v17, %v678_v0  ;;  %v1079_v27 = vrot.slane %v1077_v16, 4  ;;  %v1082_v5 = vrot.slane %v1080_v6, 5  ;;  %v4847_v37 = vrot.slane %v4831_v13, 9  ;;  %v6935_v52 = vld [vmem:[%s5561_s28 + $0x68] sm:$0x1] }
 0x130   : > { %v4968_v50 = vcombine.low %v669_v28, %v679_v49  ;;  %v1400_v10 = vrot.slane %v6809_v61, 5  ;;  %v1403_v63 = vrot.slane %v6830_v36, 5  ;;  %v4776_v44 = vrot.slane %v695_v32, 9 }
 0x131   : > { %v1090_v45 = vshrl.u32 %v6905_v57, 16  ;;  %v4992_v30 = vcombine.low %v6865_v43, %v6905_v57  ;;  %v854_v2 = vrot.slane %v6841_v19, 5  ;;  %v857_v62 = vrot.slane %v6849_v40, 5  ;;  %v6922_v34 = vpop.permute.xlu0 %2721 }
 0x132   : > { %2219 = vrot.lane.b32.xlu0 %v4968_v50, %s5495_s4  ;;  %v1401_v61 = vsel %vm5614_vm3, %v4847_v37, %v1400_v10  ;;  %v1402_v36 = vrot.slane %v1400_v10, 4  ;;  %v1251_v7 = vor.u32 %v1250_v56, %v1247_v25  ;;  %v1254_v8 = vshll.u32 %v6877_v26, 16  ;;  %v4869_v25 = vld [vmem:[%s5561_s28 + $0x60] sm:$0xf]  ;;  %v6943_v56 = vpop.permute.xlu1 %2801  ;;  %v6952_v10 = vld [vmem:[%s5561_s28 + $0x64] sm:$0xf] }
 0x133   : > { %2393 = vrot.lane.b32.xlu1 %v4999_v15, %s5493_s29  ;;  %v855_v43 = vsel %vm5614_vm3, %v4776_v44, %v854_v2  ;;  %v856_v0 = vrot.slane %v854_v2, 4  ;;  %v1260_v16 = vrot.slane %v1258_v46, 4  ;;  %v1264_v40 = vshll.u32 %v6915_v41, 16 }
 0x134   : > { %v1404_v18 = vsel %vm5614_vm3, %v1402_v36, %v1403_v63  ;;  %v1252_v47 = vrot.slane %v1251_v7, 4  ;;  %v1256_v13 = vrot.slane %v1254_v8, 5  ;;  %v1083_v17 = vor.u32 %v1082_v5, %v1079_v27 }
 0x135   : > { %v2936_v6 = vsel %vm2928_vm10, %v2903_v55, %v6718_v11  ;;  %v5023_v32 = vcombine.low %v1401_v61, %v1404_v18  ;;  %v858_v28 = vsel %vm5614_vm3, %v856_v0, %v857_v62  ;;  %v1086_v46 = vshll.u32 %v6905_v57, 16  ;;  %v4807_v61 = vld [vmem:[%s5561_s28 + $0xc0] sm:$0xf] }
 0x136   : > { %2379 = vrot.lane.b32.xlu0 %v4992_v30, %s5493_s29  ;;  %v4984_v15 = vcombine.low %v855_v43, %v858_v28  ;;  %v1261_v49 = vor.u32 %v1260_v16, %v1256_v13  ;;  %v1266_v37 = vrot.slane %v1264_v40, 5  ;;  %v1084_v27 = vrot.slane %v1083_v17, 4  ;;  %v6977_v28 = vld [vmem:[%s5561_s28 + $0xc4] sm:$0xf] }
 0x137   : > { %v3000_v11 = vsel %vm2994_vm12, %v6881_v51, %v6722_v31  ;;  %2537 = vrot.lane.b32.xlu1 %v5023_v32, %s5497_s6  ;;  %v1088_v55 = vrot.slane %v1086_v46, 5  ;;  %v1092_v5 = vrot.slane %v1090_v45, 4  ;;  %v1096_v50 = vshll.u32 %v6935_v52, 16 }
 0x138   : > { %v6954_v63 = vpop.permute.xlu0 %2199  ;;  %v1257_v44 = vsel %vm5647_vm6, %v1252_v47, %v1256_v13  ;;  %v1262_v30 = vrot.slane %v1261_v49, 4  ;;  %v1662_v2 = vshrl.u32 %v4869_v25, 16  ;;  %v1665_v62 = vshll.u32 %v4869_v25, 16  ;;  %v4832_v47 = vld [vmem:[%s5561_s28 + $0x60] sm:$0xe]  ;;  %v6973_v13 = vpop.permute.xlu1 %2279 }
 0x139   : > { %v2969_v31 = vsel %vm2961_vm11, %v2936_v6, %v6750_v21  ;;  %v3033_v51 = vsel %vm3027_vm13, %v3000_v11, %v6757_v4  ;;  %v1093_v45 = vor.u32 %v1092_v5, %v1088_v55  ;;  %v1098_v36 = vrot.slane %v1096_v50, 5  ;;  %v4839_v21 = vld [vmem:[%s5561_s28 + $0xb4] sm:$0xe]  ;;  %v6990_v50 = vld [vmem:[%s5561_s28 + $0x68] sm:$0x1] }
 0x13a   : > { %2299 = vrot.lane.b32.xlu0 %v4984_v15, %s5494_s30  ;;  %v1267_v7 = vsel %vm5647_vm6, %v1262_v30, %v1266_v37  ;;  %v1089_v8 = vsel %vm5647_vm6, %v1084_v27, %v1088_v55  ;;  %v3002_v43 = vsel %vm2994_vm12, %v2969_v31, %v6802_v3  ;;  %v1675_v0 = vshrl.u32 %v6952_v10, 16 }
 0x13b   : > { %v5015_v16 = vcombine.low %v1257_v44, %v1267_v7  ;;  %v1094_v40 = vrot.slane %v1093_v45, 4  ;;  %v1269_v4 = vshrl.u32 %v4807_v61, 16  ;;  %v1272_v18 = vshll.u32 %v4807_v61, 16 }
 0x13c   : > { %v1664_v17 = vrot.slane %v1662_v2, 4  ;;  %v1667_v6 = vrot.slane %v1665_v62, 5  ;;  %v5039_v32 = vcombine.low %v4869_v25, %v6952_v10  ;;  %v3066_v3 = vsel %vm3060_vm14, %v3033_v51, %v6811_v12 }
 0x13d   : > { %2473 = vrot.lane.b32.xlu1 %v5015_v16, %s5496_s5  ;;  %v1099_v46 = vsel %vm5647_vm6, %v1094_v40, %v1098_v36  ;;  %v1271_v15 = vrot.slane %v1269_v4, 4  ;;  %v1274_v49 = vrot.slane %v1272_v18, 5  ;;  %v4855_v37 = vrot.slane %v4839_v21, 9  ;;  %5289 = vmatprep.mubr.msk.bf16.mxu0 %vm3112_vm15, %v3066_v3  ;;  %v6985_v27 = vpop.permute.xlu0 %2723  ;;  %v7009_v21 = vld [vmem:[%s5561_s28 + $0xc8] sm:$0x1] }
 0x13e   : > { %v5008_v11 = vcombine.low %v1089_v8, %v1099_v46  ;;  %v1456_v25 = vrot.slane %v6877_v26, 5  ;;  %v1459_v55 = vrot.slane %v6915_v41, 5  ;;  %v4848_v5 = vrot.slane %v4832_v47, 9  ;;  %v4885_v47 = vld [vmem:[%s5561_s28 + $0xc0] sm:$0xf] }
 0x13f   : > { %v1282_v12 = vshrl.u32 %v6977_v28, 16  ;;  %v5000_v44 = vcombine.low %v4807_v61, %v6977_v28  ;;  %v1407_v30 = vrot.slane %v6905_v57, 5  ;;  %v1410_v2 = vrot.slane %v6935_v52, 5  ;;  %v7004_v52 = vpop.permute.xlu1 %2803 }
 0x140   : > { %2459 = vrot.lane.b32.xlu0 %v5008_v11, %s5496_s5  ;;  %v1457_v62 = vsel %vm5614_vm3, %v4855_v37, %v1456_v25  ;;  %v1458_v26 = vrot.slane %v1456_v25, 4  ;;  %v1668_v31 = vor.u32 %v1667_v6, %v1664_v17  ;;  %v1671_v41 = vshll.u32 %v6952_v10, 16 }
 0x141   : > { %2633 = vrot.lane.b32.xlu1 %v5039_v32, %s5498_s7  ;;  %v1408_v61 = vsel %vm5614_vm3, %v4848_v5, %v1407_v30  ;;  %v1409_v51 = vrot.slane %v1407_v30, 4  ;;  %v1677_v57 = vrot.slane %v1675_v0, 4  ;;  %v1681_v45 = vshll.u32 %v6990_v50, 16 }
 0x142   : > { %v1460_v36 = vsel %vm5614_vm3, %v1458_v26, %v1459_v55  ;;  %v1669_v7 = vrot.slane %v1668_v31, 4  ;;  %v1673_v8 = vrot.slane %v1671_v41, 5  ;;  %v1275_v16 = vor.u32 %v1274_v49, %v1271_v15 }
 0x143   : > { %v5031_v40 = vcombine.low %v1457_v62, %v1460_v36  ;;  %v1411_v4 = vsel %vm5614_vm3, %v1409_v51, %v1410_v2  ;;  %v3035_v0 = vsel %vm3027_vm13, %v3002_v43, %v6853_v54  ;;  %v1278_v18 = vshll.u32 %v6977_v28, 16  ;;  %v7025_v43 = vld [vmem:[%s5561_s28 + $0xc4] sm:$0xf]  ;;  %v7040_v62 = vld [vmem:[%s5561_s28 + $0x70] sm:$0xf] }
 0x144   : > { %v7017_v17 = vpop.permute.xlu0 %2213  ;;  %2395 = vrot.lane.b32.xlu0 %v5000_v44, %s5493_s29  ;;  %v5024_v6 = vcombine.low %v1408_v61, %v1411_v4  ;;  %v1678_v32 = vor.u32 %v1677_v57, %v1673_v8  ;;  %v1683_v3 = vrot.slane %v1681_v45, 5  ;;  %v1276_v46 = vrot.slane %v1275_v16, 4  ;;  %v7030_v44 = vld [vmem:[%s5561_s28 + $0x6c] sm:$0xf]  ;;  %v4840_v16 = vld [vmem:[%s5561_s28 + $0xc0] sm:$0xe] }
 0x145   : > { %2553 = vrot.lane.b32.xlu1 %v5031_v40, %s5497_s6  ;;  %v1280_v15 = vrot.slane %v1278_v18, 5  ;;  %v1284_v49 = vrot.slane %v1282_v12, 4  ;;  %v1288_v37 = vshll.u32 %v7009_v21, 16  ;;  %v3068_v54 = vsel %vm3060_vm14, %v3035_v0, %v6874_v33  ;;  %v7042_v26 = vpop.permute.xlu1 %2293 }
 0x146   : > { %v1674_v11 = vsel %vm5647_vm6, %v1669_v7, %v1673_v8  ;;  %v1679_v25 = vrot.slane %v1678_v32, 4  ;;  %v1854_v55 = vshrl.u32 %v4885_v47, 16  ;;  %v1857_v5 = vshll.u32 %v4885_v47, 16  ;;  %5290 = vmatmul.mubr.msk.bf16.gmra.mrb[4].mxu0 %vm3112_vm15, %v3068_v54  ;;  %v7072_v54 = vld [vmem:[%s5561_s28 + $0xc8] sm:$0x1] }
 0x147   : > { %v2919_v12 = vsel %vm2895_vm9, %v6889_v39, %v6734_v38  ;;  %v2983_v33 = vsel %vm2961_vm11, %v6893_v20, %v6740_v59  ;;  %v1285_v30 = vor.u32 %v1284_v49, %v1280_v15  ;;  %v1290_v2 = vrot.slane %v1288_v37, 5  ;;  %v4911_v39 = vld [vmem:[%s5561_s28 + $0x60] sm:$0xe] }
 0x148   : > { %v3016_v31 = vsel %vm2994_vm12, %v2983_v33, %v6785_v23  ;;  %2539 = vrot.lane.b32.xlu0 %v5024_v6, %s5497_s6  ;;  %v1684_v41 = vsel %vm5647_vm6, %v1679_v25, %v1683_v3  ;;  %v1281_v38 = vsel %vm5647_vm6, %v1276_v46, %v1280_v15  ;;  %v1867_v59 = vshrl.u32 %v7025_v43, 16  ;;  %v7054_v45 = vpop.permute.xlu0 %2373 }
 0x149   : > { %v5055_v20 = vcombine.low %v1674_v11, %v1684_v41  ;;  %v1286_v61 = vrot.slane %v1285_v30, 4  ;;  %v1856_v51 = vrot.slane %v1854_v55, 4  ;;  %v1686_v57 = vshrl.u32 %v7030_v44, 16 }
 0x14a   : > { %v1859_v36 = vrot.slane %v1857_v5, 5  ;;  %v5047_v23 = vcombine.low %v4885_v47, %v7025_v43  ;;  %v1689_v7 = vshll.u32 %v7030_v44, 16  ;;  %v1699_v8 = vshrl.u32 %v7040_v62, 16 }
 0x14b   : > { %2713 = vrot.lane.b32.xlu1 %v5055_v20, %s5499_s8  ;;  %v1291_v40 = vsel %vm5647_vm6, %v1286_v61, %v1290_v2  ;;  %v1688_v4 = vrot.slane %v1686_v57, 4  ;;  %v3049_v0 = vsel %vm3027_vm13, %v3016_v31, %v6922_v34  ;;  %v4927_v18 = vrot.slane %v4911_v39, 9  ;;  %v7094_v31 = vld [vmem:[%s5561_s28 + $0x74] sm:$0x1]  ;;  %v7099_v20 = vld [vmem:[%s5561_s28 + $0xcc] sm:$0xf] }
 0x14c   : > { %v5016_v6 = vcombine.low %v1281_v38, %v1291_v40  ;;  %v1691_v32 = vrot.slane %v1689_v7, 5  ;;  %v2009_v47 = vrot.slane %v6952_v10, 5  ;;  %v2012_v3 = vrot.slane %v6990_v50, 5 }
 0x14d   : > { %v4856_v46 = vrot.slane %v4840_v16, 9  ;;  %v1463_v15 = vrot.slane %v6977_v28, 5  ;;  %v1466_v49 = vrot.slane %v7009_v21, 5  ;;  %v3082_v37 = vsel %vm3060_vm14, %v3049_v0, %v6943_v56  ;;  %v7074_v11 = vpop.permute.xlu1 %2453 }
 0x14e   : > { %2475 = vrot.lane.b32.xlu0 %v5016_v6, %s5496_s5  ;;  %v5040_v34 = vcombine.low %v7030_v44, %v7040_v62  ;;  %v2010_v10 = vsel %vm5614_vm3, %v4927_v18, %v2009_v47  ;;  %v2011_v50 = vrot.slane %v2009_v47, 4  ;;  %v1860_v28 = vor.u32 %v1859_v36, %v1856_v51  ;;  %5305 = vmatprep.mubr.msk.bf16.mxu1 %vm3112_vm15, %v3082_v37  ;;  %v7108_v36 = vld [vmem:[%s5561_s28 + $0xd0] sm:$0xf]  ;;  %v4904_v6 = vld [vmem:[%s5561_s28 + $0xd4] sm:$0x1] }
 0x14f   : > { %2649 = vrot.lane.b32.xlu1 %v5047_v23, %s5498_s7  ;;  %v1464_v56 = vsel %vm5614_vm3, %v4856_v46, %v1463_v15  ;;  %v1465_v21 = vrot.slane %v1463_v15, 4  ;;  %v1863_v25 = vshll.u32 %v7025_v43, 16  ;;  %v1869_v55 = vrot.slane %v1867_v59, 4 }
 0x150   : > { %v7086_v5 = vpop.permute.xlu0 %2215  ;;  %v2952_v44 = vsel %vm2928_vm10, %v2919_v12, %v6782_v24  ;;  %v2013_v33 = vsel %vm5614_vm3, %v2011_v50, %v2012_v3  ;;  %v1861_v30 = vrot.slane %v1860_v28, 4  ;;  %v1873_v2 = vshll.u32 %v7072_v54, 16 }
 0x151   : > { %v5071_v41 = vcombine.low %v2010_v10, %v2013_v33  ;;  %v1467_v38 = vsel %vm5614_vm3, %v1465_v21, %v1466_v49  ;;  %v1865_v39 = vrot.slane %v1863_v25, 5  ;;  %v1692_v59 = vor.u32 %v1691_v32, %v1688_v4  ;;  %v7101_v61 = vpop.permute.xlu1 %2389 }
 0x152   : > { %v2985_v24 = vsel %vm2961_vm11, %v2952_v44, %v6824_v42  ;;  %2635 = vrot.lane.b32.xlu0 %v5040_v34, %s5498_s7  ;;  %v5032_v12 = vcombine.low %v1464_v56, %v1467_v38  ;;  %v1695_v51 = vshll.u32 %v7040_v62, 16  ;;  %v1701_v57 = vrot.slane %v1699_v8, 4  ;;  %v4920_v56 = vld [vmem:[%s5561_s28 + $0xcc] sm:$0xe] }
 0x153   : > { %v3018_v23 = vsel %vm2994_vm12, %v2985_v24, %v6843_v22  ;;  %2793 = vrot.lane.b32.xlu1 %v5071_v41, %s5500_s9  ;;  %v1870_v7 = vor.u32 %v1869_v55, %v1865_v39  ;;  %v1875_v16 = vrot.slane %v1873_v2, 5  ;;  %v1705_v40 = vshll.u32 %v7094_v31, 16  ;;  %v4912_v38 = vld [vmem:[%s5561_s28 + $0x6c] sm:$0xe] }
 0x154   : > { %v7114_v4 = vpop.permute.xlu0 %2375  ;;  %v1866_v42 = vsel %vm5647_vm6, %v1861_v30, %v1865_v39  ;;  %v1693_v0 = vrot.slane %v1692_v59, 4  ;;  %v1697_v18 = vrot.slane %v1695_v51, 5  ;;  %v1878_v8 = vshrl.u32 %v7099_v20, 16 }
 0x155   : > { %v1871_v32 = vrot.slane %v1870_v7, 4  ;;  %v3051_v22 = vsel %vm3027_vm13, %v3018_v23, %v6985_v27  ;;  %v1881_v47 = vshll.u32 %v7099_v20, 16  ;;  %v1887_v3 = vshll.u32 %v7108_v36, 16  ;;  %v7126_v34 = vpop.permute.xlu1 %2533  ;;  %v4919_v7 = vld [vmem:[%s5561_s28 + $0xc0] sm:$0xe] }
 0x156   : > { %2555 = vrot.lane.b32.xlu0 %v5032_v12, %s5497_s6  ;;  %v1702_v46 = vor.u32 %v1701_v57, %v1697_v18  ;;  %v1707_v15 = vrot.slane %v1705_v40, 5  ;;  %v1880_v49 = vrot.slane %v1878_v8, 4  ;;  %v1891_v37 = vshrl.u32 %v7108_v36, 16 }
 0x157   : > { %v1876_v10 = vsel %vm5647_vm6, %v1871_v32, %v1875_v16  ;;  %v1883_v50 = vrot.slane %v1881_v47, 5  ;;  %v1889_v28 = vrot.slane %v1887_v3, 5  ;;  %v1897_v27 = vshll.u32 %v4904_v6, 16 }
 0x158   : > { %v5063_v21 = vcombine.low %v1866_v42, %v1876_v10  ;;  %v1698_v25 = vsel %vm5647_vm6, %v1693_v0, %v1697_v18  ;;  %v1703_v55 = vrot.slane %v1702_v46, 4  ;;  %v1893_v44 = vrot.slane %v1891_v37, 4  ;;  %v7133_v33 = vpop.permute.xlu0 %2295 }
 0x159   : > { %v1884_v30 = vor.u32 %v1883_v50, %v1880_v49  ;;  %v1899_v2 = vrot.slane %v1897_v27, 5  ;;  %v3084_v41 = vsel %vm3060_vm14, %v3051_v22, %v7004_v52  ;;  %v4936_v24 = vrot.slane %v4920_v56, 9 }
 0x15a   : > { %2729 = vrot.lane.b32.xlu1 %v5063_v21, %s5499_s8  ;;  %v1708_v39 = vsel %vm5647_vm6, %v1703_v55, %v1707_v15  ;;  %v1894_v59 = vor.u32 %v1893_v44, %v1889_v28  ;;  %v2072_v12 = vrot.slane %v7108_v36, 5  ;;  %5306 = vmatmul.mubr.msk.bf16.gmra.mrb[4].mxu1 %vm3112_vm15, %v3084_v41  ;;  %v2075_v23 = vrot.slane %v4904_v6, 5  ;;  %v5442_v55 = vld [vmem:[%s5561_s28 + $0x34] sm:$0xf] }
 0x15b   : > { %v5056_v51 = vcombine.low %v1698_v25, %v1708_v39  ;;  %v1885_v57 = vrot.slane %v1884_v30, 4  ;;  %v4928_v42 = vrot.slane %v4912_v38, 9  ;;  %v5048_v18 = vcombine.low %v7099_v20, %v7108_v36  ;;  %v5441_v25 = vld [vmem:[%s5561_s28 + $0x30] sm:$0xf] }
 0x15c   : > { %v1895_v16 = vrot.slane %v1894_v59, 4  ;;  %v2074_v40 = vrot.slane %v2072_v12, 4  ;;  %v7144_v52 = vpop.permute.xlu1 %2469  ;;  %v2016_v8 = vrot.slane %v7040_v62, 5  ;;  %v2019_v32 = vrot.slane %v7094_v31, 5 }
 0x15d   : > { %2715 = vrot.lane.b32.xlu0 %v5056_v51, %s5499_s8  ;;  %v1890_v0 = vsel %vm5647_vm6, %v1885_v57, %v1889_v28  ;;  %v2073_v22 = vsel %vm5614_vm3, %v4936_v24, %v2072_v12  ;;  %v4935_v3 = vrot.slane %v4919_v7, 9  ;;  %v2065_v62 = vrot.slane %v7025_v43, 5  ;;  %v5443_v57 = vld [vmem:[%s5561_s28 + $0x3c] sm:$0xf] }
 0x15e   : > { %v1900_v6 = vsel %vm5647_vm6, %v1895_v16, %v1899_v2  ;;  %v2076_v47 = vsel %vm5614_vm3, %v2074_v40, %v2075_v23  ;;  %v2017_v49 = vsel %vm5614_vm3, %v4928_v42, %v2016_v8  ;;  %v2018_v20 = vrot.slane %v2016_v8, 4  ;;  %v5444_v23 = vld [vmem:[%s5561_s28 + $0x40] sm:$0xf] }
 0x15f   : > { %v2456_v46 = vpop.permute.xlu0 %2455  ;;  %v5064_v15 = vcombine.low %v1890_v0, %v1900_v6  ;;  %v2068_v31 = vrot.slane %v7072_v54, 5  ;;  %v5080_v36 = vcombine.low %v2073_v22, %v2076_v47  ;;  %v2066_v50 = vsel %vm5614_vm3, %v4935_v3, %v2065_v62  ;;  %v5445_v47 = vld [vmem:[%s5561_s28 + $0x90] sm:$0xf] }
 0x160   : > { %v2630_v1 = vpop.permute.xlu1 %2629  ;;  %v2020_v37 = vsel %vm5614_vm3, %v2018_v20, %v2019_v32  ;;  %v2067_v28 = vrot.slane %v2065_v62, 4  ;;  %v4941_v44 = vcombine.low %v5441_v25, %v5442_v55  ;;  %vm3502_vm1 = vcmask 261120  }
 0x161   : > { %2731 = vrot.lane.b32.xlu1 %v5064_v15, %s5499_s8  ;;  %2651 = vrot.lane.b32.xlu0 %v5048_v18, %s5498_s7  ;;  %v5072_v10 = vcombine.low %v2017_v49, %v2020_v37 }
 0x162   : > { %v2069_v43 = vsel %vm5614_vm3, %v2067_v28, %v2068_v31  ;;  %v2828_v2 = vsel %vm2813_vm7, %v4941_v44, %v6885_v58  ;;  %v4942_v58 = vcombine.low %v5443_v57, %v5444_v23  ;;  %v5448_v28 = vld [vmem:[%s5561_s28 + $0xa0] sm:$0xf] }
 0x163   : > { %v7169_v27 = vpop.permute.xlu0 %2391  ;;  %v5079_v54 = vcombine.low %v2066_v50, %v2069_v43  ;;  %v2872_v41 = vsel %vm2862_vm8, %v2828_v2, %v6910_v60  ;;  %v5447_v50 = vld [vmem:[%s5561_s28 + $0x9c] sm:$0xf] }
 0x164   : > { %v2550_v56 = vpop.permute.xlu1 %2549  ;;  %v2905_v38 = vsel %vm2895_vm9, %v2872_v41, %v7054_v45 }
 0x165   : > { %2811 = vrot.lane.b32.xlu1 %v5080_v36, %s5500_s9  ;;  %2795 = vrot.lane.b32.xlu0 %v5072_v10, %s5500_s9  ;;  %v2938_v59 = vsel %vm2928_vm10, %v2905_v38, %v7074_v11  ;;  %v2831_v11 = vsel %vm2813_vm7, %v4942_v58, %v6954_v63  ;;  %v5446_v63 = vld [vmem:[%s5561_s28 + $0x94] sm:$0xf] }
 0x166   : > { %v2971_v24 = vsel %vm2961_vm11, %v2938_v59, %v7126_v34  ;;  %v2874_v40 = vsel %vm2862_vm8, %v2831_v11, %v6973_v13  ;;  %v4949_v3 = vcombine.low %v5445_v47, %v5446_v63  ;;  %v5450_v11 = vld [vmem:[%s5561_s28 + $0x4c] sm:$0xf] }
 0x167   : > { %v2536_v21 = vpop.permute.xlu0 %2535  ;;  %v3004_v51 = vsel %vm2994_vm12, %v2971_v24, %v2630_v1  ;;  %v2907_v42 = vsel %vm2895_vm9, %v2874_v40, %v7114_v4 }
 0x168   : > { %v2940_v0 = vsel %vm2928_vm10, %v2907_v42, %v2456_v46  ;;  %v2852_v46 = vsel %vm2813_vm7, %v4949_v3, %v7017_v17  ;;  %v4950_v17 = vcombine.low %v5447_v50, %v5448_v28 }
 0x169   : > { %2809 = vrot.lane.b32.xlu0 %v5079_v54, %s5500_s9  ;;  %v2973_v18 = vsel %vm2961_vm11, %v2940_v0, %v2536_v21  ;;  %v2888_v49 = vsel %vm2862_vm8, %v2852_v46, %v7042_v26  ;;  %v4944_v26 = vcombine.low %v6711_v53, %v6716_v29 }
 0x16a   : > { %v2921_v20 = vsel %vm2895_vm9, %v2888_v49, %v7101_v61  ;;  %v2855_v61 = vsel %vm2813_vm7, %v4950_v17, %v7086_v5  ;;  %v3312_v49 = vld [vmem:[#allocation2 + $0x10] sm:$0xff]  ;;  %v3313_v17 = vld [vmem:[#allocation2 + $0x18] sm:$0xff] }
 0x16b   : > { %v2710_v30 = vpop.permute.xlu1 %2709  ;;  %v2954_v62 = vsel %vm2928_vm10, %v2921_v20, %v7144_v52  ;;  %v4951_v20 = vcombine.low %v6768_v35, %v6777_v48 }
 0x16c   : > { %v3037_v7 = vsel %vm3027_vm13, %v3004_v51, %v2710_v30  ;;  %v2987_v31 = vsel %vm2961_vm11, %v2954_v62, %v2550_v56  ;;  %v2890_v56 = vsel %vm2862_vm8, %v2855_v61, %v7133_v33 }
 0x16d   : > { %v2923_v25 = vsel %vm2895_vm9, %v2890_v56, %v7169_v27 }
 0x16e   : > { %v2472_v14 = vpop.permute.xlu0 %2471 }
 0x16f   : > { %v2646_v39 = vpop.permute.xlu1 %2645  ;;  %v2956_v53 = vsel %vm2928_vm10, %v2923_v25, %v2472_v14 }
 0x170   : > { %v3020_v36 = vsel %vm2994_vm12, %v2987_v31, %v2646_v39 }
 0x172   : > { %v2632_v12 = vpop.permute.xlu0 %2631 }
 0x173   : > { %v2790_v60 = vpop.permute.xlu1 %2789  ;;  %v3006_v32 = vsel %vm2994_vm12, %v2973_v18, %v2632_v12 }
 0x174   : > { %v3070_v45 = vsel %vm3060_vm14, %v3037_v7, %v2790_v60 }
 0x175   : > { %5293 = vmatprep.mubr.msk.bf16.mxu0 %vm3112_vm15, %v3070_v45 }
 0x176   : > { %v2552_v16 = vpop.permute.xlu0 %2551 }
 0x177   : > { %v2648_v34 = vpop.permute.xlu1 %2647  ;;  %v2989_v29 = vsel %vm2961_vm11, %v2956_v53, %v2552_v16  ;;  %v5449_v16 = vld [vmem:[%s5561_s28 + $0x48] sm:$0xf] }
 0x178   : > { %v3022_v5 = vsel %vm2994_vm12, %v2989_v29, %v2648_v34  ;;  %v4943_v34 = vcombine.low %v5449_v16, %v5450_v11 }
 0x17b   : > { %v2792_v8 = vpop.permute.xlu1 %2791 }
 0x17c   : > { %v2712_v6 = vpop.permute.xlu0 %2711 }
 0x17d   : > { %v3039_v22 = vsel %vm3027_vm13, %v3006_v32, %v2712_v6 }
 0x17e   : > { %v3072_v13 = vsel %vm3060_vm14, %v3039_v22, %v2792_v8 }
 0x17f   : > { %5294 = vmatmul.mubr.msk.bf16.gmra.mrb[8].mxu0 %vm3112_vm15, %v3072_v13 }
 0x180   : > { %v2282_v4 = vpop.permute.xlu1 %2281 }
 0x181   : > { %v2202_v15 = vpop.permute.xlu0 %2201 }
 0x182   : > { %v2834_v42 = vsel %vm2813_vm7, %v4943_v34, %v2202_v15 }
 0x183   : > { %v2876_v0 = vsel %vm2862_vm8, %v2834_v42, %v2282_v4  ;;  %v7264_v4 = vld [vmem:[%s7961_s2] ss:$0 sm:$0xff] }
 0x186   : > { %v2806_v1 = vpop.permute.xlu1 %2805 }
 0x187   : > { %v2726_v37 = vpop.permute.xlu0 %2725 }
 0x188   : > { %v3053_v10 = vsel %vm3027_vm13, %v3020_v36, %v2726_v37  ;;  %v3310_v36 = vld [vmem:[#allocation2] sm:$0xff]  ;;  %v3747_v37 = vlaneseq }
 0x189   : > { %v3086_v43 = vsel %vm3060_vm14, %v3053_v10, %v2806_v1  ;;  %v4952_v10 = vcombine.low %v6822_v9, %v6841_v19 }
 0x18a   : > { %5309 = vmatprep.mubr.msk.bf16.mxu1 %vm3112_vm15, %v3086_v43  ;;  %v7276_v25 = vshrl.u32 %v3747_v37, 7 }
 0x18c   : > { %vm3750_vm6 = vcmp.eq.s32.totalorder %v7276_v25, 0 }
 0x18d   : > { %v2204_v52 = vpop.permute.xlu0 %2203  ;;  %v2284_v54 = vpop.permute.xlu1 %2283 }
 0x18e   : > { %v2837_v21 = vsel %vm2813_vm7, %v4944_v26, %v2204_v52  ;;  %v3311_v52 = vld [vmem:[#allocation2 + $0x8] sm:$0xff] }
 0x18f   : > { %v7233_v55 = vsel %vm2862_vm8, %v2837_v21, %v2284_v54 }
 0x191   : > { %v2808_v44 = vpop.permute.xlu1 %2807 }
 0x192   : > { %v2728_v30 = vpop.permute.xlu0 %2727 }
 0x193   : > { %v3055_v2 = vsel %vm3027_vm13, %v3022_v5, %v2728_v30 }
 0x194   : > { %v3088_v33 = vsel %vm3060_vm14, %v3055_v2, %v2808_v44 }
 0x195   : > { %5310 = vmatmul.mubr.msk.bf16.gmra.mrb[8].mxu1 %vm3112_vm15, %v3088_v33 }
 0x198   : > { %v2298_v27 = vpop.permute.xlu1 %2297 }
 0x199   : > { %v2218_v41 = vpop.permute.xlu0 %2217 }
 0x19a   : > { %v2858_v54 = vsel %vm2813_vm7, %v4951_v20, %v2218_v41 }
 0x19b   : > { %v2892_v19 = vsel %vm2862_vm8, %v2858_v54, %v2298_v27 }
 0x19d   : > { %v2378_v38 = vpop.permute.xlu0 %2377 }
 0x19e   : > { %v2909_v8 = vsel %vm2895_vm9, %v2876_v0, %v2378_v38 }
 0x1a1   : > { %v2458_v39 = vpop.permute.xlu1 %2457 }
 0x1a2   : > { %v2942_v6 = vsel %vm2928_vm10, %v2909_v8, %v2458_v39 }
 0x1a4   : > { %v2220_v59 = vpop.permute.xlu0 %2219 }
 0x1a5   : > { %v2394_v14 = vpop.permute.xlu1 %2393  ;;  %v2861_v53 = vsel %vm2813_vm7, %v4952_v10, %v2220_v59  ;;  %vm3768_vm7 = vcmask 1046528  }
 0x1a6   : > { %v2925_v5 = vsel %vm2895_vm9, %v2892_v19, %v2394_v14  ;;  %v5501_v14 = vmov 0.0   ;;  %v3329_v19 = vld [vmem:[#allocation2 + $0x98] sm:$0xff] }
 0x1a8   : > { %v2380_v24 = vpop.permute.xlu0 %2379 }
 0x1a9   : > { %v2538_v12 = vpop.permute.xlu1 %2537  ;;  %v2911_v30 = vsel %vm2895_vm9, %v7233_v55, %v2380_v24 }
 0x1aa   : > { %v2975_v22 = vsel %vm2961_vm11, %v2942_v6, %v2538_v12 }
 0x1ac   : > { %v2300_v51 = vpop.permute.xlu0 %2299 }
 0x1ad   : > { %v2894_v41 = vsel %vm2862_vm8, %v2861_v53, %v2300_v51 }
 0x1af   : > { %v2474_v57 = vpop.permute.xlu1 %2473 }
 0x1b0   : > { %v2958_v39 = vsel %vm2928_vm10, %v2925_v5, %v2474_v57 }
 0x1b2   : > { %v2460_v23 = vpop.permute.xlu0 %2459 }
 0x1b3   : > { %v2634_v58 = vpop.permute.xlu1 %2633  ;;  %v2944_v27 = vsel %vm2928_vm10, %v2911_v30, %v2460_v23 }
 0x1b4   : > { %v3008_v47 = vsel %vm2994_vm12, %v2975_v22, %v2634_v58 }
 0x1b6   : > { %v2396_v7 = vpop.permute.xlu0 %2395 }
 0x1b7   : > { %v7241_v60 = vpop.permute.xlu1 %2553  ;;  %v2927_v59 = vsel %vm2895_vm9, %v2894_v41, %v2396_v7 }
 0x1ba   : > { %v7243_v45 = vpop.permute.xlu0 %2539 }
 0x1bb   : > { %v2977_v24 = vsel %vm2961_vm11, %v2944_v27, %v7243_v45 }
 0x1bd   : > { %v2714_v40 = vpop.permute.xlu1 %2713 }
 0x1be   : > { %v3041_v3 = vsel %vm3027_vm13, %v3008_v47, %v2714_v40 }
 0x1c0   : > { %v7249_v18 = vpop.permute.xlu0 %2475 }
 0x1c1   : > { %v7252_v32 = vpop.permute.xlu1 %2649  ;;  %v2960_v7 = vsel %vm2928_vm10, %v2927_v59, %v7249_v18 }
 0x1c4   : > { %v7257_v63 = vpop.permute.xlu0 %2635 }
 0x1c5   : > { %v2794_v13 = vpop.permute.xlu1 %2793  ;;  %v3010_v8 = vsel %vm2994_vm12, %v2977_v24, %v7257_v63 }
 0x1c6   : > { %v3074_v15 = vsel %vm3060_vm14, %v3041_v3, %v2794_v13 }
 0x1c7   : > { %5297 = vmatprep.mubr.msk.bf16.mxu0 %vm3112_vm15, %v3074_v15  ;;  %v2991_v15 = vsel %vm2961_vm11, %v2958_v39, %v7241_v60 }
 0x1c8   : > { %v2556_v62 = vpop.permute.xlu0 %2555 }
 0x1c9   : > { %v5287_v46 = vpop.f32.mrb[0].mxu0  ;;  %v2993_v6 = vsel %vm2961_vm11, %v2960_v7, %v2556_v62 }
 0x1ca   : > { %v3192_v31 = vadd.f32 %v5287_v46, %v7264_v4  ;;  %v3183_v1 = vpop.f32.mrb[1].mxu0 }
 0x1cb   : > { %v3184_v50 = vadd.f32 %v7264_v4, %v3183_v1  ;;  %v5288_v28 = vpop.f32.mrb[2].mxu0 }
 0x1cc   : > { %v3344_v43 = vsub.f32 %v3192_v31, %v3312_v49  ;;  %v3195_v26 = vadd.f32 %v5288_v28, %v7264_v4  ;;  %v3186_v61 = vpop.f32.mrb[3].mxu0  ;;  %v2730_v56 = vpop.permute.xlu1 %2729  ;;  %v3024_v31 = vsel %vm2994_vm12, %v2991_v15, %v7252_v32  ;;  %v3328_v28 = vld [vmem:[#allocation2 + $0x90] sm:$0xff] }
 0x1cd   : > { %v3342_v35 = vsub.f32 %v3184_v50, %v3310_v36  ;;  %v3187_v48 = vadd.f32 %v7264_v4, %v3186_v61  ;;  %v3057_v60 = vsel %vm3027_vm13, %v3024_v31, %v2730_v56 }
 0x1ce   : > { %v3376_v21 = vmul.f32 0.5, %v3344_v43  ;;  %v3345_v9 = vsub.f32 %v3195_v26, %v3313_v17 }
 0x1cf   : > { %v3374_v29 = vmul.f32 0.5, %v3342_v35  ;;  %v3343_v44 = vsub.f32 %v3187_v48, %v3311_v52  ;;  %v2716_v2 = vpop.permute.xlu0 %2715 }
 0x1d0   : > { %v3408_v33 = vadd.f32 %v3376_v21, %v3312_v49  ;;  %v3377_v38 = vmul.f32 0.5, %v3345_v9  ;;  %v3043_v63 = vsel %vm3027_vm13, %v3010_v8, %v2716_v2  ;;  %v3327_v2 = vld [vmem:[#allocation2 + $0x88] sm:$0xff] }
 0x1d1   : > { %v3406_v12 = vadd.f32 %v3374_v29, %v3310_v36  ;;  %v3375_v58 = vmul.f32 0.5, %v3343_v44 }
 0x1d2   : > { %vm3440_vm2 = vcmp.ge.f32.partialorder %v3408_v33, 1.0  ;;  %v3409_v16 = vadd.f32 %v3377_v38, %v3313_v17 }
 0x1d3   : > { %v3472_v11 = vsel %vm3440_vm2, 0.0, %v3408_v33  ;;  %v7288_v34 = vsel %vm3440_vm2, 1.0, %v5501_v14  ;;  %vm3438_vm3 = vcmp.ge.f32.partialorder %v3406_v12, 1.0  ;;  %v3407_v55 = vadd.f32 %v3375_v58, %v3311_v52  ;;  %v2732_v51 = vpop.permute.xlu1 %2731  ;;  %v2652_v57 = vpop.permute.xlu0 %2651  ;;  %v3326_v52 = vld [vmem:[#allocation2 + $0x80] sm:$0xff] }
 0x1d4   : > { %3505 = vst.msk [vmem:[#allocation2 + $0x10] sm:$0xff] %vm3502_vm1, %v3472_v11  ;;  %v3470_v40 = vsel %vm3438_vm3, 0.0, %v3406_v12  ;;  %v7294_v23 = vsel %vm3438_vm3, 1.0, %v5501_v14  ;;  %vm3441_vm4 = vcmp.ge.f32.partialorder %v3409_v16, 1.0  ;;  %v3026_v18 = vsel %vm2994_vm12, %v2993_v6, %v2652_v57 }
 0x1d5   : > { %3503 = vst.msk [vmem:[#allocation2] sm:$0xff] %vm3502_vm1, %v3470_v40  ;;  %v3599_v42 = vmax.f32 %v7294_v23, 0.0  ;;  %v3601_v0 = vmax.f32 %v7294_v23, %v7288_v34  ;;  %v3473_v45 = vsel %vm3441_vm4, 0.0, %v3409_v16  ;;  %v7307_v22 = vsel %vm3441_vm4, 1.0, %v5501_v14 }
 0x1d6   : > { %3506 = vst.msk [vmem:[#allocation2 + $0x18] sm:$0xff] %vm3502_vm1, %v3473_v45  ;;  %vm3439_vm5 = vcmp.ge.f32.partialorder %v3407_v55, 1.0  ;;  %v3059_v37 = vsel %vm3027_vm13, %v3026_v18, %v2732_v51  ;;  %v5502_v18 = vmov 1983009808   ;;  %vm4530_vm12 = vcmask 1041409  }
 0x1d7   : > { %v3630_v47 = vmax.f32 %v3599_v42, %v7288_v34  ;;  %v3471_v3 = vsel %vm3439_vm5, 0.0, %v3407_v55  ;;  %v7312_v13 = vsel %vm3439_vm5, 1.0, %v5501_v14  ;;  %v2812_v46 = vpop.permute.xlu1 %2811  ;;  %v2796_v49 = vpop.permute.xlu0 %2795  ;;  %vm4533_vm3 = vcmask 1042434  }
 0x1d8   : > { %3504 = vst.msk [vmem:[#allocation2 + $0x8] sm:$0xff] %vm3502_vm1, %v3471_v3  ;;  %v3600_v20 = vmax.f32 %v7312_v13, 0.0  ;;  %v3602_v62 = vmax.f32 %v7312_v13, %v7307_v22  ;;  %v3076_v1 = vsel %vm3060_vm14, %v3043_v63, %v2796_v49  ;;  %v3092_v17 = vsel %vm3060_vm14, %v3059_v37, %v2812_v46  ;;  %v3314_v37 = vld [vmem:[#allocation2 + $0x20] sm:$0xff] }
 0x1d9   : > { %v3692_v36 = vrot.slane %v3630_v47, 7  ;;  %5298 = vmatmul.mubr.msk.bf16.gmra.mrb[12].mxu0 %vm3112_vm15, %v3076_v1  ;;  %v5303_v50 = vpop.f32.mrb[0].mxu1  ;;  %v3769_v43 = vrot.slane %v3630_v47, 1  ;;  %vm7963_vm4 = vcmask 1043459   ;;  %vm4539_vm5 = vcmask 1044484  }
 0x1da   : > { %v7329_v10 = vmax.f32 %v3600_v20, %v7307_v22  ;;  %v3256_v26 = vadd.f32 %v5303_v50, %v7264_v4  ;;  %v3247_v61 = vpop.f32.mrb[1].mxu1  ;;  %v3316_v20 = vld [vmem:[#allocation2 + $0x30] sm:$0xff] }
 0x1db   : > { %v3746_v32 = vsel %vm3145_vm0, 0.0, %v3692_v36  ;;  %v2810_v35 = vpop.permute.xlu0 %2809  ;;  %v3248_v21 = vadd.f32 %v7264_v4, %v3247_v61  ;;  %v5304_v9 = vpop.f32.mrb[2].mxu1  ;;  %v3315_v61 = vld [vmem:[#allocation2 + $0x28] sm:$0xff] }
 0x1dc   : > { %v3752_v48 = vsel %vm3750_vm6, 0.0, %v3746_v32  ;;  %v3693_v54 = vrot.slane %v7329_v10, 7  ;;  %v3770_v56 = vrot.slane %v7329_v10, 1  ;;  %v3090_v53 = vsel %vm3060_vm14, %v3057_v60, %v2810_v35  ;;  %v3250_v30 = vpop.f32.mrb[3].mxu1 }
 0x1dd   : > { %v3825_v29 = vmax.f32 %v3752_v48, %v3630_v47  ;;  %v3360_v44 = vsub.f32 %v3256_v26, %v3328_v28  ;;  %v3259_v5 = vadd.f32 %v5304_v9, %v7264_v4  ;;  %5313 = vmatprep.mubr.msk.bf16.mxu1 %vm3112_vm15, %v3090_v53  ;;  %v3358_v41 = vsub.f32 %v3248_v21, %v3326_v52 }
 0x1de   : > { %v7343_v33 = vsel %vm3145_vm0, %v3692_v36, %v3693_v54  ;;  %v3771_v38 = vsel %vm3768_vm7, %v3769_v43, %v3770_v56  ;;  %v3251_v39 = vadd.f32 %v7264_v4, %v3250_v30  ;;  %5314 = vmatmul.mubr.msk.bf16.gmra.mrb[12].mxu1 %vm3112_vm15, %v3092_v17  ;;  %v3875_v47 = vunpack.c.l.s4 %v5502_v18  ;;  %v3317_v17 = vld [vmem:[#allocation2 + $0x38] sm:$0xff] }
 0x1df   : > { %v3826_v12 = vmax.f32 %v7343_v33, %v7329_v10  ;;  %v3841_v58 = vmax.f32 %v3825_v29, %v3771_v38  ;;  %v3392_v27 = vmul.f32 0.5, %v3360_v44  ;;  %v3361_v59 = vsub.f32 %v3259_v5, %v3329_v19 }
 0x1e0   : > { %v3390_v16 = vmul.f32 0.5, %v3358_v41  ;;  %v3359_v11 = vsub.f32 %v3251_v39, %v3327_v2  ;;  %v3876_v3 = vunpack.c.0.s8 %v3875_v47 }
 0x1e1   : > { %v7352_v55 = vadd.f32 %v3392_v27, %v3328_v28  ;;  %v3393_v24 = vmul.f32 0.5, %v3361_v59  ;;  %v3873_v63 = vcombine.high %v3841_v58, %v3841_v58 }
 0x1e2   : > { %v7354_v51 = vadd.f32 %v3390_v16, %v3326_v52  ;;  %v3391_v57 = vmul.f32 0.5, %v3359_v11  ;;  %v7381_v15 = vsub.s32 %v3876_v3, %v7276_v25 }
 0x1e3   : > { %vm3456_vm8 = vcmp.ge.f32.partialorder %v7352_v55, 1.0  ;;  %v7361_v7 = vadd.f32 %v3393_v24, %v3329_v19 }
 0x1e4   : > { %v3488_v40 = vsel %vm3456_vm8, 0.0, %v7352_v55  ;;  %vm3454_vm9 = vcmp.ge.f32.partialorder %v7354_v51, 1.0  ;;  %v7368_v45 = vadd.f32 %v3391_v57, %v3327_v2  ;;  %v3880_v46 = vrot.slane %v3841_v58, %v7381_v15  ;;  %v3331_v55 = vld [vmem:[#allocation2 + $0xa8] sm:$0xff] }
 0x1e5   : > { %3521 = vst.msk [vmem:[#allocation2 + $0x90] sm:$0xff] %vm3502_vm1, %v3488_v40  ;;  %v3486_v42 = vsel %vm3454_vm9, 0.0, %v7354_v51  ;;  %vm3457_vm10 = vcmp.ge.f32.partialorder %v7361_v7, 1.0  ;;  %v3887_v31 = vrot.slane %v3873_v63, %v7381_v15 }
 0x1e6   : > { %3519 = vst.msk [vmem:[#allocation2 + $0x80] sm:$0xff] %vm3502_vm1, %v3486_v42  ;;  %v3489_v8 = vsel %vm3457_vm10, 0.0, %v7361_v7  ;;  %vm3455_vm11 = vcmp.ge.f32.partialorder %v7368_v45, 1.0  ;;  %v3888_v1 = vcombine.high %v3880_v46, %v3880_v46  ;;  %v5199_v30 = vpack.c.bf16 %v3880_v46, %v3880_v46 }
 0x1e7   : > { %3522 = vst.msk [vmem:[#allocation2 + $0x98] sm:$0xff] %vm3502_vm1, %v3489_v8  ;;  %v3487_v6 = vsel %vm3455_vm11, 0.0, %v7368_v45  ;;  %v3889_v48 = vcombine.high %v3887_v31, %v3887_v31  ;;  %v5201_v29 = vpack.c.bf16 %v3887_v31, %v3887_v31 }
 0x1e8   : > { %3520 = vst.msk [vmem:[#allocation2 + $0x88] sm:$0xff] %vm3502_vm1, %v3487_v6  ;;  %v5200_v54 = vpack.c.bf16 %v3888_v1, %v3888_v1  ;;  %v4465_v31 = vunpack.c.l.b16 %v5199_v30 }
 0x1e9   : > { %v5202_v41 = vpack.c.bf16 %v3889_v48, %v3889_v48  ;;  %v4467_v11 = vunpack.c.l.b16 %v5201_v29 }
 0x1ea   : > { %v4466_v39 = vunpack.c.l.b16 %v5200_v54  ;;  %v3332_v54 = vld [vmem:[#allocation2 + $0xb0] sm:$0xff] }
 0x1eb   : > { %v4468_v18 = vunpack.c.l.b16 %v5202_v41  ;;  %v4532_v1 = vrot.slane %v4467_v11, 6  ;;  %v3330_v41 = vld [vmem:[#allocation2 + $0xa0] sm:$0xff] }
 0x1ec   : > { %v4529_v47 = vrot.slane %v4466_v39, 7 }
 0x219   : > { %v5291_v49 = vpop.f32.mrb[4].mxu0 }
 0x21a   : > { %v3208_v36 = vadd.f32 %v5291_v49, %v7264_v4  ;;  %v3199_v60 = vpop.f32.mrb[5].mxu0 }
 0x21b   : > { %v3200_v50 = vadd.f32 %v7264_v4, %v3199_v60  ;;  %v5292_v28 = vpop.f32.mrb[6].mxu0 }
 0x21c   : > { %v3348_v32 = vsub.f32 %v3208_v36, %v3316_v20  ;;  %v3211_v43 = vadd.f32 %v5292_v28, %v7264_v4  ;;  %v3202_v26 = vpop.f32.mrb[7].mxu0 }
 0x21d   : > { %v3346_v52 = vsub.f32 %v3200_v50, %v3314_v37  ;;  %v3203_v35 = vadd.f32 %v7264_v4, %v3202_v26 }
 0x21e   : > { %v3380_v21 = vmul.f32 0.5, %v3348_v32  ;;  %v3349_v9 = vsub.f32 %v3211_v43, %v3317_v17  ;;  %v4535_v32 = vrot.slane %v4468_v18, 5 }
 0x21f   : > { %v3378_v19 = vmul.f32 0.5, %v3346_v52  ;;  %v3347_v53 = vsub.f32 %v3203_v35, %v3315_v61 }
 0x220   : > { %v3412_v44 = vadd.f32 %v3380_v21, %v3316_v20  ;;  %v3381_v5 = vmul.f32 0.5, %v3349_v9 }
 0x221   : > { %v3410_v2 = vadd.f32 %v3378_v19, %v3314_v37  ;;  %v3379_v38 = vmul.f32 0.5, %v3347_v53  ;;  %v4531_v37 = vsel %vm4530_vm12, %v4529_v47, %v4465_v31 }
 0x222   : > { %vm3444_vm13 = vcmp.ge.f32.partialorder %v3412_v44, 1.0  ;;  %v3413_v58 = vadd.f32 %v3381_v5, %v3317_v17  ;;  %v4534_v26 = vsel %vm4533_vm3, %v4532_v1, %v4531_v37 }
 0x223   : > { %v3476_v27 = vsel %vm3444_vm13, 0.0, %v3412_v44  ;;  %v7390_v59 = vsel %vm3444_vm13, 1.0, %v5501_v14  ;;  %vm3442_vm14 = vcmp.ge.f32.partialorder %v3410_v2, 1.0  ;;  %v3411_v16 = vadd.f32 %v3379_v38, %v3315_v61 }
 0x224   : > { %3509 = vst.msk [vmem:[#allocation2 + $0x30] sm:$0xff] %vm3502_vm1, %v3476_v27  ;;  %v3474_v24 = vsel %vm3442_vm14, 0.0, %v3410_v2  ;;  %v7394_v57 = vsel %vm3442_vm14, 1.0, %v5501_v14  ;;  %vm3445_vm15 = vcmp.ge.f32.partialorder %v3413_v58, 1.0  ;;  %vm4542_vm13 = vcmask 1045509  }
 0x225   : > { %3507 = vst.msk [vmem:[#allocation2 + $0x20] sm:$0xff] %vm3502_vm1, %v3474_v24  ;;  %v3603_v40 = vmax.f32 %v7288_v34, %v7394_v57  ;;  %v3605_v42 = vmax.f32 %v7394_v57, %v7390_v59  ;;  %v3632_v8 = vmax.f32 %v3601_v0, %v7394_v57  ;;  %v3477_v6 = vsel %vm3445_vm15, 0.0, %v3413_v58 }
 0x226   : > { %3510 = vst.msk [vmem:[#allocation2 + $0x38] sm:$0xff] %vm3502_vm1, %v3477_v6  ;;  %v7407_v3 = vsel %vm3445_vm15, 1.0, %v5501_v14  ;;  %vm3443_vm2 = vcmp.ge.f32.partialorder %v3411_v16, 1.0  ;;  %v4537_v18 = vsel %vm7963_vm4, %v4535_v32, %v4534_v26  ;;  %vm7964_vm14 = vcmask 1046534  }
 0x227   : > { %v3634_v63 = vmax.f32 %v3603_v40, %v7390_v59  ;;  %v3772_v46 = vrot.slane %v3632_v8, 1  ;;  %v3475_v49 = vsel %vm3443_vm2, 0.0, %v3411_v16  ;;  %v7411_v20 = vsel %vm3443_vm2, 1.0, %v5501_v14 }
 0x228   : > { %3508 = vst.msk [vmem:[#allocation2 + $0x28] sm:$0xff] %vm3502_vm1, %v3475_v49  ;;  %v3604_v34 = vmax.f32 %v7307_v22, %v7411_v20  ;;  %v3606_v23 = vmax.f32 %v7411_v20, %v7407_v3  ;;  %v3633_v0 = vmax.f32 %v3602_v62, %v7411_v20  ;;  %vm4548_vm15 = vcmask 1047559  }
 0x229   : > { %v3696_v36 = vrot.slane %v3634_v63, 7  ;;  %v3773_v60 = vsel %vm3768_vm7, %v3770_v56, %v3772_v46  ;;  %v3774_v43 = vrot.slane %v3634_v63, 1  ;;  %v3333_v46 = vld [vmem:[#allocation2 + $0xb8] sm:$0xff]  ;;  %vm4664_vm2 = vcmask 257024  }
 0x22a   : > { %v3842_v50 = vmax.f32 %v3826_v12, %v3773_v60  ;;  %v7430_v28 = vmax.f32 %v3604_v34, %v7407_v3  ;;  %v3695_v17 = vrot.slane %v3633_v0, 7 }
 0x22c   : > { %v3890_v22 = vcombine.high %v3842_v50, %v3842_v50  ;;  %v3897_v13 = vrot.slane %v3842_v50, %v7381_v15  ;;  %v3697_v62 = vsel %vm3145_vm0, %v3695_v17, %v3696_v36  ;;  %v3698_v56 = vrot.slane %v7430_v28, 7 }
 0x22d   : > { %v3754_v10 = vsel %vm3750_vm6, 0.0, %v3697_v62  ;;  %v3775_v33 = vrot.slane %v7430_v28, 1  ;;  %v5307_v12 = vpop.f32.mrb[4].mxu1  ;;  %v7466_v62 = vsel %vm3454_vm9, 1.0, %v5501_v14 }
 0x22e   : > { %v3904_v61 = vrot.slane %v3890_v22, %v7381_v15  ;;  %v3905_v52 = vcombine.high %v3897_v13, %v3897_v13  ;;  %v5203_v35 = vpack.c.bf16 %v3897_v13, %v3897_v13  ;;  %v7441_v48 = vsel %vm3145_vm0, %v3696_v36, %v3698_v56  ;;  %v3263_v21 = vpop.f32.mrb[5].mxu1 }
 0x22f   : > { %v3776_v9 = vsel %vm3768_vm7, %v3774_v43, %v3775_v33  ;;  %v3827_v19 = vmax.f32 %v3754_v10, %v3634_v63  ;;  %v3828_v53 = vmax.f32 %v7441_v48, %v7430_v28  ;;  %v3272_v29 = vadd.f32 %v5307_v12, %v7264_v4  ;;  %v5308_v44 = vpop.f32.mrb[6].mxu1 }
 0x230   : > { %v3906_v5 = vcombine.high %v3904_v61, %v3904_v61  ;;  %v5204_v30 = vpack.c.bf16 %v3905_v52, %v3905_v52  ;;  %v5205_v2 = vpack.c.bf16 %v3904_v61, %v3904_v61  ;;  %v4469_v38 = vunpack.c.l.b16 %v5203_v35  ;;  %v3266_v39 = vpop.f32.mrb[7].mxu1 }
 0x231   : > { %v7449_v58 = vmax.f32 %v3827_v19, %v3776_v9  ;;  %v3364_v27 = vsub.f32 %v3272_v29, %v3332_v54  ;;  %v3264_v16 = vadd.f32 %v7264_v4, %v3263_v21  ;;  %v3275_v11 = vadd.f32 %v5308_v44, %v7264_v4 }
 0x232   : > { %v5206_v24 = vpack.c.bf16 %v3906_v5, %v3906_v5  ;;  %v4470_v40 = vunpack.c.l.b16 %v5204_v30  ;;  %v4471_v8 = vunpack.c.l.b16 %v5205_v2  ;;  %v4538_v6 = vrot.slane %v4469_v38, 4 }
 0x233   : > { %v3396_v47 = vmul.f32 0.5, %v3364_v27  ;;  %v3362_v63 = vsub.f32 %v3264_v16, %v3330_v41  ;;  %v3365_v50 = vsub.f32 %v3275_v11, %v3333_v46  ;;  %v7461_v13 = vsel %vm3456_vm8, 1.0, %v5501_v14 }
 0x234   : > { %v4472_v49 = vunpack.c.l.b16 %v5206_v24  ;;  %v4540_v31 = vsel %vm4539_vm5, %v4538_v6, %v4537_v18  ;;  %v4541_v34 = vrot.slane %v4470_v40, 3  ;;  %v4544_v0 = vrot.slane %v4471_v8, 2 }
 0x235   : > { %v3428_v1 = vadd.f32 %v3396_v47, %v3332_v54  ;;  %v3394_v37 = vmul.f32 0.5, %v3362_v63  ;;  %v3397_v10 = vmul.f32 0.5, %v3365_v50  ;;  %v3617_v61 = vmax.f32 %v7466_v62, %v7461_v13 }
 0x236   : > { %v4543_v36 = vsel %vm4542_vm13, %v4541_v34, %v4540_v31  ;;  %v4547_v60 = vrot.slane %v4472_v49, 1  ;;  %v3267_v35 = vadd.f32 %v7264_v4, %v3266_v39  ;;  %v7493_v30 = vsel %vm3457_vm10, 1.0, %v5501_v14 }
 0x237   : > { %v4546_v17 = vsel %vm7964_vm14, %v4544_v0, %v4543_v36  ;;  %vm3460_vm4 = vcmp.ge.f32.partialorder %v3428_v1, 1.0  ;;  %v3426_v22 = vadd.f32 %v3394_v37, %v3330_v41  ;;  %v3429_v52 = vadd.f32 %v3397_v10, %v3333_v46 }
 0x238   : > { %v4549_v32 = vsel %vm4548_vm15, %v4547_v60, %v4546_v17  ;;  %v3492_v43 = vsel %vm3460_vm4, 0.0, %v3428_v1  ;;  %v7469_v26 = vsel %vm3460_vm4, 1.0, %v5501_v14  ;;  %v3363_v19 = vsub.f32 %v3267_v35, %v3331_v55  ;;  %v3320_v17 = vld [vmem:[#allocation2 + $0x50] sm:$0xff] }
 0x239   : > { %v4648_v56 = vpack.c.b16 %v4549_v32, %v4549_v32  ;;  %vm3458_vm14 = vcmp.ge.f32.partialorder %v3426_v22, 1.0  ;;  %3525 = vst.msk [vmem:[#allocation2 + $0xb0] sm:$0xff] %vm3502_vm1, %v3492_v43  ;;  %vm3461_vm8 = vcmp.ge.f32.partialorder %v3429_v52, 1.0  ;;  %v7498_v2 = vsel %vm3455_vm11, 1.0, %v5501_v14  ;;  %v3318_v43 = vld [vmem:[#allocation2 + $0x40] sm:$0xff] }
 0x23a   : > { %v3490_v12 = vsel %vm3458_vm14, 0.0, %v3426_v22  ;;  %v7478_v51 = vsel %vm3458_vm14, 1.0, %v5501_v14  ;;  %v3493_v44 = vsel %vm3461_vm8, 0.0, %v3429_v52  ;;  %v3395_v5 = vmul.f32 0.5, %v3363_v19  ;;  %v3319_v19 = vld [vmem:[#allocation2 + $0x48] sm:$0xff] }
 0x23b   : > { %4665 = vst.msk [vmem:[%s5556_s25] sm:$0xf] %vm4664_vm2, %v4648_v56  ;;  %v3619_v54 = vmax.f32 %v7461_v13, %v7478_v51  ;;  %v3621_v21 = vmax.f32 %v7478_v51, %v7469_v26  ;;  %v7486_v9 = vmax.f32 %v3617_v61, %v7478_v51  ;;  %v7501_v41 = vsel %vm3461_vm8, 1.0, %v5501_v14 }
 0x23c   : > { %3523 = vst.msk [vmem:[#allocation2 + $0xa0] sm:$0xff] %vm3502_vm1, %v3490_v12  ;;  %3526 = vst.msk [vmem:[#allocation2 + $0xb8] sm:$0xff] %vm3502_vm1, %v3493_v44  ;;  %v3427_v38 = vadd.f32 %v3395_v5, %v3331_v55  ;;  %v3618_v39 = vmax.f32 %v7498_v2, %v7493_v30  ;;  %v3914_v0 = vrot.slane %v7449_v58, %v7381_v15  ;;  %v3321_v12 = vld [vmem:[#allocation2 + $0x58] sm:$0xff]  ;;  %vm7969_vm8 = vcmask 1043459  }
 0x23d   : > { %v3650_v29 = vmax.f32 %v3619_v54, %v7469_v26  ;;  %v3907_v60 = vcombine.high %v7449_v58, %v7449_v58 }
 0x23e   : > { %vm3459_vm9 = vcmp.ge.f32.partialorder %v3427_v38, 1.0  ;;  %v3922_v37 = vcombine.high %v3914_v0, %v3914_v0 }
 0x23f   : > { %v3491_v27 = vsel %vm3459_vm9, 0.0, %v3427_v38  ;;  %v7506_v16 = vsel %vm3459_vm9, 1.0, %v5501_v14  ;;  %v3716_v7 = vrot.slane %v3650_v29, 7  ;;  %v3794_v6 = vrot.slane %v3650_v29, 1 }
 0x240   : > { %3524 = vst.msk [vmem:[#allocation2 + $0xa8] sm:$0xff] %vm3502_vm1, %v3491_v27  ;;  %v3620_v45 = vmax.f32 %v7493_v30, %v7506_v16  ;;  %v3622_v11 = vmax.f32 %v7506_v16, %v7501_v41  ;;  %v3649_v24 = vmax.f32 %v3618_v39, %v7506_v16  ;;  %v3921_v56 = vrot.slane %v3907_v60, %v7381_v15 }
 0x241   : > { %v5208_v55 = vpack.c.bf16 %v3922_v37, %v3922_v37  ;;  %vm7970_vm9 = vcmask 1046534  }
 0x242   : > { %v7515_v40 = vmax.f32 %v3620_v45, %v7501_v41  ;;  %v3715_v8 = vrot.slane %v3649_v24, 7  ;;  %v3923_v38 = vcombine.high %v3921_v56, %v3921_v56  ;;  %v5209_v39 = vpack.c.bf16 %v3921_v56, %v3921_v56 }
 0x244   : > { %v3717_v18 = vsel %vm3145_vm0, %v3715_v8, %v3716_v7  ;;  %v3718_v47 = vrot.slane %v7515_v40, 7  ;;  %v3795_v63 = vrot.slane %v7515_v40, 1 }
 0x245   : > { %v3762_v46 = vsel %vm3750_vm6, 0.0, %v3717_v18  ;;  %v5207_v18 = vpack.c.bf16 %v3914_v0, %v3914_v0 }
 0x246   : > { %v7523_v49 = vsel %vm3145_vm0, %v3716_v7, %v3718_v47  ;;  %v3796_v31 = vsel %vm3768_vm7, %v3794_v6, %v3795_v63  ;;  %v3835_v34 = vmax.f32 %v3762_v46, %v3650_v29  ;;  %v4474_v7 = vunpack.c.l.b16 %v5208_v55 }
 0x247   : > { %v3836_v1 = vmax.f32 %v7523_v49, %v7515_v40  ;;  %v4473_v55 = vunpack.c.l.b16 %v5207_v18 }
 0x248   : > { %v7532_v36 = vmax.f32 %v3835_v34, %v3796_v31  ;;  %v5210_v31 = vpack.c.bf16 %v3923_v38, %v3923_v38 }
 0x252   : > { %v5295_v50 = vpop.f32.mrb[8].mxu0 }
 0x253   : > { %v3224_v32 = vadd.f32 %v5295_v50, %v7264_v4  ;;  %v3215_v22 = vpop.f32.mrb[9].mxu0  ;;  %v4475_v50 = vunpack.c.l.b16 %v5209_v39 }
 0x254   : > { %v5296_v10 = vpop.f32.mrb[10].mxu0  ;;  %v3216_v52 = vadd.f32 %v7264_v4, %v3215_v22 }
 0x255   : > { %v3352_v61 = vsub.f32 %v3224_v32, %v3320_v17  ;;  %v3227_v35 = vadd.f32 %v5296_v10, %v7264_v4  ;;  %v3218_v54 = vpop.f32.mrb[11].mxu0  ;;  %v4550_v32 = vrot.slane %v4474_v7, 7  ;;  %v4552_v57 = vrot.slane %v4475_v50, 6 }
 0x256   : > { %v3219_v58 = vadd.f32 %v7264_v4, %v3218_v54  ;;  %v3350_v44 = vsub.f32 %v3216_v52, %v3318_v43 }
 0x257   : > { %v3384_v29 = vmul.f32 0.5, %v3352_v61  ;;  %v3353_v5 = vsub.f32 %v3227_v35, %v3321_v12  ;;  %v4476_v61 = vunpack.c.l.b16 %v5210_v31 }
 0x258   : > { %v3351_v27 = vsub.f32 %v3219_v58, %v3319_v19  ;;  %v3382_v24 = vmul.f32 0.5, %v3350_v44 }
 0x259   : > { %v3416_v45 = vadd.f32 %v3384_v29, %v3320_v17  ;;  %v3385_v8 = vmul.f32 0.5, %v3353_v5  ;;  %v4551_v29 = vsel %vm4530_vm12, %v4550_v32, %v4473_v55  ;;  %v4554_v7 = vrot.slane %v4476_v61, 5 }
 0x25a   : > { %v3383_v6 = vmul.f32 0.5, %v3351_v27  ;;  %v3414_v47 = vadd.f32 %v3382_v24, %v3318_v43 }
 0x25b   : > { %vm3448_vm10 = vcmp.ge.f32.partialorder %v3416_v45, 1.0  ;;  %v3417_v46 = vadd.f32 %v3385_v8, %v3321_v12  ;;  %v4553_v8 = vsel %vm4533_vm3, %v4552_v57, %v4551_v29 }
 0x25c   : > { %v3480_v34 = vsel %vm3448_vm10, 0.0, %v3416_v45  ;;  %v7542_v60 = vsel %vm3448_vm10, 1.0, %v5501_v14  ;;  %v3415_v37 = vadd.f32 %v3383_v6, %v3319_v19  ;;  %vm3446_vm11 = vcmp.ge.f32.partialorder %v3414_v47, 1.0 }
 0x25d   : > { %3513 = vst.msk [vmem:[#allocation2 + $0x50] sm:$0xff] %vm3502_vm1, %v3480_v34  ;;  %vm3449_vm4 = vcmp.ge.f32.partialorder %v3417_v46, 1.0  ;;  %v3478_v17 = vsel %vm3446_vm11, 0.0, %v3414_v47  ;;  %v7546_v22 = vsel %vm3446_vm11, 1.0, %v5501_v14  ;;  %v3336_v34 = vld [vmem:[#allocation2 + $0xd0] sm:$0xff]  ;;  %v4555_v50 = vsel %vm7969_vm8, %v4554_v7, %v4553_v8 }
 0x25e   : > { %v3481_v0 = vsel %vm3449_vm4, 0.0, %v3417_v46  ;;  %v7549_v56 = vsel %vm3449_vm4, 1.0, %v5501_v14  ;;  %3511 = vst.msk [vmem:[#allocation2 + $0x40] sm:$0xff] %vm3502_vm1, %v3478_v17  ;;  %v3607_v43 = vmax.f32 %v7390_v59, %v7546_v22  ;;  %v3609_v10 = vmax.f32 %v7546_v22, %v7542_v60 }
 0x25f   : > { %v3636_v12 = vmax.f32 %v3605_v42, %v7546_v22  ;;  %3514 = vst.msk [vmem:[#allocation2 + $0x58] sm:$0xff] %vm3502_vm1, %v3481_v0  ;;  %vm3447_vm14 = vcmp.ge.f32.partialorder %v3415_v37, 1.0  ;;  %v4043_v7 = vcombine.high %v7532_v36, %v7532_v36 }
 0x260   : > { %v3479_v52 = vsel %vm3447_vm14, 0.0, %v3415_v37  ;;  %v7562_v35 = vsel %vm3447_vm14, 1.0, %v5501_v14  ;;  %v3638_v54 = vmax.f32 %v3607_v43, %v7542_v60  ;;  %v7600_v37 = vrot.slane %v7532_v36, %v7381_v15 }
 0x261   : > { %v3777_v19 = vrot.slane %v3636_v12, 1  ;;  %3512 = vst.msk [vmem:[#allocation2 + $0x48] sm:$0xff] %vm3502_vm1, %v3479_v52  ;;  %v3608_v58 = vmax.f32 %v7407_v3, %v7562_v35  ;;  %v3610_v59 = vmax.f32 %v7562_v35, %v7549_v56  ;;  %v3637_v42 = vmax.f32 %v3606_v23, %v7562_v35  ;;  %v3334_v52 = vld [vmem:[#allocation2 + $0xc0] sm:$0xff] }
 0x262   : > { %v3701_v44 = vrot.slane %v3638_v54, 7  ;;  %v3779_v45 = vrot.slane %v3638_v54, 1  ;;  %v4057_v36 = vrot.slane %v4043_v7, %v7381_v15 }
 0x263   : > { %v3778_v5 = vsel %vm3768_vm7, %v3775_v33, %v3777_v19  ;;  %v7579_v38 = vmax.f32 %v3608_v58, %v7549_v56  ;;  %v3700_v27 = vrot.slane %v3637_v42, 7 }
 0x264   : > { %v3844_v39 = vmax.f32 %v3828_v53, %v3778_v5 }
 0x265   : > { %v3703_v3 = vrot.slane %v7579_v38, 7  ;;  %v3780_v20 = vrot.slane %v7579_v38, 1  ;;  %v3702_v33 = vsel %vm3145_vm0, %v3700_v27, %v3701_v44 }
 0x266   : > { %v3924_v23 = vcombine.high %v3844_v39, %v3844_v39  ;;  %v3931_v24 = vrot.slane %v3844_v39, %v7381_v15  ;;  %v3756_v28 = vsel %vm3750_vm6, 0.0, %v3702_v33 }
 0x267   : > { %v7590_v6 = vsel %vm3145_vm0, %v3701_v44, %v3703_v3  ;;  %v3781_v48 = vsel %vm3768_vm7, %v3779_v45, %v3780_v20  ;;  %v3829_v46 = vmax.f32 %v3756_v28, %v3638_v54  ;;  %v4058_v45 = vcombine.high %v7600_v37, %v7600_v37 }
 0x268   : > { %v3938_v53 = vrot.slane %v3924_v23, %v7381_v15  ;;  %v3939_v18 = vcombine.high %v3931_v24, %v3931_v24  ;;  %v5211_v47 = vpack.c.bf16 %v3931_v24, %v3931_v24  ;;  %v5311_v31 = vpop.f32.mrb[8].mxu1  ;;  %v3830_v32 = vmax.f32 %v7590_v6, %v7579_v38  ;;  %v3337_v24 = vld [vmem:[#allocation2 + $0xd8] sm:$0xff] }
 0x269   : > { %v3288_v17 = vadd.f32 %v5311_v31, %v7264_v4  ;;  %v3279_v0 = vpop.f32.mrb[9].mxu1  ;;  %v7606_v19 = vmax.f32 %v3829_v46, %v3781_v48 }
 0x26a   : > { %v3940_v43 = vcombine.high %v3938_v53, %v3938_v53  ;;  %v5212_v12 = vpack.c.bf16 %v3939_v18, %v3939_v18  ;;  %v5213_v55 = vpack.c.bf16 %v3938_v53, %v3938_v53  ;;  %v4477_v61 = vunpack.c.l.b16 %v5211_v47  ;;  %v5312_v54 = vpop.f32.mrb[10].mxu1 }
 0x26b   : > { %v3368_v58 = vsub.f32 %v3288_v17, %v3336_v34  ;;  %v3280_v57 = vadd.f32 %v7264_v4, %v3279_v0  ;;  %v3291_v42 = vadd.f32 %v5312_v54, %v7264_v4  ;;  %v3282_v29 = vpop.f32.mrb[11].mxu1  ;;  %v5240_v0 = vpack.c.bf16 %v4058_v45, %v4058_v45 }
 0x26c   : > { %v5214_v44 = vpack.c.bf16 %v3940_v43, %v3940_v43  ;;  %v4478_v5 = vunpack.c.l.b16 %v5212_v12  ;;  %v4479_v39 = vunpack.c.l.b16 %v5213_v55  ;;  %v4556_v27 = vrot.slane %v4477_v61, 4 }
 0x26d   : > { %v3400_v3 = vmul.f32 0.5, %v3368_v58  ;;  %v3366_v23 = vsub.f32 %v3280_v57, %v3334_v52  ;;  %v3369_v31 = vsub.f32 %v3291_v42, %v3337_v24  ;;  %v4059_v54 = vcombine.high %v4057_v36, %v4057_v36  ;;  %v3335_v42 = vld [vmem:[#allocation2 + $0xc8] sm:$0xff] }
 0x26e   : > { %v4480_v8 = vunpack.c.l.b16 %v5214_v44  ;;  %v4557_v33 = vsel %vm4539_vm5, %v4556_v27, %v4555_v50  ;;  %v4558_v28 = vrot.slane %v4478_v5, 3  ;;  %v4560_v48 = vrot.slane %v4479_v39, 2 }
 0x26f   : > { %v3432_v53 = vadd.f32 %v3400_v3, %v3336_v34  ;;  %v3398_v46 = vmul.f32 0.5, %v3366_v23  ;;  %v3401_v34 = vmul.f32 0.5, %v3369_v31  ;;  %v5241_v58 = vpack.c.bf16 %v4057_v36, %v4057_v36 }
 0x270   : > { %v4559_v18 = vsel %vm4542_vm13, %v4558_v28, %v4557_v33  ;;  %v4562_v47 = vrot.slane %v4480_v8, 1  ;;  %v4506_v44 = vunpack.c.l.b16 %v5240_v0  ;;  %v3283_v39 = vadd.f32 %v7264_v4, %v3282_v29 }
 0x271   : > { %v4561_v17 = vsel %vm7970_vm9, %v4560_v48, %v4559_v18  ;;  %vm3464_vm10 = vcmp.ge.f32.partialorder %v3432_v53, 1.0  ;;  %v3430_v12 = vadd.f32 %v3398_v46, %v3334_v52  ;;  %v3433_v5 = vadd.f32 %v3401_v34, %v3337_v24 }
 0x272   : > { %v4563_v43 = vsel %vm4548_vm15, %v4562_v47, %v4561_v17  ;;  %v3496_v50 = vsel %vm3464_vm10, 0.0, %v3432_v53  ;;  %v7620_v61 = vsel %vm3464_vm10, 1.0, %v5501_v14  ;;  %v5239_v45 = vpack.c.bf16 %v7600_v37, %v7600_v37  ;;  %vm7971_vm10 = vmmov %vm7969_vm8 }
 0x273   : > { %v4649_v55 = vpack.c.b16 %v4563_v43, %v4563_v43  ;;  %vm3462_vm11 = vcmp.ge.f32.partialorder %v3430_v12, 1.0  ;;  %3529 = vst.msk [vmem:[#allocation2 + $0xd0] sm:$0xff] %vm3502_vm1, %v3496_v50  ;;  %vm3465_vm4 = vcmp.ge.f32.partialorder %v3433_v5, 1.0  ;;  %v3367_v23 = vsub.f32 %v3283_v39, %v3335_v42 }
 0x274   : > { %v3494_v57 = vsel %vm3462_vm11, 0.0, %v3430_v12  ;;  %v7627_v52 = vsel %vm3462_vm11, 1.0, %v5501_v14  ;;  %v5242_v8 = vpack.c.bf16 %v4059_v54, %v4059_v54  ;;  %v3497_v4 = vsel %vm3465_vm4, 0.0, %v3433_v5 }
 0x275   : > { %4666 = vst.msk [vmem:[%s5556_s25 + $0x4] sm:$0xf] %vm4664_vm2, %v4649_v55  ;;  %v3623_v27 = vmax.f32 %v7469_v26, %v7627_v52  ;;  %v3625_v7 = vmax.f32 %v7627_v52, %v7620_v61  ;;  %v3652_v3 = vmax.f32 %v3621_v21, %v7627_v52  ;;  %v4507_v29 = vunpack.c.l.b16 %v5241_v58 }
 0x276   : > { %3527 = vst.msk [vmem:[#allocation2 + $0xc0] sm:$0xff] %vm3502_vm1, %v3494_v57  ;;  %v4606_v33 = vrot.slane %v4506_v44, 7  ;;  %3530 = vst.msk [vmem:[#allocation2 + $0xd8] sm:$0xff] %vm3502_vm1, %v3497_v4  ;;  %v3399_v48 = vmul.f32 0.5, %v3367_v23  ;;  %v4505_v53 = vunpack.c.l.b16 %v5239_v45  ;;  %v7649_v51 = vsel %vm3465_vm4, 1.0, %v5501_v14 }
 0x277   : > { %v3654_v24 = vmax.f32 %v3623_v27, %v7620_v61  ;;  %v3797_v28 = vrot.slane %v3652_v3, 1  ;;  %v4508_v21 = vunpack.c.l.b16 %v5242_v8  ;;  %v4608_v46 = vrot.slane %v4507_v29, 6 }
 0x278   : > { %v3431_v18 = vadd.f32 %v3399_v48, %v3335_v42  ;;  %v4607_v47 = vsel %vm4530_vm12, %v4606_v33, %v4505_v53 }
 0x279   : > { %v3798_v37 = vsel %vm3768_vm7, %v3795_v63, %v3797_v28  ;;  %v3721_v63 = vrot.slane %v3654_v24, 7  ;;  %v4610_v50 = vrot.slane %v4508_v21, 5  ;;  %v4609_v34 = vsel %vm4533_vm3, %v4608_v46, %v4607_v47 }
 0x27a   : > { %v3852_v26 = vmax.f32 %v3836_v1, %v3798_v37  ;;  %vm3463_vm14 = vcmp.ge.f32.partialorder %v3431_v18, 1.0  ;;  %v3799_v39 = vrot.slane %v3654_v24, 1 }
 0x27b   : > { %v3495_v17 = vsel %vm3463_vm14, 0.0, %v3431_v18  ;;  %v7654_v0 = vsel %vm3463_vm14, 1.0, %v5501_v14  ;;  %v4611_v8 = vsel %vm7969_vm8, %v4610_v50, %v4609_v34 }
 0x27c   : > { %v4060_v31 = vcombine.high %v3852_v26, %v3852_v26  ;;  %v4067_v36 = vrot.slane %v3852_v26, %v7381_v15  ;;  %3528 = vst.msk [vmem:[#allocation2 + $0xc8] sm:$0xff] %vm3502_vm1, %v3495_v17  ;;  %v3624_v40 = vmax.f32 %v7501_v41, %v7654_v0  ;;  %v3626_v49 = vmax.f32 %v7654_v0, %v7649_v51 }
 0x27d   : > { %v3653_v1 = vmax.f32 %v3622_v11, %v7654_v0 }
 0x27e   : > { %v4074_v43 = vrot.slane %v4060_v31, %v7381_v15  ;;  %v4075_v12 = vcombine.high %v4067_v36, %v4067_v36  ;;  %v5243_v55 = vpack.c.bf16 %v4067_v36, %v4067_v36  ;;  %v7668_v54 = vmax.f32 %v3624_v40, %v7649_v51 }
 0x27f   : > { %v3720_v58 = vrot.slane %v3653_v1, 7 }
 0x280   : > { %v4076_v57 = vcombine.high %v4074_v43, %v4074_v43  ;;  %v5244_v42 = vpack.c.bf16 %v4075_v12, %v4075_v12  ;;  %v5245_v44 = vpack.c.bf16 %v4074_v43, %v4074_v43  ;;  %v4509_v5 = vunpack.c.l.b16 %v5243_v55 }
 0x281   : > { %v3722_v27 = vsel %vm3145_vm0, %v3720_v58, %v3721_v63  ;;  %v3723_v41 = vrot.slane %v7668_v54, 7  ;;  %v3800_v16 = vrot.slane %v7668_v54, 1 }
 0x282   : > { %v5246_v11 = vpack.c.bf16 %v4076_v57, %v4076_v57  ;;  %v4510_v45 = vunpack.c.l.b16 %v5244_v42  ;;  %v4511_v3 = vunpack.c.l.b16 %v5245_v44  ;;  %v4612_v23 = vrot.slane %v4509_v5, 4 }
 0x283   : > { %v7675_v4 = vsel %vm3145_vm0, %v3721_v63, %v3723_v41  ;;  %v3764_v29 = vsel %vm3750_vm6, 0.0, %v3722_v27  ;;  %v3801_v33 = vsel %vm3768_vm7, %v3799_v39, %v3800_v16  ;;  %v3948_v63 = vrot.slane %v7606_v19, %v7381_v15 }
 0x284   : > { %v4512_v28 = vunpack.c.l.b16 %v5246_v11  ;;  %v4613_v48 = vsel %vm4539_vm5, %v4612_v23, %v4611_v8  ;;  %v4614_v53 = vrot.slane %v4510_v45, 3  ;;  %v4616_v37 = vrot.slane %v4511_v3, 2  ;;  %v3324_v23 = vld [vmem:[#allocation2 + $0x70] sm:$0xff]  ;;  %v7705_v8 = vld [vmem:[%s7961_s2] ss:$0 sm:$0xff] }
 0x285   : > { %v3837_v18 = vmax.f32 %v3764_v29, %v3654_v24  ;;  %v3838_v26 = vmax.f32 %v7675_v4, %v7668_v54  ;;  %v3941_v24 = vcombine.high %v7606_v19, %v7606_v19  ;;  %v3956_v40 = vcombine.high %v3948_v63, %v3948_v63 }
 0x286   : > { %v4615_v21 = vsel %vm4542_vm13, %v4614_v53, %v4613_v48  ;;  %v4618_v47 = vrot.slane %v4512_v28, 1  ;;  %v5215_v34 = vpack.c.bf16 %v3948_v63, %v3948_v63  ;;  %v3322_v28 = vld [vmem:[#allocation2 + $0x60] sm:$0xff] }
 0x287   : > { %v4617_v46 = vsel %vm7970_vm9, %v4616_v37, %v4615_v21  ;;  %v3853_v31 = vmax.f32 %v3837_v18, %v3801_v33  ;;  %v3955_v1 = vrot.slane %v3941_v24, %v7381_v15  ;;  %v5216_v43 = vpack.c.bf16 %v3956_v40, %v3956_v40  ;;  %v3325_v18 = vld [vmem:[#allocation2 + $0x78] sm:$0xff] }
 0x288   : > { %v4619_v36 = vsel %vm4548_vm15, %v4618_v47, %v4617_v46  ;;  %v4481_v39 = vunpack.c.l.b16 %v5215_v34 }
 0x289   : > { %v4653_v17 = vpack.c.b16 %v4619_v36, %v4619_v36  ;;  %v3957_v12 = vcombine.high %v3955_v1, %v3955_v1  ;;  %v5217_v55 = vpack.c.bf16 %v3955_v1, %v3955_v1  ;;  %v4482_v50 = vunpack.c.l.b16 %v5216_v43 }
 0x28a   : > { %v4077_v42 = vcombine.high %v3853_v31, %v3853_v31  ;;  %v7696_v5 = vrot.slane %v3853_v31, %v7381_v15  ;;  %v3792_v43 = vrot.slane %v7486_v9, 1 }
 0x28b   : > { %4670 = vst.msk [vmem:[%s5556_s25 + $0x14] sm:$0xf] %vm4664_vm2, %v4653_v17  ;;  %v5218_v58 = vpack.c.bf16 %v3957_v12, %v3957_v12  ;;  %v4483_v57 = vunpack.c.l.b16 %v5217_v55  ;;  %v4564_v44 = vrot.slane %v4482_v50, 7  ;;  %v3323_v17 = vld [vmem:[#allocation2 + $0x68] sm:$0xff] }
 0x28c   : > { %v4091_v19 = vrot.slane %v4077_v42, %v7381_v15  ;;  %v4092_v45 = vcombine.high %v7696_v5, %v7696_v5 }
 0x28d   : > { %v4484_v27 = vunpack.c.l.b16 %v5218_v58  ;;  %v4566_v41 = vrot.slane %v4483_v57, 6  ;;  %v4565_v11 = vsel %vm4530_vm12, %v4564_v44, %v4481_v39  ;;  %v3340_v44 = vld [vmem:[#allocation2 + $0xf0] sm:$0xff] }
 0x28e   : > { %v7709_v21 = vcombine.high %v4091_v19, %v4091_v19  ;;  %v5248_v63 = vpack.c.bf16 %v4092_v45, %v4092_v45  ;;  %v5249_v24 = vpack.c.bf16 %v4091_v19, %v4091_v19 }
 0x28f   : > { %v4568_v48 = vrot.slane %v4484_v27, 5  ;;  %v4567_v46 = vsel %vm4533_vm3, %v4566_v41, %v4565_v11  ;;  %v5247_v27 = vpack.c.bf16 %v7696_v5, %v7696_v5 }
 0x290   : > { %v5250_v41 = vpack.c.bf16 %v7709_v21, %v7709_v21 }
 0x291   : > { %v7716_v58 = vsel %vm7971_vm10, %v4568_v48, %v4567_v46  ;;  %vm7972_vm10 = vcmask 1046534  }
 0x2ac   : > { %v5299_v3 = vpop.f32.mrb[12].mxu0 }
 0x2ad   : > { %v3240_v29 = vadd.f32 %v7705_v8, %v5299_v3  ;;  %v3231_v33 = vpop.f32.mrb[13].mxu0  ;;  %v7723_v3 = vunpack.c.l.b16 %v5248_v63 }
 0x2ae   : > { %v3232_v53 = vadd.f32 %v7705_v8, %v3231_v33  ;;  %v5300_v37 = vpop.f32.mrb[14].mxu0 }
 0x2af   : > { %v3356_v47 = vsub.f32 %v3240_v29, %v3324_v23  ;;  %v3243_v31 = vadd.f32 %v7705_v8, %v5300_v37  ;;  %v3234_v36 = vpop.f32.mrb[15].mxu0  ;;  %v7725_v29 = vunpack.c.l.b16 %v5249_v24 }
 0x2b0   : > { %v3354_v40 = vsub.f32 %v3232_v53, %v3322_v28  ;;  %v3235_v1 = vadd.f32 %v7705_v8, %v3234_v36 }
 0x2b1   : > { %v3388_v12 = vmul.f32 0.5, %v3356_v47  ;;  %v3357_v55 = vsub.f32 %v3243_v31, %v3325_v18  ;;  %v5315_v50 = vpop.f32.mrb[12].mxu1 }
 0x2b2   : > { %v3386_v34 = vmul.f32 0.5, %v3354_v40  ;;  %v3355_v57 = vsub.f32 %v3235_v1, %v3323_v17  ;;  %v3304_v42 = vadd.f32 %v7705_v8, %v5315_v50  ;;  %v3295_v39 = vpop.f32.mrb[13].mxu1 }
 0x2b3   : > { %v3420_v19 = vadd.f32 %v3388_v12, %v3324_v23  ;;  %v3389_v11 = vmul.f32 0.5, %v3357_v55  ;;  %v5316_v45 = vpop.f32.mrb[14].mxu1  ;;  %v3296_v46 = vadd.f32 %v7705_v8, %v3295_v39  ;;  %v7739_v55 = vld [vmem:[#allocation2 + $0xe0] sm:$0xff] }
 0x2b4   : > { %v3418_v33 = vadd.f32 %v3386_v34, %v3322_v28  ;;  %v3387_v48 = vmul.f32 0.5, %v3355_v57  ;;  %v7727_v53 = vpop.f32.mrb[15].mxu1  ;;  %v3372_v47 = vsub.f32 %v3304_v42, %v3340_v44 }
 0x2b5   : > { %vm3452_vm11 = vcmp.ge.f32.partialorder %v3420_v19, 1.0  ;;  %v3421_v37 = vadd.f32 %v3389_v11, %v3325_v18 }
 0x2b6   : > { %v3484_v31 = vsel %vm3452_vm11, 0.0, %v3420_v19  ;;  %v5114_v36 = vsel %vm3452_vm11, 1.0, %v5501_v14  ;;  %vm3450_vm4 = vcmp.ge.f32.partialorder %v3418_v33, 1.0  ;;  %v3419_v23 = vadd.f32 %v3387_v48, %v3323_v17 }
 0x2b7   : > { %3517 = vst.msk [vmem:[#allocation2 + $0x70] sm:$0xff] %vm3502_vm1, %v3484_v31  ;;  %v3615_v63 = vmax.f32 %v5114_v36, %v7466_v62  ;;  %v3482_v24 = vsel %vm3450_vm4, 0.0, %v3418_v33  ;;  %v5112_v28 = vsel %vm3450_vm4, 1.0, %v5501_v14  ;;  %vm3453_vm14 = vcmp.ge.f32.partialorder %v3421_v37, 1.0 }
 0x2b8   : > { %3515 = vst.msk [vmem:[#allocation2 + $0x60] sm:$0xff] %vm3502_vm1, %v3482_v24  ;;  %v3611_v18 = vmax.f32 %v7542_v60, %v5112_v28  ;;  %v3613_v40 = vmax.f32 %v5112_v28, %v5114_v36  ;;  %v3640_v1 = vmax.f32 %v3609_v10, %v5112_v28  ;;  %v3485_v12 = vsel %vm3453_vm14, 0.0, %v3421_v37 }
 0x2b9   : > { %v7742_v17 = vmax.f32 %v3615_v63, %v7461_v13  ;;  %3518 = vst.msk [vmem:[#allocation2 + $0x78] sm:$0xff] %vm3502_vm1, %v3485_v12  ;;  %v5115_v50 = vsel %vm3453_vm14, 1.0, %v5501_v14  ;;  %vm3451_vm8 = vcmp.ge.f32.partialorder %v3419_v23, 1.0  ;;  %v3404_v34 = vmul.f32 0.5, %v3372_v47 }
 0x2ba   : > { %v7746_v57 = vmax.f32 %v3611_v18, %v5114_v36  ;;  %v7749_v42 = vmax.f32 %v3613_v40, %v7466_v62  ;;  %v3782_v39 = vrot.slane %v3640_v1, 1  ;;  %v3616_v60 = vmax.f32 %v5115_v50, %v7498_v2 }
 0x2bb   : > { %v3483_v22 = vsel %vm3451_vm8, 0.0, %v3419_v23  ;;  %v5113_v10 = vsel %vm3451_vm8, 1.0, %v5501_v14  ;;  %v3370_v13 = vsub.f32 %v3296_v46, %v7739_v55  ;;  %v7755_v19 = vadd.f32 %v7705_v8, %v5316_v45  ;;  %vm7975_vm8 = vmmov %vm7972_vm10 }
 0x2bc   : > { %v3711_v11 = vrot.slane %v7742_v17, 7  ;;  %v3789_v33 = vrot.slane %v7742_v17, 1  ;;  %v3706_v48 = vrot.slane %v7746_v57, 7  ;;  %v3783_v62 = vsel %vm3768_vm7, %v3780_v20, %v3782_v39  ;;  %3516 = vst.msk [vmem:[#allocation2 + $0x68] sm:$0xff] %vm3502_vm1, %v3483_v22 }
 0x2bd   : > { %v3846_v37 = vmax.f32 %v3830_v32, %v3783_v62  ;;  %v3647_v47 = vmax.f32 %v3616_v60, %v7493_v30  ;;  %v3612_v45 = vmax.f32 %v7549_v56, %v5113_v10  ;;  %v3614_v46 = vmax.f32 %v5113_v10, %v5115_v50 }
 0x2be   : > { %v3784_v31 = vrot.slane %v7746_v57, 1  ;;  %v3787_v36 = vrot.slane %v7749_v42, 1  ;;  %v3641_v23 = vmax.f32 %v3610_v59, %v5113_v10  ;;  %v7774_v20 = vadd.f32 %v3404_v34, %v3340_v44 }
 0x2bf   : > { %v3958_v63 = vcombine.high %v3846_v37, %v3846_v37  ;;  %v3965_v24 = vrot.slane %v3846_v37, %v7381_v15  ;;  %v3713_v38 = vrot.slane %v3647_v47, 7  ;;  %v3790_v6 = vrot.slane %v3647_v47, 1 }
 0x2c0   : > { %v7777_v32 = vmax.f32 %v3612_v45, %v5115_v50  ;;  %v3645_v30 = vmax.f32 %v3614_v46, %v7498_v2  ;;  %v3705_v28 = vrot.slane %v3641_v23, 7  ;;  %v7780_v18 = vmul.f32 0.5, %v3370_v13 }
 0x2c1   : > { %v3972_v40 = vrot.slane %v3958_v63, %v7381_v15  ;;  %v3973_v1 = vcombine.high %v3965_v24, %v3965_v24  ;;  %v5219_v12 = vpack.c.bf16 %v3965_v24, %v3965_v24  ;;  %v3714_v56 = vsel %vm3145_vm0, %v3711_v11, %v3713_v38 }
 0x2c2   : > { %v3791_v35 = vsel %vm3768_vm7, %v3789_v33, %v3790_v6  ;;  %v3793_v59 = vsel %vm3768_vm7, %v3790_v6, %v3792_v43  ;;  %v3834_v44 = vmax.f32 %v3714_v56, %v3647_v47  ;;  %v3707_v50 = vsel %vm3145_vm0, %v3705_v28, %v3706_v48 }
 0x2c3   : > { %v3974_v34 = vcombine.high %v3972_v40, %v3972_v40  ;;  %v5220_v2 = vpack.c.bf16 %v3973_v1, %v3973_v1  ;;  %v5221_v42 = vpack.c.bf16 %v3972_v40, %v3972_v40  ;;  %v4485_v39 = vunpack.c.l.b16 %v5219_v12 }
 0x2c4   : > { %vm3468_vm9 = vcmp.ge.f32.partialorder %v7774_v20, 1.0  ;;  %v3850_v60 = vmax.f32 %v3834_v44, %v3793_v59  ;;  %v3708_v22 = vrot.slane %v7777_v32, 7  ;;  %v3710_v10 = vrot.slane %v3645_v30, 7 }
 0x2c5   : > { %v3758_v13 = vsel %vm3750_vm6, 0.0, %v3707_v50  ;;  %v5222_v33 = vpack.c.bf16 %v3974_v34, %v3974_v34  ;;  %v4486_v9 = vunpack.c.l.b16 %v5220_v2  ;;  %v4487_v62 = vunpack.c.l.b16 %v5221_v42 }
 0x2c6   : > { %v4570_v43 = vrot.slane %v4485_v39, 4  ;;  %v4026_v37 = vcombine.high %v3850_v60, %v3850_v60  ;;  %v4033_v47 = vrot.slane %v3850_v60, %v7381_v15  ;;  %v3709_v45 = vsel %vm3145_vm0, %v3706_v48, %v3708_v22  ;;  %v7810_v39 = vld [vmem:[#allocation2 + $0xf8] sm:$0xff] }
 0x2c7   : > { %v3712_v46 = vsel %vm3145_vm0, %v3710_v10, %v3711_v11  ;;  %v4488_v23 = vunpack.c.l.b16 %v5222_v33  ;;  %v4572_v24 = vrot.slane %v4486_v9, 3  ;;  %v4574_v38 = vrot.slane %v4487_v62, 2 }
 0x2c8   : > { %v4571_v63 = vsel %vm4539_vm5, %v4570_v43, %v7716_v58  ;;  %v4040_v6 = vrot.slane %v4026_v37, %v7381_v15  ;;  %v4041_v30 = vcombine.high %v4033_v47, %v4033_v47  ;;  %v5235_v28 = vpack.c.bf16 %v4033_v47, %v4033_v47 }
 0x2c9   : > { %v3760_v40 = vsel %vm3750_vm6, 0.0, %v3712_v46  ;;  %v4573_v1 = vsel %vm4542_vm13, %v4572_v24, %v4571_v63  ;;  %v4576_v12 = vrot.slane %v4488_v23, 1  ;;  %v3785_v48 = vrot.slane %v7777_v32, 1 }
 0x2ca   : > { %v3831_v11 = vmax.f32 %v3758_v13, %v7746_v57  ;;  %v4575_v56 = vsel %vm7972_vm10, %v4574_v38, %v4573_v1  ;;  %v4042_v59 = vcombine.high %v4040_v6, %v4040_v6  ;;  %v5236_v58 = vpack.c.bf16 %v4041_v30, %v4041_v30  ;;  %vm7976_vm10 = vmmov %vm7975_vm8 }
 0x2cb   : > { %v5237_v44 = vpack.c.bf16 %v4040_v6, %v4040_v6  ;;  %v4577_v50 = vsel %vm4548_vm15, %v4576_v12, %v4575_v56  ;;  %v7806_v34 = vunpack.c.l.b16 %v5235_v28  ;;  %v3786_v2 = vsel %vm3768_vm7, %v3784_v31, %v3785_v48 }
 0x2cc   : > { %v3788_v42 = vsel %vm3768_vm7, %v3785_v48, %v3787_v36  ;;  %v4650_v60 = vpack.c.b16 %v4577_v50, %v4577_v50  ;;  %v5238_v22 = vpack.c.bf16 %v4042_v59, %v4042_v59  ;;  %v7812_v10 = vunpack.c.l.b16 %v5236_v58 }
 0x2cd   : > { %v7814_v57 = vunpack.c.l.b16 %v5237_v44  ;;  %v3832_v13 = vmax.f32 %v3709_v45, %v7777_v32  ;;  %v3833_v33 = vmax.f32 %v3760_v40, %v7742_v17  ;;  %v3847_v9 = vmax.f32 %v3831_v11, %v3786_v2 }
 0x2ce   : > { %v7820_v62 = vadd.f32 %v7705_v8, %v7727_v53  ;;  %4667 = vst.msk [vmem:[%s5556_s25 + $0x8] sm:$0xf] %vm4664_vm2, %v4650_v60  ;;  %v7824_v31 = vunpack.c.l.b16 %v5238_v22  ;;  %v4598_v36 = vrot.slane %v7806_v34, 4  ;;  %v3500_v43 = vsel %vm3468_vm9, 0.0, %v7774_v20 }
 0x2cf   : > { %v3373_v32 = vsub.f32 %v7755_v19, %v7810_v39  ;;  %v3848_v37 = vmax.f32 %v3832_v13, %v3788_v42  ;;  %v3849_v17 = vmax.f32 %v3833_v33, %v3791_v35  ;;  %v3975_v47 = vcombine.high %v3847_v9, %v3847_v9  ;;  %3533 = vst.msk [vmem:[#allocation2 + $0xf0] sm:$0xff] %vm3502_vm1, %v3500_v43 }
 0x2d0   : > { %v3982_v45 = vrot.slane %v3847_v9, %v7381_v15  ;;  %v4600_v8 = vrot.slane %v7812_v10, 3  ;;  %v4602_v53 = vrot.slane %v7814_v57, 2  ;;  %v7839_v46 = vsel %vm3468_vm9, 1.0, %v5501_v14 }
 0x2d1   : > { %v3434_v23 = vadd.f32 %v7780_v18, %v7739_v55  ;;  %v3989_v19 = vrot.slane %v3975_v47, %v7381_v15  ;;  %v3992_v63 = vcombine.high %v3848_v37, %v3848_v37  ;;  %v3999_v24 = vrot.slane %v3848_v37, %v7381_v15 }
 0x2d2   : > { %v3990_v35 = vcombine.high %v3982_v45, %v3982_v45  ;;  %v4009_v38 = vcombine.high %v3849_v17, %v3849_v17  ;;  %v4016_v6 = vrot.slane %v3849_v17, %v7381_v15  ;;  %v5223_v30 = vpack.c.bf16 %v3982_v45, %v3982_v45 }
 0x2d3   : > { %v3405_v28 = vmul.f32 0.5, %v3373_v32  ;;  %v3991_v40 = vcombine.high %v3989_v19, %v3989_v19  ;;  %v4006_v1 = vrot.slane %v3992_v63, %v7381_v15  ;;  %v4007_v20 = vcombine.high %v3999_v24, %v3999_v24 }
 0x2d4   : > { %v5224_v12 = vpack.c.bf16 %v3990_v35, %v3990_v35  ;;  %v4023_v48 = vrot.slane %v4009_v38, %v7381_v15  ;;  %v4024_v11 = vcombine.high %v4016_v6, %v4016_v6  ;;  %v5225_v55 = vpack.c.bf16 %v3989_v19, %v3989_v19 }
 0x2d5   : > { %v5227_v18 = vpack.c.bf16 %v3999_v24, %v3999_v24  ;;  %v4008_v56 = vcombine.high %v4006_v1, %v4006_v1  ;;  %v5226_v59 = vpack.c.bf16 %v3991_v40, %v3991_v40  ;;  %v5228_v58 = vpack.c.bf16 %v4007_v20, %v4007_v20 }
 0x2d6   : > { %v5229_v44 = vpack.c.bf16 %v4006_v1, %v4006_v1  ;;  %v4025_v50 = vcombine.high %v4023_v48, %v4023_v48  ;;  %v5232_v2 = vpack.c.bf16 %v4024_v11, %v4024_v11  ;;  %v5233_v42 = vpack.c.bf16 %v4023_v48, %v4023_v48 }
 0x2d7   : > { %vm3466_vm11 = vcmp.ge.f32.partialorder %v3434_v23, 1.0  ;;  %v5230_v60 = vpack.c.bf16 %v4008_v56, %v4008_v56  ;;  %v5231_v22 = vpack.c.bf16 %v4016_v6, %v4016_v6  ;;  %v4490_v13 = vunpack.c.l.b16 %v5224_v12 }
 0x2d8   : > { %v4491_v33 = vunpack.c.l.b16 %v5225_v55  ;;  %v5234_v9 = vpack.c.bf16 %v4025_v50, %v4025_v50  ;;  %v4492_v43 = vunpack.c.l.b16 %v5226_v59  ;;  %v4493_v32 = vunpack.c.l.b16 %v5227_v18 }
 0x2d9   : > { %v4494_v37 = vunpack.c.l.b16 %v5228_v58  ;;  %v4489_v17 = vunpack.c.l.b16 %v5223_v30  ;;  %v4495_v47 = vunpack.c.l.b16 %v5229_v44  ;;  %v4496_v45 = vunpack.c.l.b16 %v5230_v60 }
 0x2da   : > { %v4498_v19 = vunpack.c.l.b16 %v5232_v2  ;;  %v4499_v35 = vunpack.c.l.b16 %v5233_v42  ;;  %v4500_v63 = vunpack.c.l.b16 %v5234_v9  ;;  %v4578_v24 = vrot.slane %v4490_v13, 7 }
 0x2db   : > { %v4580_v38 = vrot.slane %v4491_v33, 6  ;;  %v4497_v40 = vunpack.c.l.b16 %v5231_v22  ;;  %v4582_v1 = vrot.slane %v4492_v43, 5  ;;  %v4584_v20 = vrot.slane %v4493_v32, 4 }
 0x2dc   : > { %v4586_v48 = vrot.slane %v4494_v37, 3  ;;  %v4579_v6 = vsel %vm4530_vm12, %v4578_v24, %v4489_v17  ;;  %v4588_v12 = vrot.slane %v4495_v47, 2  ;;  %v4592_v11 = vrot.slane %v4498_v19, 7 }
 0x2dd   : > { %v4594_v55 = vrot.slane %v4499_v35, 6  ;;  %v4581_v18 = vsel %vm4533_vm3, %v4580_v38, %v4579_v6  ;;  %v4596_v56 = vrot.slane %v4500_v63, 5  ;;  %v3498_v30 = vsel %vm3466_vm11, 0.0, %v3434_v23 }
 0x2de   : > { %v5128_v59 = vsel %vm3466_vm11, 1.0, %v5501_v14  ;;  %vm7973_vm4 = vcmask 1043459   ;;  %v4593_v44 = vsel %vm4530_vm12, %v4592_v11, %v4497_v40  ;;  %3531 = vst.msk [vmem:[#allocation2 + $0xe0] sm:$0xff] %vm3502_vm1, %v3498_v30  ;;  %v3437_v23 = vadd.f32 %v3405_v28, %v7810_v39 }
 0x2df   : > { %v4583_v58 = vsel %vm7973_vm4, %v4582_v1, %v4581_v18  ;;  %v3627_v50 = vmax.f32 %v7620_v61, %v5128_v59  ;;  %v3629_v2 = vmax.f32 %v5128_v59, %v7839_v46  ;;  %v4595_v60 = vsel %vm4533_vm3, %v4594_v55, %v4593_v44  ;;  %vm7974_vm14 = vmmov %vm7973_vm4 }
 0x2e0   : > { %v4585_v42 = vsel %vm4539_vm5, %v4584_v20, %v4583_v58  ;;  %v3656_v22 = vmax.f32 %v3625_v7, %v5128_v59  ;;  %v4590_v33 = vrot.slane %v4496_v45, 1  ;;  %v4597_v9 = vsel %vm7974_vm14, %v4596_v56, %v4595_v60  ;;  %vm7977_vm14 = vmmov %vm7975_vm8 }
 0x2e1   : > { %v4587_v13 = vsel %vm4542_vm13, %v4586_v48, %v4585_v42  ;;  %v7867_v43 = vmax.f32 %v3627_v50, %v7839_v46  ;;  %v4599_v37 = vsel %vm4539_vm5, %v4598_v36, %v4597_v9  ;;  %vm3469_vm9 = vcmp.ge.f32.partialorder %v3437_v23, 1.0  ;;  %v3339_v46 = vld [vmem:[#allocation2 + $0xe8] sm:$0xff] }
 0x2e2   : > { %v4589_v32 = vsel %vm7975_vm8, %v4588_v12, %v4587_v13  ;;  %v3802_v17 = vrot.slane %v3656_v22, 1  ;;  %v4620_v61 = vrot.slane %v7723_v3, 7  ;;  %v4604_v52 = vrot.slane %v7824_v31, 1 }
 0x2e3   : > { %v4591_v7 = vsel %vm4548_vm15, %v4590_v33, %v4589_v32  ;;  %v4601_v39 = vsel %vm4542_vm13, %v4600_v8, %v4599_v37  ;;  %v4513_v3 = vunpack.c.l.b16 %v5247_v27  ;;  %v3501_v57 = vsel %vm3469_vm9, 0.0, %v3437_v23 }
 0x2e4   : > { %v4603_v34 = vsel %vm7976_vm10, %v4602_v53, %v4601_v39  ;;  %v4651_v36 = vpack.c.b16 %v4591_v7, %v4591_v7  ;;  %v3803_v28 = vsel %vm3768_vm7, %v3800_v16, %v3802_v17  ;;  %v4516_v8 = vunpack.c.l.b16 %v5250_v41  ;;  %3534 = vst.msk [vmem:[#allocation2 + $0xf8] sm:$0xff] %vm3502_vm1, %v3501_v57 }
 0x2e5   : > { %v4605_v31 = vsel %vm4548_vm15, %v4604_v52, %v4603_v34  ;;  %v3854_v10 = vmax.f32 %v3838_v26, %v3803_v28  ;;  %v4622_v53 = vrot.slane %v7725_v29, 6  ;;  %v3371_v16 = vsub.f32 %v7820_v62, %v3339_v46 }
 0x2e6   : > { %v4652_v47 = vpack.c.b16 %v4605_v31, %v4605_v31  ;;  %4668 = vst.msk [vmem:[%s5556_s25 + $0xc] sm:$0xf] %vm4664_vm2, %v4651_v36  ;;  %v4621_v5 = vsel %vm4530_vm12, %v4620_v61, %v4513_v3  ;;  %v4624_v29 = vrot.slane %v4516_v8, 5  ;;  %v3660_v48 = vmax.f32 %v3629_v2, 0.0 }
 0x2e7   : > { %v4094_v27 = vcombine.high %v3854_v10, %v3854_v10  ;;  %v4101_v54 = vrot.slane %v3854_v10, %v7381_v15  ;;  %v3403_v4 = vmul.f32 0.5, %v3371_v16  ;;  %v4623_v45 = vsel %vm4533_vm3, %v4622_v53, %v4621_v5 }
 0x2e8   : > { %4669 = vst.msk [vmem:[%s5556_s25 + $0x10] sm:$0xf] %vm4664_vm2, %v4652_v47  ;;  %v4625_v6 = vsel %vm7973_vm4, %v4624_v29, %v4623_v45  ;;  %v3726_v59 = vrot.slane %v7867_v43, 7  ;;  %v5131_v42 = vsel %vm3469_vm9, 1.0, %v5501_v14  ;;  %v3804_v33 = vrot.slane %v7867_v43, 1 }
 0x2e9   : > { %v4108_v26 = vrot.slane %v4094_v27, %v7381_v15  ;;  %v4109_v21 = vcombine.high %v4101_v54, %v4101_v54  ;;  %v5251_v41 = vpack.c.bf16 %v4101_v54, %v4101_v54  ;;  %v3435_v19 = vadd.f32 %v3403_v4, %v3339_v46 }
 0x2ea   : > { %v3807_v9 = vrot.slane %v3660_v48, 1 }
 0x2eb   : > { %v4110_v35 = vcombine.high %v4108_v26, %v4108_v26  ;;  %v5252_v63 = vpack.c.bf16 %v4109_v21, %v4109_v21  ;;  %v5253_v24 = vpack.c.bf16 %v4108_v26, %v4108_v26  ;;  %v4517_v62 = vunpack.c.l.b16 %v5251_v41 }
 0x2ec   : > { %vm3467_vm11 = vcmp.ge.f32.partialorder %v3435_v19, 1.0 }
 0x2ed   : > { %v5254_v38 = vpack.c.bf16 %v4110_v35, %v4110_v35  ;;  %v4518_v40 = vunpack.c.l.b16 %v5252_v63  ;;  %v4519_v1 = vunpack.c.l.b16 %v5253_v24  ;;  %v4626_v20 = vrot.slane %v4517_v62, 4 }
 0x2ee   : > { %v3499_v12 = vsel %vm3467_vm11, 0.0, %v3435_v19  ;;  %v5129_v11 = vsel %vm3467_vm11, 1.0, %v5501_v14 }
 0x2ef   : > { %v4520_v55 = vunpack.c.l.b16 %v5254_v38  ;;  %v4627_v18 = vsel %vm4539_vm5, %v4626_v20, %v4625_v6  ;;  %v4628_v56 = vrot.slane %v4518_v40, 3  ;;  %v4630_v30 = vrot.slane %v4519_v1, 2  ;;  %3532 = vst.msk [vmem:[#allocation2 + $0xe8] sm:$0xff] %vm3502_vm1, %v3499_v12  ;;  %vm7979_vm1 = vmmov %vm7975_vm8 }
 0x2f0   : > { %v3628_v58 = vmax.f32 %v7649_v51, %v5129_v11  ;;  %v3657_v44 = vmax.f32 %v3626_v49, %v5129_v11 }
 0x2f1   : > { %v4629_v50 = vsel %vm4542_vm13, %v4628_v56, %v4627_v18  ;;  %v4632_v2 = vrot.slane %v4520_v55, 1 }
 0x2f2   : > { %v4631_v60 = vsel %vm7977_vm14, %v4630_v30, %v4629_v50  ;;  %v3659_v22 = vmax.f32 %v3628_v58, %v5131_v42  ;;  %v3725_v13 = vrot.slane %v3657_v44, 7 }
 0x2f3   : > { %v4633_v32 = vsel %vm4548_vm15, %v4632_v2, %v4631_v60 }
 0x2f4   : > { %v4654_v37 = vpack.c.b16 %v4633_v32, %v4633_v32  ;;  %v3727_v51 = vsel %vm3145_vm0, %v3725_v13, %v3726_v59  ;;  %v3728_v0 = vrot.slane %v3659_v22, 7  ;;  %v3805_v49 = vrot.slane %v3659_v22, 1 }
 0x2f5   : > { %v3766_v17 = vsel %vm3750_vm6, 0.0, %v3727_v51 }
 0x2f6   : > { %4671 = vst.msk [vmem:[%s5556_s25 + $0x18] sm:$0xf] %vm4664_vm2, %v4654_v37  ;;  %v3729_v14 = vsel %vm3145_vm0, %v3726_v59, %v3728_v0  ;;  %v3806_v23 = vsel %vm3768_vm7, %v3804_v33, %v3805_v49  ;;  %v3808_v61 = vsel %vm3768_vm7, %v3805_v49, %v3807_v9  ;;  %v3839_v52 = vmax.f32 %v3766_v17, %v7867_v43  ;;  %vm7978_vm0 = vmmov %vm7973_vm4 }
 0x2f7   : > { %v3840_v7 = vmax.f32 %v3729_v14, %v3659_v22 }
 0x2f8   : > { %v3855_v39 = vmax.f32 %v3839_v52, %v3806_v23 }
 0x2f9   : > { %v3856_v46 = vmax.f32 %v3840_v7, %v3808_v61 }
 0x2fa   : > { %v4111_v34 = vcombine.high %v3855_v39, %v3855_v39  ;;  %v4118_v36 = vrot.slane %v3855_v39, %v7381_v15 }
 0x2fb   : > { %v4128_v28 = vcombine.high %v3856_v46, %v3856_v46  ;;  %v4135_v25 = vrot.slane %v3856_v46, %v7381_v15 }
 0x2fc   : > { %v4125_v3 = vrot.slane %v4111_v34, %v7381_v15  ;;  %v4126_v31 = vcombine.high %v4118_v36, %v4118_v36  ;;  %v5255_v8 = vpack.c.bf16 %v4118_v36, %v4118_v36 }
 0x2fd   : > { %v4142_v10 = vrot.slane %v4128_v28, %v7381_v15  ;;  %v4143_v57 = vcombine.high %v4135_v25, %v4135_v25  ;;  %v5259_v53 = vpack.c.bf16 %v4135_v25, %v4135_v25 }
 0x2fe   : > { %v4127_v47 = vcombine.high %v4125_v3, %v4125_v3  ;;  %v5256_v16 = vpack.c.bf16 %v4126_v31, %v4126_v31  ;;  %v5257_v43 = vpack.c.bf16 %v4125_v3, %v4125_v3  ;;  %v4521_v29 = vunpack.c.l.b16 %v5255_v8 }
 0x2ff   : > { %v4144_v5 = vcombine.high %v4142_v10, %v4142_v10  ;;  %v5260_v27 = vpack.c.bf16 %v4143_v57, %v4143_v57  ;;  %v5261_v54 = vpack.c.bf16 %v4142_v10, %v4142_v10  ;;  %v4525_v45 = vunpack.c.l.b16 %v5259_v53 }
 0x300   : > { %v5258_v4 = vpack.c.bf16 %v4127_v47, %v4127_v47  ;;  %v4522_v26 = vunpack.c.l.b16 %v5256_v16  ;;  %v4523_v21 = vunpack.c.l.b16 %v5257_v43 }
 0x301   : > { %v5262_v41 = vpack.c.bf16 %v4144_v5, %v4144_v5  ;;  %v4526_v35 = vunpack.c.l.b16 %v5260_v27  ;;  %v4527_v15 = vunpack.c.l.b16 %v5261_v54  ;;  %v4640_v20 = vrot.slane %v4525_v45, 4 }
 0x302   : > { %v4524_v19 = vunpack.c.l.b16 %v5258_v4  ;;  %v4634_v63 = vrot.slane %v4522_v26, 7  ;;  %v4636_v24 = vrot.slane %v4523_v21, 6 }
 0x303   : > { %v4528_v62 = vunpack.c.l.b16 %v5262_v41  ;;  %v4642_v6 = vrot.slane %v4526_v35, 3  ;;  %v4644_v11 = vrot.slane %v4527_v15, 2 }
 0x304   : > { %v4635_v38 = vsel %vm4530_vm12, %v4634_v63, %v4521_v29  ;;  %v4638_v40 = vrot.slane %v4524_v19, 5 }
 0x305   : > { %v4637_v1 = vsel %vm4533_vm3, %v4636_v24, %v4635_v38  ;;  %v4646_v18 = vrot.slane %v4528_v62, 1 }
 0x306   : > { %v4639_v48 = vsel %vm7978_vm0, %v4638_v40, %v4637_v1 }
 0x307   : > { %v4641_v12 = vsel %vm4539_vm5, %v4640_v20, %v4639_v48 }
 0x308   : > { %v4643_v55 = vsel %vm4542_vm13, %v4642_v6, %v4641_v12 }
 0x309   : > { %v4645_v56 = vsel %vm7979_vm1, %v4644_v11, %v4643_v55 }
 0x30a   : > { %v4647_v30 = vsel %vm4548_vm15, %v4646_v18, %v4645_v56 }
 0x30b   : > { %v4655_v59 = vpack.c.b16 %v4647_v30, %v4647_v30 }
 0x30d   : > { %4672 = vst.msk [vmem:[%s5556_s25 + $0x1c] sm:$0xf] %vm4664_vm2, %v4655_v59 }
 0x30e PF: > { %s13_s16 = sadd.s32 1, %s5490_s16   ;;  %s7980_s12 = smov %s5482_s14 }
 0x30f   : > { %p10_p7 = scmp.ge.s32.totalorder %s13_s16, 10   ;;  %s7981_s13 = smov %s5486_s15 }
 0x310   : > { %s7982_s14 = smov %s7985_s17  ;;  %s7983_s15 = smov %s7989_s18 }
 0x311   :  { %12 = sbr.rel (!%p10_p7) target bundleno = 3 (0x3), region = 68 }

</bundles_post_ra>
